<compile_context>
chip_gen: v6e
topology: v6e:2x2x1
jax: 0.10.0
libtpu: 0.0.40
codegen_flags: <defaults>
</compile_context>

<pallas_src>
import numpy as np
import jax
import jax.numpy as jnp
from jax import lax
from jax.experimental import pallas as pl
from jax.experimental.pallas import tpu as pltpu

BN_EPS = 1e-5
_VEC_IDX = {"bu": 0, "gu": 1, "hu": 2, "b1": 3, "g1": 4, "h1": 5,
            "b2": 6, "g2": 7, "h2": 8}


def _rup8(x):
    return ((x + 7) // 8) * 8


def _full_spec(shape):
    nd = len(shape)
    return pl.BlockSpec(tuple(shape), lambda *_: (0,) * nd)


# ----------------------------------------------------------------------------
# Static per-stage configuration (Python ints only)
# ----------------------------------------------------------------------------
def _make_cfgs(N, L1, filters):
    stride = _rup8(L1 + 1)              # > L1 and multiple of 8 -> zero gap rows
    total = N * stride
    Ls = [L1 // 8, L1 // 4, L1 // 2, L1]                    # stage 5,4,3,2
    Css = [filters[3], filters[2], filters[1], filters[0]]  # out channels
    Cps = [filters[4], filters[3], filters[2], filters[1]]  # in  channels
    cfgs = []
    for i in range(4):
        Cs, Cp, L = Css[i], Cps[i], Ls[i]
        with_final = (i == 3)
        off = {}
        pos = [0]

        def add(name, nrows, off=off, pos=pos):
            off[name] = pos[0]
            pos[0] += _rup8(nrows)

        for t in range(3):
            add(("wu", t), Cp)          # up_conv weight, tap t    (Cp, Cs)
        for t in range(3):
            add(("w1s", t), Cs)         # conv1 weight, skip half  (Cs, Cs)
        for t in range(3):
            add(("w1u", t), Cs)         # conv1 weight, up half    (Cs, Cs)
        for t in range(3):
            add(("w2", t), Cs)          # conv2 weight             (Cs, Cs)
        add("vec", 9)                   # bu,gu,hu,b1,g1,h1,b2,g2,h2 (1 row each)
        add("mask", total)              # body-row mask, broadcast to Cs cols
        if with_final:
            add("wf", Cs)               # final 1x1 conv weight (Cs, n_classes)
            add("bf", 1)                # final bias
        cfgs.append(dict(N=N, L=L, Cs=Cs, Cp=Cp, stride=stride, total=total,
                         off=off, rows=pos[0], with_final=with_final))
    return stride, total, cfgs


# ----------------------------------------------------------------------------
# Hoisted constants: shift matrices + x2 nearest-upsample scatter matrices
# ----------------------------------------------------------------------------
def _build_consts(N, stride, Ls):
    T = N * stride
    mats = [np.eye(T, k=-1, dtype=np.float32),   # (sp @ v)[i] = v[i-1]
            np.eye(T, k=1, dtype=np.float32)]    # (sm @ v)[i] = v[i+1]
    for L in Ls:
        r = np.zeros((T, T), np.float32)
        for n in range(N):
            for l in range(L):
                # nearest x2: out body row l <- prev body row l//2 (same batch)
                r[n * stride + l, n * stride + l // 2] = 1.0
        mats.append(r)
    return np.concatenate(mats, axis=0)          # (6*T, T)


# ----------------------------------------------------------------------------
# Parameter init (mimics PyTorch default Conv1d / BatchNorm1d init)
# ----------------------------------------------------------------------------
def _conv_init(key, cin, cout, k):
    kw, kb = jax.random.split(key)
    bound = (1.0 / (cin * k)) ** 0.5
    w = jax.random.uniform(kw, (k, cin, cout), jnp.float32, -bound, bound)
    b = jax.random.uniform(kb, (1, cout), jnp.float32, -bound, bound)
    return w, b


def _stage_raw(key, cs, cp):
    k1, k2, k3 = jax.random.split(key, 3)
    wu, bu = _conv_init(k1, cp, cs, 3)           # up_conv conv:   cp   -> cs
    w1, b1 = _conv_init(k2, 2 * cs, cs, 3)       # conv_block c1:  2*cs -> cs
    w2, b2 = _conv_init(k3, cs, cs, 3)           # conv_block c2:  cs   -> cs
    ones = jnp.ones((1, cs), jnp.float32)
    zeros = jnp.zeros((1, cs), jnp.float32)
    return dict(wu=wu, bu=bu, gu=ones, hu=zeros,
                w1=w1, b1=b1, g1=ones, h1=zeros,
                w2=w2, b2=b2, g2=ones, h2=zeros)


def _init_raw_params(key, filters, n_classes):
    keys = jax.random.split(key, 5)
    raw = {
        "stage5": _stage_raw(keys[0], filters[3], filters[4]),
        "stage4": _stage_raw(keys[1], filters[2], filters[3]),
        "stage3": _stage_raw(keys[2], filters[1], filters[2]),
        "stage2": _stage_raw(keys[3], filters[0], filters[1]),
    }
    wf, bf = _conv_init(keys[4], filters[0], n_classes, 1)
    raw["final"] = dict(w=wf[0], b=bf)           # (C0, n_classes), (1, n_classes)
    return raw


# ----------------------------------------------------------------------------
# Pack one stage's parameters into ONE (rows, Cs) buffer (wrapper side, once)
# ----------------------------------------------------------------------------
def _pack_stage_params(p, cfg, final=None):
    Cs, Cp, T = cfg["Cs"], cfg["Cp"], cfg["total"]
    stride, L, off = cfg["stride"], cfg["L"], cfg["off"]
    buf = np.zeros((cfg["rows"], Cs), np.float32)
    wu = np.asarray(p["wu"], np.float32)         # (3, Cp, Cs)
    w1 = np.asarray(p["w1"], np.float32)         # (3, 2Cs, Cs)  cat([skip, up])
    w2 = np.asarray(p["w2"], np.float32)         # (3, Cs, Cs)
    for t in range(3):
        buf[off[("wu", t)]:off[("wu", t)] + Cp] = wu[t]
        buf[off[("w1s", t)]:off[("w1s", t)] + Cs] = w1[t, :Cs]
        buf[off[("w1u", t)]:off[("w1u", t)] + Cs] = w1[t, Cs:]
        buf[off[("w2", t)]:off[("w2", t)] + Cs] = w2[t]
    v = off["vec"]
    for i, name in enumerate(("bu", "gu", "hu", "b1", "g1", "h1",
                              "b2", "g2", "h2")):
        buf[v + i] = np.asarray(p[name], np.float32).reshape(-1)
    m = off["mask"]
    for n in range(cfg["N"]):
        buf[m + n * stride: m + n * stride + L] = 1.0
    if final is not None:
        wf = np.asarray(final["w"], np.float32)  # (Cs, n_classes)
        bf = np.asarray(final["b"], np.float32).reshape(-1)
        buf[off["wf"]:off["wf"] + wf.shape[0], :wf.shape[1]] = wf
        buf[off["bf"], :bf.shape[0]] = bf
    return jnp.asarray(buf)


# ----------------------------------------------------------------------------
# The fused kernel (all 4 stages + final 1x1 conv + sigmoid)
# ----------------------------------------------------------------------------
def _make_fused_kernel(cfgs):
    T = cfgs[0]["total"]

    def kernel(x5_ref, sk5_ref, sk4_ref, sk3_ref, sk2_ref, c_ref,
               p5_ref, p4_ref, p3_ref, p2_ref, o_ref):
        skips = (sk5_ref, sk4_ref, sk3_ref, sk2_ref)
        packs = (p5_ref, p4_ref, p3_ref, p2_ref)

        def mm(a, b):
            return jnp.dot(a, b, preferred_element_type=jnp.float32)

        sp = c_ref[0:T, :]          # (T, T)  (sp @ v)[i] = v[i-1]
        sm = c_ref[T:2 * T, :]      # (T, T)  (sm @ v)[i] = v[i+1]

        d = x5_ref[...]             # deepest encoder feature, padded slab

        for s, cfg in enumerate(cfgs):
            pp = packs[s]
            off = cfg["off"]
            Cs, Cp, L, N = cfg["Cs"], cfg["Cp"], cfg["L"], cfg["N"]
            inv_cnt = 1.0 / float(N * L)
            mask = pp[off["mask"]:off["mask"] + T, :]          # (T, Cs)

            def vec(name, _pp=pp, _off=off):
                i = _off["vec"] + _VEC_IDX[name]
                return _pp[i:i + 1, :]                         # (1, Cs)

            def conv3(ops, _pp=pp, _off=off, _sp=sp, _sm=sm):
                # Conv1d(k=3, p=1) over all batches at once: one MXU matmul
                # per tap per operand; +-1 halo shifts are matmuls against the
                # hoisted sub/super-diagonal matrices (no unaligned slices).
                t0 = t1 = t2 = None
                for x_sl, name, cin in ops:
                    w0 = _pp[_off[(name, 0)]:_off[(name, 0)] + cin, :]
                    w1 = _pp[_off[(name, 1)]:_off[(name, 1)] + cin, :]
                    w2 = _pp[_off[(name, 2)]:_off[(name, 2)] + cin, :]
                    a0, a1, a2 = mm(x_sl, w0), mm(x_sl, w1), mm(x_sl, w2)
                    t0 = a0 if t0 is None else t0 + a0
                    t1 = a1 if t1 is None else t1 + a1
                    t2 = a2 if t2 is None else t2 + a2
                # out[i] = w0.x[i-1] + w1.x[i] + w2.x[i+1]
                return mm(_sp, t0) + t1 + mm(_sm, t2)

            def bn_relu(y, gname, bname, _mask=mask, _inv=inv_cnt):
                # BatchNorm1d training-mode stats over the masked body rows
                # (single pass); gap rows re-zeroed so they stay valid padding.
                ym = y * _mask
                mean = jnp.sum(ym, axis=0, keepdims=True) * _inv
                var = jnp.sum(ym * ym, axis=0, keepdims=True) * _inv - mean * mean
                var = jnp.maximum(var, 0.0)
                y = (y - mean) * lax.rsqrt(var + BN_EPS) * vec(gname) + vec(bname)
                return jnp.maximum(y, 0.0) * _mask

            # x2 nearest upsample: one scatter matmul with the hoisted matrix.
            rep = c_ref[(2 + s) * T:(3 + s) * T, :]
            u = mm(rep, d)                                     # (T, Cp)
            skip = skips[s][...]                               # (T, Cs)

            # up_conv: Conv1d(k3,p1) + BN + ReLU
            y = bn_relu(conv3([(u, "wu", Cp)]) + vec("bu"), "gu", "hu")
            # conv_block conv1 on cat([skip, up], ch): split-weight matmuls,
            # the concatenated tensor never exists.
            y = bn_relu(conv3([(skip, "w1s", Cs), (y, "w1u", Cs)]) + vec("b1"),
                        "g1", "h1")
            # conv_block conv2
            y = bn_relu(conv3([(y, "w2", Cs)]) + vec("b2"), "g2", "h2")
            d = y

        # Final Conv1d(k=1) + sigmoid (HermiteConvolution stand-in), fused.
        cfg = cfgs[-1]
        pp = packs[-1]
        off = cfg["off"]
        wf = pp[off["wf"]:off["wf"] + cfg["Cs"], :]            # (Cs, Cs) padded
        bf = pp[off["bf"]:off["bf"] + 1, :]
        yf = mm(d, wf) + bf
        o_ref[...] = (1.0 / (1.0 + jnp.exp(-yf))).astype(o_ref.dtype)

    return kernel


# ----------------------------------------------------------------------------
# Decoder builder: packs params/constants once, returns a jitted forward
# ----------------------------------------------------------------------------
def make_decoder(N, L1, filters, n_classes, key):
    assert L1 % 16 == 0
    for i in range(4):
        assert filters[i + 1] == 2 * filters[i], \
            "module requires filters[i+1] == 2*filters[i] (channel concat)"
    assert n_classes <= filters[0]

    stride, total, cfgs = _make_cfgs(N, L1, filters)
    raw = _init_raw_params(key, filters, n_classes)

    packs = []
    for i, nm in enumerate(("stage5", "stage4", "stage3", "stage2")):
        packs.append(_pack_stage_params(
            raw[nm], cfgs[i],
            final=raw["final"] if cfgs[i]["with_final"] else None))
    consts = jnp.asarray(_build_consts(N, stride,
                                       [L1 // 8, L1 // 4, L1 // 2, L1]))
    kernel = _make_fused_kernel(cfgs)
    out_w = cfgs[-1]["Cs"]

    def _pad_slab(x):                   # (N, L, C) -> (N*stride, C), gaps zero
        n, l, c = x.shape
        return jnp.pad(x, ((0, 0), (0, stride - l), (0, 0))).reshape(n * stride, c)

    @jax.jit
    def forward(x1, x2, x3, x4, x5):
        # channels-last inputs (N, L_i, C_i)
        ins = [_pad_slab(x5), _pad_slab(x4), _pad_slab(x3), _pad_slab(x2),
               _pad_slab(x1), consts] + packs
        out = pl.pallas_call(
            kernel,
            grid=(1,),
            in_specs=[_full_spec(a.shape) for a in ins],
            out_specs=_full_spec((total, out_w)),
            out_shape=jax.ShapeDtypeStruct((total, out_w), jnp.float32),
            compiler_params=pltpu.CompilerParams(
                dimension_semantics=("arbitrary",)),
        )(*ins)
        return out.reshape(N, stride, out_w)[:, :L1, :n_classes]

    return forward, raw


# ----------------------------------------------------------------------------
# Pure-JAX reference (channels-last), used only for the correctness check
# ----------------------------------------------------------------------------
def _ref_conv3(x, w, b):
    L = x.shape[1]
    xp = jnp.pad(x, ((0, 0), (1, 1), (0, 0)))
    out = b
    for k in range(3):
        out = out + jnp.einsum("nlc,co->nlo", xp[:, k:k + L, :], w[k],
                               precision=lax.Precision.HIGHEST)
    return out


def _ref_bn_relu(x, g, h):
    mean = jnp.mean(x, axis=(0, 1), keepdims=True)
    var = jnp.mean(jnp.square(x - mean), axis=(0, 1), keepdims=True)
    y = (x - mean) * lax.rsqrt(var + BN_EPS) * g + h
    return jnp.maximum(y, 0.0)


def _ref_stage(d, skip, p):
    u = jnp.repeat(d, 2, axis=1)
    y = _ref_bn_relu(_ref_conv3(u, p["wu"], p["bu"]), p["gu"], p["hu"])
    y = _ref_bn_relu(_ref_conv3(jnp.concatenate([skip, y], axis=-1),
                                p["w1"], p["b1"]), p["g1"], p["h1"])
    y = _ref_bn_relu(_ref_conv3(y, p["w2"], p["b2"]), p["g2"], p["h2"])
    return y


def decoder_reference(raw, x1, x2, x3, x4, x5):
    d = _ref_stage(x5, x4, raw["stage5"])
    d = _ref_stage(d, x3, raw["stage4"])
    d = _ref_stage(d, x2, raw["stage3"])
    d = _ref_stage(d, x1, raw["stage2"])
    yf = jnp.einsum("nlc,co->nlo", d, raw["final"]["w"],
                    precision=lax.Precision.HIGHEST) + raw["final"]["b"]
    return 1.0 / (1.0 + jnp.exp(-yf))


# ----------------------------------------------------------------------------
if __name__ == "__main__":
    key = jax.random.PRNGKey(0)
    filters = [4, 8, 16, 32, 64]
    n_classes = 3
    N, L1 = 2, 16

    kp, kx = jax.random.split(key)
    forward, raw = make_decoder(N, L1, filters, n_classes, kp)

    lengths = [L1, L1 // 2, L1 // 4, L1 // 8, L1 // 16]   # x1..x5
    xkeys = jax.random.split(kx, 5)
    # PyTorch NCL inputs, transposed once to channels-last (N, L, C).
    xs_ncl = [jax.random.normal(xkeys[i], (N, filters[i], lengths[i]),
                                jnp.float32) for i in range(5)]
    x1, x2, x3, x4, x5 = [jnp.transpose(x, (0, 2, 1)) for x in xs_ncl]

    out_nlc = jax.block_until_ready(forward(x1, x2, x3, x4, x5))
    out_ncl = jnp.transpose(out_nlc, (0, 2, 1))           # (N, n_classes, L1)
    assert out_ncl.shape == (N, n_classes, L1), out_ncl.shape

    ref_nlc = decoder_reference(raw, x1, x2, x3, x4, x5)
    np.testing.assert_allclose(np.asarray(out_nlc), np.asarray(ref_nlc),
                               rtol=0.0, atol=5e-2)
    print("KERNEL_OK")
</pallas_src>

<mosaic_0001>
module attributes {stable_mosaic.version = 11 : i64} {
  func.func @kernel(%arg0: i32, %arg1: memref<48x64xf32, #tpu.memory_space<vmem>>, %arg2: memref<48x32xf32, #tpu.memory_space<vmem>>, %arg3: memref<48x16xf32, #tpu.memory_space<vmem>>, %arg4: memref<48x8xf32, #tpu.memory_space<vmem>>, %arg5: memref<48x4xf32, #tpu.memory_space<vmem>>, %arg6: memref<288x48xf32, #tpu.memory_space<vmem>>, %arg7: memref<544x32xf32, #tpu.memory_space<vmem>>, %arg8: memref<304x16xf32, #tpu.memory_space<vmem>>, %arg9: memref<184x8xf32, #tpu.memory_space<vmem>>, %arg10: memref<176x4xf32, #tpu.memory_space<vmem>>, %arg11: memref<48x4xf32, #tpu.memory_space<vmem>>) attributes {dimension_semantics = [#tpu.dimension_semantics<arbitrary>], iteration_bounds = array<i64: 1>, scalar_prefetch = 0 : i64, scratch_operands = 0 : i64, tpu.core_type = #tpu.core_type<tc>, window_params = [{pipeline_mode = #tpu.pipeline_mode<synchronous>, transform_indices = @transform_0, window_bounds = array<i64: 48, 64>}, {pipeline_mode = #tpu.pipeline_mode<synchronous>, transform_indices = @transform_1, window_bounds = array<i64: 48, 32>}, {pipeline_mode = #tpu.pipeline_mode<synchronous>, transform_indices = @transform_2, window_bounds = array<i64: 48, 16>}, {pipeline_mode = #tpu.pipeline_mode<synchronous>, transform_indices = @transform_3, window_bounds = array<i64: 48, 8>}, {pipeline_mode = #tpu.pipeline_mode<synchronous>, transform_indices = @transform_4, window_bounds = array<i64: 48, 4>}, {pipeline_mode = #tpu.pipeline_mode<synchronous>, transform_indices = @transform_5, window_bounds = array<i64: 288, 48>}, {pipeline_mode = #tpu.pipeline_mode<synchronous>, transform_indices = @transform_6, window_bounds = array<i64: 544, 32>}, {pipeline_mode = #tpu.pipeline_mode<synchronous>, transform_indices = @transform_7, window_bounds = array<i64: 304, 16>}, {pipeline_mode = #tpu.pipeline_mode<synchronous>, transform_indices = @transform_8, window_bounds = array<i64: 184, 8>}, {pipeline_mode = #tpu.pipeline_mode<synchronous>, transform_indices = @transform_9, window_bounds = array<i64: 176, 4>}, {pipeline_mode = #tpu.pipeline_mode<synchronous>, transform_indices = @transform_10, window_bounds = array<i64: 48, 4>}]} {
    %c0 = arith.constant 0 : index
    %c0_0 = arith.constant 0 : index
    %0 = vector.load %arg6[%c0, %c0_0] : memref<288x48xf32, #tpu.memory_space<vmem>>, vector<48x48xf32>
    %c48 = arith.constant 48 : index
    %c0_1 = arith.constant 0 : index
    %1 = vector.load %arg6[%c48, %c0_1] : memref<288x48xf32, #tpu.memory_space<vmem>>, vector<48x48xf32>
    %c0_2 = arith.constant 0 : index
    %c0_3 = arith.constant 0 : index
    %2 = vector.load %arg1[%c0_2, %c0_3] : memref<48x64xf32, #tpu.memory_space<vmem>>, vector<48x64xf32>
    %c496 = arith.constant 496 : index
    %c0_4 = arith.constant 0 : index
    %3 = vector.load %arg7[%c496, %c0_4] : memref<544x32xf32, #tpu.memory_space<vmem>>, vector<48x32xf32>
    %c96 = arith.constant 96 : index
    %c0_5 = arith.constant 0 : index
    %4 = vector.load %arg6[%c96, %c0_5] : memref<288x48xf32, #tpu.memory_space<vmem>>, vector<48x48xf32>
    %cst = arith.constant dense<0.000000e+00> : vector<48x64xf32>
    %5 = tpu.matmul %4, %2, %cst {dimension_numbers = #tpu.dot_dimension_numbers<[1], [0], [0], [1], [0, 0, 1, 1], [], []>} : vector<48x48xf32>, vector<48x64xf32>, vector<48x64xf32> -> vector<48x64xf32>
    %c0_6 = arith.constant 0 : index
    %c0_7 = arith.constant 0 : index
    %6 = vector.load %arg2[%c0_6, %c0_7] : memref<48x32xf32, #tpu.memory_space<vmem>>, vector<48x32xf32>
    %c0_8 = arith.constant 0 : index
    %c0_9 = arith.constant 0 : index
    %7 = vector.load %arg7[%c0_8, %c0_9] : memref<544x32xf32, #tpu.memory_space<vmem>>, vector<64x32xf32>
    %c64 = arith.constant 64 : index
    %c0_10 = arith.constant 0 : index
    %8 = vector.load %arg7[%c64, %c0_10] : memref<544x32xf32, #tpu.memory_space<vmem>>, vector<64x32xf32>
    %c128 = arith.constant 128 : index
    %c0_11 = arith.constant 0 : index
    %9 = vector.load %arg7[%c128, %c0_11] : memref<544x32xf32, #tpu.memory_space<vmem>>, vector<64x32xf32>
    %cst_12 = arith.constant dense<0.000000e+00> : vector<48x32xf32>
    %10 = tpu.matmul %5, %7, %cst_12 {dimension_numbers = #tpu.dot_dimension_numbers<[1], [0], [0], [1], [0, 0, 1, 1], [], []>} : vector<48x64xf32>, vector<64x32xf32>, vector<48x32xf32> -> vector<48x32xf32>
    %cst_13 = arith.constant dense<0.000000e+00> : vector<48x32xf32>
    %11 = tpu.matmul %5, %8, %cst_13 {dimension_numbers = #tpu.dot_dimension_numbers<[1], [0], [0], [1], [0, 0, 1, 1], [], []>} : vector<48x64xf32>, vector<64x32xf32>, vector<48x32xf32> -> vector<48x32xf32>
    %cst_14 = arith.constant dense<0.000000e+00> : vector<48x32xf32>
    %12 = tpu.matmul %5, %9, %cst_14 {dimension_numbers = #tpu.dot_dimension_numbers<[1], [0], [0], [1], [0, 0, 1, 1], [], []>} : vector<48x64xf32>, vector<64x32xf32>, vector<48x32xf32> -> vector<48x32xf32>
    %cst_15 = arith.constant dense<0.000000e+00> : vector<48x32xf32>
    %13 = tpu.matmul %0, %10, %cst_15 {dimension_numbers = #tpu.dot_dimension_numbers<[1], [0], [0], [1], [0, 0, 1, 1], [], []>} : vector<48x48xf32>, vector<48x32xf32>, vector<48x32xf32> -> vector<48x32xf32>
    %14 = arith.addf %13, %11 : vector<48x32xf32>
    %cst_16 = arith.constant dense<0.000000e+00> : vector<48x32xf32>
    %15 = tpu.matmul %1, %12, %cst_16 {dimension_numbers = #tpu.dot_dimension_numbers<[1], [0], [0], [1], [0, 0, 1, 1], [], []>} : vector<48x48xf32>, vector<48x32xf32>, vector<48x32xf32> -> vector<48x32xf32>
    %16 = arith.addf %14, %15 : vector<48x32xf32>
    %c480 = arith.constant 480 : index
    %c0_17 = arith.constant 0 : index
    %17 = vector.load %arg7[%c480, %c0_17] : memref<544x32xf32, #tpu.memory_space<vmem>>, vector<1x32xf32>
    %18 = vector.broadcast %17 : vector<1x32xf32> to vector<48x32xf32>
    %19 = arith.addf %16, %18 : vector<48x32xf32>
    %20 = arith.mulf %19, %3 : vector<48x32xf32>
    %cst_18 = arith.constant dense<0.000000e+00> : vector<32xf32>
    %21 = vector.multi_reduction <add>, %20, %cst_18 [0] : vector<48x32xf32> to vector<32xf32>
    %22 = vector.shape_cast %21 : vector<32xf32> to vector<1x32xf32>
    %cst_19 = arith.constant 2.500000e-01 : f32
    %23 = vector.broadcast %cst_19 : f32 to vector<1x32xf32>
    %24 = arith.mulf %22, %23 : vector<1x32xf32>
    %25 = arith.mulf %20, %20 : vector<48x32xf32>
    %cst_20 = arith.constant dense<0.000000e+00> : vector<32xf32>
    %26 = vector.multi_reduction <add>, %25, %cst_20 [0] : vector<48x32xf32> to vector<32xf32>
    %27 = vector.shape_cast %26 : vector<32xf32> to vector<1x32xf32>
    %cst_21 = arith.constant 2.500000e-01 : f32
    %28 = vector.broadcast %cst_21 : f32 to vector<1x32xf32>
    %29 = arith.mulf %27, %28 : vector<1x32xf32>
    %30 = arith.mulf %24, %24 : vector<1x32xf32>
    %31 = arith.subf %29, %30 : vector<1x32xf32>
    %cst_22 = arith.constant 0.000000e+00 : f32
    %32 = vector.broadcast %cst_22 : f32 to vector<1x32xf32>
    %33 = arith.maximumf %31, %32 : vector<1x32xf32>
    %34 = vector.broadcast %24 : vector<1x32xf32> to vector<48x32xf32>
    %35 = arith.subf %19, %34 : vector<48x32xf32>
    %cst_23 = arith.constant 9.99999974E-6 : f32
    %36 = vector.broadcast %cst_23 : f32 to vector<1x32xf32>
    %37 = arith.addf %33, %36 : vector<1x32xf32>
    %38 = math.rsqrt %37 : vector<1x32xf32>
    %39 = vector.broadcast %38 : vector<1x32xf32> to vector<48x32xf32>
    %40 = arith.mulf %35, %39 : vector<48x32xf32>
    %c481 = arith.constant 481 : index
    %c0_24 = arith.constant 0 : index
    %41 = vector.load %arg7[%c481, %c0_24] : memref<544x32xf32, #tpu.memory_space<vmem>>, vector<1x32xf32>
    %42 = vector.broadcast %41 : vector<1x32xf32> to vector<48x32xf32>
    %43 = arith.mulf %40, %42 : vector<48x32xf32>
    %c482 = arith.constant 482 : index
    %c0_25 = arith.constant 0 : index
    %44 = vector.load %arg7[%c482, %c0_25] : memref<544x32xf32, #tpu.memory_space<vmem>>, vector<1x32xf32>
    %45 = vector.broadcast %44 : vector<1x32xf32> to vector<48x32xf32>
    %46 = arith.addf %43, %45 : vector<48x32xf32>
    %cst_26 = arith.constant 0.000000e+00 : f32
    %47 = vector.broadcast %cst_26 : f32 to vector<48x32xf32>
    %48 = arith.maximumf %46, %47 : vector<48x32xf32>
    %49 = arith.mulf %48, %3 : vector<48x32xf32>
    %c192 = arith.constant 192 : index
    %c0_27 = arith.constant 0 : index
    %50 = vector.load %arg7[%c192, %c0_27] : memref<544x32xf32, #tpu.memory_space<vmem>>, vector<32x32xf32>
    %c224 = arith.constant 224 : index
    %c0_28 = arith.constant 0 : index
    %51 = vector.load %arg7[%c224, %c0_28] : memref<544x32xf32, #tpu.memory_space<vmem>>, vector<32x32xf32>
    %c256 = arith.constant 256 : index
    %c0_29 = arith.constant 0 : index
    %52 = vector.load %arg7[%c256, %c0_29] : memref<544x32xf32, #tpu.memory_space<vmem>>, vector<32x32xf32>
    %cst_30 = arith.constant dense<0.000000e+00> : vector<48x32xf32>
    %53 = tpu.matmul %6, %50, %cst_30 {dimension_numbers = #tpu.dot_dimension_numbers<[1], [0], [0], [1], [0, 0, 1, 1], [], []>} : vector<48x32xf32>, vector<32x32xf32>, vector<48x32xf32> -> vector<48x32xf32>
    %cst_31 = arith.constant dense<0.000000e+00> : vector<48x32xf32>
    %54 = tpu.matmul %6, %51, %cst_31 {dimension_numbers = #tpu.dot_dimension_numbers<[1], [0], [0], [1], [0, 0, 1, 1], [], []>} : vector<48x32xf32>, vector<32x32xf32>, vector<48x32xf32> -> vector<48x32xf32>
    %cst_32 = arith.constant dense<0.000000e+00> : vector<48x32xf32>
    %55 = tpu.matmul %6, %52, %cst_32 {dimension_numbers = #tpu.dot_dimension_numbers<[1], [0], [0], [1], [0, 0, 1, 1], [], []>} : vector<48x32xf32>, vector<32x32xf32>, vector<48x32xf32> -> vector<48x32xf32>
    %c288 = arith.constant 288 : index
    %c0_33 = arith.constant 0 : index
    %56 = vector.load %arg7[%c288, %c0_33] : memref<544x32xf32, #tpu.memory_space<vmem>>, vector<32x32xf32>
    %c320 = arith.constant 320 : index
    %c0_34 = arith.constant 0 : index
    %57 = vector.load %arg7[%c320, %c0_34] : memref<544x32xf32, #tpu.memory_space<vmem>>, vector<32x32xf32>
    %c352 = arith.constant 352 : index
    %c0_35 = arith.constant 0 : index
    %58 = vector.load %arg7[%c352, %c0_35] : memref<544x32xf32, #tpu.memory_space<vmem>>, vector<32x32xf32>
    %cst_36 = arith.constant dense<0.000000e+00> : vector<48x32xf32>
    %59 = tpu.matmul %49, %56, %cst_36 {dimension_numbers = #tpu.dot_dimension_numbers<[1], [0], [0], [1], [0, 0, 1, 1], [], []>} : vector<48x32xf32>, vector<32x32xf32>, vector<48x32xf32> -> vector<48x32xf32>
    %cst_37 = arith.constant dense<0.000000e+00> : vector<48x32xf32>
    %60 = tpu.matmul %49, %57, %cst_37 {dimension_numbers = #tpu.dot_dimension_numbers<[1], [0], [0], [1], [0, 0, 1, 1], [], []>} : vector<48x32xf32>, vector<32x32xf32>, vector<48x32xf32> -> vector<48x32xf32>
    %cst_38 = arith.constant dense<0.000000e+00> : vector<48x32xf32>
    %61 = tpu.matmul %49, %58, %cst_38 {dimension_numbers = #tpu.dot_dimension_numbers<[1], [0], [0], [1], [0, 0, 1, 1], [], []>} : vector<48x32xf32>, vector<32x32xf32>, vector<48x32xf32> -> vector<48x32xf32>
    %62 = arith.addf %53, %59 : vector<48x32xf32>
    %63 = arith.addf %54, %60 : vector<48x32xf32>
    %64 = arith.addf %55, %61 : vector<48x32xf32>
    %cst_39 = arith.constant dense<0.000000e+00> : vector<48x32xf32>
    %65 = tpu.matmul %0, %62, %cst_39 {dimension_numbers = #tpu.dot_dimension_numbers<[1], [0], [0], [1], [0, 0, 1, 1], [], []>} : vector<48x48xf32>, vector<48x32xf32>, vector<48x32xf32> -> vector<48x32xf32>
    %66 = arith.addf %65, %63 : vector<48x32xf32>
    %cst_40 = arith.constant dense<0.000000e+00> : vector<48x32xf32>
    %67 = tpu.matmul %1, %64, %cst_40 {dimension_numbers = #tpu.dot_dimension_numbers<[1], [0], [0], [1], [0, 0, 1, 1], [], []>} : vector<48x48xf32>, vector<48x32xf32>, vector<48x32xf32> -> vector<48x32xf32>
    %68 = arith.addf %66, %67 : vector<48x32xf32>
    %c483 = arith.constant 483 : index
    %c0_41 = arith.constant 0 : index
    %69 = vector.load %arg7[%c483, %c0_41] : memref<544x32xf32, #tpu.memory_space<vmem>>, vector<1x32xf32>
    %70 = vector.broadcast %69 : vector<1x32xf32> to vector<48x32xf32>
    %71 = arith.addf %68, %70 : vector<48x32xf32>
    %72 = arith.mulf %71, %3 : vector<48x32xf32>
    %cst_42 = arith.constant dense<0.000000e+00> : vector<32xf32>
    %73 = vector.multi_reduction <add>, %72, %cst_42 [0] : vector<48x32xf32> to vector<32xf32>
    %74 = vector.shape_cast %73 : vector<32xf32> to vector<1x32xf32>
    %cst_43 = arith.constant 2.500000e-01 : f32
    %75 = vector.broadcast %cst_43 : f32 to vector<1x32xf32>
    %76 = arith.mulf %74, %75 : vector<1x32xf32>
    %77 = arith.mulf %72, %72 : vector<48x32xf32>
    %cst_44 = arith.constant dense<0.000000e+00> : vector<32xf32>
    %78 = vector.multi_reduction <add>, %77, %cst_44 [0] : vector<48x32xf32> to vector<32xf32>
    %79 = vector.shape_cast %78 : vector<32xf32> to vector<1x32xf32>
    %cst_45 = arith.constant 2.500000e-01 : f32
    %80 = vector.broadcast %cst_45 : f32 to vector<1x32xf32>
    %81 = arith.mulf %79, %80 : vector<1x32xf32>
    %82 = arith.mulf %76, %76 : vector<1x32xf32>
    %83 = arith.subf %81, %82 : vector<1x32xf32>
    %cst_46 = arith.constant 0.000000e+00 : f32
    %84 = vector.broadcast %cst_46 : f32 to vector<1x32xf32>
    %85 = arith.maximumf %83, %84 : vector<1x32xf32>
    %86 = vector.broadcast %76 : vector<1x32xf32> to vector<48x32xf32>
    %87 = arith.subf %71, %86 : vector<48x32xf32>
    %cst_47 = arith.constant 9.99999974E-6 : f32
    %88 = vector.broadcast %cst_47 : f32 to vector<1x32xf32>
    %89 = arith.addf %85, %88 : vector<1x32xf32>
    %90 = math.rsqrt %89 : vector<1x32xf32>
    %91 = vector.broadcast %90 : vector<1x32xf32> to vector<48x32xf32>
    %92 = arith.mulf %87, %91 : vector<48x32xf32>
    %c484 = arith.constant 484 : index
    %c0_48 = arith.constant 0 : index
    %93 = vector.load %arg7[%c484, %c0_48] : memref<544x32xf32, #tpu.memory_space<vmem>>, vector<1x32xf32>
    %94 = vector.broadcast %93 : vector<1x32xf32> to vector<48x32xf32>
    %95 = arith.mulf %92, %94 : vector<48x32xf32>
    %c485 = arith.constant 485 : index
    %c0_49 = arith.constant 0 : index
    %96 = vector.load %arg7[%c485, %c0_49] : memref<544x32xf32, #tpu.memory_space<vmem>>, vector<1x32xf32>
    %97 = vector.broadcast %96 : vector<1x32xf32> to vector<48x32xf32>
    %98 = arith.addf %95, %97 : vector<48x32xf32>
    %cst_50 = arith.constant 0.000000e+00 : f32
    %99 = vector.broadcast %cst_50 : f32 to vector<48x32xf32>
    %100 = arith.maximumf %98, %99 : vector<48x32xf32>
    %101 = arith.mulf %100, %3 : vector<48x32xf32>
    %c384 = arith.constant 384 : index
    %c0_51 = arith.constant 0 : index
    %102 = vector.load %arg7[%c384, %c0_51] : memref<544x32xf32, #tpu.memory_space<vmem>>, vector<32x32xf32>
    %c416 = arith.constant 416 : index
    %c0_52 = arith.constant 0 : index
    %103 = vector.load %arg7[%c416, %c0_52] : memref<544x32xf32, #tpu.memory_space<vmem>>, vector<32x32xf32>
    %c448 = arith.constant 448 : index
    %c0_53 = arith.constant 0 : index
    %104 = vector.load %arg7[%c448, %c0_53] : memref<544x32xf32, #tpu.memory_space<vmem>>, vector<32x32xf32>
    %cst_54 = arith.constant dense<0.000000e+00> : vector<48x32xf32>
    %105 = tpu.matmul %101, %102, %cst_54 {dimension_numbers = #tpu.dot_dimension_numbers<[1], [0], [0], [1], [0, 0, 1, 1], [], []>} : vector<48x32xf32>, vector<32x32xf32>, vector<48x32xf32> -> vector<48x32xf32>
    %cst_55 = arith.constant dense<0.000000e+00> : vector<48x32xf32>
    %106 = tpu.matmul %101, %103, %cst_55 {dimension_numbers = #tpu.dot_dimension_numbers<[1], [0], [0], [1], [0, 0, 1, 1], [], []>} : vector<48x32xf32>, vector<32x32xf32>, vector<48x32xf32> -> vector<48x32xf32>
    %cst_56 = arith.constant dense<0.000000e+00> : vector<48x32xf32>
    %107 = tpu.matmul %101, %104, %cst_56 {dimension_numbers = #tpu.dot_dimension_numbers<[1], [0], [0], [1], [0, 0, 1, 1], [], []>} : vector<48x32xf32>, vector<32x32xf32>, vector<48x32xf32> -> vector<48x32xf32>
    %cst_57 = arith.constant dense<0.000000e+00> : vector<48x32xf32>
    %108 = tpu.matmul %0, %105, %cst_57 {dimension_numbers = #tpu.dot_dimension_numbers<[1], [0], [0], [1], [0, 0, 1, 1], [], []>} : vector<48x48xf32>, vector<48x32xf32>, vector<48x32xf32> -> vector<48x32xf32>
    %109 = arith.addf %108, %106 : vector<48x32xf32>
    %cst_58 = arith.constant dense<0.000000e+00> : vector<48x32xf32>
    %110 = tpu.matmul %1, %107, %cst_58 {dimension_numbers = #tpu.dot_dimension_numbers<[1], [0], [0], [1], [0, 0, 1, 1], [], []>} : vector<48x48xf32>, vector<48x32xf32>, vector<48x32xf32> -> vector<48x32xf32>
    %111 = arith.addf %109, %110 : vector<48x32xf32>
    %c486 = arith.constant 486 : index
    %c0_59 = arith.constant 0 : index
    %112 = vector.load %arg7[%c486, %c0_59] : memref<544x32xf32, #tpu.memory_space<vmem>>, vector<1x32xf32>
    %113 = vector.broadcast %112 : vector<1x32xf32> to vector<48x32xf32>
    %114 = arith.addf %111, %113 : vector<48x32xf32>
    %115 = arith.mulf %114, %3 : vector<48x32xf32>
    %cst_60 = arith.constant dense<0.000000e+00> : vector<32xf32>
    %116 = vector.multi_reduction <add>, %115, %cst_60 [0] : vector<48x32xf32> to vector<32xf32>
    %117 = vector.shape_cast %116 : vector<32xf32> to vector<1x32xf32>
    %cst_61 = arith.constant 2.500000e-01 : f32
    %118 = vector.broadcast %cst_61 : f32 to vector<1x32xf32>
    %119 = arith.mulf %117, %118 : vector<1x32xf32>
    %120 = arith.mulf %115, %115 : vector<48x32xf32>
    %cst_62 = arith.constant dense<0.000000e+00> : vector<32xf32>
    %121 = vector.multi_reduction <add>, %120, %cst_62 [0] : vector<48x32xf32> to vector<32xf32>
    %122 = vector.shape_cast %121 : vector<32xf32> to vector<1x32xf32>
    %cst_63 = arith.constant 2.500000e-01 : f32
    %123 = vector.broadcast %cst_63 : f32 to vector<1x32xf32>
    %124 = arith.mulf %122, %123 : vector<1x32xf32>
    %125 = arith.mulf %119, %119 : vector<1x32xf32>
    %126 = arith.subf %124, %125 : vector<1x32xf32>
    %cst_64 = arith.constant 0.000000e+00 : f32
    %127 = vector.broadcast %cst_64 : f32 to vector<1x32xf32>
    %128 = arith.maximumf %126, %127 : vector<1x32xf32>
    %129 = vector.broadcast %119 : vector<1x32xf32> to vector<48x32xf32>
    %130 = arith.subf %114, %129 : vector<48x32xf32>
    %cst_65 = arith.constant 9.99999974E-6 : f32
    %131 = vector.broadcast %cst_65 : f32 to vector<1x32xf32>
    %132 = arith.addf %128, %131 : vector<1x32xf32>
    %133 = math.rsqrt %132 : vector<1x32xf32>
    %134 = vector.broadcast %133 : vector<1x32xf32> to vector<48x32xf32>
    %135 = arith.mulf %130, %134 : vector<48x32xf32>
    %c487 = arith.constant 487 : index
    %c0_66 = arith.constant 0 : index
    %136 = vector.load %arg7[%c487, %c0_66] : memref<544x32xf32, #tpu.memory_space<vmem>>, vector<1x32xf32>
    %137 = vector.broadcast %136 : vector<1x32xf32> to vector<48x32xf32>
    %138 = arith.mulf %135, %137 : vector<48x32xf32>
    %c488 = arith.constant 488 : index
    %c0_67 = arith.constant 0 : index
    %139 = vector.load %arg7[%c488, %c0_67] : memref<544x32xf32, #tpu.memory_space<vmem>>, vector<1x32xf32>
    %140 = vector.broadcast %139 : vector<1x32xf32> to vector<48x32xf32>
    %141 = arith.addf %138, %140 : vector<48x32xf32>
    %cst_68 = arith.constant 0.000000e+00 : f32
    %142 = vector.broadcast %cst_68 : f32 to vector<48x32xf32>
    %143 = arith.maximumf %141, %142 : vector<48x32xf32>
    %144 = arith.mulf %143, %3 : vector<48x32xf32>
    %c256_69 = arith.constant 256 : index
    %c0_70 = arith.constant 0 : index
    %145 = vector.load %arg8[%c256_69, %c0_70] : memref<304x16xf32, #tpu.memory_space<vmem>>, vector<48x16xf32>
    %c144 = arith.constant 144 : index
    %c0_71 = arith.constant 0 : index
    %146 = vector.load %arg6[%c144, %c0_71] : memref<288x48xf32, #tpu.memory_space<vmem>>, vector<48x48xf32>
    %cst_72 = arith.constant dense<0.000000e+00> : vector<48x32xf32>
    %147 = tpu.matmul %146, %144, %cst_72 {dimension_numbers = #tpu.dot_dimension_numbers<[1], [0], [0], [1], [0, 0, 1, 1], [], []>} : vector<48x48xf32>, vector<48x32xf32>, vector<48x32xf32> -> vector<48x32xf32>
    %c0_73 = arith.constant 0 : index
    %c0_74 = arith.constant 0 : index
    %148 = vector.load %arg3[%c0_73, %c0_74] : memref<48x16xf32, #tpu.memory_space<vmem>>, vector<48x16xf32>
    %c0_75 = arith.constant 0 : index
    %c0_76 = arith.constant 0 : index
    %149 = vector.load %arg8[%c0_75, %c0_76] : memref<304x16xf32, #tpu.memory_space<vmem>>, vector<32x16xf32>
    %c32 = arith.constant 32 : index
    %c0_77 = arith.constant 0 : index
    %150 = vector.load %arg8[%c32, %c0_77] : memref<304x16xf32, #tpu.memory_space<vmem>>, vector<32x16xf32>
    %c64_78 = arith.constant 64 : index
    %c0_79 = arith.constant 0 : index
    %151 = vector.load %arg8[%c64_78, %c0_79] : memref<304x16xf32, #tpu.memory_space<vmem>>, vector<32x16xf32>
    %cst_80 = arith.constant dense<0.000000e+00> : vector<48x16xf32>
    %152 = tpu.matmul %147, %149, %cst_80 {dimension_numbers = #tpu.dot_dimension_numbers<[1], [0], [0], [1], [0, 0, 1, 1], [], []>} : vector<48x32xf32>, vector<32x16xf32>, vector<48x16xf32> -> vector<48x16xf32>
    %cst_81 = arith.constant dense<0.000000e+00> : vector<48x16xf32>
    %153 = tpu.matmul %147, %150, %cst_81 {dimension_numbers = #tpu.dot_dimension_numbers<[1], [0], [0], [1], [0, 0, 1, 1], [], []>} : vector<48x32xf32>, vector<32x16xf32>, vector<48x16xf32> -> vector<48x16xf32>
    %cst_82 = arith.constant dense<0.000000e+00> : vector<48x16xf32>
    %154 = tpu.matmul %147, %151, %cst_82 {dimension_numbers = #tpu.dot_dimension_numbers<[1], [0], [0], [1], [0, 0, 1, 1], [], []>} : vector<48x32xf32>, vector<32x16xf32>, vector<48x16xf32> -> vector<48x16xf32>
    %cst_83 = arith.constant dense<0.000000e+00> : vector<48x16xf32>
    %155 = tpu.matmul %0, %152, %cst_83 {dimension_numbers = #tpu.dot_dimension_numbers<[1], [0], [0], [1], [0, 0, 1, 1], [], []>} : vector<48x48xf32>, vector<48x16xf32>, vector<48x16xf32> -> vector<48x16xf32>
    %156 = arith.addf %155, %153 : vector<48x16xf32>
    %cst_84 = arith.constant dense<0.000000e+00> : vector<48x16xf32>
    %157 = tpu.matmul %1, %154, %cst_84 {dimension_numbers = #tpu.dot_dimension_numbers<[1], [0], [0], [1], [0, 0, 1, 1], [], []>} : vector<48x48xf32>, vector<48x16xf32>, vector<48x16xf32> -> vector<48x16xf32>
    %158 = arith.addf %156, %157 : vector<48x16xf32>
    %c240 = arith.constant 240 : index
    %c0_85 = arith.constant 0 : index
    %159 = vector.load %arg8[%c240, %c0_85] : memref<304x16xf32, #tpu.memory_space<vmem>>, vector<1x16xf32>
    %160 = vector.broadcast %159 : vector<1x16xf32> to vector<48x16xf32>
    %161 = arith.addf %158, %160 : vector<48x16xf32>
    %162 = arith.mulf %161, %145 : vector<48x16xf32>
    %cst_86 = arith.constant dense<0.000000e+00> : vector<16xf32>
    %163 = vector.multi_reduction <add>, %162, %cst_86 [0] : vector<48x16xf32> to vector<16xf32>
    %164 = vector.shape_cast %163 : vector<16xf32> to vector<1x16xf32>
    %cst_87 = arith.constant 1.250000e-01 : f32
    %165 = vector.broadcast %cst_87 : f32 to vector<1x16xf32>
    %166 = arith.mulf %164, %165 : vector<1x16xf32>
    %167 = arith.mulf %162, %162 : vector<48x16xf32>
    %cst_88 = arith.constant dense<0.000000e+00> : vector<16xf32>
    %168 = vector.multi_reduction <add>, %167, %cst_88 [0] : vector<48x16xf32> to vector<16xf32>
    %169 = vector.shape_cast %168 : vector<16xf32> to vector<1x16xf32>
    %cst_89 = arith.constant 1.250000e-01 : f32
    %170 = vector.broadcast %cst_89 : f32 to vector<1x16xf32>
    %171 = arith.mulf %169, %170 : vector<1x16xf32>
    %172 = arith.mulf %166, %166 : vector<1x16xf32>
    %173 = arith.subf %171, %172 : vector<1x16xf32>
    %cst_90 = arith.constant 0.000000e+00 : f32
    %174 = vector.broadcast %cst_90 : f32 to vector<1x16xf32>
    %175 = arith.maximumf %173, %174 : vector<1x16xf32>
    %176 = vector.broadcast %166 : vector<1x16xf32> to vector<48x16xf32>
    %177 = arith.subf %161, %176 : vector<48x16xf32>
    %cst_91 = arith.constant 9.99999974E-6 : f32
    %178 = vector.broadcast %cst_91 : f32 to vector<1x16xf32>
    %179 = arith.addf %175, %178 : vector<1x16xf32>
    %180 = math.rsqrt %179 : vector<1x16xf32>
    %181 = vector.broadcast %180 : vector<1x16xf32> to vector<48x16xf32>
    %182 = arith.mulf %177, %181 : vector<48x16xf32>
    %c241 = arith.constant 241 : index
    %c0_92 = arith.constant 0 : index
    %183 = vector.load %arg8[%c241, %c0_92] : memref<304x16xf32, #tpu.memory_space<vmem>>, vector<1x16xf32>
    %184 = vector.broadcast %183 : vector<1x16xf32> to vector<48x16xf32>
    %185 = arith.mulf %182, %184 : vector<48x16xf32>
    %c242 = arith.constant 242 : index
    %c0_93 = arith.constant 0 : index
    %186 = vector.load %arg8[%c242, %c0_93] : memref<304x16xf32, #tpu.memory_space<vmem>>, vector<1x16xf32>
    %187 = vector.broadcast %186 : vector<1x16xf32> to vector<48x16xf32>
    %188 = arith.addf %185, %187 : vector<48x16xf32>
    %cst_94 = arith.constant 0.000000e+00 : f32
    %189 = vector.broadcast %cst_94 : f32 to vector<48x16xf32>
    %190 = arith.maximumf %188, %189 : vector<48x16xf32>
    %191 = arith.mulf %190, %145 : vector<48x16xf32>
    %c96_95 = arith.constant 96 : index
    %c0_96 = arith.constant 0 : index
    %192 = vector.load %arg8[%c96_95, %c0_96] : memref<304x16xf32, #tpu.memory_space<vmem>>, vector<16x16xf32>
    %c112 = arith.constant 112 : index
    %c0_97 = arith.constant 0 : index
    %193 = vector.load %arg8[%c112, %c0_97] : memref<304x16xf32, #tpu.memory_space<vmem>>, vector<16x16xf32>
    %c128_98 = arith.constant 128 : index
    %c0_99 = arith.constant 0 : index
    %194 = vector.load %arg8[%c128_98, %c0_99] : memref<304x16xf32, #tpu.memory_space<vmem>>, vector<16x16xf32>
    %cst_100 = arith.constant dense<0.000000e+00> : vector<48x16xf32>
    %195 = tpu.matmul %148, %192, %cst_100 {dimension_numbers = #tpu.dot_dimension_numbers<[1], [0], [0], [1], [0, 0, 1, 1], [], []>} : vector<48x16xf32>, vector<16x16xf32>, vector<48x16xf32> -> vector<48x16xf32>
    %cst_101 = arith.constant dense<0.000000e+00> : vector<48x16xf32>
    %196 = tpu.matmul %148, %193, %cst_101 {dimension_numbers = #tpu.dot_dimension_numbers<[1], [0], [0], [1], [0, 0, 1, 1], [], []>} : vector<48x16xf32>, vector<16x16xf32>, vector<48x16xf32> -> vector<48x16xf32>
    %cst_102 = arith.constant dense<0.000000e+00> : vector<48x16xf32>
    %197 = tpu.matmul %148, %194, %cst_102 {dimension_numbers = #tpu.dot_dimension_numbers<[1], [0], [0], [1], [0, 0, 1, 1], [], []>} : vector<48x16xf32>, vector<16x16xf32>, vector<48x16xf32> -> vector<48x16xf32>
    %c144_103 = arith.constant 144 : index
    %c0_104 = arith.constant 0 : index
    %198 = vector.load %arg8[%c144_103, %c0_104] : memref<304x16xf32, #tpu.memory_space<vmem>>, vector<16x16xf32>
    %c160 = arith.constant 160 : index
    %c0_105 = arith.constant 0 : index
    %199 = vector.load %arg8[%c160, %c0_105] : memref<304x16xf32, #tpu.memory_space<vmem>>, vector<16x16xf32>
    %c176 = arith.constant 176 : index
    %c0_106 = arith.constant 0 : index
    %200 = vector.load %arg8[%c176, %c0_106] : memref<304x16xf32, #tpu.memory_space<vmem>>, vector<16x16xf32>
    %cst_107 = arith.constant dense<0.000000e+00> : vector<48x16xf32>
    %201 = tpu.matmul %191, %198, %cst_107 {dimension_numbers = #tpu.dot_dimension_numbers<[1], [0], [0], [1], [0, 0, 1, 1], [], []>} : vector<48x16xf32>, vector<16x16xf32>, vector<48x16xf32> -> vector<48x16xf32>
    %cst_108 = arith.constant dense<0.000000e+00> : vector<48x16xf32>
    %202 = tpu.matmul %191, %199, %cst_108 {dimension_numbers = #tpu.dot_dimension_numbers<[1], [0], [0], [1], [0, 0, 1, 1], [], []>} : vector<48x16xf32>, vector<16x16xf32>, vector<48x16xf32> -> vector<48x16xf32>
    %cst_109 = arith.constant dense<0.000000e+00> : vector<48x16xf32>
    %203 = tpu.matmul %191, %200, %cst_109 {dimension_numbers = #tpu.dot_dimension_numbers<[1], [0], [0], [1], [0, 0, 1, 1], [], []>} : vector<48x16xf32>, vector<16x16xf32>, vector<48x16xf32> -> vector<48x16xf32>
    %204 = arith.addf %195, %201 : vector<48x16xf32>
    %205 = arith.addf %196, %202 : vector<48x16xf32>
    %206 = arith.addf %197, %203 : vector<48x16xf32>
    %cst_110 = arith.constant dense<0.000000e+00> : vector<48x16xf32>
    %207 = tpu.matmul %0, %204, %cst_110 {dimension_numbers = #tpu.dot_dimension_numbers<[1], [0], [0], [1], [0, 0, 1, 1], [], []>} : vector<48x48xf32>, vector<48x16xf32>, vector<48x16xf32> -> vector<48x16xf32>
    %208 = arith.addf %207, %205 : vector<48x16xf32>
    %cst_111 = arith.constant dense<0.000000e+00> : vector<48x16xf32>
    %209 = tpu.matmul %1, %206, %cst_111 {dimension_numbers = #tpu.dot_dimension_numbers<[1], [0], [0], [1], [0, 0, 1, 1], [], []>} : vector<48x48xf32>, vector<48x16xf32>, vector<48x16xf32> -> vector<48x16xf32>
    %210 = arith.addf %208, %209 : vector<48x16xf32>
    %c243 = arith.constant 243 : index
    %c0_112 = arith.constant 0 : index
    %211 = vector.load %arg8[%c243, %c0_112] : memref<304x16xf32, #tpu.memory_space<vmem>>, vector<1x16xf32>
    %212 = vector.broadcast %211 : vector<1x16xf32> to vector<48x16xf32>
    %213 = arith.addf %210, %212 : vector<48x16xf32>
    %214 = arith.mulf %213, %145 : vector<48x16xf32>
    %cst_113 = arith.constant dense<0.000000e+00> : vector<16xf32>
    %215 = vector.multi_reduction <add>, %214, %cst_113 [0] : vector<48x16xf32> to vector<16xf32>
    %216 = vector.shape_cast %215 : vector<16xf32> to vector<1x16xf32>
    %cst_114 = arith.constant 1.250000e-01 : f32
    %217 = vector.broadcast %cst_114 : f32 to vector<1x16xf32>
    %218 = arith.mulf %216, %217 : vector<1x16xf32>
    %219 = arith.mulf %214, %214 : vector<48x16xf32>
    %cst_115 = arith.constant dense<0.000000e+00> : vector<16xf32>
    %220 = vector.multi_reduction <add>, %219, %cst_115 [0] : vector<48x16xf32> to vector<16xf32>
    %221 = vector.shape_cast %220 : vector<16xf32> to vector<1x16xf32>
    %cst_116 = arith.constant 1.250000e-01 : f32
    %222 = vector.broadcast %cst_116 : f32 to vector<1x16xf32>
    %223 = arith.mulf %221, %222 : vector<1x16xf32>
    %224 = arith.mulf %218, %218 : vector<1x16xf32>
    %225 = arith.subf %223, %224 : vector<1x16xf32>
    %cst_117 = arith.constant 0.000000e+00 : f32
    %226 = vector.broadcast %cst_117 : f32 to vector<1x16xf32>
    %227 = arith.maximumf %225, %226 : vector<1x16xf32>
    %228 = vector.broadcast %218 : vector<1x16xf32> to vector<48x16xf32>
    %229 = arith.subf %213, %228 : vector<48x16xf32>
    %cst_118 = arith.constant 9.99999974E-6 : f32
    %230 = vector.broadcast %cst_118 : f32 to vector<1x16xf32>
    %231 = arith.addf %227, %230 : vector<1x16xf32>
    %232 = math.rsqrt %231 : vector<1x16xf32>
    %233 = vector.broadcast %232 : vector<1x16xf32> to vector<48x16xf32>
    %234 = arith.mulf %229, %233 : vector<48x16xf32>
    %c244 = arith.constant 244 : index
    %c0_119 = arith.constant 0 : index
    %235 = vector.load %arg8[%c244, %c0_119] : memref<304x16xf32, #tpu.memory_space<vmem>>, vector<1x16xf32>
    %236 = vector.broadcast %235 : vector<1x16xf32> to vector<48x16xf32>
    %237 = arith.mulf %234, %236 : vector<48x16xf32>
    %c245 = arith.constant 245 : index
    %c0_120 = arith.constant 0 : index
    %238 = vector.load %arg8[%c245, %c0_120] : memref<304x16xf32, #tpu.memory_space<vmem>>, vector<1x16xf32>
    %239 = vector.broadcast %238 : vector<1x16xf32> to vector<48x16xf32>
    %240 = arith.addf %237, %239 : vector<48x16xf32>
    %cst_121 = arith.constant 0.000000e+00 : f32
    %241 = vector.broadcast %cst_121 : f32 to vector<48x16xf32>
    %242 = arith.maximumf %240, %241 : vector<48x16xf32>
    %243 = arith.mulf %242, %145 : vector<48x16xf32>
    %c192_122 = arith.constant 192 : index
    %c0_123 = arith.constant 0 : index
    %244 = vector.load %arg8[%c192_122, %c0_123] : memref<304x16xf32, #tpu.memory_space<vmem>>, vector<16x16xf32>
    %c208 = arith.constant 208 : index
    %c0_124 = arith.constant 0 : index
    %245 = vector.load %arg8[%c208, %c0_124] : memref<304x16xf32, #tpu.memory_space<vmem>>, vector<16x16xf32>
    %c224_125 = arith.constant 224 : index
    %c0_126 = arith.constant 0 : index
    %246 = vector.load %arg8[%c224_125, %c0_126] : memref<304x16xf32, #tpu.memory_space<vmem>>, vector<16x16xf32>
    %cst_127 = arith.constant dense<0.000000e+00> : vector<48x16xf32>
    %247 = tpu.matmul %243, %244, %cst_127 {dimension_numbers = #tpu.dot_dimension_numbers<[1], [0], [0], [1], [0, 0, 1, 1], [], []>} : vector<48x16xf32>, vector<16x16xf32>, vector<48x16xf32> -> vector<48x16xf32>
    %cst_128 = arith.constant dense<0.000000e+00> : vector<48x16xf32>
    %248 = tpu.matmul %243, %245, %cst_128 {dimension_numbers = #tpu.dot_dimension_numbers<[1], [0], [0], [1], [0, 0, 1, 1], [], []>} : vector<48x16xf32>, vector<16x16xf32>, vector<48x16xf32> -> vector<48x16xf32>
    %cst_129 = arith.constant dense<0.000000e+00> : vector<48x16xf32>
    %249 = tpu.matmul %243, %246, %cst_129 {dimension_numbers = #tpu.dot_dimension_numbers<[1], [0], [0], [1], [0, 0, 1, 1], [], []>} : vector<48x16xf32>, vector<16x16xf32>, vector<48x16xf32> -> vector<48x16xf32>
    %cst_130 = arith.constant dense<0.000000e+00> : vector<48x16xf32>
    %250 = tpu.matmul %0, %247, %cst_130 {dimension_numbers = #tpu.dot_dimension_numbers<[1], [0], [0], [1], [0, 0, 1, 1], [], []>} : vector<48x48xf32>, vector<48x16xf32>, vector<48x16xf32> -> vector<48x16xf32>
    %251 = arith.addf %250, %248 : vector<48x16xf32>
    %cst_131 = arith.constant dense<0.000000e+00> : vector<48x16xf32>
    %252 = tpu.matmul %1, %249, %cst_131 {dimension_numbers = #tpu.dot_dimension_numbers<[1], [0], [0], [1], [0, 0, 1, 1], [], []>} : vector<48x48xf32>, vector<48x16xf32>, vector<48x16xf32> -> vector<48x16xf32>
    %253 = arith.addf %251, %252 : vector<48x16xf32>
    %c246 = arith.constant 246 : index
    %c0_132 = arith.constant 0 : index
    %254 = vector.load %arg8[%c246, %c0_132] : memref<304x16xf32, #tpu.memory_space<vmem>>, vector<1x16xf32>
    %255 = vector.broadcast %254 : vector<1x16xf32> to vector<48x16xf32>
    %256 = arith.addf %253, %255 : vector<48x16xf32>
    %257 = arith.mulf %256, %145 : vector<48x16xf32>
    %cst_133 = arith.constant dense<0.000000e+00> : vector<16xf32>
    %258 = vector.multi_reduction <add>, %257, %cst_133 [0] : vector<48x16xf32> to vector<16xf32>
    %259 = vector.shape_cast %258 : vector<16xf32> to vector<1x16xf32>
    %cst_134 = arith.constant 1.250000e-01 : f32
    %260 = vector.broadcast %cst_134 : f32 to vector<1x16xf32>
    %261 = arith.mulf %259, %260 : vector<1x16xf32>
    %262 = arith.mulf %257, %257 : vector<48x16xf32>
    %cst_135 = arith.constant dense<0.000000e+00> : vector<16xf32>
    %263 = vector.multi_reduction <add>, %262, %cst_135 [0] : vector<48x16xf32> to vector<16xf32>
    %264 = vector.shape_cast %263 : vector<16xf32> to vector<1x16xf32>
    %cst_136 = arith.constant 1.250000e-01 : f32
    %265 = vector.broadcast %cst_136 : f32 to vector<1x16xf32>
    %266 = arith.mulf %264, %265 : vector<1x16xf32>
    %267 = arith.mulf %261, %261 : vector<1x16xf32>
    %268 = arith.subf %266, %267 : vector<1x16xf32>
    %cst_137 = arith.constant 0.000000e+00 : f32
    %269 = vector.broadcast %cst_137 : f32 to vector<1x16xf32>
    %270 = arith.maximumf %268, %269 : vector<1x16xf32>
    %271 = vector.broadcast %261 : vector<1x16xf32> to vector<48x16xf32>
    %272 = arith.subf %256, %271 : vector<48x16xf32>
    %cst_138 = arith.constant 9.99999974E-6 : f32
    %273 = vector.broadcast %cst_138 : f32 to vector<1x16xf32>
    %274 = arith.addf %270, %273 : vector<1x16xf32>
    %275 = math.rsqrt %274 : vector<1x16xf32>
    %276 = vector.broadcast %275 : vector<1x16xf32> to vector<48x16xf32>
    %277 = arith.mulf %272, %276 : vector<48x16xf32>
    %c247 = arith.constant 247 : index
    %c0_139 = arith.constant 0 : index
    %278 = vector.load %arg8[%c247, %c0_139] : memref<304x16xf32, #tpu.memory_space<vmem>>, vector<1x16xf32>
    %279 = vector.broadcast %278 : vector<1x16xf32> to vector<48x16xf32>
    %280 = arith.mulf %277, %279 : vector<48x16xf32>
    %c248 = arith.constant 248 : index
    %c0_140 = arith.constant 0 : index
    %281 = vector.load %arg8[%c248, %c0_140] : memref<304x16xf32, #tpu.memory_space<vmem>>, vector<1x16xf32>
    %282 = vector.broadcast %281 : vector<1x16xf32> to vector<48x16xf32>
    %283 = arith.addf %280, %282 : vector<48x16xf32>
    %cst_141 = arith.constant 0.000000e+00 : f32
    %284 = vector.broadcast %cst_141 : f32 to vector<48x16xf32>
    %285 = arith.maximumf %283, %284 : vector<48x16xf32>
    %286 = arith.mulf %285, %145 : vector<48x16xf32>
    %c136 = arith.constant 136 : index
    %c0_142 = arith.constant 0 : index
    %287 = vector.load %arg9[%c136, %c0_142] : memref<184x8xf32, #tpu.memory_space<vmem>>, vector<48x8xf32>
    %c192_143 = arith.constant 192 : index
    %c0_144 = arith.constant 0 : index
    %288 = vector.load %arg6[%c192_143, %c0_144] : memref<288x48xf32, #tpu.memory_space<vmem>>, vector<48x48xf32>
    %cst_145 = arith.constant dense<0.000000e+00> : vector<48x16xf32>
    %289 = tpu.matmul %288, %286, %cst_145 {dimension_numbers = #tpu.dot_dimension_numbers<[1], [0], [0], [1], [0, 0, 1, 1], [], []>} : vector<48x48xf32>, vector<48x16xf32>, vector<48x16xf32> -> vector<48x16xf32>
    %c0_146 = arith.constant 0 : index
    %c0_147 = arith.constant 0 : index
    %290 = vector.load %arg4[%c0_146, %c0_147] : memref<48x8xf32, #tpu.memory_space<vmem>>, vector<48x8xf32>
    %c0_148 = arith.constant 0 : index
    %c0_149 = arith.constant 0 : index
    %291 = vector.load %arg9[%c0_148, %c0_149] : memref<184x8xf32, #tpu.memory_space<vmem>>, vector<16x8xf32>
    %c16 = arith.constant 16 : index
    %c0_150 = arith.constant 0 : index
    %292 = vector.load %arg9[%c16, %c0_150] : memref<184x8xf32, #tpu.memory_space<vmem>>, vector<16x8xf32>
    %c32_151 = arith.constant 32 : index
    %c0_152 = arith.constant 0 : index
    %293 = vector.load %arg9[%c32_151, %c0_152] : memref<184x8xf32, #tpu.memory_space<vmem>>, vector<16x8xf32>
    %cst_153 = arith.constant dense<0.000000e+00> : vector<48x8xf32>
    %294 = tpu.matmul %289, %291, %cst_153 {dimension_numbers = #tpu.dot_dimension_numbers<[1], [0], [0], [1], [0, 0, 1, 1], [], []>} : vector<48x16xf32>, vector<16x8xf32>, vector<48x8xf32> -> vector<48x8xf32>
    %cst_154 = arith.constant dense<0.000000e+00> : vector<48x8xf32>
    %295 = tpu.matmul %289, %292, %cst_154 {dimension_numbers = #tpu.dot_dimension_numbers<[1], [0], [0], [1], [0, 0, 1, 1], [], []>} : vector<48x16xf32>, vector<16x8xf32>, vector<48x8xf32> -> vector<48x8xf32>
    %cst_155 = arith.constant dense<0.000000e+00> : vector<48x8xf32>
    %296 = tpu.matmul %289, %293, %cst_155 {dimension_numbers = #tpu.dot_dimension_numbers<[1], [0], [0], [1], [0, 0, 1, 1], [], []>} : vector<48x16xf32>, vector<16x8xf32>, vector<48x8xf32> -> vector<48x8xf32>
    %cst_156 = arith.constant dense<0.000000e+00> : vector<48x8xf32>
    %297 = tpu.matmul %0, %294, %cst_156 {dimension_numbers = #tpu.dot_dimension_numbers<[1], [0], [0], [1], [0, 0, 1, 1], [], []>} : vector<48x48xf32>, vector<48x8xf32>, vector<48x8xf32> -> vector<48x8xf32>
    %298 = arith.addf %297, %295 : vector<48x8xf32>
    %cst_157 = arith.constant dense<0.000000e+00> : vector<48x8xf32>
    %299 = tpu.matmul %1, %296, %cst_157 {dimension_numbers = #tpu.dot_dimension_numbers<[1], [0], [0], [1], [0, 0, 1, 1], [], []>} : vector<48x48xf32>, vector<48x8xf32>, vector<48x8xf32> -> vector<48x8xf32>
    %300 = arith.addf %298, %299 : vector<48x8xf32>
    %c120 = arith.constant 120 : index
    %c0_158 = arith.constant 0 : index
    %301 = vector.load %arg9[%c120, %c0_158] : memref<184x8xf32, #tpu.memory_space<vmem>>, vector<1x8xf32>
    %302 = vector.broadcast %301 : vector<1x8xf32> to vector<48x8xf32>
    %303 = arith.addf %300, %302 : vector<48x8xf32>
    %304 = arith.mulf %303, %287 : vector<48x8xf32>
    %cst_159 = arith.constant dense<0.000000e+00> : vector<8xf32>
    %305 = vector.multi_reduction <add>, %304, %cst_159 [0] : vector<48x8xf32> to vector<8xf32>
    %306 = vector.shape_cast %305 : vector<8xf32> to vector<1x8xf32>
    %cst_160 = arith.constant 6.250000e-02 : f32
    %307 = vector.broadcast %cst_160 : f32 to vector<1x8xf32>
    %308 = arith.mulf %306, %307 : vector<1x8xf32>
    %309 = arith.mulf %304, %304 : vector<48x8xf32>
    %cst_161 = arith.constant dense<0.000000e+00> : vector<8xf32>
    %310 = vector.multi_reduction <add>, %309, %cst_161 [0] : vector<48x8xf32> to vector<8xf32>
    %311 = vector.shape_cast %310 : vector<8xf32> to vector<1x8xf32>
    %cst_162 = arith.constant 6.250000e-02 : f32
    %312 = vector.broadcast %cst_162 : f32 to vector<1x8xf32>
    %313 = arith.mulf %311, %312 : vector<1x8xf32>
    %314 = arith.mulf %308, %308 : vector<1x8xf32>
    %315 = arith.subf %313, %314 : vector<1x8xf32>
    %cst_163 = arith.constant 0.000000e+00 : f32
    %316 = vector.broadcast %cst_163 : f32 to vector<1x8xf32>
    %317 = arith.maximumf %315, %316 : vector<1x8xf32>
    %318 = vector.broadcast %308 : vector<1x8xf32> to vector<48x8xf32>
    %319 = arith.subf %303, %318 : vector<48x8xf32>
    %cst_164 = arith.constant 9.99999974E-6 : f32
    %320 = vector.broadcast %cst_164 : f32 to vector<1x8xf32>
    %321 = arith.addf %317, %320 : vector<1x8xf32>
    %322 = math.rsqrt %321 : vector<1x8xf32>
    %323 = vector.broadcast %322 : vector<1x8xf32> to vector<48x8xf32>
    %324 = arith.mulf %319, %323 : vector<48x8xf32>
    %c121 = arith.constant 121 : index
    %c0_165 = arith.constant 0 : index
    %325 = vector.load %arg9[%c121, %c0_165] : memref<184x8xf32, #tpu.memory_space<vmem>>, vector<1x8xf32>
    %326 = vector.broadcast %325 : vector<1x8xf32> to vector<48x8xf32>
    %327 = arith.mulf %324, %326 : vector<48x8xf32>
    %c122 = arith.constant 122 : index
    %c0_166 = arith.constant 0 : index
    %328 = vector.load %arg9[%c122, %c0_166] : memref<184x8xf32, #tpu.memory_space<vmem>>, vector<1x8xf32>
    %329 = vector.broadcast %328 : vector<1x8xf32> to vector<48x8xf32>
    %330 = arith.addf %327, %329 : vector<48x8xf32>
    %cst_167 = arith.constant 0.000000e+00 : f32
    %331 = vector.broadcast %cst_167 : f32 to vector<48x8xf32>
    %332 = arith.maximumf %330, %331 : vector<48x8xf32>
    %333 = arith.mulf %332, %287 : vector<48x8xf32>
    %c48_168 = arith.constant 48 : index
    %c0_169 = arith.constant 0 : index
    %334 = vector.load %arg9[%c48_168, %c0_169] : memref<184x8xf32, #tpu.memory_space<vmem>>, vector<8x8xf32>
    %c56 = arith.constant 56 : index
    %c0_170 = arith.constant 0 : index
    %335 = vector.load %arg9[%c56, %c0_170] : memref<184x8xf32, #tpu.memory_space<vmem>>, vector<8x8xf32>
    %c64_171 = arith.constant 64 : index
    %c0_172 = arith.constant 0 : index
    %336 = vector.load %arg9[%c64_171, %c0_172] : memref<184x8xf32, #tpu.memory_space<vmem>>, vector<8x8xf32>
    %cst_173 = arith.constant dense<0.000000e+00> : vector<48x8xf32>
    %337 = tpu.matmul %290, %334, %cst_173 {dimension_numbers = #tpu.dot_dimension_numbers<[1], [0], [0], [1], [0, 0, 1, 1], [], []>} : vector<48x8xf32>, vector<8x8xf32>, vector<48x8xf32> -> vector<48x8xf32>
    %cst_174 = arith.constant dense<0.000000e+00> : vector<48x8xf32>
    %338 = tpu.matmul %290, %335, %cst_174 {dimension_numbers = #tpu.dot_dimension_numbers<[1], [0], [0], [1], [0, 0, 1, 1], [], []>} : vector<48x8xf32>, vector<8x8xf32>, vector<48x8xf32> -> vector<48x8xf32>
    %cst_175 = arith.constant dense<0.000000e+00> : vector<48x8xf32>
    %339 = tpu.matmul %290, %336, %cst_175 {dimension_numbers = #tpu.dot_dimension_numbers<[1], [0], [0], [1], [0, 0, 1, 1], [], []>} : vector<48x8xf32>, vector<8x8xf32>, vector<48x8xf32> -> vector<48x8xf32>
    %c72 = arith.constant 72 : index
    %c0_176 = arith.constant 0 : index
    %340 = vector.load %arg9[%c72, %c0_176] : memref<184x8xf32, #tpu.memory_space<vmem>>, vector<8x8xf32>
    %c80 = arith.constant 80 : index
    %c0_177 = arith.constant 0 : index
    %341 = vector.load %arg9[%c80, %c0_177] : memref<184x8xf32, #tpu.memory_space<vmem>>, vector<8x8xf32>
    %c88 = arith.constant 88 : index
    %c0_178 = arith.constant 0 : index
    %342 = vector.load %arg9[%c88, %c0_178] : memref<184x8xf32, #tpu.memory_space<vmem>>, vector<8x8xf32>
    %cst_179 = arith.constant dense<0.000000e+00> : vector<48x8xf32>
    %343 = tpu.matmul %333, %340, %cst_179 {dimension_numbers = #tpu.dot_dimension_numbers<[1], [0], [0], [1], [0, 0, 1, 1], [], []>} : vector<48x8xf32>, vector<8x8xf32>, vector<48x8xf32> -> vector<48x8xf32>
    %cst_180 = arith.constant dense<0.000000e+00> : vector<48x8xf32>
    %344 = tpu.matmul %333, %341, %cst_180 {dimension_numbers = #tpu.dot_dimension_numbers<[1], [0], [0], [1], [0, 0, 1, 1], [], []>} : vector<48x8xf32>, vector<8x8xf32>, vector<48x8xf32> -> vector<48x8xf32>
    %cst_181 = arith.constant dense<0.000000e+00> : vector<48x8xf32>
    %345 = tpu.matmul %333, %342, %cst_181 {dimension_numbers = #tpu.dot_dimension_numbers<[1], [0], [0], [1], [0, 0, 1, 1], [], []>} : vector<48x8xf32>, vector<8x8xf32>, vector<48x8xf32> -> vector<48x8xf32>
    %346 = arith.addf %337, %343 : vector<48x8xf32>
    %347 = arith.addf %338, %344 : vector<48x8xf32>
    %348 = arith.addf %339, %345 : vector<48x8xf32>
    %cst_182 = arith.constant dense<0.000000e+00> : vector<48x8xf32>
    %349 = tpu.matmul %0, %346, %cst_182 {dimension_numbers = #tpu.dot_dimension_numbers<[1], [0], [0], [1], [0, 0, 1, 1], [], []>} : vector<48x48xf32>, vector<48x8xf32>, vector<48x8xf32> -> vector<48x8xf32>
    %350 = arith.addf %349, %347 : vector<48x8xf32>
    %cst_183 = arith.constant dense<0.000000e+00> : vector<48x8xf32>
    %351 = tpu.matmul %1, %348, %cst_183 {dimension_numbers = #tpu.dot_dimension_numbers<[1], [0], [0], [1], [0, 0, 1, 1], [], []>} : vector<48x48xf32>, vector<48x8xf32>, vector<48x8xf32> -> vector<48x8xf32>
    %352 = arith.addf %350, %351 : vector<48x8xf32>
    %c123 = arith.constant 123 : index
    %c0_184 = arith.constant 0 : index
    %353 = vector.load %arg9[%c123, %c0_184] : memref<184x8xf32, #tpu.memory_space<vmem>>, vector<1x8xf32>
    %354 = vector.broadcast %353 : vector<1x8xf32> to vector<48x8xf32>
    %355 = arith.addf %352, %354 : vector<48x8xf32>
    %356 = arith.mulf %355, %287 : vector<48x8xf32>
    %cst_185 = arith.constant dense<0.000000e+00> : vector<8xf32>
    %357 = vector.multi_reduction <add>, %356, %cst_185 [0] : vector<48x8xf32> to vector<8xf32>
    %358 = vector.shape_cast %357 : vector<8xf32> to vector<1x8xf32>
    %cst_186 = arith.constant 6.250000e-02 : f32
    %359 = vector.broadcast %cst_186 : f32 to vector<1x8xf32>
    %360 = arith.mulf %358, %359 : vector<1x8xf32>
    %361 = arith.mulf %356, %356 : vector<48x8xf32>
    %cst_187 = arith.constant dense<0.000000e+00> : vector<8xf32>
    %362 = vector.multi_reduction <add>, %361, %cst_187 [0] : vector<48x8xf32> to vector<8xf32>
    %363 = vector.shape_cast %362 : vector<8xf32> to vector<1x8xf32>
    %cst_188 = arith.constant 6.250000e-02 : f32
    %364 = vector.broadcast %cst_188 : f32 to vector<1x8xf32>
    %365 = arith.mulf %363, %364 : vector<1x8xf32>
    %366 = arith.mulf %360, %360 : vector<1x8xf32>
    %367 = arith.subf %365, %366 : vector<1x8xf32>
    %cst_189 = arith.constant 0.000000e+00 : f32
    %368 = vector.broadcast %cst_189 : f32 to vector<1x8xf32>
    %369 = arith.maximumf %367, %368 : vector<1x8xf32>
    %370 = vector.broadcast %360 : vector<1x8xf32> to vector<48x8xf32>
    %371 = arith.subf %355, %370 : vector<48x8xf32>
    %cst_190 = arith.constant 9.99999974E-6 : f32
    %372 = vector.broadcast %cst_190 : f32 to vector<1x8xf32>
    %373 = arith.addf %369, %372 : vector<1x8xf32>
    %374 = math.rsqrt %373 : vector<1x8xf32>
    %375 = vector.broadcast %374 : vector<1x8xf32> to vector<48x8xf32>
    %376 = arith.mulf %371, %375 : vector<48x8xf32>
    %c124 = arith.constant 124 : index
    %c0_191 = arith.constant 0 : index
    %377 = vector.load %arg9[%c124, %c0_191] : memref<184x8xf32, #tpu.memory_space<vmem>>, vector<1x8xf32>
    %378 = vector.broadcast %377 : vector<1x8xf32> to vector<48x8xf32>
    %379 = arith.mulf %376, %378 : vector<48x8xf32>
    %c125 = arith.constant 125 : index
    %c0_192 = arith.constant 0 : index
    %380 = vector.load %arg9[%c125, %c0_192] : memref<184x8xf32, #tpu.memory_space<vmem>>, vector<1x8xf32>
    %381 = vector.broadcast %380 : vector<1x8xf32> to vector<48x8xf32>
    %382 = arith.addf %379, %381 : vector<48x8xf32>
    %cst_193 = arith.constant 0.000000e+00 : f32
    %383 = vector.broadcast %cst_193 : f32 to vector<48x8xf32>
    %384 = arith.maximumf %382, %383 : vector<48x8xf32>
    %385 = arith.mulf %384, %287 : vector<48x8xf32>
    %c96_194 = arith.constant 96 : index
    %c0_195 = arith.constant 0 : index
    %386 = vector.load %arg9[%c96_194, %c0_195] : memref<184x8xf32, #tpu.memory_space<vmem>>, vector<8x8xf32>
    %c104 = arith.constant 104 : index
    %c0_196 = arith.constant 0 : index
    %387 = vector.load %arg9[%c104, %c0_196] : memref<184x8xf32, #tpu.memory_space<vmem>>, vector<8x8xf32>
    %c112_197 = arith.constant 112 : index
    %c0_198 = arith.constant 0 : index
    %388 = vector.load %arg9[%c112_197, %c0_198] : memref<184x8xf32, #tpu.memory_space<vmem>>, vector<8x8xf32>
    %cst_199 = arith.constant dense<0.000000e+00> : vector<48x8xf32>
    %389 = tpu.matmul %385, %386, %cst_199 {dimension_numbers = #tpu.dot_dimension_numbers<[1], [0], [0], [1], [0, 0, 1, 1], [], []>} : vector<48x8xf32>, vector<8x8xf32>, vector<48x8xf32> -> vector<48x8xf32>
    %cst_200 = arith.constant dense<0.000000e+00> : vector<48x8xf32>
    %390 = tpu.matmul %385, %387, %cst_200 {dimension_numbers = #tpu.dot_dimension_numbers<[1], [0], [0], [1], [0, 0, 1, 1], [], []>} : vector<48x8xf32>, vector<8x8xf32>, vector<48x8xf32> -> vector<48x8xf32>
    %cst_201 = arith.constant dense<0.000000e+00> : vector<48x8xf32>
    %391 = tpu.matmul %385, %388, %cst_201 {dimension_numbers = #tpu.dot_dimension_numbers<[1], [0], [0], [1], [0, 0, 1, 1], [], []>} : vector<48x8xf32>, vector<8x8xf32>, vector<48x8xf32> -> vector<48x8xf32>
    %cst_202 = arith.constant dense<0.000000e+00> : vector<48x8xf32>
    %392 = tpu.matmul %0, %389, %cst_202 {dimension_numbers = #tpu.dot_dimension_numbers<[1], [0], [0], [1], [0, 0, 1, 1], [], []>} : vector<48x48xf32>, vector<48x8xf32>, vector<48x8xf32> -> vector<48x8xf32>
    %393 = arith.addf %392, %390 : vector<48x8xf32>
    %cst_203 = arith.constant dense<0.000000e+00> : vector<48x8xf32>
    %394 = tpu.matmul %1, %391, %cst_203 {dimension_numbers = #tpu.dot_dimension_numbers<[1], [0], [0], [1], [0, 0, 1, 1], [], []>} : vector<48x48xf32>, vector<48x8xf32>, vector<48x8xf32> -> vector<48x8xf32>
    %395 = arith.addf %393, %394 : vector<48x8xf32>
    %c126 = arith.constant 126 : index
    %c0_204 = arith.constant 0 : index
    %396 = vector.load %arg9[%c126, %c0_204] : memref<184x8xf32, #tpu.memory_space<vmem>>, vector<1x8xf32>
    %397 = vector.broadcast %396 : vector<1x8xf32> to vector<48x8xf32>
    %398 = arith.addf %395, %397 : vector<48x8xf32>
    %399 = arith.mulf %398, %287 : vector<48x8xf32>
    %cst_205 = arith.constant dense<0.000000e+00> : vector<8xf32>
    %400 = vector.multi_reduction <add>, %399, %cst_205 [0] : vector<48x8xf32> to vector<8xf32>
    %401 = vector.shape_cast %400 : vector<8xf32> to vector<1x8xf32>
    %cst_206 = arith.constant 6.250000e-02 : f32
    %402 = vector.broadcast %cst_206 : f32 to vector<1x8xf32>
    %403 = arith.mulf %401, %402 : vector<1x8xf32>
    %404 = arith.mulf %399, %399 : vector<48x8xf32>
    %cst_207 = arith.constant dense<0.000000e+00> : vector<8xf32>
    %405 = vector.multi_reduction <add>, %404, %cst_207 [0] : vector<48x8xf32> to vector<8xf32>
    %406 = vector.shape_cast %405 : vector<8xf32> to vector<1x8xf32>
    %cst_208 = arith.constant 6.250000e-02 : f32
    %407 = vector.broadcast %cst_208 : f32 to vector<1x8xf32>
    %408 = arith.mulf %406, %407 : vector<1x8xf32>
    %409 = arith.mulf %403, %403 : vector<1x8xf32>
    %410 = arith.subf %408, %409 : vector<1x8xf32>
    %cst_209 = arith.constant 0.000000e+00 : f32
    %411 = vector.broadcast %cst_209 : f32 to vector<1x8xf32>
    %412 = arith.maximumf %410, %411 : vector<1x8xf32>
    %413 = vector.broadcast %403 : vector<1x8xf32> to vector<48x8xf32>
    %414 = arith.subf %398, %413 : vector<48x8xf32>
    %cst_210 = arith.constant 9.99999974E-6 : f32
    %415 = vector.broadcast %cst_210 : f32 to vector<1x8xf32>
    %416 = arith.addf %412, %415 : vector<1x8xf32>
    %417 = math.rsqrt %416 : vector<1x8xf32>
    %418 = vector.broadcast %417 : vector<1x8xf32> to vector<48x8xf32>
    %419 = arith.mulf %414, %418 : vector<48x8xf32>
    %c127 = arith.constant 127 : index
    %c0_211 = arith.constant 0 : index
    %420 = vector.load %arg9[%c127, %c0_211] : memref<184x8xf32, #tpu.memory_space<vmem>>, vector<1x8xf32>
    %421 = vector.broadcast %420 : vector<1x8xf32> to vector<48x8xf32>
    %422 = arith.mulf %419, %421 : vector<48x8xf32>
    %c128_212 = arith.constant 128 : index
    %c0_213 = arith.constant 0 : index
    %423 = vector.load %arg9[%c128_212, %c0_213] : memref<184x8xf32, #tpu.memory_space<vmem>>, vector<1x8xf32>
    %424 = vector.broadcast %423 : vector<1x8xf32> to vector<48x8xf32>
    %425 = arith.addf %422, %424 : vector<48x8xf32>
    %cst_214 = arith.constant 0.000000e+00 : f32
    %426 = vector.broadcast %cst_214 : f32 to vector<48x8xf32>
    %427 = arith.maximumf %425, %426 : vector<48x8xf32>
    %428 = arith.mulf %427, %287 : vector<48x8xf32>
    %c112_215 = arith.constant 112 : index
    %c0_216 = arith.constant 0 : index
    %429 = vector.load %arg10[%c112_215, %c0_216] : memref<176x4xf32, #tpu.memory_space<vmem>>, vector<48x4xf32>
    %c240_217 = arith.constant 240 : index
    %c0_218 = arith.constant 0 : index
    %430 = vector.load %arg6[%c240_217, %c0_218] : memref<288x48xf32, #tpu.memory_space<vmem>>, vector<48x48xf32>
    %cst_219 = arith.constant dense<0.000000e+00> : vector<48x8xf32>
    %431 = tpu.matmul %430, %428, %cst_219 {dimension_numbers = #tpu.dot_dimension_numbers<[1], [0], [0], [1], [0, 0, 1, 1], [], []>} : vector<48x48xf32>, vector<48x8xf32>, vector<48x8xf32> -> vector<48x8xf32>
    %c0_220 = arith.constant 0 : index
    %c0_221 = arith.constant 0 : index
    %432 = vector.load %arg5[%c0_220, %c0_221] : memref<48x4xf32, #tpu.memory_space<vmem>>, vector<48x4xf32>
    %c0_222 = arith.constant 0 : index
    %c0_223 = arith.constant 0 : index
    %433 = vector.load %arg10[%c0_222, %c0_223] : memref<176x4xf32, #tpu.memory_space<vmem>>, vector<8x4xf32>
    %c8 = arith.constant 8 : index
    %c0_224 = arith.constant 0 : index
    %434 = vector.load %arg10[%c8, %c0_224] : memref<176x4xf32, #tpu.memory_space<vmem>>, vector<8x4xf32>
    %c16_225 = arith.constant 16 : index
    %c0_226 = arith.constant 0 : index
    %435 = vector.load %arg10[%c16_225, %c0_226] : memref<176x4xf32, #tpu.memory_space<vmem>>, vector<8x4xf32>
    %cst_227 = arith.constant dense<0.000000e+00> : vector<48x4xf32>
    %436 = tpu.matmul %431, %433, %cst_227 {dimension_numbers = #tpu.dot_dimension_numbers<[1], [0], [0], [1], [0, 0, 1, 1], [], []>} : vector<48x8xf32>, vector<8x4xf32>, vector<48x4xf32> -> vector<48x4xf32>
    %cst_228 = arith.constant dense<0.000000e+00> : vector<48x4xf32>
    %437 = tpu.matmul %431, %434, %cst_228 {dimension_numbers = #tpu.dot_dimension_numbers<[1], [0], [0], [1], [0, 0, 1, 1], [], []>} : vector<48x8xf32>, vector<8x4xf32>, vector<48x4xf32> -> vector<48x4xf32>
    %cst_229 = arith.constant dense<0.000000e+00> : vector<48x4xf32>
    %438 = tpu.matmul %431, %435, %cst_229 {dimension_numbers = #tpu.dot_dimension_numbers<[1], [0], [0], [1], [0, 0, 1, 1], [], []>} : vector<48x8xf32>, vector<8x4xf32>, vector<48x4xf32> -> vector<48x4xf32>
    %cst_230 = arith.constant dense<0.000000e+00> : vector<48x4xf32>
    %439 = tpu.matmul %0, %436, %cst_230 {dimension_numbers = #tpu.dot_dimension_numbers<[1], [0], [0], [1], [0, 0, 1, 1], [], []>} : vector<48x48xf32>, vector<48x4xf32>, vector<48x4xf32> -> vector<48x4xf32>
    %440 = arith.addf %439, %437 : vector<48x4xf32>
    %cst_231 = arith.constant dense<0.000000e+00> : vector<48x4xf32>
    %441 = tpu.matmul %1, %438, %cst_231 {dimension_numbers = #tpu.dot_dimension_numbers<[1], [0], [0], [1], [0, 0, 1, 1], [], []>} : vector<48x48xf32>, vector<48x4xf32>, vector<48x4xf32> -> vector<48x4xf32>
    %442 = arith.addf %440, %441 : vector<48x4xf32>
    %c96_232 = arith.constant 96 : index
    %c0_233 = arith.constant 0 : index
    %443 = vector.load %arg10[%c96_232, %c0_233] : memref<176x4xf32, #tpu.memory_space<vmem>>, vector<1x4xf32>
    %444 = vector.broadcast %443 : vector<1x4xf32> to vector<48x4xf32>
    %445 = arith.addf %442, %444 : vector<48x4xf32>
    %446 = arith.mulf %445, %429 : vector<48x4xf32>
    %cst_234 = arith.constant dense<0.000000e+00> : vector<4xf32>
    %447 = vector.multi_reduction <add>, %446, %cst_234 [0] : vector<48x4xf32> to vector<4xf32>
    %448 = vector.shape_cast %447 : vector<4xf32> to vector<1x4xf32>
    %cst_235 = arith.constant 3.125000e-02 : f32
    %449 = vector.broadcast %cst_235 : f32 to vector<1x4xf32>
    %450 = arith.mulf %448, %449 : vector<1x4xf32>
    %451 = arith.mulf %446, %446 : vector<48x4xf32>
    %cst_236 = arith.constant dense<0.000000e+00> : vector<4xf32>
    %452 = vector.multi_reduction <add>, %451, %cst_236 [0] : vector<48x4xf32> to vector<4xf32>
    %453 = vector.shape_cast %452 : vector<4xf32> to vector<1x4xf32>
    %cst_237 = arith.constant 3.125000e-02 : f32
    %454 = vector.broadcast %cst_237 : f32 to vector<1x4xf32>
    %455 = arith.mulf %453, %454 : vector<1x4xf32>
    %456 = arith.mulf %450, %450 : vector<1x4xf32>
    %457 = arith.subf %455, %456 : vector<1x4xf32>
    %cst_238 = arith.constant 0.000000e+00 : f32
    %458 = vector.broadcast %cst_238 : f32 to vector<1x4xf32>
    %459 = arith.maximumf %457, %458 : vector<1x4xf32>
    %460 = vector.broadcast %450 : vector<1x4xf32> to vector<48x4xf32>
    %461 = arith.subf %445, %460 : vector<48x4xf32>
    %cst_239 = arith.constant 9.99999974E-6 : f32
    %462 = vector.broadcast %cst_239 : f32 to vector<1x4xf32>
    %463 = arith.addf %459, %462 : vector<1x4xf32>
    %464 = math.rsqrt %463 : vector<1x4xf32>
    %465 = vector.broadcast %464 : vector<1x4xf32> to vector<48x4xf32>
    %466 = arith.mulf %461, %465 : vector<48x4xf32>
    %c97 = arith.constant 97 : index
    %c0_240 = arith.constant 0 : index
    %467 = vector.load %arg10[%c97, %c0_240] : memref<176x4xf32, #tpu.memory_space<vmem>>, vector<1x4xf32>
    %468 = vector.broadcast %467 : vector<1x4xf32> to vector<48x4xf32>
    %469 = arith.mulf %466, %468 : vector<48x4xf32>
    %c98 = arith.constant 98 : index
    %c0_241 = arith.constant 0 : index
    %470 = vector.load %arg10[%c98, %c0_241] : memref<176x4xf32, #tpu.memory_space<vmem>>, vector<1x4xf32>
    %471 = vector.broadcast %470 : vector<1x4xf32> to vector<48x4xf32>
    %472 = arith.addf %469, %471 : vector<48x4xf32>
    %cst_242 = arith.constant 0.000000e+00 : f32
    %473 = vector.broadcast %cst_242 : f32 to vector<48x4xf32>
    %474 = arith.maximumf %472, %473 : vector<48x4xf32>
    %475 = arith.mulf %474, %429 : vector<48x4xf32>
    %c24 = arith.constant 24 : index
    %c0_243 = arith.constant 0 : index
    %476 = vector.load %arg10[%c24, %c0_243] : memref<176x4xf32, #tpu.memory_space<vmem>>, vector<4x4xf32>
    %c32_244 = arith.constant 32 : index
    %c0_245 = arith.constant 0 : index
    %477 = vector.load %arg10[%c32_244, %c0_245] : memref<176x4xf32, #tpu.memory_space<vmem>>, vector<4x4xf32>
    %c40 = arith.constant 40 : index
    %c0_246 = arith.constant 0 : index
    %478 = vector.load %arg10[%c40, %c0_246] : memref<176x4xf32, #tpu.memory_space<vmem>>, vector<4x4xf32>
    %cst_247 = arith.constant dense<0.000000e+00> : vector<48x4xf32>
    %479 = tpu.matmul %432, %476, %cst_247 {dimension_numbers = #tpu.dot_dimension_numbers<[1], [0], [0], [1], [0, 0, 1, 1], [], []>} : vector<48x4xf32>, vector<4x4xf32>, vector<48x4xf32> -> vector<48x4xf32>
    %cst_248 = arith.constant dense<0.000000e+00> : vector<48x4xf32>
    %480 = tpu.matmul %432, %477, %cst_248 {dimension_numbers = #tpu.dot_dimension_numbers<[1], [0], [0], [1], [0, 0, 1, 1], [], []>} : vector<48x4xf32>, vector<4x4xf32>, vector<48x4xf32> -> vector<48x4xf32>
    %cst_249 = arith.constant dense<0.000000e+00> : vector<48x4xf32>
    %481 = tpu.matmul %432, %478, %cst_249 {dimension_numbers = #tpu.dot_dimension_numbers<[1], [0], [0], [1], [0, 0, 1, 1], [], []>} : vector<48x4xf32>, vector<4x4xf32>, vector<48x4xf32> -> vector<48x4xf32>
    %c48_250 = arith.constant 48 : index
    %c0_251 = arith.constant 0 : index
    %482 = vector.load %arg10[%c48_250, %c0_251] : memref<176x4xf32, #tpu.memory_space<vmem>>, vector<4x4xf32>
    %c56_252 = arith.constant 56 : index
    %c0_253 = arith.constant 0 : index
    %483 = vector.load %arg10[%c56_252, %c0_253] : memref<176x4xf32, #tpu.memory_space<vmem>>, vector<4x4xf32>
    %c64_254 = arith.constant 64 : index
    %c0_255 = arith.constant 0 : index
    %484 = vector.load %arg10[%c64_254, %c0_255] : memref<176x4xf32, #tpu.memory_space<vmem>>, vector<4x4xf32>
    %cst_256 = arith.constant dense<0.000000e+00> : vector<48x4xf32>
    %485 = tpu.matmul %475, %482, %cst_256 {dimension_numbers = #tpu.dot_dimension_numbers<[1], [0], [0], [1], [0, 0, 1, 1], [], []>} : vector<48x4xf32>, vector<4x4xf32>, vector<48x4xf32> -> vector<48x4xf32>
    %cst_257 = arith.constant dense<0.000000e+00> : vector<48x4xf32>
    %486 = tpu.matmul %475, %483, %cst_257 {dimension_numbers = #tpu.dot_dimension_numbers<[1], [0], [0], [1], [0, 0, 1, 1], [], []>} : vector<48x4xf32>, vector<4x4xf32>, vector<48x4xf32> -> vector<48x4xf32>
    %cst_258 = arith.constant dense<0.000000e+00> : vector<48x4xf32>
    %487 = tpu.matmul %475, %484, %cst_258 {dimension_numbers = #tpu.dot_dimension_numbers<[1], [0], [0], [1], [0, 0, 1, 1], [], []>} : vector<48x4xf32>, vector<4x4xf32>, vector<48x4xf32> -> vector<48x4xf32>
    %488 = arith.addf %479, %485 : vector<48x4xf32>
    %489 = arith.addf %480, %486 : vector<48x4xf32>
    %490 = arith.addf %481, %487 : vector<48x4xf32>
    %cst_259 = arith.constant dense<0.000000e+00> : vector<48x4xf32>
    %491 = tpu.matmul %0, %488, %cst_259 {dimension_numbers = #tpu.dot_dimension_numbers<[1], [0], [0], [1], [0, 0, 1, 1], [], []>} : vector<48x48xf32>, vector<48x4xf32>, vector<48x4xf32> -> vector<48x4xf32>
    %492 = arith.addf %491, %489 : vector<48x4xf32>
    %cst_260 = arith.constant dense<0.000000e+00> : vector<48x4xf32>
    %493 = tpu.matmul %1, %490, %cst_260 {dimension_numbers = #tpu.dot_dimension_numbers<[1], [0], [0], [1], [0, 0, 1, 1], [], []>} : vector<48x48xf32>, vector<48x4xf32>, vector<48x4xf32> -> vector<48x4xf32>
    %494 = arith.addf %492, %493 : vector<48x4xf32>
    %c99 = arith.constant 99 : index
    %c0_261 = arith.constant 0 : index
    %495 = vector.load %arg10[%c99, %c0_261] : memref<176x4xf32, #tpu.memory_space<vmem>>, vector<1x4xf32>
    %496 = vector.broadcast %495 : vector<1x4xf32> to vector<48x4xf32>
    %497 = arith.addf %494, %496 : vector<48x4xf32>
    %498 = arith.mulf %497, %429 : vector<48x4xf32>
    %cst_262 = arith.constant dense<0.000000e+00> : vector<4xf32>
    %499 = vector.multi_reduction <add>, %498, %cst_262 [0] : vector<48x4xf32> to vector<4xf32>
    %500 = vector.shape_cast %499 : vector<4xf32> to vector<1x4xf32>
    %cst_263 = arith.constant 3.125000e-02 : f32
    %501 = vector.broadcast %cst_263 : f32 to vector<1x4xf32>
    %502 = arith.mulf %500, %501 : vector<1x4xf32>
    %503 = arith.mulf %498, %498 : vector<48x4xf32>
    %cst_264 = arith.constant dense<0.000000e+00> : vector<4xf32>
    %504 = vector.multi_reduction <add>, %503, %cst_264 [0] : vector<48x4xf32> to vector<4xf32>
    %505 = vector.shape_cast %504 : vector<4xf32> to vector<1x4xf32>
    %cst_265 = arith.constant 3.125000e-02 : f32
    %506 = vector.broadcast %cst_265 : f32 to vector<1x4xf32>
    %507 = arith.mulf %505, %506 : vector<1x4xf32>
    %508 = arith.mulf %502, %502 : vector<1x4xf32>
    %509 = arith.subf %507, %508 : vector<1x4xf32>
    %cst_266 = arith.constant 0.000000e+00 : f32
    %510 = vector.broadcast %cst_266 : f32 to vector<1x4xf32>
    %511 = arith.maximumf %509, %510 : vector<1x4xf32>
    %512 = vector.broadcast %502 : vector<1x4xf32> to vector<48x4xf32>
    %513 = arith.subf %497, %512 : vector<48x4xf32>
    %cst_267 = arith.constant 9.99999974E-6 : f32
    %514 = vector.broadcast %cst_267 : f32 to vector<1x4xf32>
    %515 = arith.addf %511, %514 : vector<1x4xf32>
    %516 = math.rsqrt %515 : vector<1x4xf32>
    %517 = vector.broadcast %516 : vector<1x4xf32> to vector<48x4xf32>
    %518 = arith.mulf %513, %517 : vector<48x4xf32>
    %c100 = arith.constant 100 : index
    %c0_268 = arith.constant 0 : index
    %519 = vector.load %arg10[%c100, %c0_268] : memref<176x4xf32, #tpu.memory_space<vmem>>, vector<1x4xf32>
    %520 = vector.broadcast %519 : vector<1x4xf32> to vector<48x4xf32>
    %521 = arith.mulf %518, %520 : vector<48x4xf32>
    %c101 = arith.constant 101 : index
    %c0_269 = arith.constant 0 : index
    %522 = vector.load %arg10[%c101, %c0_269] : memref<176x4xf32, #tpu.memory_space<vmem>>, vector<1x4xf32>
    %523 = vector.broadcast %522 : vector<1x4xf32> to vector<48x4xf32>
    %524 = arith.addf %521, %523 : vector<48x4xf32>
    %cst_270 = arith.constant 0.000000e+00 : f32
    %525 = vector.broadcast %cst_270 : f32 to vector<48x4xf32>
    %526 = arith.maximumf %524, %525 : vector<48x4xf32>
    %527 = arith.mulf %526, %429 : vector<48x4xf32>
    %c72_271 = arith.constant 72 : index
    %c0_272 = arith.constant 0 : index
    %528 = vector.load %arg10[%c72_271, %c0_272] : memref<176x4xf32, #tpu.memory_space<vmem>>, vector<4x4xf32>
    %c80_273 = arith.constant 80 : index
    %c0_274 = arith.constant 0 : index
    %529 = vector.load %arg10[%c80_273, %c0_274] : memref<176x4xf32, #tpu.memory_space<vmem>>, vector<4x4xf32>
    %c88_275 = arith.constant 88 : index
    %c0_276 = arith.constant 0 : index
    %530 = vector.load %arg10[%c88_275, %c0_276] : memref<176x4xf32, #tpu.memory_space<vmem>>, vector<4x4xf32>
    %cst_277 = arith.constant dense<0.000000e+00> : vector<48x4xf32>
    %531 = tpu.matmul %527, %528, %cst_277 {dimension_numbers = #tpu.dot_dimension_numbers<[1], [0], [0], [1], [0, 0, 1, 1], [], []>} : vector<48x4xf32>, vector<4x4xf32>, vector<48x4xf32> -> vector<48x4xf32>
    %cst_278 = arith.constant dense<0.000000e+00> : vector<48x4xf32>
    %532 = tpu.matmul %527, %529, %cst_278 {dimension_numbers = #tpu.dot_dimension_numbers<[1], [0], [0], [1], [0, 0, 1, 1], [], []>} : vector<48x4xf32>, vector<4x4xf32>, vector<48x4xf32> -> vector<48x4xf32>
    %cst_279 = arith.constant dense<0.000000e+00> : vector<48x4xf32>
    %533 = tpu.matmul %527, %530, %cst_279 {dimension_numbers = #tpu.dot_dimension_numbers<[1], [0], [0], [1], [0, 0, 1, 1], [], []>} : vector<48x4xf32>, vector<4x4xf32>, vector<48x4xf32> -> vector<48x4xf32>
    %cst_280 = arith.constant dense<0.000000e+00> : vector<48x4xf32>
    %534 = tpu.matmul %0, %531, %cst_280 {dimension_numbers = #tpu.dot_dimension_numbers<[1], [0], [0], [1], [0, 0, 1, 1], [], []>} : vector<48x48xf32>, vector<48x4xf32>, vector<48x4xf32> -> vector<48x4xf32>
    %535 = arith.addf %534, %532 : vector<48x4xf32>
    %cst_281 = arith.constant dense<0.000000e+00> : vector<48x4xf32>
    %536 = tpu.matmul %1, %533, %cst_281 {dimension_numbers = #tpu.dot_dimension_numbers<[1], [0], [0], [1], [0, 0, 1, 1], [], []>} : vector<48x48xf32>, vector<48x4xf32>, vector<48x4xf32> -> vector<48x4xf32>
    %537 = arith.addf %535, %536 : vector<48x4xf32>
    %c102 = arith.constant 102 : index
    %c0_282 = arith.constant 0 : index
    %538 = vector.load %arg10[%c102, %c0_282] : memref<176x4xf32, #tpu.memory_space<vmem>>, vector<1x4xf32>
    %539 = vector.broadcast %538 : vector<1x4xf32> to vector<48x4xf32>
    %540 = arith.addf %537, %539 : vector<48x4xf32>
    %541 = arith.mulf %540, %429 : vector<48x4xf32>
    %cst_283 = arith.constant dense<0.000000e+00> : vector<4xf32>
    %542 = vector.multi_reduction <add>, %541, %cst_283 [0] : vector<48x4xf32> to vector<4xf32>
    %543 = vector.shape_cast %542 : vector<4xf32> to vector<1x4xf32>
    %cst_284 = arith.constant 3.125000e-02 : f32
    %544 = vector.broadcast %cst_284 : f32 to vector<1x4xf32>
    %545 = arith.mulf %543, %544 : vector<1x4xf32>
    %546 = arith.mulf %541, %541 : vector<48x4xf32>
    %cst_285 = arith.constant dense<0.000000e+00> : vector<4xf32>
    %547 = vector.multi_reduction <add>, %546, %cst_285 [0] : vector<48x4xf32> to vector<4xf32>
    %548 = vector.shape_cast %547 : vector<4xf32> to vector<1x4xf32>
    %cst_286 = arith.constant 3.125000e-02 : f32
    %549 = vector.broadcast %cst_286 : f32 to vector<1x4xf32>
    %550 = arith.mulf %548, %549 : vector<1x4xf32>
    %551 = arith.mulf %545, %545 : vector<1x4xf32>
    %552 = arith.subf %550, %551 : vector<1x4xf32>
    %cst_287 = arith.constant 0.000000e+00 : f32
    %553 = vector.broadcast %cst_287 : f32 to vector<1x4xf32>
    %554 = arith.maximumf %552, %553 : vector<1x4xf32>
    %555 = vector.broadcast %545 : vector<1x4xf32> to vector<48x4xf32>
    %556 = arith.subf %540, %555 : vector<48x4xf32>
    %cst_288 = arith.constant 9.99999974E-6 : f32
    %557 = vector.broadcast %cst_288 : f32 to vector<1x4xf32>
    %558 = arith.addf %554, %557 : vector<1x4xf32>
    %559 = math.rsqrt %558 : vector<1x4xf32>
    %560 = vector.broadcast %559 : vector<1x4xf32> to vector<48x4xf32>
    %561 = arith.mulf %556, %560 : vector<48x4xf32>
    %c103 = arith.constant 103 : index
    %c0_289 = arith.constant 0 : index
    %562 = vector.load %arg10[%c103, %c0_289] : memref<176x4xf32, #tpu.memory_space<vmem>>, vector<1x4xf32>
    %563 = vector.broadcast %562 : vector<1x4xf32> to vector<48x4xf32>
    %564 = arith.mulf %561, %563 : vector<48x4xf32>
    %c104_290 = arith.constant 104 : index
    %c0_291 = arith.constant 0 : index
    %565 = vector.load %arg10[%c104_290, %c0_291] : memref<176x4xf32, #tpu.memory_space<vmem>>, vector<1x4xf32>
    %566 = vector.broadcast %565 : vector<1x4xf32> to vector<48x4xf32>
    %567 = arith.addf %564, %566 : vector<48x4xf32>
    %cst_292 = arith.constant 0.000000e+00 : f32
    %568 = vector.broadcast %cst_292 : f32 to vector<48x4xf32>
    %569 = arith.maximumf %567, %568 : vector<48x4xf32>
    %570 = arith.mulf %569, %429 : vector<48x4xf32>
    %c160_293 = arith.constant 160 : index
    %c0_294 = arith.constant 0 : index
    %571 = vector.load %arg10[%c160_293, %c0_294] : memref<176x4xf32, #tpu.memory_space<vmem>>, vector<4x4xf32>
    %c168 = arith.constant 168 : index
    %c0_295 = arith.constant 0 : index
    %572 = vector.load %arg10[%c168, %c0_295] : memref<176x4xf32, #tpu.memory_space<vmem>>, vector<1x4xf32>
    %cst_296 = arith.constant dense<0.000000e+00> : vector<48x4xf32>
    %573 = tpu.matmul %570, %571, %cst_296 {dimension_numbers = #tpu.dot_dimension_numbers<[1], [0], [0], [1], [0, 0, 1, 1], [], []>} : vector<48x4xf32>, vector<4x4xf32>, vector<48x4xf32> -> vector<48x4xf32>
    %574 = vector.broadcast %572 : vector<1x4xf32> to vector<48x4xf32>
    %575 = arith.addf %573, %574 : vector<48x4xf32>
    %cst_297 = arith.constant 0.000000e+00 : f32
    %576 = vector.broadcast %cst_297 : f32 to vector<48x4xf32>
    %577 = arith.subf %576, %575 : vector<48x4xf32>
    %578 = math.exp %577 : vector<48x4xf32>
    %cst_298 = arith.constant 1.000000e+00 : f32
    %579 = vector.broadcast %cst_298 : f32 to vector<48x4xf32>
    %580 = arith.addf %579, %578 : vector<48x4xf32>
    %cst_299 = arith.constant 1.000000e+00 : f32
    %581 = vector.broadcast %cst_299 : f32 to vector<48x4xf32>
    %582 = arith.divf %581, %580 : vector<48x4xf32>
    %c0_300 = arith.constant 0 : index
    %c0_301 = arith.constant 0 : index
    %583 = vector.load %arg11[%c0_300, %c0_301] : memref<48x4xf32, #tpu.memory_space<vmem>>, vector<48x4xf32>
    tpu.vector_store %arg11[%c0_300, %c0_301], %582 {strides = array<i32>} : memref<48x4xf32, #tpu.memory_space<vmem>>, vector<48x4xf32>,
    return
  }
  func.func @transform_0(%arg0: i32) -> (i32, i32) {
    %c0_i32 = arith.constant 0 : i32
    %c0_i32_0 = arith.constant 0 : i32
    %c0_i32_1 = arith.constant 0 : i32
    return %c0_i32, %c0_i32_0 : i32, i32
  }
  func.func @transform_1(%arg0: i32) -> (i32, i32) {
    %c0_i32 = arith.constant 0 : i32
    %c0_i32_0 = arith.constant 0 : i32
    %c0_i32_1 = arith.constant 0 : i32
    return %c0_i32, %c0_i32_0 : i32, i32
  }
  func.func @transform_2(%arg0: i32) -> (i32, i32) {
    %c0_i32 = arith.constant 0 : i32
    %c0_i32_0 = arith.constant 0 : i32
    %c0_i32_1 = arith.constant 0 : i32
    return %c0_i32, %c0_i32_0 : i32, i32
  }
  func.func @transform_3(%arg0: i32) -> (i32, i32) {
    %c0_i32 = arith.constant 0 : i32
    %c0_i32_0 = arith.constant 0 : i32
    %c0_i32_1 = arith.constant 0 : i32
    return %c0_i32, %c0_i32_0 : i32, i32
  }
  func.func @transform_4(%arg0: i32) -> (i32, i32) {
    %c0_i32 = arith.constant 0 : i32
    %c0_i32_0 = arith.constant 0 : i32
    %c0_i32_1 = arith.constant 0 : i32
    return %c0_i32, %c0_i32_0 : i32, i32
  }
  func.func @transform_5(%arg0: i32) -> (i32, i32) {
    %c0_i32 = arith.constant 0 : i32
    %c0_i32_0 = arith.constant 0 : i32
    %c0_i32_1 = arith.constant 0 : i32
    return %c0_i32, %c0_i32_0 : i32, i32
  }
  func.func @transform_6(%arg0: i32) -> (i32, i32) {
    %c0_i32 = arith.constant 0 : i32
    %c0_i32_0 = arith.constant 0 : i32
    %c0_i32_1 = arith.constant 0 : i32
    return %c0_i32, %c0_i32_0 : i32, i32
  }
  func.func @transform_7(%arg0: i32) -> (i32, i32) {
    %c0_i32 = arith.constant 0 : i32
    %c0_i32_0 = arith.constant 0 : i32
    %c0_i32_1 = arith.constant 0 : i32
    return %c0_i32, %c0_i32_0 : i32, i32
  }
  func.func @transform_8(%arg0: i32) -> (i32, i32) {
    %c0_i32 = arith.constant 0 : i32
    %c0_i32_0 = arith.constant 0 : i32
    %c0_i32_1 = arith.constant 0 : i32
    return %c0_i32, %c0_i32_0 : i32, i32
  }
  func.func @transform_9(%arg0: i32) -> (i32, i32) {
    %c0_i32 = arith.constant 0 : i32
    %c0_i32_0 = arith.constant 0 : i32
    %c0_i32_1 = arith.constant 0 : i32
    return %c0_i32, %c0_i32_0 : i32, i32
  }
  func.func @transform_10(%arg0: i32) -> (i32, i32) {
    %c0_i32 = arith.constant 0 : i32
    %c0_i32_0 = arith.constant 0 : i32
    %c0_i32_1 = arith.constant 0 : i32
    return %c0_i32, %c0_i32_0 : i32, i32
  }
}

</mosaic_0001>

<bundles_post_ra>
// kernel: forward.1
= control target key start
LH: loop header
LB: loop body
LE: loop exit
PB: predicated region body
PF: predicated region fallthrough
CT: control target
= control target key end

     0   :  { %15 = vsyncpa [#allocation3], 0  ;;  %s14003_s0 = inlined_call_operand.vmem [shape: f32[48,64], index: 0, kind: input, shape index: {}]   ;;  %s14004_s1 = inlined_call_operand.vmem [shape: f32[48,32], index: 1, kind: input, shape index: {}]   ;;  %s14005_s2 = inlined_call_operand.vmem [shape: f32[48,16], index: 2, kind: input, shape index: {}]   ;;  %s14006_s3 = inlined_call_operand.vmem [shape: f32[48,8], index: 3, kind: input, shape index: {}]   ;;  %s14007_s4 = inlined_call_operand.vmem [shape: f32[48,4], index: 4, kind: input, shape index: {}]   ;;  %s14008_s5 = inlined_call_operand.hbm [shape: f32[288,48], index: 5, kind: input, shape index: {}]   ;;  %s14009_s6 = inlined_call_operand.hbm [shape: f32[544,32], index: 6, kind: input, shape index: {}]   ;;  %s14010_s7 = inlined_call_operand.vmem [shape: f32[304,16], index: 7, kind: input, shape index: {}]   ;;  %s14011_s8 = inlined_call_operand.hbm [shape: f32[184,8], index: 8, kind: input, shape index: {}]   ;;  %s14012_s9 = inlined_call_operand.hbm [shape: f32[176,4], index: 9, kind: input, shape index: {}]   ;;  %s14013_s10 = inlined_call_operand.vmem [shape: f32[48,4], index: 10, kind: output, shape index: {}]  }
   0x1   :  { %16 = vsyncpa [#allocation5], 0 }
   0x2   :  { %17 = vsyncpa [#allocation8], 0  ;;  %s12256_s13 = smov [#allocation4]   ;;  %s12257_s15 = smov [#allocation2]  }
   0x3   :  { %s45_s14 = sshll.u32 %s12256_s13, 4  ;;  %s33_s16 = sshll.u32 %s12257_s15, 4  ;;  %s46_s14 = int_to_ptr.vmem [resolvable:$true] %s45_s14  ;;  %s34_s16 = int_to_ptr.vmem [resolvable:$true] %s33_s16 }
   0x4   :  { %s12178_s17 = scalar_lea.vmem %s46_s14, 8704  ;;  %p12183_p1 = scmp.lt.s32.totalorder %s46_s14, %s46_s14 }
   0x5   :  { %p12179_p0 = scmp.ne.s32.totalorder %s46_s14, %s12178_s17  ;;  %p12184_p2 = scmp.lt.s32.totalorder %s12178_s17, %s12178_s17 }
   0x7   :  { %p12185_p3 = por %p12184_p2, %p12183_p1 }
   0x9   :  { %p12186_p4 = pnand %p12185_p3, %p12179_p0 }
   0xb   :  { %12189 = shalt.err (!%p12186_p4)
}
   0xc   :  { %s12258_s18 = smov 128   ;;  %s12259_s19 = smov 8  }
   0xd   :  { %51 = dma.hbm_to_vmem [thread:$0]  %s14009_s6, 8704, %s46_s14, [#allocation5], %s12258_s18, %s12258_s18, %s12259_s19  }
   0xe   :  { %s12198_s22 = scalar_lea.vmem %s34_s16, 4608  ;;  %p12203_p6 = scmp.lt.s32.totalorder %s34_s16, %s34_s16 }
   0xf   :  { %p12199_p5 = scmp.ne.s32.totalorder %s34_s16, %s12198_s22  ;;  %p12204_p7 = scmp.lt.s32.totalorder %s12198_s22, %s12198_s22 }
  0x11   :  { %p12205_p8 = por %p12204_p7, %p12203_p6 }
  0x13   :  { %p12206_p9 = pnand %p12205_p8, %p12199_p5 }
  0x15   :  { %12209 = shalt.err (!%p12206_p9)
}
  0x16   :  { %39 = dma.hbm_to_vmem [thread:$0]  %s14008_s5, 4608, %s34_s16, [#allocation3], %s12258_s18, %s12258_s18, %s12259_s19  }
  0x17   :  { %s12260_s25 = smov [#allocation6]   ;;  %s12261_s27 = smov [#allocation7]  }
  0x18   :  { %s59_s26 = sshll.u32 %s12260_s25, 4  ;;  %s71_s28 = sshll.u32 %s12261_s27, 4  ;;  %s60_s26 = int_to_ptr.vmem [resolvable:$true] %s59_s26  ;;  %s72_s28 = int_to_ptr.vmem [resolvable:$true] %s71_s28 }
  0x19   :  { %s12218_s6 = scalar_lea.vmem %s60_s26, 2944  ;;  %p12223_p11 = scmp.lt.s32.totalorder %s60_s26, %s60_s26 }
  0x1a   :  { %p12219_p10 = scmp.ne.s32.totalorder %s60_s26, %s12218_s6  ;;  %p12224_p12 = scmp.lt.s32.totalorder %s12218_s6, %s12218_s6 }
  0x1c   :  { %p12225_p13 = por %p12224_p12, %p12223_p11 }
  0x1e   :  { %p12226_p0 = pnand %p12225_p13, %p12219_p10 }
  0x20   :  { %12229 = shalt.err (!%p12226_p0)
}
  0x21   :  { %65 = dma.hbm_to_vmem [thread:$0]  %s14011_s8, 2944, %s60_s26, [#allocation5], %s12258_s18, %s12258_s18, %s12259_s19  }
  0x22   :  { %s12238_s5 = scalar_lea.vmem %s72_s28, 2816  ;;  %p12243_p2 = scmp.lt.s32.totalorder %s72_s28, %s72_s28 }
  0x23   :  { %p12239_p1 = scmp.ne.s32.totalorder %s72_s28, %s12238_s5  ;;  %p12244_p3 = scmp.lt.s32.totalorder %s12238_s5, %s12238_s5 }
  0x25   :  { %p12245_p4 = por %p12244_p3, %p12243_p2 }
  0x27   :  { %p12246_p5 = pnand %p12245_p4, %p12239_p1 }
  0x29   :  { %12249 = shalt.err (!%p12246_p5)
}
  0x2a   :  { %77 = dma.hbm_to_vmem [thread:$0]  %s14012_s9, 2816, %s72_s28, [#allocation8], %s12258_s18, %s12258_s18, %s12259_s19  }
  0x2b   :  { %12250 = dma.done.wait [#allocation3], 4608  }
  0x2c   :  { %12251 = vsyncadd [#allocation3], 4294962688 }
  0x2d   :  { %12252 = dma.done.wait [#allocation5], 11648  }
  0x2e   :  { %12253 = vsyncadd [#allocation5], 4294955648 }
  0x2f   :  { %12254 = dma.done.wait [#allocation8], 2816  }
  0x30   :  { %12255 = vsyncadd [#allocation8], 4294964480  ;;  %v107_v0 = vld [vmem:[%s14003_s0 + $0x28] sm:$0xff]  ;;  %v106_v1 = vld [vmem:[%s14003_s0 + $0x20] sm:$0xff]  ;;  %vm120_vm0 = vcmask 392192   ;;  %vm264_vm1 = vcmask 523264  }
  0x31   :  { %10767 = vmatprep.subr.mxu0 %v107_v0  ;;  %v105_v2 = vld [vmem:[%s14003_s0 + $0x18] sm:$0xff]  ;;  %v114_v3 = vld [vmem:[#allocation2 + $0x60] sm:$0xff]  ;;  %v104_v4 = vld [vmem:[%s14003_s0 + $0x10] sm:$0xff]  ;;  %vm817_vm2 = vcmask 261120   ;;  %vm3127_vm3 = vcmask 130048   ;;  %vm5413_vm4 = vcmask 64512  }
  0x32   :  { %10768 = vmatpush3.msra.mxu0 %v107_v0  ;;  %10779 = vmatprep.mubr.msk.f32.mxu0 %vm120_vm0, %v114_v3  ;;  %v247_v5 = vld [vmem:[#allocation4 + $0x38] sm:$0xff]  ;;  %v246_v6 = vld [vmem:[#allocation4 + $0x30] sm:$0xff]  ;;  %v103_v7 = vld [vmem:[%s14003_s0 + $0x8] sm:$0xff]  ;;  %vm7805_vm5 = vcmask 1043456   ;;  %vm7687_vm6 = vcmask 31744  }
  0x33   :  { %10769 = vmatprep.subr.mxu0 %v106_v1  ;;  %10788 = vmatprep.subr.mxu1 %v247_v5  ;;  %v245_v8 = vld [vmem:[#allocation4 + $0x28] sm:$0xff]  ;;  %v102_v9 = vld [vmem:[%s14003_s0] sm:$0xff]  ;;  %v255_v12 = vld [vmem:[#allocation4 + $0x78] sm:$0xff] }
  0x34   :  { %10770 = vmatpush3.msra.mxu0 %v106_v1  ;;  %10789 = vmatpush3.msra.mxu1 %v247_v5  ;;  %v244_v10 = vld [vmem:[#allocation4 + $0x20] sm:$0xff]  ;;  %v115_v11 = vld [vmem:[#allocation2 + $0x68] sm:$0xff]  ;;  %v116_v13 = vld [vmem:[#allocation2 + $0x70] sm:$0xff] }
  0x35   :  { %10771 = vmatprep.subr.mxu0 %v105_v2  ;;  %10790 = vmatprep.subr.mxu1 %v246_v6  ;;  %v254_v14 = vld [vmem:[#allocation4 + $0x70] sm:$0xff]  ;;  %v243_v15 = vld [vmem:[#allocation4 + $0x18] sm:$0xff]  ;;  %v253_v17 = vld [vmem:[#allocation4 + $0x68] sm:$0xff] }
  0x36   :  { %10772 = vmatpush3.msra.mxu0 %v105_v2  ;;  %10791 = vmatpush3.msra.mxu1 %v246_v6  ;;  %v117_v16 = vld [vmem:[#allocation2 + $0x78] sm:$0xff]  ;;  %v118_v18 = vld [vmem:[#allocation2 + $0x80] sm:$0xff]  ;;  %v242_v20 = vld [vmem:[#allocation4 + $0x10] sm:$0xff] }
  0x37   :  { %10773 = vmatprep.subr.mxu0 %v104_v4  ;;  %10792 = vmatprep.subr.mxu1 %v245_v8  ;;  %v252_v19 = vld [vmem:[#allocation4 + $0x60] sm:$0xff]  ;;  %v119_v21 = vld [vmem:[#allocation2 + $0x88] sm:$0xff]  ;;  %v251_v22 = vld [vmem:[#allocation4 + $0x58] sm:$0xff] }
  0x38   :  { %10774 = vmatpush3.msra.mxu0 %v104_v4  ;;  %10793 = vmatpush3.msra.mxu1 %v245_v8  ;;  %v241_v23 = vld [vmem:[#allocation4 + $0x8] sm:$0xff]  ;;  %v250_v24 = vld [vmem:[#allocation4 + $0x50] sm:$0xff]  ;;  %v240_v26 = vld [vmem:[#allocation4] sm:$0xff] }
  0x39   :  { %10775 = vmatprep.subr.mxu0 %v103_v7  ;;  %10794 = vmatprep.subr.mxu1 %v244_v10  ;;  %v249_v25 = vld [vmem:[#allocation4 + $0x48] sm:$0xff]  ;;  %v248_v27 = vld [vmem:[#allocation4 + $0x40] sm:$0xff]  ;;  %v263_v28 = vld [vmem:[#allocation4 + $0xb8] sm:$0xff] }
  0x3a   :  { %10776 = vmatpush3.msra.mxu0 %v103_v7  ;;  %10795 = vmatpush3.msra.mxu1 %v244_v10  ;;  %v262_v31 = vld [vmem:[#allocation4 + $0xb0] sm:$0xff]  ;;  %v261_v33 = vld [vmem:[#allocation4 + $0xa8] sm:$0xff]  ;;  %v260_v36 = vld [vmem:[#allocation4 + $0xa0] sm:$0xff] }
  0x3b   :  { %10777 = vmatprep.subr.mxu0 %v102_v9  ;;  %10796 = vmatprep.subr.mxu1 %v243_v15  ;;  %v259_v38 = vld [vmem:[#allocation4 + $0x98] sm:$0xff]  ;;  %v258_v39 = vld [vmem:[#allocation4 + $0x90] sm:$0xff]  ;;  %v257_v40 = vld [vmem:[#allocation4 + $0x88] sm:$0xff] }
  0x3c   :  { %10778 = vmatpush3.msra.mxu0 %v102_v9  ;;  %10797 = vmatpush3.msra.mxu1 %v243_v15  ;;  %v256_v41 = vld [vmem:[#allocation4 + $0x80] sm:$0xff]  ;;  %v12387_v43 = vld [vmem:[#allocation2 + $0x30] sm:$0xff]  ;;  %v12391_v52 = vld [vmem:[#allocation2 + $0x8] sm:$0xff] }
  0x3d   :  { %10780 = vmatmul.mubr.msk.f32.vlgmr.msra.gmra.mxu0 %vm120_vm0, %v115_v11  ;;  %10813 = vmatprep.subr.mxu0 %v255_v12  ;;  %v12383_v42 = vld [vmem:[#allocation2] sm:$0xff]  ;;  %v12393_v53 = vld [vmem:[#allocation2 + $0x10] sm:$0xff]  ;;  %v12399_v56 = vld [vmem:[#allocation2 + $0x18] sm:$0xff] }
  0x3e   :  { %10782 = vmatprep.mubr.msk.f32.mxu0 %vm120_vm0, %v116_v13  ;;  %10814 = vmatpush3.msra.mxu0 %v255_v12  ;;  %v12401_v57 = vld [vmem:[#allocation2 + $0x20] sm:$0xff]  ;;  %v12407_v60 = vld [vmem:[#allocation2 + $0x28] sm:$0xff]  ;;  %v12411_v61 = vld [vmem:[#allocation2 + $0x38] sm:$0xff] }
  0x3f   :  { %10815 = vmatprep.subr.mxu0 %v254_v14  ;;  %10798 = vmatprep.subr.mxu1 %v242_v20  ;;  %v12413_v62 = vld [vmem:[#allocation2 + $0x40] sm:$0xff]  ;;  %v12419_v63 = vld [vmem:[#allocation2 + $0x48] sm:$0xff]  ;;  %v12421_v0 = vld [vmem:[#allocation2 + $0x50] sm:$0xff] }
  0x40   :  { %10816 = vmatpush3.msra.mxu0 %v254_v14  ;;  %10799 = vmatpush3.msra.mxu1 %v242_v20  ;;  %v12427_v1 = vld [vmem:[#allocation2 + $0x58] sm:$0xff]  ;;  %v929_v3 = vld [vmem:[#allocation4 + $0x150] sm:$0xff]  ;;  %v928_v6 = vld [vmem:[#allocation4 + $0x148] sm:$0xff] }
  0x41   :  { %10783 = vmatmul.mubr.msk.f32.gmra.mxu0 %vm120_vm0, %v117_v16  ;;  %10817 = vmatprep.subr.mxu0 %v253_v17  ;;  %v930_v2 = vld [vmem:[#allocation4 + $0x158] sm:$0xff]  ;;  %v925_v5 = vld [vmem:[#allocation4 + $0x130] sm:$0xff]  ;;  %v924_v7 = vld [vmem:[#allocation4 + $0x128] sm:$0xff] }
  0x42   :  { %10785 = vmatprep.mubr.msk.f32.mxu0 %vm120_vm0, %v118_v18  ;;  %10818 = vmatpush3.msra.mxu0 %v253_v17  ;;  %v926_v4 = vld [vmem:[#allocation4 + $0x138] sm:$0xff]  ;;  %v927_v8 = vld [vmem:[#allocation4 + $0x140] sm:$0xff] }
  0x43   :  { %10819 = vmatprep.subr.mxu0 %v252_v19  ;;  %10800 = vmatprep.subr.mxu1 %v241_v23  ;;  %v923_v9 = vld [vmem:[#allocation4 + $0x120] sm:$0xff]  ;;  %v12431_v10 = vld [vmem:[#allocation4 + $0xd8] sm:$0xff] }
  0x44   :  { %10820 = vmatpush3.msra.mxu0 %v252_v19  ;;  %10801 = vmatpush3.msra.mxu1 %v241_v23  ;;  %v12434_v11 = vld [vmem:[#allocation4 + $0x178] sm:$0xff] }
  0x45   :  { %10786 = vmatmul.mubr.msk.f32.gmra.mxu0 %vm120_vm0, %v119_v21  ;;  %10821 = vmatprep.subr.mxu0 %v251_v22 }
  0x46   :  { %10822 = vmatpush3.msra.mxu0 %v251_v22  ;;  %10802 = vmatprep.subr.mxu1 %v240_v26 }
  0x47   :  { %10823 = vmatprep.subr.mxu0 %v250_v24  ;;  %10803 = vmatpush3.msra.mxu1 %v240_v26 }
  0x48   :  { %10824 = vmatpush3.msra.mxu0 %v250_v24  ;;  %10838 = vmatprep.subr.mxu1 %v263_v28  ;;  %v9546_v24 = vld [vmem:[#allocation4 + $0x1e0] ss:$0 sm:$0xff] }
  0x49   :  { %10825 = vmatprep.subr.mxu0 %v249_v25 }
  0x4a   :  { %10826 = vmatpush3.msra.mxu0 %v249_v25 }
  0x4b   :  { %10827 = vmatprep.subr.mxu0 %v248_v27 }
  0x4c   :  { %10828 = vmatpush3.msra.mxu0 %v248_v27 }
  0xfd   :  { %v10781_v29 = vpop.f32.mrf.mxu0 }
  0xff   :  { %v205_v30 = vpop.f32.mrf.mxu0 }
 0x100   :  { %10804 = vmatprep.mubr.msk.f32.mxu1 %vm264_vm1, %v205_v30  ;;  %10829 = vmatprep.mubr.msk.f32.mxu0 %vm264_vm1, %v205_v30 }
 0x101   :  { %v10784_v32 = vpop.f32.mrf.mxu0  ;;  %10805 = vmatmul.mubr.msk.f32.vlgmr.msra.gmra.mxu1 %vm264_vm1, %v10781_v29  ;;  %10830 = vmatmul.mubr.msk.f32.vlgmr.msra.gmra.mxu0 %vm264_vm1, %v10781_v29 }
 0x102   :  { %10839 = vmatpush3.msra.mxu1 %v263_v28  ;;  %v12437_v28 = vld [vmem:[#allocation4 + $0x1f8] sm:$0xff] }
 0x103   :  { %10840 = vmatprep.subr.mxu1 %v262_v31  ;;  %v215_v34 = vpop.f32.mrf.mxu0 }
 0x104   :  { %10841 = vmatpush3.msra.mxu1 %v262_v31  ;;  %10807 = vmatprep.mubr.msk.f32.mxu1 %vm264_vm1, %v215_v34 }
 0x105   :  { %10832 = vmatprep.mubr.msk.f32.mxu0 %vm264_vm1, %v215_v34  ;;  %10842 = vmatprep.subr.mxu1 %v261_v33  ;;  %v10787_v35 = vpop.f32.mrf.mxu0 }
 0x106   :  { %10808 = vmatmul.mubr.msk.f32.gmra.mxu1 %vm264_vm1, %v10784_v32  ;;  %10833 = vmatmul.mubr.msk.f32.gmra.mxu0 %vm264_vm1, %v10784_v32 }
 0x107   :  { %10843 = vmatpush3.msra.mxu1 %v261_v33  ;;  %v225_v37 = vpop.f32.mrf.mxu0  ;;  %v12441_v33 = vld [vmem:[#allocation4 + $0x1f0] sm:$0xff] }
 0x108   :  { %10844 = vmatprep.subr.mxu1 %v260_v36  ;;  %10810 = vmatprep.mubr.msk.f32.mxu1 %vm264_vm1, %v225_v37 }
 0x109   :  { %10845 = vmatpush3.msra.mxu1 %v260_v36  ;;  %10835 = vmatprep.mubr.msk.f32.mxu0 %vm264_vm1, %v225_v37 }
 0x10a   :  { %10846 = vmatprep.subr.mxu1 %v259_v38  ;;  %10811 = vmatmul.mubr.msk.f32.gmra.mxu1 %vm264_vm1, %v10787_v35 }
 0x10b   :  { %10836 = vmatmul.mubr.msk.f32.gmra.mxu0 %vm264_vm1, %v10787_v35  ;;  %10847 = vmatpush3.msra.mxu1 %v259_v38 }
 0x10c   :  { %10848 = vmatprep.subr.mxu1 %v258_v39  ;;  %10854 = vmatprep.mubr.msk.f32.mxu1 %vm264_vm1, %v205_v30 }
 0x10d   :  { %10849 = vmatpush3.msra.mxu1 %v258_v39  ;;  %10875 = vmatprep.mubr.msk.f32.mxu0 %vm120_vm0, %v12383_v42 }
 0x10e   :  { %10850 = vmatprep.subr.mxu1 %v257_v40 }
 0x10f   :  { %10851 = vmatpush3.msra.mxu1 %v257_v40 }
 0x110   :  { %10852 = vmatprep.subr.mxu1 %v256_v41 }
 0x111   :  { %10853 = vmatpush3.msra.mxu1 %v256_v41 }
 0x112   :  { %10855 = vmatmul.mubr.msk.f32.vlgmr.msra.gmra.mxu1 %vm264_vm1, %v10781_v29 }
 0x113   :  { %10857 = vmatprep.mubr.msk.f32.mxu1 %vm264_vm1, %v215_v34 }
 0x116   :  { %10858 = vmatmul.mubr.msk.f32.gmra.mxu1 %vm264_vm1, %v10784_v32 }
 0x117   :  { %10860 = vmatprep.mubr.msk.f32.mxu1 %vm264_vm1, %v225_v37 }
 0x11a   :  { %10861 = vmatmul.mubr.msk.f32.gmra.mxu1 %vm264_vm1, %v10787_v35 }
 0x11b   :  { %10896 = vmatprep.mubr.msk.f32.mxu1 %vm120_vm0, %v12387_v43 }
 0x1c1   :  { %v10806_v44 = vpop.f32.mrf.mxu1  ;;  %v10831_v12 = vpop.f32.mrf.mxu0 }
 0x1c3   :  { %v349_v45 = vpop.f32.mrf.mxu1  ;;  %v444_v13 = vpop.f32.mrf.mxu0 }
 0x1c6   :  { %v10809_v46 = vpop.f32.mrf.mxu1  ;;  %v10834_v14 = vpop.f32.mrf.mxu0 }
 0x1c8   :  { %v359_v47 = vpop.f32.mrf.mxu1  ;;  %v454_v15 = vpop.f32.mrf.mxu0 }
 0x1ca   :  { %v10812_v48 = vpop.f32.mrf.mxu1 }
 0x1cb   :  { %10863 = vmatprep.subr.mxu0 %v10812_v48  ;;  %v10837_v16 = vpop.f32.mrf.mxu0 }
 0x1cc   :  { %v369_v49 = vpop.f32.mrf.mxu1  ;;  %10864 = vmatpush3.msra.mxu0 %v10812_v48 }
 0x1cd   :  { %10865 = vmatprep.subr.mxu0 %v369_v49  ;;  %v464_v17 = vpop.f32.mrf.mxu0 }
 0x1ce   :  { %10866 = vmatpush3.msra.mxu0 %v369_v49 }
 0x1cf   :  { %10867 = vmatprep.subr.mxu0 %v10809_v46 }
 0x1d0   :  { %10868 = vmatpush3.msra.mxu0 %v10809_v46 }
 0x1d1   :  { %10869 = vmatprep.subr.mxu0 %v359_v47 }
 0x1d2   :  { %v10856_v50 = vpop.f32.mrf.mxu1  ;;  %10870 = vmatpush3.msra.mxu0 %v359_v47 }
 0x1d3   :  { %10871 = vmatprep.subr.mxu0 %v10806_v44 }
 0x1d4   :  { %v539_v51 = vpop.f32.mrf.mxu1  ;;  %10872 = vmatpush3.msra.mxu0 %v10806_v44  ;;  %v12449_v44 = vld [vmem:[#allocation4 + $0x208] sm:$0xff] }
 0x1d5   :  { %10873 = vmatprep.subr.mxu0 %v349_v45 }
 0x1d6   :  { %v10859_v54 = vpop.f32.mrf.mxu1  ;;  %10874 = vmatpush3.msra.mxu0 %v349_v45 }
 0x1d7   :  { %10876 = vmatmul.mubr.msk.f32.vlgmr.msra.gmra.mxu0 %vm120_vm0, %v12391_v52  ;;  %10905 = vmatprep.subr.mxu0 %v926_v4 }
 0x1d8   :  { %v549_v55 = vpop.f32.mrf.mxu1  ;;  %10878 = vmatprep.mubr.msk.f32.mxu0 %vm120_vm0, %v12393_v53  ;;  %10906 = vmatpush3.msra.mxu0 %v926_v4  ;;  %v12460_v4 = vld [vmem:[#allocation4 + $0x218] sm:$0xff] }
 0x1d9   :  { %10907 = vmatprep.subr.mxu0 %v925_v5 }
 0x1da   :  { %v10862_v58 = vpop.f32.mrf.mxu1  ;;  %10908 = vmatpush3.msra.mxu0 %v925_v5 }
 0x1db   :  { %10884 = vmatprep.subr.mxu1 %v10862_v58  ;;  %10879 = vmatmul.mubr.msk.f32.gmra.mxu0 %vm120_vm0, %v12399_v56 }
 0x1dc   :  { %v559_v59 = vpop.f32.mrf.mxu1  ;;  %10885 = vmatpush3.msra.mxu1 %v10862_v58  ;;  %10881 = vmatprep.mubr.msk.f32.mxu0 %vm120_vm0, %v12401_v57 }
 0x1dd   :  { %10886 = vmatprep.subr.mxu1 %v559_v59  ;;  %10909 = vmatprep.subr.mxu0 %v924_v7 }
 0x1de   :  { %10887 = vmatpush3.msra.mxu1 %v559_v59  ;;  %10910 = vmatpush3.msra.mxu0 %v924_v7 }
 0x1df   :  { %10888 = vmatprep.subr.mxu1 %v10859_v54  ;;  %10882 = vmatmul.mubr.msk.f32.gmra.mxu0 %vm120_vm0, %v12407_v60 }
 0x1e0   :  { %10889 = vmatpush3.msra.mxu1 %v10859_v54  ;;  %10911 = vmatprep.subr.mxu0 %v923_v9  ;;  %v12453_v54 = vld [vmem:[#allocation4 + $0x200] sm:$0xff] }
 0x1e1   :  { %10890 = vmatprep.subr.mxu1 %v549_v55  ;;  %10912 = vmatpush3.msra.mxu0 %v923_v9 }
 0x1e2   :  { %10891 = vmatpush3.msra.mxu1 %v549_v55  ;;  %10939 = vmatprep.subr.mxu0 %v12434_v11 }
 0x1e3   :  { %10892 = vmatprep.subr.mxu1 %v10856_v50 }
 0x1e4   :  { %10893 = vmatpush3.msra.mxu1 %v10856_v50 }
 0x1e5   :  { %10894 = vmatprep.subr.mxu1 %v539_v51 }
 0x1e6   :  { %10895 = vmatpush3.msra.mxu1 %v539_v51 }
 0x1e7   :  { %10897 = vmatmul.mubr.msk.f32.vlgmr.msra.gmra.mxu1 %vm120_vm0, %v12411_v61  ;;  %10922 = vmatprep.subr.mxu1 %v930_v2 }
 0x1e8   :  { %10899 = vmatprep.mubr.msk.f32.mxu1 %vm120_vm0, %v12413_v62  ;;  %10923 = vmatpush3.msra.mxu1 %v930_v2 }
 0x1e9   :  { %10924 = vmatprep.subr.mxu1 %v929_v3 }
 0x1ea   :  { %10925 = vmatpush3.msra.mxu1 %v929_v3 }
 0x1eb   :  { %10900 = vmatmul.mubr.msk.f32.gmra.mxu1 %vm120_vm0, %v12419_v63  ;;  %10926 = vmatprep.subr.mxu1 %v928_v6 }
 0x1ec   :  { %10902 = vmatprep.mubr.msk.f32.mxu1 %vm120_vm0, %v12421_v0  ;;  %10927 = vmatpush3.msra.mxu1 %v928_v6 }
 0x1ed   :  { %10928 = vmatprep.subr.mxu1 %v927_v8 }
 0x1ee   :  { %10929 = vmatpush3.msra.mxu1 %v927_v8 }
 0x1ef   :  { %10903 = vmatmul.mubr.msk.f32.gmra.mxu1 %vm120_vm0, %v12427_v1  ;;  %10956 = vmatprep.subr.mxu1 %v12431_v10 }
 0x297   :  { %v10877_v18 = vpop.f32.mrf.mxu0 }
 0x298   :  { %v658_v22 = vadd.f32 %v10877_v18, %v10831_v12  ;;  %v12466_v12 = vld [vmem:[#allocation4 + $0x210] sm:$0xff] }
 0x299   :  { %v652_v19 = vpop.f32.mrf.mxu0 }
 0x29a   :  { %v653_v25 = vadd.f32 %v652_v19, %v444_v13 }
 0x29b   :  { %v10880_v20 = vpop.f32.mrf.mxu0 }
 0x29c   :  { %v668_v30 = vadd.f32 %v10880_v20, %v10834_v14 }
 0x29d   :  { %v662_v21 = vpop.f32.mrf.mxu0 }
 0x29e   :  { %v663_v38 = vadd.f32 %v662_v21, %v454_v15 }
 0x29f   :  { %v10883_v27 = vpop.f32.mrf.mxu0 }
 0x2a0   :  { %v678_v46 = vadd.f32 %v10883_v27, %v10837_v16 }
 0x2a1   :  { %v672_v39 = vpop.f32.mrf.mxu0 }
 0x2a2   :  { %v673_v49 = vadd.f32 %v672_v39, %v464_v17 }
 0x2a7   :  { %v10898_v23 = vpop.f32.mrf.mxu1 }
 0x2a8   :  { %v795_v26 = vadd.f32 %v10898_v23, %v658_v22 }
 0x2a9   :  { %v765_v29 = vpop.f32.mrf.mxu1 }
 0x2aa   :  { %v12439_v31 = vadd.f32 %v9546_v24, %v795_v26  ;;  %v794_v32 = vadd.f32 %v765_v29, %v653_v25 }
 0x2ab   :  { %v10901_v34 = vpop.f32.mrf.mxu1 }
 0x2ac   :  { %v812_v35 = vmul.f32 %v12439_v31, %v12437_v28  ;;  %v12445_v36 = vadd.f32 %v9546_v24, %v794_v32  ;;  %v797_v37 = vadd.f32 %v10901_v34, %v668_v30 }
 0x2ad   :  { %v775_v40 = vpop.f32.mrf.mxu1 }
 0x2ae   :  { %v811_v41 = vmul.f32 %v12445_v36, %v12441_v33  ;;  %v12451_v45 = vadd.f32 %v9546_v24, %v797_v37  ;;  %v796_v47 = vadd.f32 %v775_v40, %v663_v38  ;;  %v837_v50 = vmul.f32 %v812_v35, %v812_v35 }
 0x2af   :  { %v10904_v48 = vpop.f32.mrf.mxu1  ;;  %v819_v6 = vsel %vm817_vm2, %v812_v35, 0.0 }
 0x2b0   :  { %v836_v51 = vmul.f32 %v811_v41, %v811_v41  ;;  %v818_v55 = vsel %vm817_vm2, %v811_v41, 0.0  ;;  %v814_v58 = vmul.f32 %v12451_v45, %v12449_v44  ;;  %v12458_v59 = vadd.f32 %v9546_v24, %v796_v47 }
 0x2b1   :  { %v799_v2 = vadd.f32 %v10904_v48, %v678_v46  ;;  %v785_v3 = vpop.f32.mrf.mxu1  ;;  %v843_v13 = vsel %vm817_vm2, %v837_v50, 0.0  ;;  %v820_v14 = vadd.f32 %v819_v6, %v818_v55 }
 0x2b2   :  { %v798_v5 = vadd.f32 %v785_v3, %v673_v49  ;;  %v842_v7 = vsel %vm817_vm2, %v836_v51, 0.0  ;;  %v813_v8 = vmul.f32 %v12458_v59, %v12453_v54  ;;  %v839_v16 = vmul.f32 %v814_v58, %v814_v58 }
 0x2b3   :  { %v810_v9 = vadd.f32 %v9546_v24, %v799_v2  ;;  %v844_v20 = vadd.f32 %v843_v13, %v842_v7  ;;  %v823_v23 = vsel %vm817_vm2, %v814_v58, 0.0 }
 0x2b4   :  { %v809_v15 = vadd.f32 %v9546_v24, %v798_v5  ;;  %v821_v17 = vsel %vm817_vm2, %v813_v8, 0.0  ;;  %v838_v18 = vmul.f32 %v813_v8, %v813_v8  ;;  %v847_v24 = vsel %vm817_vm2, %v839_v16, 0.0 }
 0x2b5   :  { %v816_v19 = vmul.f32 %v810_v9, %v12460_v4  ;;  %v822_v21 = vadd.f32 %v821_v17, %v820_v14 }
 0x2b6   :  { %v815_v22 = vmul.f32 %v809_v15, %v12466_v12  ;;  %v845_v25 = vsel %vm817_vm2, %v838_v18, 0.0 }
 0x2b7   :  { %v846_v26 = vadd.f32 %v845_v25, %v844_v20  ;;  %v824_v27 = vadd.f32 %v823_v23, %v822_v21  ;;  %v841_v32 = vmul.f32 %v816_v19, %v816_v19  ;;  %v827_v38 = vsel %vm817_vm2, %v816_v19, 0.0  ;;  %v9547_v25 = vld [vmem:[#allocation4 + $0x1e1] ss:$0 sm:$0xff] }
 0x2b8   :  { %v825_v29 = vsel %vm817_vm2, %v815_v22, 0.0  ;;  %v840_v30 = vmul.f32 %v815_v22, %v815_v22 }
 0x2b9   :  { %v826_v34 = vadd.f32 %v825_v29, %v824_v27  ;;  %v848_v35 = vadd.f32 %v847_v24, %v846_v26  ;;  %v851_v41 = vsel %vm817_vm2, %v841_v32, 0.0 }
 0x2ba   :  { %v849_v37 = vsel %vm817_vm2, %v840_v30, 0.0 }
 0x2bb   :  { %v828_v39 = vadd.f32 %v827_v38, %v826_v34  ;;  %v850_v40 = vadd.f32 %v849_v37, %v848_v35  ;;  %v9548_v34 = vld [vmem:[#allocation4 + $0x1e2] ss:$0 sm:$0xff] }
 0x2bd   :  { %v829_v46 = vrot.slane %v828_v39, 4  ;;  %v852_v47 = vadd.f32 %v851_v41, %v850_v40 }
 0x2bf   :  { %v830_v48 = vadd.f32 %v829_v46, %v828_v39  ;;  %v853_v49 = vrot.slane %v852_v47, 4 }
 0x2c1   :  { %v831_v50 = vrot.slane %v830_v48, 2  ;;  %v854_v51 = vadd.f32 %v853_v49, %v852_v47 }
 0x2c3   :  { %v832_v55 = vadd.f32 %v831_v50, %v830_v48  ;;  %v855_v58 = vrot.slane %v854_v51, 2 }
 0x2c5   :  { %v833_v2 = vrot.slane %v832_v55, 1  ;;  %v856_v3 = vadd.f32 %v855_v58, %v854_v51 }
 0x2c7   :  { %v834_v5 = vadd.f32 %v833_v2, %v832_v55  ;;  %v857_v6 = vrot.slane %v856_v3, 1 }
 0x2c9   :  { %v835_v7 = vmul.f32 0.25, %v834_v5  ;;  %v858_v8 = vadd.f32 %v857_v6, %v856_v3  ;;  %v913_v5 = vld [vmem:[#allocation4 + $0xd0] sm:$0xff] }
 0x2ca   :  { %v933_v6 = vld [vmem:[#allocation4 + $0x170] sm:$0xff] }
 0x2cb   :  { %v859_v13 = vmul.f32 0.25, %v858_v8  ;;  %v860_v14 = vmul.f32 %v835_v7, %v835_v7  ;;  %v867_v19 = vsub.f32 %v809_v15, %v835_v7  ;;  %v863_v20 = vsub.f32 %v12445_v36, %v835_v7 }
 0x2cc   :  { %v864_v21 = vsub.f32 %v12439_v31, %v835_v7  ;;  %v865_v22 = vsub.f32 %v12458_v59, %v835_v7  ;;  %v866_v26 = vsub.f32 %v12451_v45, %v835_v7  ;;  %v868_v27 = vsub.f32 %v810_v9, %v835_v7 }
 0x2cd   :  { %v861_v16 = vsub.f32 %v859_v13, %v860_v14  ;;  %v912_v14 = vld [vmem:[#allocation4 + $0xc8] sm:$0xff] }
 0x2cf   :  { %v862_v17 = vmax.f32 %v861_v16, 0.0  ;;  %v932_v16 = vld [vmem:[#allocation4 + $0x168] sm:$0xff] }
 0x2d1   :  { %v869_v18 = vadd.f32 1e-05, %v862_v17  ;;  %v931_v17 = vld [vmem:[#allocation4 + $0x160] sm:$0xff] }
 0x2d3   :  { %12050 = vrsqrt.f32 %v869_v18  ;;  %v234_v18 = vld [vmem:[%s14004_s1] sm:$0xff] }
 0x2e0   :  { %v12051_v23 = vpop.eup %12050 }
 0x2e1   :  { %v875_v29 = vmul.f32 %v12051_v23, %v867_v19  ;;  %v871_v30 = vmul.f32 %v12051_v23, %v863_v20  ;;  %v872_v24 = vmul.f32 %v12051_v23, %v864_v21  ;;  %v873_v32 = vmul.f32 %v12051_v23, %v865_v22  ;;  %v235_v19 = vld [vmem:[%s14004_s1 + $0x8] sm:$0xff]  ;;  %v922_v20 = vld [vmem:[#allocation4 + $0x118] sm:$0xff]  ;;  %v236_v21 = vld [vmem:[%s14004_s1 + $0x10] sm:$0xff] }
 0x2e2   :  { %v874_v35 = vmul.f32 %v12051_v23, %v866_v26  ;;  %v876_v37 = vmul.f32 %v12051_v23, %v868_v27  ;;  %v921_v22 = vld [vmem:[#allocation4 + $0x110] sm:$0xff]  ;;  %v918_v23 = vld [vmem:[#allocation4 + $0xf8] sm:$0xff]  ;;  %v920_v26 = vld [vmem:[#allocation4 + $0x108] sm:$0xff] }
 0x2e3   :  { %v886_v38 = vmul.f32 %v9547_v25, %v875_v29  ;;  %v882_v15 = vmul.f32 %v9547_v25, %v871_v30  ;;  %v883_v39 = vmul.f32 %v9547_v25, %v872_v24  ;;  %v884_v36 = vmul.f32 %v9547_v25, %v873_v32  ;;  %v917_v27 = vld [vmem:[#allocation4 + $0xf0] sm:$0xff]  ;;  %v238_v29 = vld [vmem:[%s14004_s1 + $0x20] sm:$0xff]  ;;  %v239_v30 = vld [vmem:[%s14004_s1 + $0x28] sm:$0xff] }
 0x2e4   :  { %v885_v40 = vmul.f32 %v9547_v25, %v874_v35  ;;  %v887_v47 = vmul.f32 %v9547_v25, %v876_v37  ;;  %v237_v25 = vld [vmem:[%s14004_s1 + $0x18] sm:$0xff]  ;;  %v916_v24 = vld [vmem:[#allocation4 + $0xe8] sm:$0xff]  ;;  %v919_v32 = vld [vmem:[#allocation4 + $0x100] sm:$0xff] }
 0x2e5   :  { %v893_v31 = vadd.f32 %v9548_v34, %v882_v15  ;;  %v894_v41 = vadd.f32 %v9548_v34, %v883_v39  ;;  %v895_v59 = vadd.f32 %v9548_v34, %v884_v36  ;;  %v897_v49 = vadd.f32 %v9548_v34, %v886_v38 }
 0x2e6   :  { %v896_v46 = vadd.f32 %v9548_v34, %v885_v40  ;;  %v898_v58 = vadd.f32 %v9548_v34, %v887_v47  ;;  %v915_v34 = vld [vmem:[#allocation4 + $0xe0] sm:$0xff] }
 0x2e7   :  { %v899_v48 = vmax.f32 %v893_v31, 0.0  ;;  %v900_v45 = vmax.f32 %v894_v41, 0.0  ;;  %v901_v9 = vmax.f32 %v895_v59, 0.0  ;;  %v903_v3 = vmax.f32 %v897_v49, 0.0 }
 0x2e8   :  { %v902_v55 = vmax.f32 %v896_v46, 0.0  ;;  %v904_v8 = vmax.f32 %v898_v58, 0.0 }
 0x2e9   :  { %v905_v50 = vmul.f32 %v899_v48, %v12441_v33  ;;  %v906_v51 = vmul.f32 %v900_v45, %v12437_v28  ;;  %v907_v2 = vmul.f32 %v901_v9, %v12453_v54  ;;  %v909_v13 = vmul.f32 %v903_v3, %v12466_v12 }
 0x2ea   :  { %v908_v7 = vmul.f32 %v902_v55, %v12449_v44 }
 0x2eb   :  { %10913 = vmatprep.mubr.msk.f32.mxu0 %vm817_vm2, %v905_v50  ;;  %10930 = vmatprep.mubr.msk.f32.mxu1 %vm817_vm2, %v905_v50 }
 0x2ec   :  { %10914 = vmatmul.mubr.msk.f32.vlgmr.msra.gmra.mxu0 %vm817_vm2, %v906_v51  ;;  %10931 = vmatmul.mubr.msk.f32.vlgmr.msra.gmra.mxu1 %vm817_vm2, %v906_v51 }
 0x2ed   :  { %10916 = vmatprep.mubr.msk.f32.mxu0 %vm817_vm2, %v907_v2  ;;  %10933 = vmatprep.mubr.msk.f32.mxu1 %vm817_vm2, %v907_v2 }
 0x2ee   :  { %10957 = vmatpush3.msra.mxu1 %v12431_v10  ;;  %10940 = vmatpush3.msra.mxu0 %v12434_v11  ;;  %v910_v10 = vmul.f32 %v904_v8, %v12460_v4  ;;  %v911_v11 = vld [vmem:[#allocation4 + $0xc0] sm:$0xff] }
 0x2ef   :  { %10958 = vmatprep.subr.mxu1 %v913_v5  ;;  %10941 = vmatprep.subr.mxu0 %v933_v6 }
 0x2f0   :  { %10917 = vmatmul.mubr.msk.f32.gmra.mxu0 %vm817_vm2, %v908_v7  ;;  %10934 = vmatmul.mubr.msk.f32.gmra.mxu1 %vm817_vm2, %v908_v7 }
 0x2f1   :  { %10959 = vmatpush3.msra.mxu1 %v913_v5  ;;  %10919 = vmatprep.mubr.msk.f32.mxu0 %vm817_vm2, %v909_v13 }
 0x2f2   :  { %10936 = vmatprep.mubr.msk.f32.mxu1 %vm817_vm2, %v909_v13  ;;  %10960 = vmatprep.subr.mxu1 %v912_v14 }
 0x2f3   :  { %10942 = vmatpush3.msra.mxu0 %v933_v6  ;;  %10961 = vmatpush3.msra.mxu1 %v912_v14 }
 0x2f4   :  { %10920 = vmatmul.mubr.msk.f32.gmra.mxu0 %vm817_vm2, %v910_v10  ;;  %10937 = vmatmul.mubr.msk.f32.gmra.mxu1 %vm817_vm2, %v910_v10 }
 0x2f5   :  { %10943 = vmatprep.subr.mxu0 %v932_v16  ;;  %10947 = vmatprep.mubr.msk.f32.mxu0 %vm817_vm2, %v905_v50 }
 0x2f6   :  { %10944 = vmatpush3.msra.mxu0 %v932_v16  ;;  %10962 = vmatprep.subr.mxu1 %v911_v11 }
 0x2f7   :  { %10945 = vmatprep.subr.mxu0 %v931_v17  ;;  %10963 = vmatpush3.msra.mxu1 %v911_v11 }
 0x2f8   :  { %10946 = vmatpush3.msra.mxu0 %v931_v17  ;;  %10964 = vmatprep.mubr.msk.f32.mxu1 %vm817_vm2, %v234_v18 }
 0x2f9   :  { %10948 = vmatmul.mubr.msk.f32.vlgmr.msra.gmra.mxu0 %vm817_vm2, %v906_v51  ;;  %10965 = vmatmul.mubr.msk.f32.vlgmr.msra.gmra.mxu1 %vm817_vm2, %v235_v19 }
 0x2fa   :  { %10990 = vmatprep.subr.mxu1 %v922_v20  ;;  %10950 = vmatprep.mubr.msk.f32.mxu0 %vm817_vm2, %v907_v2 }
 0x2fb   :  { %10991 = vmatpush3.msra.mxu1 %v922_v20  ;;  %10967 = vmatprep.mubr.msk.f32.mxu1 %vm817_vm2, %v236_v21 }
 0x2fc   :  { %10992 = vmatprep.subr.mxu1 %v921_v22  ;;  %10973 = vmatprep.subr.mxu0 %v918_v23 }
 0x2fd   :  { %10951 = vmatmul.mubr.msk.f32.gmra.mxu0 %vm817_vm2, %v908_v7  ;;  %10968 = vmatmul.mubr.msk.f32.gmra.mxu1 %vm817_vm2, %v237_v25 }
 0x2fe   :  { %10993 = vmatpush3.msra.mxu1 %v921_v22  ;;  %10953 = vmatprep.mubr.msk.f32.mxu0 %vm817_vm2, %v909_v13 }
 0x2ff   :  { %10974 = vmatpush3.msra.mxu0 %v918_v23  ;;  %10994 = vmatprep.subr.mxu1 %v920_v26 }
 0x300   :  { %10975 = vmatprep.subr.mxu0 %v917_v27  ;;  %10970 = vmatprep.mubr.msk.f32.mxu1 %vm817_vm2, %v238_v29 }
 0x301   :  { %10976 = vmatpush3.msra.mxu0 %v917_v27  ;;  %10995 = vmatpush3.msra.mxu1 %v920_v26  ;;  %v1852_v26 = vld [vmem:[#allocation4 + $0x1a8] sm:$0xff] }
 0x302   :  { %10954 = vmatmul.mubr.msk.f32.gmra.mxu0 %vm817_vm2, %v910_v10  ;;  %10971 = vmatmul.mubr.msk.f32.gmra.mxu1 %vm817_vm2, %v239_v30 }
 0x303   :  { %10977 = vmatprep.subr.mxu0 %v916_v24  ;;  %10996 = vmatprep.subr.mxu1 %v919_v32 }
 0x304   :  { %10978 = vmatpush3.msra.mxu0 %v916_v24  ;;  %10997 = vmatpush3.msra.mxu1 %v919_v32 }
 0x305   :  { %10979 = vmatprep.subr.mxu0 %v915_v34  ;;  %10981 = vmatprep.mubr.msk.f32.mxu0 %vm817_vm2, %v234_v18 }
 0x306   :  { %10980 = vmatpush3.msra.mxu0 %v915_v34  ;;  %10998 = vmatprep.mubr.msk.f32.mxu1 %vm817_vm2, %v234_v18 }
 0x307   :  { %10982 = vmatmul.mubr.msk.f32.vlgmr.msra.gmra.mxu0 %vm817_vm2, %v235_v19  ;;  %10999 = vmatmul.mubr.msk.f32.vlgmr.msra.gmra.mxu1 %vm817_vm2, %v235_v19 }
 0x308   :  { %10984 = vmatprep.mubr.msk.f32.mxu0 %vm817_vm2, %v236_v21  ;;  %11001 = vmatprep.mubr.msk.f32.mxu1 %vm817_vm2, %v236_v21 }
 0x30b   :  { %10985 = vmatmul.mubr.msk.f32.gmra.mxu0 %vm817_vm2, %v237_v25  ;;  %11002 = vmatmul.mubr.msk.f32.gmra.mxu1 %vm817_vm2, %v237_v25 }
 0x30c   :  { %10987 = vmatprep.mubr.msk.f32.mxu0 %vm817_vm2, %v238_v29  ;;  %11004 = vmatprep.mubr.msk.f32.mxu1 %vm817_vm2, %v238_v29 }
 0x30f   :  { %10988 = vmatmul.mubr.msk.f32.gmra.mxu0 %vm817_vm2, %v239_v30  ;;  %11005 = vmatmul.mubr.msk.f32.gmra.mxu1 %vm817_vm2, %v239_v30 }
 0x310   :  { %11019 = vmatprep.mubr.msk.f32.mxu0 %vm120_vm0, %v12383_v42  ;;  %11040 = vmatprep.mubr.msk.f32.mxu1 %vm120_vm0, %v12387_v43 }
 0x3ac   :  { %v10915_v35 = vpop.f32.mrf.mxu0  ;;  %v12549_v37 = vpop.f32.mrf.mxu1 }
 0x3ae   :  { %v1019_v38 = vpop.f32.mrf.mxu0  ;;  %v12551_v15 = vpop.f32.mrf.mxu1 }
 0x3b0   :  { %v10918_v39 = vpop.f32.mrf.mxu0  ;;  %v12553_v36 = vpop.f32.mrf.mxu1 }
 0x3b2   :  { %v1029_v40 = vpop.f32.mrf.mxu0  ;;  %v12555_v31 = vpop.f32.mrf.mxu1 }
 0x3b4   :  { %v12557_v41 = vpop.f32.mrf.mxu1  ;;  %v10921_v59 = vpop.f32.mrf.mxu0 }
 0x3b6   :  { %v12559_v46 = vpop.f32.mrf.mxu1  ;;  %v1039_v42 = vpop.f32.mrf.mxu0 }
 0x3b9   :  { %v10966_v47 = vpop.f32.mrf.mxu1  ;;  %v10949_v48 = vpop.f32.mrf.mxu0 }
 0x3ba   :  { %v1328_v13 = vadd.f32 %v10966_v47, %v10915_v35 }
 0x3bb   :  { %v1322_v43 = vpop.f32.mrf.mxu1  ;;  %v1209_v49 = vpop.f32.mrf.mxu0 }
 0x3bc   :  { %v1323_v10 = vadd.f32 %v1322_v43, %v1019_v38  ;;  %v9597_v43 = vld [vmem:[#allocation4 + $0x1e3] ss:$0 sm:$0xff] }
 0x3bd   :  { %v10969_v45 = vpop.f32.mrf.mxu1  ;;  %v10952_v58 = vpop.f32.mrf.mxu0 }
 0x3be   :  { %v1338_v3 = vadd.f32 %v10969_v45, %v10918_v39 }
 0x3bf   :  { %v1332_v9 = vpop.f32.mrf.mxu1  ;;  %v1219_v6 = vpop.f32.mrf.mxu0 }
 0x3c0   :  { %v1333_v7 = vadd.f32 %v1332_v9, %v1029_v40 }
 0x3c2   :  { %v10972_v50 = vpop.f32.mrf.mxu1  ;;  %v10955_v16 = vpop.f32.mrf.mxu0 }
 0x3c3   :  { %v1348_v51 = vadd.f32 %v10972_v50, %v10921_v59 }
 0x3c4   :  { %v1342_v55 = vpop.f32.mrf.mxu1  ;;  %v1229_v19 = vpop.f32.mrf.mxu0 }
 0x3c5   :  { %v1343_v2 = vadd.f32 %v1342_v55, %v1039_v42  ;;  %11007 = vmatprep.subr.mxu0 %v1348_v51 }
 0x3c6   :  { %11008 = vmatpush3.msra.mxu0 %v1348_v51 }
 0x3c7   :  { %v11000_v5 = vpop.f32.mrf.mxu1  ;;  %11009 = vmatprep.subr.mxu0 %v1343_v2 }
 0x3c8   :  { %11010 = vmatpush3.msra.mxu0 %v1343_v2  ;;  %v1518_v25 = vadd.f32 %v11000_v5, %v10949_v48 }
 0x3c9   :  { %v1512_v8 = vpop.f32.mrf.mxu1  ;;  %11011 = vmatprep.subr.mxu0 %v1338_v3 }
 0x3ca   :  { %11012 = vmatpush3.msra.mxu0 %v1338_v3 }
 0x3cb   :  { %v11003_v14 = vpop.f32.mrf.mxu1  ;;  %11013 = vmatprep.subr.mxu0 %v1333_v7 }
 0x3cc   :  { %11014 = vmatpush3.msra.mxu0 %v1333_v7  ;;  %v1528_v22 = vadd.f32 %v11003_v14, %v10952_v58 }
 0x3cd   :  { %v1522_v11 = vpop.f32.mrf.mxu1  ;;  %11015 = vmatprep.subr.mxu0 %v1328_v13 }
 0x3ce   :  { %11016 = vmatpush3.msra.mxu0 %v1328_v13  ;;  %v1523_v23 = vadd.f32 %v1522_v11, %v1219_v6 }
 0x3cf   :  { %v11006_v17 = vpop.f32.mrf.mxu1  ;;  %11017 = vmatprep.subr.mxu0 %v1323_v10 }
 0x3d0   :  { %v1538_v18 = vadd.f32 %v11006_v17, %v10955_v16  ;;  %11018 = vmatpush3.msra.mxu0 %v1323_v10 }
 0x3d1   :  { %v1532_v20 = vpop.f32.mrf.mxu1  ;;  %11020 = vmatmul.mubr.msk.f32.vlgmr.msra.gmra.mxu0 %vm120_vm0, %v12391_v52  ;;  %v1513_v52 = vadd.f32 %v1512_v8, %v1209_v49 }
 0x3d2   :  { %v1533_v21 = vadd.f32 %v1532_v20, %v1229_v19  ;;  %11028 = vmatprep.subr.mxu1 %v1538_v18  ;;  %11022 = vmatprep.mubr.msk.f32.mxu0 %vm120_vm0, %v12393_v53  ;;  %v1850_v53 = vld [vmem:[#allocation4 + $0x198] sm:$0xff] }
 0x3d3   :  { %11029 = vmatpush3.msra.mxu1 %v1538_v18  ;;  %11049 = vmatprep.subr.mxu0 %v1850_v53 }
 0x3d4   :  { %11030 = vmatprep.subr.mxu1 %v1533_v21  ;;  %11050 = vmatpush3.msra.mxu0 %v1850_v53 }
 0x3d5   :  { %11031 = vmatpush3.msra.mxu1 %v1533_v21  ;;  %11023 = vmatmul.mubr.msk.f32.gmra.mxu0 %vm120_vm0, %v12399_v56  ;;  %v1849_v56 = vld [vmem:[#allocation4 + $0x190] sm:$0xff] }
 0x3d6   :  { %11032 = vmatprep.subr.mxu1 %v1528_v22  ;;  %11025 = vmatprep.mubr.msk.f32.mxu0 %vm120_vm0, %v12401_v57  ;;  %v1854_v57 = vld [vmem:[#allocation4 + $0x1b8] sm:$0xff] }
 0x3d7   :  { %11033 = vmatpush3.msra.mxu1 %v1528_v22  ;;  %11051 = vmatprep.subr.mxu0 %v1849_v56 }
 0x3d8   :  { %11034 = vmatprep.subr.mxu1 %v1523_v23  ;;  %11052 = vmatpush3.msra.mxu0 %v1849_v56 }
 0x3d9   :  { %11035 = vmatpush3.msra.mxu1 %v1523_v23  ;;  %11026 = vmatmul.mubr.msk.f32.gmra.mxu0 %vm120_vm0, %v12407_v60  ;;  %v1853_v60 = vld [vmem:[#allocation4 + $0x1b0] sm:$0xff] }
 0x3da   :  { %11036 = vmatprep.subr.mxu1 %v1518_v25 }
 0x3db   :  { %11037 = vmatpush3.msra.mxu1 %v1518_v25 }
 0x3dc   :  { %11038 = vmatprep.subr.mxu1 %v1513_v52 }
 0x3dd   :  { %11039 = vmatpush3.msra.mxu1 %v1513_v52 }
 0x3de   :  { %11041 = vmatmul.mubr.msk.f32.vlgmr.msra.gmra.mxu1 %vm120_vm0, %v12411_v61  ;;  %11066 = vmatprep.subr.mxu1 %v1854_v57  ;;  %v1848_v61 = vld [vmem:[#allocation4 + $0x188] sm:$0xff] }
 0x3df   :  { %11043 = vmatprep.mubr.msk.f32.mxu1 %vm120_vm0, %v12413_v62  ;;  %11067 = vmatpush3.msra.mxu1 %v1854_v57  ;;  %v1847_v62 = vld [vmem:[#allocation4 + $0x180] sm:$0xff] }
 0x3e0   :  { %11068 = vmatprep.subr.mxu1 %v1853_v60  ;;  %11053 = vmatprep.subr.mxu0 %v1848_v61 }
 0x3e1   :  { %11069 = vmatpush3.msra.mxu1 %v1853_v60  ;;  %11054 = vmatpush3.msra.mxu0 %v1848_v61 }
 0x3e2   :  { %11044 = vmatmul.mubr.msk.f32.gmra.mxu1 %vm120_vm0, %v12419_v63  ;;  %v1851_v63 = vld [vmem:[#allocation4 + $0x1a0] sm:$0xff]  ;;  %11070 = vmatprep.subr.mxu1 %v1852_v26 }
 0x3e3   :  { %11046 = vmatprep.mubr.msk.f32.mxu1 %vm120_vm0, %v12421_v0  ;;  %11071 = vmatpush3.msra.mxu1 %v1852_v26  ;;  %v12581_v0 = vld [vmem:[#allocation4 + $0x1d8] sm:$0xff] }
 0x3e4   :  { %11055 = vmatprep.subr.mxu0 %v1847_v62  ;;  %11072 = vmatprep.subr.mxu1 %v1851_v63 }
 0x3e5   :  { %11056 = vmatpush3.msra.mxu0 %v1847_v62  ;;  %11073 = vmatpush3.msra.mxu1 %v1851_v63 }
 0x3e6   :  { %11047 = vmatmul.mubr.msk.f32.gmra.mxu1 %vm120_vm0, %v12427_v1  ;;  %11083 = vmatprep.subr.mxu0 %v12581_v0  ;;  %v10983_v1 = vpop.f32.mrf.mxu0 }
 0x3e7   :  { %v1423_v39 = vadd.f32 %v10983_v1, %v12549_v37 }
 0x3e8   :  { %v1417_v27 = vpop.f32.mrf.mxu0 }
 0x3e9   :  { %v1418_v59 = vadd.f32 %v1417_v27, %v12551_v15 }
 0x3ea   :  { %v10986_v29 = vpop.f32.mrf.mxu0 }
 0x3eb   :  { %v1433_v48 = vadd.f32 %v10986_v29, %v12553_v36 }
 0x3ec   :  { %v1427_v30 = vpop.f32.mrf.mxu0 }
 0x3ed   :  { %v1428_v2 = vadd.f32 %v1427_v30, %v12555_v31 }
 0x3ee   :  { %v10989_v24 = vpop.f32.mrf.mxu0 }
 0x3ef   :  { %v1443_v6 = vadd.f32 %v10989_v24, %v12557_v41 }
 0x3f0   :  { %v1437_v32 = vpop.f32.mrf.mxu0 }
 0x3f1   :  { %v1438_v13 = vadd.f32 %v1437_v32, %v12559_v46 }
 0x491   :  { %v11021_v34 = vpop.f32.mrf.mxu0 }
 0x492   :  { %v1613_v42 = vadd.f32 %v11021_v34, %v1423_v39 }
 0x493   :  { %v1607_v35 = vpop.f32.mrf.mxu0 }
 0x494   :  { %v1608_v45 = vadd.f32 %v1607_v35, %v1418_v59 }
 0x495   :  { %v11024_v38 = vpop.f32.mrf.mxu0 }
 0x496   :  { %v1623_v51 = vadd.f32 %v11024_v38, %v1433_v48 }
 0x497   :  { %v1617_v40 = vpop.f32.mrf.mxu0 }
 0x498   :  { %v1618_v36 = vadd.f32 %v1617_v40, %v1428_v2 }
 0x499   :  { %v11027_v49 = vpop.f32.mrf.mxu0 }
 0x49a   :  { %v1633_v31 = vadd.f32 %v11027_v49, %v1443_v6 }
 0x49b   :  { %v1627_v7 = vpop.f32.mrf.mxu0 }
 0x49c   :  { %v1628_v17 = vadd.f32 %v1627_v7, %v1438_v13 }
 0x49e   :  { %v11042_v47 = vpop.f32.mrf.mxu1 }
 0x49f   :  { %v1732_v9 = vadd.f32 %v11042_v47, %v1613_v42 }
 0x4a0   :  { %v1702_v50 = vpop.f32.mrf.mxu1 }
 0x4a1   :  { %v12587_v55 = vadd.f32 %v9597_v43, %v1732_v9  ;;  %v1731_v58 = vadd.f32 %v1702_v50, %v1608_v45 }
 0x4a2   :  { %v11045_v3 = vpop.f32.mrf.mxu1 }
 0x4a3   :  { %v1749_v37 = vmul.f32 %v12587_v55, %v12437_v28  ;;  %v12592_v15 = vadd.f32 %v9597_v43, %v1731_v58  ;;  %v1734_v5 = vadd.f32 %v11045_v3, %v1623_v51 }
 0x4a4   :  { %v1712_v8 = vpop.f32.mrf.mxu1 }
 0x4a5   :  { %v1748_v14 = vmul.f32 %v12592_v15, %v12441_v33  ;;  %v12598_v10 = vadd.f32 %v9597_v43, %v1734_v5  ;;  %v1733_v16 = vadd.f32 %v1712_v8, %v1618_v36  ;;  %v1773_v18 = vmul.f32 %v1749_v37, %v1749_v37 }
 0x4a6   :  { %v11048_v11 = vpop.f32.mrf.mxu1  ;;  %v1755_v25 = vsel %vm817_vm2, %v1749_v37, 0.0 }
 0x4a7   :  { %v1772_v19 = vmul.f32 %v1748_v14, %v1748_v14  ;;  %v1754_v20 = vsel %vm817_vm2, %v1748_v14, 0.0  ;;  %v1751_v41 = vmul.f32 %v12598_v10, %v12449_v44  ;;  %v12603_v21 = vadd.f32 %v9597_v43, %v1733_v16 }
 0x4a8   :  { %v1736_v22 = vadd.f32 %v11048_v11, %v1633_v31  ;;  %v1722_v46 = vpop.f32.mrf.mxu1  ;;  %v1779_v57 = vsel %vm817_vm2, %v1773_v18, 0.0  ;;  %v1756_v60 = vadd.f32 %v1755_v25, %v1754_v20 }
 0x4a9   :  { %v1735_v23 = vadd.f32 %v1722_v46, %v1628_v17  ;;  %v1778_v52 = vsel %vm817_vm2, %v1772_v19, 0.0  ;;  %v1750_v53 = vmul.f32 %v12603_v21, %v12453_v54  ;;  %v1775_v26 = vmul.f32 %v1751_v41, %v1751_v41 }
 0x4aa   :  { %v1747_v56 = vadd.f32 %v9597_v43, %v1736_v22  ;;  %v1780_v27 = vadd.f32 %v1779_v57, %v1778_v52  ;;  %v1759_v24 = vsel %vm817_vm2, %v1751_v41, 0.0 }
 0x4ab   :  { %v1746_v61 = vadd.f32 %v9597_v43, %v1735_v23  ;;  %v1757_v62 = vsel %vm817_vm2, %v1750_v53, 0.0  ;;  %v1774_v63 = vmul.f32 %v1750_v53, %v1750_v53  ;;  %v1783_v40 = vsel %vm817_vm2, %v1775_v26, 0.0  ;;  %v9598_v53 = vld [vmem:[#allocation4 + $0x1e4] ss:$0 sm:$0xff] }
 0x4ac   :  { %v1753_v1 = vmul.f32 %v1747_v56, %v12460_v4  ;;  %v1758_v29 = vadd.f32 %v1757_v62, %v1756_v60 }
 0x4ad   :  { %v1752_v30 = vmul.f32 %v1746_v61, %v12466_v12  ;;  %v1781_v32 = vsel %vm817_vm2, %v1774_v63, 0.0  ;;  %v9599_v63 = vld [vmem:[#allocation4 + $0x1e5] ss:$0 sm:$0xff] }
 0x4ae   :  { %v1782_v34 = vadd.f32 %v1781_v32, %v1780_v27  ;;  %v1760_v35 = vadd.f32 %v1759_v24, %v1758_v29  ;;  %v1777_v59 = vmul.f32 %v1753_v1, %v1753_v1  ;;  %v1763_v48 = vsel %vm817_vm2, %v1753_v1, 0.0 }
 0x4af   :  { %v1761_v38 = vsel %vm817_vm2, %v1752_v30, 0.0  ;;  %v1776_v39 = vmul.f32 %v1752_v30, %v1752_v30 }
 0x4b0   :  { %v1762_v42 = vadd.f32 %v1761_v38, %v1760_v35  ;;  %v1784_v47 = vadd.f32 %v1783_v40, %v1782_v34  ;;  %v1787_v49 = vsel %vm817_vm2, %v1777_v59, 0.0 }
 0x4b1   :  { %v1785_v43 = vsel %vm817_vm2, %v1776_v39, 0.0 }
 0x4b2   :  { %v1764_v45 = vadd.f32 %v1763_v48, %v1762_v42  ;;  %v1786_v9 = vadd.f32 %v1785_v43, %v1784_v47 }
 0x4b4   :  { %v1765_v50 = vrot.slane %v1764_v45, 4  ;;  %v1788_v51 = vadd.f32 %v1787_v49, %v1786_v9  ;;  %v1856_v49 = vld [vmem:[#allocation4 + $0x1c8] sm:$0xff] }
 0x4b6   :  { %v1766_v58 = vadd.f32 %v1765_v50, %v1764_v45  ;;  %v1789_v2 = vrot.slane %v1788_v51, 4  ;;  %v1857_v45 = vld [vmem:[#allocation4 + $0x1d0] sm:$0xff] }
 0x4b8   :  { %v1767_v3 = vrot.slane %v1766_v58, 2  ;;  %v1790_v37 = vadd.f32 %v1789_v2, %v1788_v51 }
 0x4ba   :  { %v1768_v5 = vadd.f32 %v1767_v3, %v1766_v58  ;;  %v1791_v6 = vrot.slane %v1790_v37, 2 }
 0x4bc   :  { %v1769_v36 = vrot.slane %v1768_v5, 1  ;;  %v1792_v7 = vadd.f32 %v1791_v6, %v1790_v37 }
 0x4be   :  { %v1770_v8 = vadd.f32 %v1769_v36, %v1768_v5  ;;  %v1793_v13 = vrot.slane %v1792_v7, 1 }
 0x4c0   :  { %v1771_v14 = vmul.f32 0.25, %v1770_v8  ;;  %v1794_v31 = vadd.f32 %v1793_v13, %v1792_v7  ;;  %v12657_v8 = vld [vmem:[#allocation2 + $0x8] sm:$0xff] }
 0x4c2   :  { %v1795_v16 = vmul.f32 0.25, %v1794_v31  ;;  %v1796_v11 = vmul.f32 %v1771_v14, %v1771_v14  ;;  %v1800_v17 = vsub.f32 %v12587_v55, %v1771_v14  ;;  %v1802_v18 = vsub.f32 %v12598_v10, %v1771_v14  ;;  %v12665_v31 = vld [vmem:[#allocation2 + $0x18] sm:$0xff] }
 0x4c3   :  { %v1804_v19 = vsub.f32 %v1747_v56, %v1771_v14  ;;  %v1803_v46 = vsub.f32 %v1746_v61, %v1771_v14  ;;  %v1799_v23 = vsub.f32 %v12592_v15, %v1771_v14  ;;  %v1801_v25 = vsub.f32 %v12603_v21, %v1771_v14  ;;  %v12661_v14 = vld [vmem:[#allocation2 + $0x10] sm:$0xff] }
 0x4c4   :  { %v1797_v20 = vsub.f32 %v1795_v16, %v1796_v11  ;;  %v12669_v16 = vld [vmem:[#allocation2 + $0x20] sm:$0xff]  ;;  %v12673_v11 = vld [vmem:[#allocation2 + $0x28] sm:$0xff] }
 0x4c6   :  { %v1798_v41 = vmax.f32 %v1797_v20, 0.0  ;;  %v12689_v20 = vld [vmem:[#allocation2 + $0x50] sm:$0xff] }
 0x4c8   :  { %v1805_v22 = vadd.f32 1e-05, %v1798_v41  ;;  %v12693_v41 = vld [vmem:[#allocation2 + $0x58] sm:$0xff] }
 0x4ca   :  { %12052 = vrsqrt.f32 %v1805_v22  ;;  %v2474_v22 = vld [vmem:[#allocation2 + $0x90] sm:$0xff] }
 0x4d7   :  { %v12053_v52 = vpop.eup %12052 }
 0x4d8   :  { %v1811_v57 = vmul.f32 %v12053_v52, %v1803_v46  ;;  %v1807_v60 = vmul.f32 %v12053_v52, %v1799_v23  ;;  %v1808_v26 = vmul.f32 %v12053_v52, %v1800_v17  ;;  %v1809_v62 = vmul.f32 %v12053_v52, %v1801_v25  ;;  %v12677_v17 = vld [vmem:[#allocation2 + $0x38] sm:$0xff]  ;;  %v2601_v23 = vld [vmem:[%s14010_s7 + $0x10] sm:$0xff]  ;;  %v2600_v25 = vld [vmem:[%s14010_s7 + $0x8] sm:$0xff] }
 0x4d9   :  { %v1810_v55 = vmul.f32 %v12053_v52, %v1802_v18  ;;  %v1812_v1 = vmul.f32 %v12053_v52, %v1804_v19  ;;  %v12681_v18 = vld [vmem:[#allocation2 + $0x40] sm:$0xff]  ;;  %v12685_v19 = vld [vmem:[#allocation2 + $0x48] sm:$0xff]  ;;  %v2602_v46 = vld [vmem:[%s14010_s7 + $0x18] sm:$0xff] }
 0x4da   :  { %v1822_v10 = vmul.f32 %v9598_v53, %v1811_v57  ;;  %v1818_v56 = vmul.f32 %v9598_v53, %v1807_v60  ;;  %v1819_v27 = vmul.f32 %v9598_v53, %v1808_v26  ;;  %v1820_v29 = vmul.f32 %v9598_v53, %v1809_v62 }
 0x4db   :  { %v1821_v30 = vmul.f32 %v9598_v53, %v1810_v55  ;;  %v1823_v34 = vmul.f32 %v9598_v53, %v1812_v1 }
 0x4dc   :  { %v1829_v24 = vadd.f32 %v9599_v63, %v1818_v56  ;;  %v1830_v61 = vadd.f32 %v9599_v63, %v1819_v27  ;;  %v1831_v32 = vadd.f32 %v9599_v63, %v1820_v29  ;;  %v1833_v39 = vadd.f32 %v9599_v63, %v1822_v10  ;;  %v9630_v29 = vld [vmem:[#allocation4 + $0x1e6] ss:$0 sm:$0xff] }
 0x4dd   :  { %v1832_v15 = vadd.f32 %v9599_v63, %v1821_v30  ;;  %v1834_v47 = vadd.f32 %v9599_v63, %v1823_v34 }
 0x4de   :  { %v1835_v21 = vmax.f32 %v1829_v24, 0.0  ;;  %v1836_v35 = vmax.f32 %v1830_v61, 0.0  ;;  %v1837_v38 = vmax.f32 %v1831_v32, 0.0  ;;  %v1839_v48 = vmax.f32 %v1833_v39, 0.0 }
 0x4df   :  { %v1838_v42 = vmax.f32 %v1832_v15, 0.0 }
 0x4e0   :  { %v1841_v40 = vmul.f32 %v1835_v21, %v12441_v33  ;;  %v1842_v59 = vmul.f32 %v1836_v35, %v12437_v28  ;;  %v1843_v43 = vmul.f32 %v1837_v38, %v12453_v54  ;;  %v1840_v33 = vmax.f32 %v1834_v47, 0.0  ;;  %v12709_v38 = vld [vmem:[#allocation4 + $0x1f8] sm:$0xff] }
 0x4e1   :  { %v1844_v28 = vmul.f32 %v1838_v42, %v12449_v44  ;;  %v1845_v9 = vmul.f32 %v1839_v48, %v12466_v12  ;;  %v12644_v44 = vld [vmem:[#allocation2] sm:$0xff]  ;;  %v12715_v48 = vld [vmem:[#allocation4 + $0x1f0] sm:$0xff] }
 0x4e2   :  { %11057 = vmatprep.mubr.msk.f32.mxu0 %vm817_vm2, %v1841_v40  ;;  %11074 = vmatprep.mubr.msk.f32.mxu1 %vm817_vm2, %v1841_v40  ;;  %v1846_v54 = vmul.f32 %v1840_v33, %v12460_v4  ;;  %v12653_v4 = vld [vmem:[#allocation2 + $0x30] sm:$0xff] }
 0x4e3   :  { %11058 = vmatmul.mubr.msk.f32.vlgmr.msra.gmra.mxu0 %vm817_vm2, %v1842_v59  ;;  %11075 = vmatmul.mubr.msk.f32.vlgmr.msra.gmra.mxu1 %vm817_vm2, %v1842_v59 }
 0x4e4   :  { %11060 = vmatprep.mubr.msk.f32.mxu0 %vm817_vm2, %v1843_v43  ;;  %11077 = vmatprep.mubr.msk.f32.mxu1 %vm817_vm2, %v1843_v43 }
 0x4e5   :  { %11084 = vmatpush3.msra.mxu0 %v12581_v0  ;;  %v1855_v0 = vld [vmem:[#allocation4 + $0x1c0] sm:$0xff] }
 0x4e6   :  { %11085 = vmatprep.subr.mxu0 %v1857_v45 }
 0x4e7   :  { %11061 = vmatmul.mubr.msk.f32.gmra.mxu0 %vm817_vm2, %v1844_v28  ;;  %11078 = vmatmul.mubr.msk.f32.gmra.mxu1 %vm817_vm2, %v1844_v28 }
 0x4e8   :  { %11086 = vmatpush3.msra.mxu0 %v1857_v45  ;;  %11063 = vmatprep.mubr.msk.f32.mxu0 %vm817_vm2, %v1845_v9 }
 0x4e9   :  { %11080 = vmatprep.mubr.msk.f32.mxu1 %vm817_vm2, %v1845_v9  ;;  %11087 = vmatprep.subr.mxu0 %v1856_v49 }
 0x4ea   :  { %11088 = vmatpush3.msra.mxu0 %v1856_v49 }
 0x4eb   :  { %11064 = vmatmul.mubr.msk.f32.gmra.mxu0 %vm817_vm2, %v1846_v54  ;;  %11081 = vmatmul.mubr.msk.f32.gmra.mxu1 %vm817_vm2, %v1846_v54 }
 0x4ec   :  { %11089 = vmatprep.subr.mxu0 %v1855_v0  ;;  %11091 = vmatprep.mubr.msk.f32.mxu0 %vm817_vm2, %v1841_v40 }
 0x4ed   :  { %11090 = vmatpush3.msra.mxu0 %v1855_v0  ;;  %11112 = vmatprep.mubr.msk.f32.mxu1 %vm120_vm0, %v12644_v44 }
 0x4ef   :  { %11092 = vmatmul.mubr.msk.f32.vlgmr.msra.gmra.mxu0 %vm817_vm2, %v1842_v59 }
 0x4f0   :  { %11094 = vmatprep.mubr.msk.f32.mxu0 %vm817_vm2, %v1843_v43 }
 0x4f3   :  { %11095 = vmatmul.mubr.msk.f32.gmra.mxu0 %vm817_vm2, %v1844_v28 }
 0x4f4   :  { %11097 = vmatprep.mubr.msk.f32.mxu0 %vm817_vm2, %v1845_v9 }
 0x4f7   :  { %11098 = vmatmul.mubr.msk.f32.gmra.mxu0 %vm817_vm2, %v1846_v54 }
 0x4f8   :  { %11133 = vmatprep.mubr.msk.f32.mxu0 %vm120_vm0, %v12653_v4 }
 0x5a3   :  { %v11059_v12 = vpop.f32.mrf.mxu0  ;;  %v11076_v52 = vpop.f32.mrf.mxu1 }
 0x5a5   :  { %v1943_v50 = vpop.f32.mrf.mxu0  ;;  %v2038_v53 = vpop.f32.mrf.mxu1 }
 0x5a7   :  { %v11062_v51 = vpop.f32.mrf.mxu0  ;;  %v11079_v57 = vpop.f32.mrf.mxu1 }
 0x5a9   :  { %v1953_v58 = vpop.f32.mrf.mxu0  ;;  %v2048_v60 = vpop.f32.mrf.mxu1 }
 0x5ab   :  { %v11065_v2 = vpop.f32.mrf.mxu0  ;;  %v11082_v26 = vpop.f32.mrf.mxu1 }
 0x5ac   :  { %11100 = vmatprep.subr.mxu1 %v11065_v2 }
 0x5ad   :  { %v1963_v3 = vpop.f32.mrf.mxu0  ;;  %11101 = vmatpush3.msra.mxu1 %v11065_v2  ;;  %v2058_v62 = vpop.f32.mrf.mxu1 }
 0x5ae   :  { %11102 = vmatprep.subr.mxu1 %v1963_v3 }
 0x5af   :  { %v11093_v37 = vpop.f32.mrf.mxu0  ;;  %11103 = vmatpush3.msra.mxu1 %v1963_v3 }
 0x5b0   :  { %11104 = vmatprep.subr.mxu1 %v11062_v51 }
 0x5b1   :  { %v2133_v5 = vpop.f32.mrf.mxu0  ;;  %11105 = vmatpush3.msra.mxu1 %v11062_v51  ;;  %v12722_v51 = vld [vmem:[#allocation4 + $0x208] sm:$0xff] }
 0x5b2   :  { %11106 = vmatprep.subr.mxu1 %v1953_v58 }
 0x5b3   :  { %v11096_v6 = vpop.f32.mrf.mxu0  ;;  %11107 = vmatpush3.msra.mxu1 %v1953_v58 }
 0x5b4   :  { %11108 = vmatprep.subr.mxu1 %v11059_v12 }
 0x5b5   :  { %v2143_v36 = vpop.f32.mrf.mxu0  ;;  %11109 = vmatpush3.msra.mxu1 %v11059_v12 }
 0x5b6   :  { %11110 = vmatprep.subr.mxu1 %v1943_v50 }
 0x5b7   :  { %v11099_v7 = vpop.f32.mrf.mxu0  ;;  %11111 = vmatpush3.msra.mxu1 %v1943_v50 }
 0x5b8   :  { %11113 = vmatmul.mubr.msk.f32.vlgmr.msra.gmra.mxu1 %vm120_vm0, %v12657_v8  ;;  %11121 = vmatprep.subr.mxu0 %v11099_v7 }
 0x5b9   :  { %v2153_v13 = vpop.f32.mrf.mxu0  ;;  %11122 = vmatpush3.msra.mxu0 %v11099_v7  ;;  %11115 = vmatprep.mubr.msk.f32.mxu1 %vm120_vm0, %v12661_v14  ;;  %v12730_v7 = vld [vmem:[#allocation4 + $0x200] sm:$0xff] }
 0x5ba   :  { %11123 = vmatprep.subr.mxu0 %v2153_v13 }
 0x5bb   :  { %11124 = vmatpush3.msra.mxu0 %v2153_v13 }
 0x5bc   :  { %11116 = vmatmul.mubr.msk.f32.gmra.mxu1 %vm120_vm0, %v12665_v31  ;;  %11125 = vmatprep.subr.mxu0 %v11096_v6 }
 0x5bd   :  { %11126 = vmatpush3.msra.mxu0 %v11096_v6  ;;  %11118 = vmatprep.mubr.msk.f32.mxu1 %vm120_vm0, %v12669_v16 }
 0x5be   :  { %11127 = vmatprep.subr.mxu0 %v2143_v36 }
 0x5bf   :  { %11128 = vmatpush3.msra.mxu0 %v2143_v36 }
 0x5c0   :  { %11119 = vmatmul.mubr.msk.f32.gmra.mxu1 %vm120_vm0, %v12673_v11  ;;  %11129 = vmatprep.subr.mxu0 %v11093_v37 }
 0x5c1   :  { %11130 = vmatpush3.msra.mxu0 %v11093_v37  ;;  %11154 = vmatprep.mubr.msk.f32.mxu1 %vm120_vm0, %v2474_v22 }
 0x5c2   :  { %11131 = vmatprep.subr.mxu0 %v2133_v5 }
 0x5c3   :  { %11132 = vmatpush3.msra.mxu0 %v2133_v5 }
 0x5c4   :  { %11134 = vmatmul.mubr.msk.f32.vlgmr.msra.gmra.mxu0 %vm120_vm0, %v12677_v17  ;;  %11163 = vmatprep.subr.mxu0 %v2602_v46 }
 0x5c5   :  { %11136 = vmatprep.mubr.msk.f32.mxu0 %vm120_vm0, %v12681_v18  ;;  %11164 = vmatpush3.msra.mxu0 %v2602_v46 }
 0x5c6   :  { %11165 = vmatprep.subr.mxu0 %v2601_v23 }
 0x5c7   :  { %11166 = vmatpush3.msra.mxu0 %v2601_v23 }
 0x5c8   :  { %11137 = vmatmul.mubr.msk.f32.gmra.mxu0 %vm120_vm0, %v12685_v19  ;;  %11167 = vmatprep.subr.mxu0 %v2600_v25 }
 0x5c9   :  { %11139 = vmatprep.mubr.msk.f32.mxu0 %vm120_vm0, %v12689_v20  ;;  %11168 = vmatpush3.msra.mxu0 %v2600_v25 }
 0x5cc   :  { %11140 = vmatmul.mubr.msk.f32.gmra.mxu0 %vm120_vm0, %v12693_v41 }
 0x678   :  { %v11114_v63 = vpop.f32.mrf.mxu1 }
 0x679   :  { %v2234_v56 = vadd.f32 %v11114_v63, %v11076_v52 }
 0x67a   :  { %v2228_v55 = vpop.f32.mrf.mxu1 }
 0x67b   :  { %v2229_v30 = vadd.f32 %v2228_v55, %v2038_v53  ;;  %v12739_v55 = vld [vmem:[#allocation4 + $0x210] sm:$0xff] }
 0x67c   :  { %v11117_v1 = vpop.f32.mrf.mxu1 }
 0x67d   :  { %v2244_v15 = vadd.f32 %v11117_v1, %v11079_v57 }
 0x67e   :  { %v2238_v10 = vpop.f32.mrf.mxu1 }
 0x67f   :  { %v2239_v42 = vadd.f32 %v2238_v10, %v2048_v60  ;;  %v12736_v60 = vld [vmem:[#allocation4 + $0x218] sm:$0xff] }
 0x680   :  { %v11120_v61 = vpop.f32.mrf.mxu1 }
 0x681   :  { %v2254_v33 = vadd.f32 %v11120_v61, %v11082_v26 }
 0x682   :  { %v2248_v47 = vpop.f32.mrf.mxu1 }
 0x683   :  { %v2249_v54 = vadd.f32 %v2248_v47, %v2058_v62 }
 0x684   :  { %v11135_v27 = vpop.f32.mrf.mxu0 }
 0x685   :  { %v2353_v24 = vadd.f32 %v11135_v27, %v2234_v56 }
 0x686   :  { %v2323_v32 = vpop.f32.mrf.mxu0 }
 0x687   :  { %v12707_v34 = vadd.f32 %v9630_v29, %v2353_v24  ;;  %v2352_v21 = vadd.f32 %v2323_v32, %v2229_v30 }
 0x688   :  { %v11138_v35 = vpop.f32.mrf.mxu0 }
 0x689   :  { %v2370_v39 = vmul.f32 %v12709_v38, %v12707_v34  ;;  %v12713_v40 = vadd.f32 %v9630_v29, %v2352_v21  ;;  %v2355_v59 = vadd.f32 %v11138_v35, %v2244_v15 }
 0x68a   :  { %v2333_v43 = vpop.f32.mrf.mxu0 }
 0x68b   :  { %v2369_v45 = vmul.f32 %v12715_v48, %v12713_v40  ;;  %v12719_v28 = vadd.f32 %v9630_v29, %v2355_v59  ;;  %v2354_v9 = vadd.f32 %v2333_v43, %v2239_v42  ;;  %v2394_v0 = vmul.f32 %v2370_v39, %v2370_v39 }
 0x68c   :  { %v11141_v49 = vpop.f32.mrf.mxu0  ;;  %v2376_v6 = vsel %vm817_vm2, %v2370_v39, 0.0 }
 0x68d   :  { %v2393_v12 = vmul.f32 %v2369_v45, %v2369_v45  ;;  %v2375_v50 = vsel %vm817_vm2, %v2369_v45, 0.0  ;;  %v2372_v58 = vmul.f32 %v12722_v51, %v12719_v28  ;;  %v12726_v2 = vadd.f32 %v9630_v29, %v2354_v9 }
 0x68e   :  { %v2357_v3 = vadd.f32 %v11141_v49, %v2254_v33  ;;  %v2343_v37 = vpop.f32.mrf.mxu0  ;;  %v2400_v46 = vsel %vm817_vm2, %v2394_v0, 0.0  ;;  %v2377_v23 = vadd.f32 %v2376_v6, %v2375_v50 }
 0x68f   :  { %v2356_v5 = vadd.f32 %v2343_v37, %v2249_v54  ;;  %v2399_v36 = vsel %vm817_vm2, %v2393_v12, 0.0  ;;  %v2371_v13 = vmul.f32 %v12730_v7, %v12726_v2  ;;  %v2396_v52 = vmul.f32 %v2372_v58, %v2372_v58 }
 0x690   :  { %v2368_v22 = vadd.f32 %v9630_v29, %v2357_v3  ;;  %v2401_v62 = vadd.f32 %v2400_v46, %v2399_v36  ;;  %v2380_v10 = vsel %vm817_vm2, %v2372_v58, 0.0 }
 0x691   :  { %v2367_v25 = vadd.f32 %v9630_v29, %v2356_v5  ;;  %v2378_v53 = vsel %vm817_vm2, %v2371_v13, 0.0  ;;  %v2395_v57 = vmul.f32 %v2371_v13, %v2371_v13  ;;  %v2404_v61 = vsel %vm817_vm2, %v2396_v52, 0.0 }
 0x692   :  { %v2374_v26 = vmul.f32 %v12736_v60, %v2368_v22  ;;  %v2379_v63 = vadd.f32 %v2378_v53, %v2377_v23 }
 0x693   :  { %v2373_v1 = vmul.f32 %v12739_v55, %v2367_v25  ;;  %v2402_v56 = vsel %vm817_vm2, %v2395_v57, 0.0 }
 0x694   :  { %v2403_v27 = vadd.f32 %v2402_v56, %v2401_v62  ;;  %v2381_v29 = vadd.f32 %v2380_v10, %v2379_v63  ;;  %v2398_v32 = vmul.f32 %v2374_v26, %v2374_v26  ;;  %v2384_v39 = vsel %vm817_vm2, %v2374_v26, 0.0 }
 0x695   :  { %v2382_v30 = vsel %vm817_vm2, %v2373_v1, 0.0  ;;  %v2397_v24 = vmul.f32 %v2373_v1, %v2373_v1  ;;  %v9631_v1 = vld [vmem:[#allocation4 + $0x1e7] ss:$0 sm:$0xff] }
 0x696   :  { %v2383_v15 = vadd.f32 %v2382_v30, %v2381_v29  ;;  %v2405_v21 = vadd.f32 %v2404_v61, %v2403_v27  ;;  %v2408_v47 = vsel %vm817_vm2, %v2398_v32, 0.0  ;;  %v9632_v61 = vld [vmem:[#allocation4 + $0x1e8] ss:$0 sm:$0xff] }
 0x697   :  { %v2406_v35 = vsel %vm817_vm2, %v2397_v24, 0.0 }
 0x698   :  { %v2385_v59 = vadd.f32 %v2384_v39, %v2383_v15  ;;  %v2407_v42 = vadd.f32 %v2406_v35, %v2405_v21 }
 0x69a   :  { %v2386_v43 = vrot.slane %v2385_v59, 4  ;;  %v2409_v45 = vadd.f32 %v2408_v47, %v2407_v42 }
 0x69c   :  { %v2387_v33 = vadd.f32 %v2386_v43, %v2385_v59  ;;  %v2410_v9 = vrot.slane %v2409_v45, 4 }
 0x69e   :  { %v2388_v49 = vrot.slane %v2387_v33, 2  ;;  %v2411_v54 = vadd.f32 %v2410_v9, %v2409_v45 }
 0x6a0   :  { %v2389_v0 = vadd.f32 %v2388_v49, %v2387_v33  ;;  %v2412_v12 = vrot.slane %v2411_v54, 2 }
 0x6a2   :  { %v2390_v50 = vrot.slane %v2389_v0, 1  ;;  %v2413_v58 = vadd.f32 %v2412_v12, %v2411_v54 }
 0x6a4   :  { %v2391_v3 = vadd.f32 %v2390_v50, %v2389_v0  ;;  %v2414_v37 = vrot.slane %v2413_v58, 1 }
 0x6a6   :  { %v2392_v5 = vmul.f32 0.25, %v2391_v3  ;;  %v2415_v6 = vadd.f32 %v2414_v37, %v2413_v58  ;;  %v2475_v3 = vld [vmem:[#allocation2 + $0x98] sm:$0xff]  ;;  %v2476_v37 = vld [vmem:[#allocation2 + $0xa0] sm:$0xff] }
 0x6a8   :  { %v2416_v36 = vmul.f32 0.25, %v2415_v6  ;;  %v2417_v13 = vmul.f32 %v2392_v5, %v2392_v5  ;;  %v2424_v53 = vsub.f32 %v2367_v25, %v2392_v5  ;;  %v2425_v57 = vsub.f32 %v2368_v22, %v2392_v5  ;;  %v2604_v6 = vld [vmem:[%s14010_s7 + $0x28] sm:$0xff] }
 0x6a9   :  { %v2423_v26 = vsub.f32 %v12719_v28, %v2392_v5  ;;  %v2422_v62 = vsub.f32 %v12726_v2, %v2392_v5  ;;  %v2421_v10 = vsub.f32 %v12707_v34, %v2392_v5  ;;  %v2420_v56 = vsub.f32 %v12713_v40, %v2392_v5  ;;  %v2479_v5 = vld [vmem:[#allocation2 + $0xb8] sm:$0xff] }
 0x6aa   :  { %v2418_v46 = vsub.f32 %v2416_v36, %v2417_v13  ;;  %v2599_v36 = vld [vmem:[%s14010_s7] sm:$0xff] }
 0x6ab   :  { %11169 = vmatprep.subr.mxu0 %v2599_v36  ;;  %v2603_v13 = vld [vmem:[%s14010_s7 + $0x20] sm:$0xff] }
 0x6ac   :  { %v2419_v23 = vmax.f32 %v2418_v46, 0.0  ;;  %11170 = vmatpush3.msra.mxu0 %v2599_v36  ;;  %v2610_v46 = vld [vmem:[%s14010_s7 + $0x58] sm:$0xff] }
 0x6ad   :  { %11197 = vmatprep.subr.mxu0 %v2610_v46 }
 0x6ae   :  { %v2426_v52 = vadd.f32 1e-05, %v2419_v23 }
 0x6b0   :  { %12054 = vrsqrt.f32 %v2426_v52 }
 0x6bd   :  { %v12055_v63 = vpop.eup %12054 }
 0x6be   :  { %v2432_v27 = vmul.f32 %v12055_v63, %v2424_v53  ;;  %v2433_v29 = vmul.f32 %v12055_v63, %v2425_v57  ;;  %v2431_v30 = vmul.f32 %v12055_v63, %v2423_v26  ;;  %v2430_v24 = vmul.f32 %v12055_v63, %v2422_v62  ;;  %v2609_v53 = vld [vmem:[%s14010_s7 + $0x50] sm:$0xff]  ;;  %v2608_v62 = vld [vmem:[%s14010_s7 + $0x48] sm:$0xff] }
 0x6bf   :  { %v2429_v32 = vmul.f32 %v12055_v63, %v2421_v10  ;;  %v2428_v15 = vmul.f32 %v12055_v63, %v2420_v56  ;;  %v2607_v10 = vld [vmem:[%s14010_s7 + $0x40] sm:$0xff] }
 0x6c0   :  { %v2444_v21 = vmul.f32 %v9631_v1, %v2433_v29  ;;  %v2443_v25 = vmul.f32 %v9631_v1, %v2432_v27  ;;  %v2442_v22 = vmul.f32 %v9631_v1, %v2431_v30  ;;  %v2441_v35 = vmul.f32 %v9631_v1, %v2430_v24 }
 0x6c1   :  { %v2440_v59 = vmul.f32 %v9631_v1, %v2429_v32  ;;  %v2439_v43 = vmul.f32 %v9631_v1, %v2428_v15 }
 0x6c2   :  { %v2455_v28 = vadd.f32 %v9632_v61, %v2444_v21  ;;  %v2454_v39 = vadd.f32 %v9632_v61, %v2443_v25  ;;  %v2453_v2 = vadd.f32 %v9632_v61, %v2442_v22  ;;  %v2452_v34 = vadd.f32 %v9632_v61, %v2441_v35 }
 0x6c3   :  { %v2451_v33 = vadd.f32 %v9632_v61, %v2440_v59  ;;  %v2450_v54 = vadd.f32 %v9632_v61, %v2439_v43 }
 0x6c4   :  { %v2461_v42 = vmax.f32 %v2455_v28, 0.0  ;;  %v2460_v47 = vmax.f32 %v2454_v39, 0.0  ;;  %v2459_v45 = vmax.f32 %v2453_v2, 0.0  ;;  %v2458_v49 = vmax.f32 %v2452_v34, 0.0 }
 0x6c5   :  { %v2457_v12 = vmax.f32 %v2451_v33, 0.0  ;;  %v2456_v58 = vmax.f32 %v2450_v54, 0.0 }
 0x6c6   :  { %v2467_v40 = vmul.f32 %v12736_v60, %v2461_v42  ;;  %v2466_v9 = vmul.f32 %v12739_v55, %v2460_v47  ;;  %v2465_v0 = vmul.f32 %v12722_v51, %v2459_v45  ;;  %v2464_v50 = vmul.f32 %v12730_v7, %v2458_v49  ;;  %v2606_v51 = vld [vmem:[%s14010_s7 + $0x38] sm:$0xff]  ;;  %v2605_v7 = vld [vmem:[%s14010_s7 + $0x30] sm:$0xff] }
 0x6c7   :  { %v2463_v60 = vmul.f32 %v12709_v38, %v2457_v12  ;;  %v2462_v55 = vmul.f32 %v12715_v48, %v2456_v58  ;;  %v2477_v38 = vld [vmem:[#allocation2 + $0xa8] sm:$0xff]  ;;  %v2478_v48 = vld [vmem:[#allocation2 + $0xb0] sm:$0xff] }
 0x6c8   :  { %11142 = vmatprep.subr.mxu1 %v2467_v40 }
 0x6c9   :  { %11143 = vmatpush3.msra.mxu1 %v2467_v40  ;;  %v9669_v40 = vld [vmem:[%s14010_s7 + $0xf0] ss:$0 sm:$0xff] }
 0x6ca   :  { %11144 = vmatprep.subr.mxu1 %v2466_v9 }
 0x6cb   :  { %11145 = vmatpush3.msra.mxu1 %v2466_v9 }
 0x6cc   :  { %11146 = vmatprep.subr.mxu1 %v2465_v0 }
 0x6cd   :  { %11147 = vmatpush3.msra.mxu1 %v2465_v0 }
 0x6ce   :  { %11148 = vmatprep.subr.mxu1 %v2464_v50 }
 0x6cf   :  { %11149 = vmatpush3.msra.mxu1 %v2464_v50 }
 0x6d0   :  { %11150 = vmatprep.subr.mxu1 %v2463_v60 }
 0x6d1   :  { %11151 = vmatpush3.msra.mxu1 %v2463_v60 }
 0x6d2   :  { %11152 = vmatprep.subr.mxu1 %v2462_v55 }
 0x6d3   :  { %11153 = vmatpush3.msra.mxu1 %v2462_v55  ;;  %v12865_v55 = vld [vmem:[%s14010_s7 + $0x108] sm:$0xff] }
 0x6d4   :  { %11155 = vmatmul.mubr.msk.f32.vlgmr.msra.gmra.mxu1 %vm120_vm0, %v2475_v3  ;;  %11180 = vmatprep.subr.mxu1 %v2606_v51 }
 0x6d5   :  { %11157 = vmatprep.mubr.msk.f32.mxu1 %vm120_vm0, %v2476_v37  ;;  %11181 = vmatpush3.msra.mxu1 %v2606_v51  ;;  %v12870_v51 = vld [vmem:[%s14010_s7 + $0x100] sm:$0xff] }
 0x6d6   :  { %11182 = vmatprep.subr.mxu1 %v2605_v7 }
 0x6d7   :  { %11183 = vmatpush3.msra.mxu1 %v2605_v7 }
 0x6d8   :  { %11158 = vmatmul.mubr.msk.f32.gmra.mxu1 %vm120_vm0, %v2477_v38  ;;  %11184 = vmatprep.subr.mxu1 %v2604_v6 }
 0x6d9   :  { %11160 = vmatprep.mubr.msk.f32.mxu1 %vm120_vm0, %v2478_v48  ;;  %11185 = vmatpush3.msra.mxu1 %v2604_v6 }
 0x6da   :  { %11186 = vmatprep.subr.mxu1 %v2603_v13 }
 0x6db   :  { %11187 = vmatpush3.msra.mxu1 %v2603_v13 }
 0x6dc   :  { %11161 = vmatmul.mubr.msk.f32.gmra.mxu1 %vm120_vm0, %v2479_v5 }
 0x794   :  { %v11156_v23 = vpop.f32.mrf.mxu1 }
 0x796   :  { %v2564_v52 = vpop.f32.mrf.mxu1 }
 0x797   :  { %11171 = vmatprep.mubr.msk.f32.mxu0 %vm817_vm2, %v2564_v52  ;;  %11188 = vmatprep.mubr.msk.f32.mxu1 %vm817_vm2, %v2564_v52 }
 0x798   :  { %v11159_v57 = vpop.f32.mrf.mxu1  ;;  %11172 = vmatmul.mubr.msk.f32.vlgmr.msra.gmra.mxu0 %vm817_vm2, %v11156_v23  ;;  %11189 = vmatmul.mubr.msk.f32.vlgmr.msra.gmra.mxu1 %vm817_vm2, %v11156_v23 }
 0x799   :  { %11198 = vmatpush3.msra.mxu0 %v2610_v46  ;;  %v12881_v46 = vld [vmem:[%s14010_s7 + $0x118] sm:$0xff] }
 0x79a   :  { %v2574_v26 = vpop.f32.mrf.mxu1  ;;  %11199 = vmatprep.subr.mxu0 %v2609_v53 }
 0x79b   :  { %11174 = vmatprep.mubr.msk.f32.mxu0 %vm817_vm2, %v2574_v26  ;;  %11191 = vmatprep.mubr.msk.f32.mxu1 %vm817_vm2, %v2574_v26 }
 0x79c   :  { %v11162_v63 = vpop.f32.mrf.mxu1  ;;  %11175 = vmatmul.mubr.msk.f32.gmra.mxu0 %vm817_vm2, %v11159_v57  ;;  %11192 = vmatmul.mubr.msk.f32.gmra.mxu1 %vm817_vm2, %v11159_v57 }
 0x79d   :  { %11200 = vmatpush3.msra.mxu0 %v2609_v53 }
 0x79e   :  { %v2584_v1 = vpop.f32.mrf.mxu1  ;;  %11201 = vmatprep.subr.mxu0 %v2608_v62 }
 0x79f   :  { %11177 = vmatprep.mubr.msk.f32.mxu0 %vm817_vm2, %v2584_v1  ;;  %11194 = vmatprep.mubr.msk.f32.mxu1 %vm817_vm2, %v2584_v1 }
 0x7a0   :  { %11202 = vmatpush3.msra.mxu0 %v2608_v62  ;;  %11195 = vmatmul.mubr.msk.f32.gmra.mxu1 %vm817_vm2, %v11162_v63  ;;  %v12892_v62 = vld [vmem:[%s14010_s7 + $0x120] sm:$0xff] }
 0x7a1   :  { %11178 = vmatmul.mubr.msk.f32.gmra.mxu0 %vm817_vm2, %v11162_v63  ;;  %11203 = vmatprep.subr.mxu0 %v2607_v10 }
 0x7a2   :  { %11205 = vmatprep.mubr.msk.f32.mxu0 %vm817_vm2, %v2564_v52  ;;  %11204 = vmatpush3.msra.mxu0 %v2607_v10  ;;  %v12902_v10 = vld [vmem:[%s14010_s7 + $0x128] sm:$0xff] }
 0x7a3   :  { %11226 = vmatprep.mubr.msk.f32.mxu1 %vm120_vm0, %v12644_v44 }
 0x7a5   :  { %11206 = vmatmul.mubr.msk.f32.vlgmr.msra.gmra.mxu0 %vm817_vm2, %v11156_v23 }
 0x7a6   :  { %11208 = vmatprep.mubr.msk.f32.mxu0 %vm817_vm2, %v2574_v26 }
 0x7a9   :  { %11209 = vmatmul.mubr.msk.f32.gmra.mxu0 %vm817_vm2, %v11159_v57 }
 0x7aa   :  { %11211 = vmatprep.mubr.msk.f32.mxu0 %vm817_vm2, %v2584_v1 }
 0x7ad   :  { %11212 = vmatmul.mubr.msk.f32.gmra.mxu0 %vm817_vm2, %v11162_v63  ;;  %v12897_v63 = vld [vmem:[%s14010_s7 + $0x110] sm:$0xff] }
 0x7ae   :  { %11247 = vmatprep.mubr.msk.f32.mxu0 %vm120_vm0, %v12653_v4 }
 0x858   :  { %v11173_v56 = vpop.f32.mrf.mxu0 }
 0x85a   :  { %v2695_v27 = vpop.f32.mrf.mxu0 }
 0x85c   :  { %v11176_v29 = vpop.f32.mrf.mxu0 }
 0x85e   :  { %v2705_v30 = vpop.f32.mrf.mxu0 }
 0x861   :  { %v11179_v24 = vpop.f32.mrf.mxu0 }
 0x862   :  { %11214 = vmatprep.subr.mxu1 %v11179_v24 }
 0x863   :  { %v2715_v44 = vpop.f32.mrf.mxu0  ;;  %11215 = vmatpush3.msra.mxu1 %v11179_v24 }
 0x864   :  { %11216 = vmatprep.subr.mxu1 %v2715_v44 }
 0x865   :  { %v11207_v61 = vpop.f32.mrf.mxu0  ;;  %11217 = vmatpush3.msra.mxu1 %v2715_v44 }
 0x866   :  { %11218 = vmatprep.subr.mxu1 %v11176_v29 }
 0x867   :  { %v2885_v32 = vpop.f32.mrf.mxu0  ;;  %11219 = vmatpush3.msra.mxu1 %v11176_v29 }
 0x868   :  { %11220 = vmatprep.subr.mxu1 %v2705_v30 }
 0x869   :  { %v11210_v15 = vpop.f32.mrf.mxu0  ;;  %11221 = vmatpush3.msra.mxu1 %v2705_v30 }
 0x86a   :  { %11222 = vmatprep.subr.mxu1 %v11173_v56 }
 0x86b   :  { %v2895_v21 = vpop.f32.mrf.mxu0  ;;  %11223 = vmatpush3.msra.mxu1 %v11173_v56 }
 0x86c   :  { %11224 = vmatprep.subr.mxu1 %v2695_v27 }
 0x86d   :  { %v11213_v4 = vpop.f32.mrf.mxu0  ;;  %11225 = vmatpush3.msra.mxu1 %v2695_v27 }
 0x86e   :  { %11227 = vmatmul.mubr.msk.f32.vlgmr.msra.gmra.mxu1 %vm120_vm0, %v12657_v8  ;;  %11235 = vmatprep.subr.mxu0 %v11213_v4  ;;  %v3230_v8 = vld [vmem:[%s14010_s7 + $0xa8] sm:$0xff] }
 0x86f   :  { %12032 = vmatprep.subr.mxu1 %v11213_v4  ;;  %v2905_v25 = vpop.f32.mrf.mxu0  ;;  %11236 = vmatpush3.msra.mxu0 %v11213_v4 }
 0x870   :  { %12038 = vmatpush3.msra.mxu1 %v11213_v4  ;;  %11237 = vmatprep.subr.mxu0 %v2905_v25 }
 0x871   :  { %12033 = vmatprep.subr.mxu1 %v2905_v25  ;;  %11229 = vmatprep.mubr.msk.f32.mxu1 %vm120_vm0, %v12661_v14  ;;  %v3228_v14 = vld [vmem:[%s14010_s7 + $0x98] sm:$0xff] }
 0x872   :  { %11238 = vmatpush3.msra.mxu0 %v2905_v25  ;;  %12039 = vmatpush3.msra.mxu1 %v2905_v25 }
 0x873   :  { %11230 = vmatmul.mubr.msk.f32.gmra.mxu1 %vm120_vm0, %v12665_v31  ;;  %11239 = vmatprep.subr.mxu0 %v11210_v15  ;;  %v3229_v31 = vld [vmem:[%s14010_s7 + $0xa0] sm:$0xff] }
 0x874   :  { %12034 = vmatprep.subr.mxu1 %v11210_v15  ;;  %11240 = vmatpush3.msra.mxu0 %v11210_v15 }
 0x875   :  { %12040 = vmatpush3.msra.mxu1 %v11210_v15  ;;  %11241 = vmatprep.subr.mxu0 %v2895_v21 }
 0x876   :  { %12035 = vmatprep.subr.mxu1 %v2895_v21  ;;  %11232 = vmatprep.mubr.msk.f32.mxu1 %vm120_vm0, %v12669_v16  ;;  %v3227_v16 = vld [vmem:[%s14010_s7 + $0x90] sm:$0xff] }
 0x877   :  { %11242 = vmatpush3.msra.mxu0 %v2895_v21  ;;  %12041 = vmatpush3.msra.mxu1 %v2895_v21 }
 0x878   :  { %11233 = vmatmul.mubr.msk.f32.gmra.mxu1 %vm120_vm0, %v12673_v11  ;;  %11243 = vmatprep.subr.mxu0 %v11207_v61  ;;  %v12848_v11 = vld [vmem:[%s14010_s7 + $0x68] sm:$0xff] }
 0x879   :  { %12036 = vmatprep.subr.mxu1 %v11207_v61  ;;  %11244 = vmatpush3.msra.mxu0 %v11207_v61 }
 0x87a   :  { %12042 = vmatpush3.msra.mxu1 %v11207_v61  ;;  %11245 = vmatprep.subr.mxu0 %v2885_v32 }
 0x87b   :  { %12037 = vmatprep.subr.mxu1 %v2885_v32  ;;  %11246 = vmatpush3.msra.mxu0 %v2885_v32 }
 0x87c   :  { %12043 = vmatpush3.msra.mxu1 %v2885_v32  ;;  %11253 = vmatprep.mubr.msk.f32.mxu1 %vm120_vm0, %v12689_v20 }
 0x87d   :  { %11248 = vmatmul.mubr.msk.f32.vlgmr.msra.gmra.mxu0 %vm120_vm0, %v12677_v17  ;;  %11254 = vmatmul.mubr.msk.f32.vlgmr.msra.gmra.mxu1 %vm120_vm0, %v12693_v41  ;;  %v12854_v17 = vld [vmem:[%s14010_s7 + $0xb8] sm:$0xff] }
 0x87e   :  { %11250 = vmatprep.mubr.msk.f32.mxu0 %vm120_vm0, %v12681_v18  ;;  %11269 = vmatprep.subr.mxu0 %v3230_v8  ;;  %v11190_v18 = vpop.f32.mrf.mxu1 }
 0x87f   :  { %11256 = vmatprep.subr.mxu1 %v3228_v14  ;;  %11270 = vmatpush3.msra.mxu0 %v3230_v8 }
 0x880   :  { %11257 = vmatpush3.msra.mxu1 %v3228_v14  ;;  %11271 = vmatprep.subr.mxu0 %v3229_v31 }
 0x881   :  { %11251 = vmatmul.mubr.msk.f32.gmra.mxu0 %vm120_vm0, %v12685_v19  ;;  %11258 = vmatprep.subr.mxu1 %v3227_v16  ;;  %v2790_v19 = vpop.f32.mrf.mxu1 }
 0x882   :  { %11272 = vmatpush3.msra.mxu0 %v3229_v31  ;;  %11259 = vmatpush3.msra.mxu1 %v3227_v16 }
 0x883   :  { %11295 = vmatprep.subr.mxu0 %v12848_v11  ;;  %11282 = vmatprep.subr.mxu1 %v12854_v17  ;;  %v11193_v20 = vpop.f32.mrf.mxu1 }
 0x885   :  { %v2800_v41 = vpop.f32.mrf.mxu1 }
 0x887   :  { %v11196_v22 = vpop.f32.mrf.mxu1 }
 0x889   :  { %v2810_v35 = vpop.f32.mrf.mxu1 }
 0x92e   :  { %v11228_v28 = vpop.f32.mrf.mxu1 }
 0x92f   :  { %v2986_v34 = vadd.f32 %v11228_v28, %v11190_v18 }
 0x930   :  { %v2980_v39 = vpop.f32.mrf.mxu1 }
 0x931   :  { %v2981_v33 = vadd.f32 %v2980_v39, %v2790_v19 }
 0x933   :  { %v11231_v2 = vpop.f32.mrf.mxu1 }
 0x934   :  { %v2996_v58 = vadd.f32 %v11231_v2, %v11193_v20 }
 0x935   :  { %v2990_v59 = vpop.f32.mrf.mxu1 }
 0x936   :  { %v2991_v38 = vadd.f32 %v2990_v59, %v2800_v41 }
 0x938   :  { %v11234_v42 = vpop.f32.mrf.mxu1 }
 0x939   :  { %v3006_v60 = vadd.f32 %v11234_v42, %v11196_v22 }
 0x93a   :  { %v3000_v47 = vpop.f32.mrf.mxu1 }
 0x93b   :  { %v3001_v0 = vadd.f32 %v3000_v47, %v2810_v35 }
 0x93d   :  { %v11249_v43 = vpop.f32.mrf.mxu0  ;;  %v11255_v45 = vpop.f32.mrf.mxu1 }
 0x93e   :  { %v3105_v9 = vadd.f32 %v11249_v43, %v2986_v34  ;;  %v3109_v48 = vadd.f32 %v11255_v45, %v3006_v60 }
 0x93f   :  { %v3075_v49 = vpop.f32.mrf.mxu0  ;;  %v3095_v54 = vpop.f32.mrf.mxu1 }
 0x940   :  { %v12860_v12 = vadd.f32 %v9669_v40, %v3105_v9  ;;  %v3104_v50 = vadd.f32 %v3075_v49, %v2981_v33  ;;  %v3108_v7 = vadd.f32 %v3095_v54, %v3001_v0  ;;  %v12887_v57 = vadd.f32 %v9669_v40, %v3109_v48 }
 0x941   :  { %v11252_v3 = vpop.f32.mrf.mxu0 }
 0x942   :  { %v12872_v37 = vadd.f32 %v9669_v40, %v3104_v50  ;;  %v3107_v5 = vadd.f32 %v11252_v3, %v2996_v58  ;;  %v3122_v36 = vmul.f32 %v12860_v12, %v12865_v55  ;;  %v12885_v53 = vadd.f32 %v9669_v40, %v3108_v7 }
 0x943   :  { %v3085_v6 = vpop.f32.mrf.mxu0  ;;  %v3126_v32 = vmul.f32 %v12887_v57, %v12902_v10 }
 0x944   :  { %v3121_v13 = vmul.f32 %v12872_v37, %v12870_v51  ;;  %v12883_v23 = vadd.f32 %v9669_v40, %v3107_v5  ;;  %v3106_v52 = vadd.f32 %v3085_v6, %v2991_v38  ;;  %v3147_v1 = vmul.f32 %v3122_v36, %v3122_v36 }
 0x945   :  { %v3129_v30 = vsel %vm3127_vm3, %v3122_v36, 0.0  ;;  %v3125_v44 = vmul.f32 %v12885_v53, %v12892_v62  ;;  %v3151_v22 = vmul.f32 %v3126_v32, %v3126_v32  ;;  %v3137_v59 = vsel %vm3127_vm3, %v3126_v32, 0.0 }
 0x946   :  { %v3146_v26 = vmul.f32 %v3121_v13, %v3121_v13  ;;  %v3128_v56 = vsel %vm3127_vm3, %v3121_v13, 0.0  ;;  %v3124_v27 = vmul.f32 %v12883_v23, %v12881_v46  ;;  %v3117_v29 = vadd.f32 %v9669_v40, %v3106_v52 }
 0x947   :  { %v3130_v15 = vadd.f32 %v3129_v30, %v3128_v56  ;;  %v3153_v21 = vsel %vm3127_vm3, %v3147_v1, 0.0  ;;  %v3150_v16 = vmul.f32 %v3125_v44, %v3125_v44  ;;  %v3135_v35 = vsel %vm3127_vm3, %v3125_v44, 0.0 }
 0x948   :  { %v3152_v24 = vsel %vm3127_vm3, %v3146_v26, 0.0  ;;  %v3123_v61 = vmul.f32 %v3117_v29, %v12897_v63  ;;  %v3149_v4 = vmul.f32 %v3124_v27, %v3124_v27  ;;  %v3133_v18 = vsel %vm3127_vm3, %v3124_v27, 0.0 }
 0x949   :  { %v3154_v14 = vadd.f32 %v3153_v21, %v3152_v24  ;;  %v3159_v42 = vsel %vm3127_vm3, %v3150_v16, 0.0  ;;  %v3161_v43 = vsel %vm3127_vm3, %v3151_v22, 0.0  ;;  %v9670_v24 = vld [vmem:[%s14010_s7 + $0xf1] ss:$0 sm:$0xff] }
 0x94a   :  { %v3131_v25 = vsel %vm3127_vm3, %v3123_v61, 0.0  ;;  %v3148_v8 = vmul.f32 %v3123_v61, %v3123_v61  ;;  %v3157_v28 = vsel %vm3127_vm3, %v3149_v4, 0.0 }
 0x94b   :  { %v3132_v31 = vadd.f32 %v3131_v25, %v3130_v15 }
 0x94c   :  { %v3155_v19 = vsel %vm3127_vm3, %v3148_v8, 0.0 }
 0x94d   :  { %v3134_v20 = vadd.f32 %v3133_v18, %v3132_v31  ;;  %v3156_v41 = vadd.f32 %v3155_v19, %v3154_v14 }
 0x94f   :  { %v3136_v39 = vadd.f32 %v3135_v35, %v3134_v20  ;;  %v3158_v2 = vadd.f32 %v3157_v28, %v3156_v41 }
 0x951   :  { %v3138_v47 = vadd.f32 %v3137_v59, %v3136_v39  ;;  %v3160_v34 = vadd.f32 %v3159_v42, %v3158_v2 }
 0x953   :  { %v3139_v40 = vrot.slane %v3138_v47, 4  ;;  %v3162_v45 = vadd.f32 %v3161_v43, %v3160_v34  ;;  %v3221_v34 = vld [vmem:[%s14010_s7 + $0x60] sm:$0xff]  ;;  %v3231_v43 = vld [vmem:[%s14010_s7 + $0xb0] sm:$0xff] }
 0x955   :  { %v3140_v33 = vadd.f32 %v3139_v40, %v3138_v47  ;;  %v3163_v9 = vrot.slane %v3162_v45, 4 }
 0x957   :  { %v3141_v49 = vrot.slane %v3140_v33, 2  ;;  %v3164_v54 = vadd.f32 %v3163_v9, %v3162_v45  ;;  %v3226_v9 = vld [vmem:[%s14010_s7 + $0x88] sm:$0xff] }
 0x959   :  { %v3142_v0 = vadd.f32 %v3141_v49, %v3140_v33  ;;  %v3165_v50 = vrot.slane %v3164_v54, 2  ;;  %v2593_v49 = vld [vmem:[%s14005_s2] sm:$0xff] }
 0x95b   :  { %v3143_v58 = vrot.slane %v3142_v0, 1  ;;  %v3166_v60 = vadd.f32 %v3165_v50, %v3164_v54  ;;  %v2594_v54 = vld [vmem:[%s14005_s2 + $0x8] sm:$0xff]  ;;  %v3225_v50 = vld [vmem:[%s14010_s7 + $0x80] sm:$0xff] }
 0x95d   :  { %v3144_v3 = vadd.f32 %v3143_v58, %v3142_v0  ;;  %v3167_v7 = vrot.slane %v3166_v60, 1  ;;  %v2595_v0 = vld [vmem:[%s14005_s2 + $0x10] sm:$0xff]  ;;  %v2596_v58 = vld [vmem:[%s14005_s2 + $0x18] sm:$0xff] }
 0x95f   :  { %v3145_v38 = vmul.f32 0.125, %v3144_v3  ;;  %v3168_v48 = vadd.f32 %v3167_v7, %v3166_v60  ;;  %v2597_v60 = vld [vmem:[%s14005_s2 + $0x20] sm:$0xff]  ;;  %v3223_v3 = vld [vmem:[%s14010_s7 + $0x70] sm:$0xff]  ;;  %v2598_v7 = vld [vmem:[%s14005_s2 + $0x28] sm:$0xff] }
 0x961   :  { %v3169_v5 = vmul.f32 0.125, %v3168_v48  ;;  %v3170_v6 = vmul.f32 %v3145_v38, %v3145_v38  ;;  %v3175_v26 = vsub.f32 %v3117_v29, %v3145_v38  ;;  %v3173_v1 = vsub.f32 %v12872_v37, %v3145_v38  ;;  %v9671_v37 = vld [vmem:[%s14010_s7 + $0xf2] ss:$0 sm:$0xff] }
 0x962   :  { %v3174_v56 = vsub.f32 %v12860_v12, %v3145_v38  ;;  %v3176_v27 = vsub.f32 %v12883_v23, %v3145_v38  ;;  %v3177_v44 = vsub.f32 %v12885_v53, %v3145_v38  ;;  %v3178_v61 = vsub.f32 %v12887_v57, %v3145_v38  ;;  %v13014_v38 = vld [vmem:[#allocation2] sm:$0xff]  ;;  %v13018_v48 = vld [vmem:[#allocation2 + $0x30] sm:$0xff] }
 0x963   :  { %v3171_v36 = vsub.f32 %v3169_v5, %v3170_v6 }
 0x965   :  { %v3172_v13 = vmax.f32 %v3171_v36, 0.0 }
 0x967   :  { %v3179_v52 = vadd.f32 1e-05, %v3172_v13 }
 0x969   :  { %12056 = vrsqrt.f32 %v3179_v52 }
 0x976   :  { %v12057_v30 = vpop.eup %12056 }
 0x977   :  { %v3183_v32 = vmul.f32 %v12057_v30, %v3175_v26  ;;  %v3181_v15 = vmul.f32 %v12057_v30, %v3173_v1  ;;  %v3182_v21 = vmul.f32 %v12057_v30, %v3174_v56  ;;  %v3184_v4 = vmul.f32 %v12057_v30, %v3176_v27 }
 0x978   :  { %v3185_v12 = vmul.f32 %v12057_v30, %v3177_v44  ;;  %v3186_v29 = vmul.f32 %v12057_v30, %v3178_v61 }
 0x979   :  { %v3194_v23 = vmul.f32 %v9670_v24, %v3183_v32  ;;  %v3192_v25 = vmul.f32 %v9670_v24, %v3181_v15  ;;  %v3193_v8 = vmul.f32 %v9670_v24, %v3182_v21  ;;  %v3195_v14 = vmul.f32 %v9670_v24, %v3184_v4 }
 0x97a   :  { %v3196_v31 = vmul.f32 %v9670_v24, %v3185_v12  ;;  %v3197_v57 = vmul.f32 %v9670_v24, %v3186_v29 }
 0x97b   :  { %v3203_v16 = vadd.f32 %v9671_v37, %v3192_v25  ;;  %v3204_v18 = vadd.f32 %v9671_v37, %v3193_v8  ;;  %v3205_v53 = vadd.f32 %v9671_v37, %v3194_v23  ;;  %v3206_v19 = vadd.f32 %v9671_v37, %v3195_v14 }
 0x97c   :  { %v3207_v35 = vadd.f32 %v9671_v37, %v3196_v31  ;;  %v3208_v59 = vadd.f32 %v9671_v37, %v3197_v57 }
 0x97d   :  { %v3209_v20 = vmax.f32 %v3203_v16, 0.0  ;;  %v3210_v41 = vmax.f32 %v3204_v18, 0.0  ;;  %v3211_v22 = vmax.f32 %v3205_v53, 0.0  ;;  %v3212_v2 = vmax.f32 %v3206_v19, 0.0 }
 0x97e   :  { %v3213_v47 = vmax.f32 %v3207_v35, 0.0  ;;  %v3214_v45 = vmax.f32 %v3208_v59, 0.0 }
 0x97f   :  { %v3215_v28 = vmul.f32 %v3209_v20, %v12870_v51  ;;  %v3216_v39 = vmul.f32 %v3210_v41, %v12865_v55  ;;  %v3217_v42 = vmul.f32 %v3211_v22, %v12897_v63  ;;  %v3218_v40 = vmul.f32 %v3212_v2, %v12881_v46 }
 0x980   :  { %v3219_v33 = vmul.f32 %v3213_v47, %v12892_v62  ;;  %v13038_v47 = vld [vmem:[#allocation2 + $0x10] sm:$0xff] }
 0x981   :  { %11260 = vmatprep.mubr.msk.f32.mxu1 %vm3127_vm3, %v3215_v28  ;;  %11273 = vmatprep.mubr.msk.f32.mxu0 %vm3127_vm3, %v3215_v28 }
 0x982   :  { %11261 = vmatmul.mubr.msk.f32.vlgmr.msra.gmra.mxu1 %vm3127_vm3, %v3216_v39  ;;  %11274 = vmatmul.mubr.msk.f32.vlgmr.msra.gmra.mxu0 %vm3127_vm3, %v3216_v39 }
 0x983   :  { %11263 = vmatprep.mubr.msk.f32.mxu1 %vm3127_vm3, %v3217_v42  ;;  %11276 = vmatprep.mubr.msk.f32.mxu0 %vm3127_vm3, %v3217_v42 }
 0x984   :  { %11296 = vmatpush3.msra.mxu0 %v12848_v11  ;;  %11283 = vmatpush3.msra.mxu1 %v12854_v17  ;;  %v3224_v11 = vld [vmem:[%s14010_s7 + $0x78] sm:$0xff]  ;;  %v3220_v17 = vmul.f32 %v3214_v45, %v12902_v10  ;;  %v13046_v45 = vld [vmem:[#allocation2 + $0x20] sm:$0xff] }
 0x985   :  { %11297 = vmatprep.subr.mxu0 %v3221_v34  ;;  %11284 = vmatprep.subr.mxu1 %v3231_v43 }
 0x986   :  { %11264 = vmatmul.mubr.msk.f32.gmra.mxu1 %vm3127_vm3, %v3218_v40  ;;  %11277 = vmatmul.mubr.msk.f32.gmra.mxu0 %vm3127_vm3, %v3218_v40 }
 0x987   :  { %11266 = vmatprep.mubr.msk.f32.mxu1 %vm3127_vm3, %v3219_v33  ;;  %11279 = vmatprep.mubr.msk.f32.mxu0 %vm3127_vm3, %v3219_v33 }
 0x988   :  { %11298 = vmatpush3.msra.mxu0 %v3221_v34  ;;  %11285 = vmatpush3.msra.mxu1 %v3231_v43 }
 0x989   :  { %11321 = vmatprep.subr.mxu0 %v3226_v9  ;;  %11308 = vmatprep.subr.mxu1 %v3224_v11 }
 0x98a   :  { %11267 = vmatmul.mubr.msk.f32.gmra.mxu1 %vm3127_vm3, %v3220_v17  ;;  %11280 = vmatmul.mubr.msk.f32.gmra.mxu0 %vm3127_vm3, %v3220_v17 }
 0x98b   :  { %11286 = vmatprep.mubr.msk.f32.mxu1 %vm3127_vm3, %v3215_v28  ;;  %11299 = vmatprep.mubr.msk.f32.mxu0 %vm3127_vm3, %v2593_v49 }
 0x98e   :  { %11287 = vmatmul.mubr.msk.f32.vlgmr.msra.gmra.mxu1 %vm3127_vm3, %v3216_v39  ;;  %11300 = vmatmul.mubr.msk.f32.vlgmr.msra.gmra.mxu0 %vm3127_vm3, %v2594_v54 }
 0x98f   :  { %11289 = vmatprep.mubr.msk.f32.mxu1 %vm3127_vm3, %v3217_v42  ;;  %11322 = vmatpush3.msra.mxu0 %v3226_v9  ;;  %v13034_v42 = vld [vmem:[#allocation2 + $0x8] sm:$0xff] }
 0x990   :  { %11302 = vmatprep.mubr.msk.f32.mxu0 %vm3127_vm3, %v2595_v0  ;;  %11323 = vmatprep.subr.mxu0 %v3225_v50 }
 0x991   :  { %11324 = vmatpush3.msra.mxu0 %v3225_v50  ;;  %11309 = vmatpush3.msra.mxu1 %v3224_v11  ;;  %v13050_v11 = vld [vmem:[#allocation2 + $0x28] sm:$0xff]  ;;  %v13070_v50 = vld [vmem:[#allocation2 + $0x58] sm:$0xff] }
 0x992   :  { %11290 = vmatmul.mubr.msk.f32.gmra.mxu1 %vm3127_vm3, %v3218_v40  ;;  %11303 = vmatmul.mubr.msk.f32.gmra.mxu0 %vm3127_vm3, %v2596_v58  ;;  %v13042_v40 = vld [vmem:[#allocation2 + $0x18] sm:$0xff] }
 0x993   :  { %11292 = vmatprep.mubr.msk.f32.mxu1 %vm3127_vm3, %v3219_v33  ;;  %11305 = vmatprep.mubr.msk.f32.mxu0 %vm3127_vm3, %v2597_v60 }
 0x994   :  { %11310 = vmatprep.subr.mxu1 %v3223_v3 }
 0x995   :  { %11311 = vmatpush3.msra.mxu1 %v3223_v3  ;;  %v4148_v3 = vld [vmem:[%s14010_s7 + $0xd8] sm:$0xff] }
 0x996   :  { %11293 = vmatmul.mubr.msk.f32.gmra.mxu1 %vm3127_vm3, %v3220_v17  ;;  %11306 = vmatmul.mubr.msk.f32.gmra.mxu0 %vm3127_vm3, %v2598_v7  ;;  %v13054_v17 = vld [vmem:[#allocation2 + $0x38] sm:$0xff] }
 0x997   :  { %11312 = vmatprep.mubr.msk.f32.mxu1 %vm3127_vm3, %v2593_v49  ;;  %11325 = vmatprep.mubr.msk.f32.mxu0 %vm3127_vm3, %v2593_v49  ;;  %v13058_v49 = vld [vmem:[#allocation2 + $0x40] sm:$0xff] }
 0x99a   :  { %11313 = vmatmul.mubr.msk.f32.vlgmr.msra.gmra.mxu1 %vm3127_vm3, %v2594_v54  ;;  %11326 = vmatmul.mubr.msk.f32.vlgmr.msra.gmra.mxu0 %vm3127_vm3, %v2594_v54  ;;  %v13062_v54 = vld [vmem:[#allocation2 + $0x48] sm:$0xff] }
 0x99b   :  { %11315 = vmatprep.mubr.msk.f32.mxu1 %vm3127_vm3, %v2595_v0  ;;  %11328 = vmatprep.mubr.msk.f32.mxu0 %vm3127_vm3, %v2595_v0  ;;  %v13066_v0 = vld [vmem:[#allocation2 + $0x50] sm:$0xff] }
 0x99e   :  { %11316 = vmatmul.mubr.msk.f32.gmra.mxu1 %vm3127_vm3, %v2596_v58  ;;  %11329 = vmatmul.mubr.msk.f32.gmra.mxu0 %vm3127_vm3, %v2596_v58  ;;  %v4146_v58 = vld [vmem:[%s14010_s7 + $0xc8] sm:$0xff] }
 0x99f   :  { %11318 = vmatprep.mubr.msk.f32.mxu1 %vm3127_vm3, %v2597_v60  ;;  %11331 = vmatprep.mubr.msk.f32.mxu0 %vm3127_vm3, %v2597_v60  ;;  %v4145_v60 = vld [vmem:[%s14010_s7 + $0xc0] sm:$0xff] }
 0x9a2   :  { %11319 = vmatmul.mubr.msk.f32.gmra.mxu1 %vm3127_vm3, %v2598_v7  ;;  %11332 = vmatmul.mubr.msk.f32.gmra.mxu0 %vm3127_vm3, %v2598_v7  ;;  %v4147_v7 = vld [vmem:[%s14010_s7 + $0xd0] sm:$0xff] }
 0x9a3   :  { %11346 = vmatprep.mubr.msk.f32.mxu1 %vm120_vm0, %v13014_v38  ;;  %11367 = vmatprep.mubr.msk.f32.mxu0 %vm120_vm0, %v13018_v48 }
 0xa42   :  { %v11262_v5 = vpop.f32.mrf.mxu1  ;;  %v13022_v6 = vpop.f32.mrf.mxu0 }
 0xa44   :  { %v3317_v36 = vpop.f32.mrf.mxu1  ;;  %v13024_v13 = vpop.f32.mrf.mxu0 }
 0xa46   :  { %v11265_v52 = vpop.f32.mrf.mxu1  ;;  %v13026_v26 = vpop.f32.mrf.mxu0 }
 0xa48   :  { %v3327_v1 = vpop.f32.mrf.mxu1  ;;  %v13028_v56 = vpop.f32.mrf.mxu0 }
 0xa4a   :  { %v11268_v27 = vpop.f32.mrf.mxu1  ;;  %v13030_v30 = vpop.f32.mrf.mxu0 }
 0xa4c   :  { %v3337_v24 = vpop.f32.mrf.mxu1  ;;  %v13032_v44 = vpop.f32.mrf.mxu0 }
 0xa4e   :  { %v11301_v61 = vpop.f32.mrf.mxu0  ;;  %v11288_v32 = vpop.f32.mrf.mxu1 }
 0xa4f   :  { %v3626_v57 = vadd.f32 %v11301_v61, %v11262_v5  ;;  %v13089_v5 = vld [vmem:[%s14010_s7 + $0xe8] sm:$0xff] }
 0xa50   :  { %v3620_v15 = vpop.f32.mrf.mxu0  ;;  %v3507_v4 = vpop.f32.mrf.mxu1 }
 0xa51   :  { %v3621_v22 = vadd.f32 %v3620_v15, %v3317_v36 }
 0xa52   :  { %v11304_v21 = vpop.f32.mrf.mxu0  ;;  %v11291_v23 = vpop.f32.mrf.mxu1 }
 0xa53   :  { %v3636_v31 = vadd.f32 %v11304_v21, %v11265_v52 }
 0xa54   :  { %v3630_v37 = vpop.f32.mrf.mxu0  ;;  %v3517_v16 = vpop.f32.mrf.mxu1 }
 0xa55   :  { %v3631_v53 = vadd.f32 %v3630_v37, %v3327_v1 }
 0xa56   :  { %v11307_v12 = vpop.f32.mrf.mxu0  ;;  %v11294_v20 = vpop.f32.mrf.mxu1 }
 0xa57   :  { %v3646_v29 = vadd.f32 %v11307_v12, %v11268_v27 }
 0xa58   :  { %v3640_v25 = vpop.f32.mrf.mxu0  ;;  %v3527_v39 = vpop.f32.mrf.mxu1 }
 0xa59   :  { %v3641_v8 = vadd.f32 %v3640_v25, %v3337_v24  ;;  %11334 = vmatprep.subr.mxu1 %v3646_v29  ;;  %v9720_v25 = vld [vmem:[%s14010_s7 + $0xf3] ss:$0 sm:$0xff] }
 0xa5a   :  { %v11327_v14 = vpop.f32.mrf.mxu0  ;;  %11335 = vmatpush3.msra.mxu1 %v3646_v29  ;;  %v11314_v36 = vpop.f32.mrf.mxu1 }
 0xa5b   :  { %11336 = vmatprep.subr.mxu1 %v3641_v8  ;;  %v3816_v33 = vadd.f32 %v11327_v14, %v11288_v32 }
 0xa5c   :  { %v3810_v18 = vpop.f32.mrf.mxu0  ;;  %11337 = vmatpush3.msra.mxu1 %v3641_v8  ;;  %v3715_v52 = vpop.f32.mrf.mxu1 }
 0xa5d   :  { %11338 = vmatprep.subr.mxu1 %v3636_v31  ;;  %v3811_v9 = vadd.f32 %v3810_v18, %v3507_v4  ;;  %v3721_v4 = vadd.f32 %v11314_v36, %v13022_v6  ;;  %v3716_v12 = vadd.f32 %v3715_v52, %v13024_v13 }
 0xa5e   :  { %v11330_v19 = vpop.f32.mrf.mxu0  ;;  %11339 = vmatpush3.msra.mxu1 %v3636_v31  ;;  %v11317_v1 = vpop.f32.mrf.mxu1 }
 0xa5f   :  { %11340 = vmatprep.subr.mxu1 %v3631_v53  ;;  %v3826_v34 = vadd.f32 %v11330_v19, %v11291_v23  ;;  %v3731_v8 = vadd.f32 %v11317_v1, %v13026_v26 }
 0xa60   :  { %v3820_v41 = vpop.f32.mrf.mxu0  ;;  %11341 = vmatpush3.msra.mxu1 %v3631_v53  ;;  %v3725_v27 = vpop.f32.mrf.mxu1 }
 0xa61   :  { %11342 = vmatprep.subr.mxu1 %v3626_v57  ;;  %v3821_v43 = vadd.f32 %v3820_v41, %v3517_v16  ;;  %v3726_v6 = vadd.f32 %v3725_v27, %v13028_v56 }
 0xa62   :  { %v11333_v35 = vpop.f32.mrf.mxu0  ;;  %11343 = vmatpush3.msra.mxu1 %v3626_v57  ;;  %v11320_v24 = vpop.f32.mrf.mxu1 }
 0xa63   :  { %v3836_v28 = vadd.f32 %v11333_v35, %v11294_v20  ;;  %11344 = vmatprep.subr.mxu1 %v3621_v22  ;;  %v3741_v35 = vadd.f32 %v11320_v24, %v13030_v30 }
 0xa64   :  { %v3830_v2 = vpop.f32.mrf.mxu0  ;;  %11345 = vmatpush3.msra.mxu1 %v3621_v22  ;;  %v3735_v61 = vpop.f32.mrf.mxu1 }
 0xa65   :  { %v3831_v59 = vadd.f32 %v3830_v2, %v3527_v39  ;;  %11347 = vmatmul.mubr.msk.f32.vlgmr.msra.gmra.mxu1 %vm120_vm0, %v13034_v42  ;;  %11355 = vmatprep.subr.mxu0 %v3836_v28  ;;  %v3736_v2 = vadd.f32 %v3735_v61, %v13032_v44 }
 0xa66   :  { %11356 = vmatpush3.msra.mxu0 %v3836_v28  ;;  %11349 = vmatprep.mubr.msk.f32.mxu1 %vm120_vm0, %v13038_v47 }
 0xa67   :  { %11357 = vmatprep.subr.mxu0 %v3831_v59  ;;  %11376 = vmatprep.subr.mxu1 %v4146_v58 }
 0xa68   :  { %11358 = vmatpush3.msra.mxu0 %v3831_v59  ;;  %11377 = vmatpush3.msra.mxu1 %v4146_v58 }
 0xa69   :  { %11350 = vmatmul.mubr.msk.f32.gmra.mxu1 %vm120_vm0, %v13042_v40  ;;  %11359 = vmatprep.subr.mxu0 %v3826_v34 }
 0xa6a   :  { %11360 = vmatpush3.msra.mxu0 %v3826_v34  ;;  %11352 = vmatprep.mubr.msk.f32.mxu1 %vm120_vm0, %v13046_v45 }
 0xa6b   :  { %11361 = vmatprep.subr.mxu0 %v3821_v43  ;;  %11378 = vmatprep.subr.mxu1 %v4145_v60 }
 0xa6c   :  { %11362 = vmatpush3.msra.mxu0 %v3821_v43  ;;  %11379 = vmatpush3.msra.mxu1 %v4145_v60 }
 0xa6d   :  { %11353 = vmatmul.mubr.msk.f32.gmra.mxu1 %vm120_vm0, %v13050_v11  ;;  %11363 = vmatprep.subr.mxu0 %v3816_v33 }
 0xa6e   :  { %11364 = vmatpush3.msra.mxu0 %v3816_v33  ;;  %11402 = vmatprep.subr.mxu1 %v13089_v5 }
 0xa6f   :  { %11365 = vmatprep.subr.mxu0 %v3811_v9 }
 0xa70   :  { %11366 = vmatpush3.msra.mxu0 %v3811_v9 }
 0xa71   :  { %11368 = vmatmul.mubr.msk.f32.vlgmr.msra.gmra.mxu0 %vm120_vm0, %v13054_v17  ;;  %11389 = vmatprep.subr.mxu0 %v4148_v3 }
 0xa72   :  { %11370 = vmatprep.mubr.msk.f32.mxu0 %vm120_vm0, %v13058_v49  ;;  %11390 = vmatpush3.msra.mxu0 %v4148_v3 }
 0xa73   :  { %11391 = vmatprep.subr.mxu0 %v4147_v7 }
 0xa74   :  { %11392 = vmatpush3.msra.mxu0 %v4147_v7 }
 0xa75   :  { %11371 = vmatmul.mubr.msk.f32.gmra.mxu0 %vm120_vm0, %v13062_v54 }
 0xa76   :  { %11373 = vmatprep.mubr.msk.f32.mxu0 %vm120_vm0, %v13066_v0 }
 0xa79   :  { %11374 = vmatmul.mubr.msk.f32.gmra.mxu0 %vm120_vm0, %v13070_v50 }
 0xb25   :  { %v11348_v32 = vpop.f32.mrf.mxu1 }
 0xb26   :  { %v3911_v29 = vadd.f32 %v11348_v32, %v3721_v4 }
 0xb27   :  { %v3905_v15 = vpop.f32.mrf.mxu1 }
 0xb28   :  { %v3906_v14 = vadd.f32 %v3905_v15, %v3716_v12 }
 0xb29   :  { %v11351_v21 = vpop.f32.mrf.mxu1 }
 0xb2a   :  { %v3921_v53 = vadd.f32 %v11351_v21, %v3731_v8 }
 0xb2b   :  { %v3915_v37 = vpop.f32.mrf.mxu1 }
 0xb2c   :  { %v3916_v26 = vadd.f32 %v3915_v37, %v3726_v6 }
 0xb2d   :  { %v11354_v16 = vpop.f32.mrf.mxu1 }
 0xb2e   :  { %v3931_v56 = vadd.f32 %v11354_v16, %v3741_v35 }
 0xb2f   :  { %v3925_v28 = vpop.f32.mrf.mxu1 }
 0xb30   :  { %v3926_v9 = vadd.f32 %v3925_v28, %v3736_v2 }
 0xb31   :  { %v11369_v23 = vpop.f32.mrf.mxu0 }
 0xb32   :  { %v4030_v31 = vadd.f32 %v11369_v23, %v3911_v29 }
 0xb33   :  { %v4000_v18 = vpop.f32.mrf.mxu0 }
 0xb34   :  { %v13098_v19 = vadd.f32 %v9720_v25, %v4030_v31  ;;  %v4029_v57 = vadd.f32 %v4000_v18, %v3906_v14 }
 0xb35   :  { %v11372_v20 = vpop.f32.mrf.mxu0 }
 0xb36   :  { %v4047_v13 = vmul.f32 %v13098_v19, %v12865_v55  ;;  %v13103_v41 = vadd.f32 %v9720_v25, %v4029_v57  ;;  %v4032_v22 = vadd.f32 %v11372_v20, %v3921_v53 }
 0xb37   :  { %v4010_v39 = vpop.f32.mrf.mxu0 }
 0xb38   :  { %v4046_v59 = vmul.f32 %v13103_v41, %v12870_v51  ;;  %v13109_v34 = vadd.f32 %v9720_v25, %v4032_v22  ;;  %v4031_v43 = vadd.f32 %v4010_v39, %v3916_v26  ;;  %v4071_v58 = vmul.f32 %v4047_v13, %v4047_v13 }
 0xb39   :  { %v11375_v33 = vpop.f32.mrf.mxu0  ;;  %v4053_v1 = vsel %vm3127_vm3, %v4047_v13, 0.0 }
 0xb3a   :  { %v4070_v60 = vmul.f32 %v4046_v59, %v4046_v59  ;;  %v4052_v3 = vsel %vm3127_vm3, %v4046_v59, 0.0  ;;  %v4049_v30 = vmul.f32 %v13109_v34, %v12881_v46  ;;  %v13114_v7 = vadd.f32 %v9720_v25, %v4031_v43 }
 0xb3b   :  { %v4034_v36 = vadd.f32 %v11375_v33, %v3931_v56  ;;  %v4020_v44 = vpop.f32.mrf.mxu0  ;;  %v4077_v32 = vsel %vm3127_vm3, %v4071_v58, 0.0  ;;  %v4054_v15 = vadd.f32 %v4053_v1, %v4052_v3 }
 0xb3c   :  { %v4033_v52 = vadd.f32 %v4020_v44, %v3926_v9  ;;  %v4076_v27 = vsel %vm3127_vm3, %v4070_v60, 0.0  ;;  %v4048_v24 = vmul.f32 %v13114_v7, %v12897_v63  ;;  %v4073_v4 = vmul.f32 %v4049_v30, %v4049_v30 }
 0xb3d   :  { %v4045_v61 = vadd.f32 %v9720_v25, %v4034_v36  ;;  %v4078_v23 = vadd.f32 %v4077_v32, %v4076_v27  ;;  %v4057_v31 = vsel %vm3127_vm3, %v4049_v30, 0.0 }
 0xb3e   :  { %v4044_v21 = vadd.f32 %v9720_v25, %v4033_v52  ;;  %v4055_v37 = vsel %vm3127_vm3, %v4048_v24, 0.0  ;;  %v4072_v12 = vmul.f32 %v4048_v24, %v4048_v24  ;;  %v4081_v25 = vsel %vm3127_vm3, %v4073_v4, 0.0 }
 0xb3f   :  { %v4051_v29 = vmul.f32 %v4045_v61, %v12902_v10  ;;  %v4056_v8 = vadd.f32 %v4055_v37, %v4054_v15 }
 0xb40   :  { %v4050_v14 = vmul.f32 %v4044_v21, %v12892_v62  ;;  %v4079_v16 = vsel %vm3127_vm3, %v4072_v12, 0.0 }
 0xb41   :  { %v4080_v18 = vadd.f32 %v4079_v16, %v4078_v23  ;;  %v4058_v53 = vadd.f32 %v4057_v31, %v4056_v8  ;;  %v4075_v20 = vmul.f32 %v4051_v29, %v4051_v29  ;;  %v4061_v26 = vsel %vm3127_vm3, %v4051_v29, 0.0 }
 0xb42   :  { %v4059_v57 = vsel %vm3127_vm3, %v4050_v14, 0.0  ;;  %v4074_v6 = vmul.f32 %v4050_v14, %v4050_v14 }
 0xb43   :  { %v4060_v13 = vadd.f32 %v4059_v57, %v4058_v53  ;;  %v4082_v22 = vadd.f32 %v4081_v25, %v4080_v18  ;;  %v4085_v2 = vsel %vm3127_vm3, %v4075_v20, 0.0  ;;  %v9721_v18 = vld [vmem:[%s14010_s7 + $0xf4] ss:$0 sm:$0xff] }
 0xb44   :  { %v4083_v35 = vsel %vm3127_vm3, %v4074_v6, 0.0 }
 0xb45   :  { %v4062_v28 = vadd.f32 %v4061_v26, %v4060_v13  ;;  %v4084_v39 = vadd.f32 %v4083_v35, %v4082_v22 }
 0xb47   :  { %v4063_v59 = vrot.slane %v4062_v28, 4  ;;  %v4086_v56 = vadd.f32 %v4085_v2, %v4084_v39 }
 0xb49   :  { %v4064_v43 = vadd.f32 %v4063_v59, %v4062_v28  ;;  %v4087_v33 = vrot.slane %v4086_v56, 4 }
 0xb4b   :  { %v4065_v9 = vrot.slane %v4064_v43, 2  ;;  %v4088_v58 = vadd.f32 %v4087_v33, %v4086_v56 }
 0xb4d   :  { %v4066_v60 = vadd.f32 %v4065_v9, %v4064_v43  ;;  %v4089_v3 = vrot.slane %v4088_v58, 2 }
 0xb4f   :  { %v4067_v30 = vrot.slane %v4066_v60, 1  ;;  %v4090_v36 = vadd.f32 %v4089_v3, %v4088_v58 }
 0xb51   :  { %v4068_v44 = vadd.f32 %v4067_v30, %v4066_v60  ;;  %v4091_v52 = vrot.slane %v4090_v36, 1 }
 0xb53   :  { %v4069_v1 = vmul.f32 0.125, %v4068_v44  ;;  %v4092_v27 = vadd.f32 %v4091_v52, %v4090_v36  ;;  %v4149_v36 = vld [vmem:[%s14010_s7 + $0xe0] sm:$0xff] }
 0xb55   :  { %v4093_v24 = vmul.f32 0.125, %v4092_v27  ;;  %v4094_v32 = vmul.f32 %v4069_v1, %v4069_v1  ;;  %v4098_v15 = vsub.f32 %v13098_v19, %v4069_v1  ;;  %v4100_v4 = vsub.f32 %v13109_v34, %v4069_v1  ;;  %v9722_v34 = vld [vmem:[%s14010_s7 + $0xf5] ss:$0 sm:$0xff] }
 0xb56   :  { %v4102_v37 = vsub.f32 %v4045_v61, %v4069_v1  ;;  %v4101_v8 = vsub.f32 %v4044_v21, %v4069_v1  ;;  %v4097_v14 = vsub.f32 %v13103_v41, %v4069_v1  ;;  %v4099_v31 = vsub.f32 %v13114_v7, %v4069_v1 }
 0xb57   :  { %v4095_v12 = vsub.f32 %v4093_v24, %v4094_v32 }
 0xb59   :  { %v4096_v29 = vmax.f32 %v4095_v12, 0.0 }
 0xb5b   :  { %v4103_v23 = vadd.f32 1e-05, %v4096_v29 }
 0xb5d   :  { %12058 = vrsqrt.f32 %v4103_v23 }
 0xb6a   :  { %v12059_v16 = vpop.eup %12058 }
 0xb6b   :  { %v4109_v53 = vmul.f32 %v12059_v16, %v4101_v8  ;;  %v4105_v57 = vmul.f32 %v12059_v16, %v4097_v14  ;;  %v4106_v19 = vmul.f32 %v12059_v16, %v4098_v15  ;;  %v4107_v6 = vmul.f32 %v12059_v16, %v4099_v31  ;;  %v4766_v31 = vld [vmem:[#allocation2 + $0xc0] sm:$0xff] }
 0xb6c   :  { %v4108_v61 = vmul.f32 %v12059_v16, %v4100_v4  ;;  %v4110_v25 = vmul.f32 %v12059_v16, %v4102_v37  ;;  %v4892_v16 = vld [vmem:[#allocation6 + $0x8] sm:$0xff] }
 0xb6d   :  { %v4120_v21 = vmul.f32 %v9721_v18, %v4109_v53  ;;  %v4116_v20 = vmul.f32 %v9721_v18, %v4105_v57  ;;  %v4117_v41 = vmul.f32 %v9721_v18, %v4106_v19  ;;  %v4118_v13 = vmul.f32 %v9721_v18, %v4107_v6 }
 0xb6e   :  { %v4119_v7 = vmul.f32 %v9721_v18, %v4108_v61  ;;  %v4121_v39 = vmul.f32 %v9721_v18, %v4110_v25  ;;  %v4891_v18 = vld [vmem:[#allocation6] sm:$0xff] }
 0xb6f   :  { %v4127_v22 = vadd.f32 %v9722_v34, %v4116_v20  ;;  %v4128_v35 = vadd.f32 %v9722_v34, %v4117_v41  ;;  %v4129_v26 = vadd.f32 %v9722_v34, %v4118_v13  ;;  %v4131_v43 = vadd.f32 %v9722_v34, %v4120_v21 }
 0xb70   :  { %v4130_v28 = vadd.f32 %v9722_v34, %v4119_v7  ;;  %v4132_v60 = vadd.f32 %v9722_v34, %v4121_v39 }
 0xb71   :  { %v4133_v2 = vmax.f32 %v4127_v22, 0.0  ;;  %v4134_v59 = vmax.f32 %v4128_v35, 0.0  ;;  %v4135_v56 = vmax.f32 %v4129_v26, 0.0  ;;  %v4137_v30 = vmax.f32 %v4131_v43, 0.0  ;;  %v9753_v22 = vld [vmem:[%s14010_s7 + $0xf6] ss:$0 sm:$0xff] }
 0xb72   :  { %v4136_v58 = vmax.f32 %v4130_v28, 0.0  ;;  %v4138_v52 = vmax.f32 %v4132_v60, 0.0 }
 0xb73   :  { %v4139_v33 = vmul.f32 %v4133_v2, %v12870_v51  ;;  %v4140_v9 = vmul.f32 %v4134_v59, %v12865_v55  ;;  %v4141_v3 = vmul.f32 %v4135_v56, %v12897_v63  ;;  %v4143_v1 = vmul.f32 %v4137_v30, %v12892_v62 }
 0xb74   :  { %v4142_v44 = vmul.f32 %v4136_v58, %v12881_v46  ;;  %v4144_v27 = vmul.f32 %v4138_v52, %v12902_v10 }
 0xb75   :  { %11380 = vmatprep.mubr.msk.f32.mxu1 %vm3127_vm3, %v4139_v33  ;;  %11393 = vmatprep.mubr.msk.f32.mxu0 %vm3127_vm3, %v4139_v33 }
 0xb76   :  { %11381 = vmatmul.mubr.msk.f32.vlgmr.msra.gmra.mxu1 %vm3127_vm3, %v4140_v9  ;;  %11394 = vmatmul.mubr.msk.f32.vlgmr.msra.gmra.mxu0 %vm3127_vm3, %v4140_v9 }
 0xb77   :  { %11383 = vmatprep.mubr.msk.f32.mxu1 %vm3127_vm3, %v4141_v3  ;;  %11396 = vmatprep.mubr.msk.f32.mxu0 %vm3127_vm3, %v4141_v3 }
 0xb78   :  { %11403 = vmatpush3.msra.mxu1 %v13089_v5 }
 0xb79   :  { %11404 = vmatprep.subr.mxu1 %v4149_v36 }
 0xb7a   :  { %11384 = vmatmul.mubr.msk.f32.gmra.mxu1 %vm3127_vm3, %v4142_v44  ;;  %11397 = vmatmul.mubr.msk.f32.gmra.mxu0 %vm3127_vm3, %v4142_v44 }
 0xb7b   :  { %11386 = vmatprep.mubr.msk.f32.mxu1 %vm3127_vm3, %v4143_v1  ;;  %11399 = vmatprep.mubr.msk.f32.mxu0 %vm3127_vm3, %v4143_v1 }
 0xb7c   :  { %11405 = vmatpush3.msra.mxu1 %v4149_v36 }
 0xb7e   :  { %11387 = vmatmul.mubr.msk.f32.gmra.mxu1 %vm3127_vm3, %v4144_v27  ;;  %11400 = vmatmul.mubr.msk.f32.gmra.mxu0 %vm3127_vm3, %v4144_v27 }
 0xb7f   :  { %11406 = vmatprep.mubr.msk.f32.mxu1 %vm3127_vm3, %v4139_v33  ;;  %11427 = vmatprep.mubr.msk.f32.mxu0 %vm120_vm0, %v13014_v38 }
 0xb82   :  { %11407 = vmatmul.mubr.msk.f32.vlgmr.msra.gmra.mxu1 %vm3127_vm3, %v4140_v9 }
 0xb83   :  { %11409 = vmatprep.mubr.msk.f32.mxu1 %vm3127_vm3, %v4141_v3 }
 0xb86   :  { %11410 = vmatmul.mubr.msk.f32.gmra.mxu1 %vm3127_vm3, %v4142_v44 }
 0xb87   :  { %11412 = vmatprep.mubr.msk.f32.mxu1 %vm3127_vm3, %v4143_v1 }
 0xb8a   :  { %11413 = vmatmul.mubr.msk.f32.gmra.mxu1 %vm3127_vm3, %v4144_v27 }
 0xb8b   :  { %11448 = vmatprep.mubr.msk.f32.mxu1 %vm120_vm0, %v13018_v48 }
 0xc36   :  { %v11382_v62 = vpop.f32.mrf.mxu1  ;;  %v11395_v53 = vpop.f32.mrf.mxu0 }
 0xc38   :  { %v4235_v5 = vpop.f32.mrf.mxu1  ;;  %v4330_v57 = vpop.f32.mrf.mxu0 }
 0xc3a   :  { %v11385_v24 = vpop.f32.mrf.mxu1  ;;  %v11398_v19 = vpop.f32.mrf.mxu0 }
 0xc3c   :  { %v4245_v32 = vpop.f32.mrf.mxu1  ;;  %v4340_v6 = vpop.f32.mrf.mxu0 }
 0xc3e   :  { %v11388_v15 = vpop.f32.mrf.mxu1  ;;  %v11401_v34 = vpop.f32.mrf.mxu0 }
 0xc3f   :  { %11415 = vmatprep.subr.mxu0 %v11388_v15 }
 0xc40   :  { %v4255_v4 = vpop.f32.mrf.mxu1  ;;  %11416 = vmatpush3.msra.mxu0 %v11388_v15  ;;  %v4350_v61 = vpop.f32.mrf.mxu0 }
 0xc41   :  { %11417 = vmatprep.subr.mxu0 %v4255_v4 }
 0xc42   :  { %v11408_v37 = vpop.f32.mrf.mxu1  ;;  %11418 = vmatpush3.msra.mxu0 %v4255_v4 }
 0xc43   :  { %11419 = vmatprep.subr.mxu0 %v11385_v24 }
 0xc44   :  { %v4425_v12 = vpop.f32.mrf.mxu1  ;;  %11420 = vmatpush3.msra.mxu0 %v11385_v24 }
 0xc45   :  { %11421 = vmatprep.subr.mxu0 %v4245_v32 }
 0xc46   :  { %v11411_v29 = vpop.f32.mrf.mxu1  ;;  %11422 = vmatpush3.msra.mxu0 %v4245_v32 }
 0xc47   :  { %11423 = vmatprep.subr.mxu0 %v11382_v62 }
 0xc48   :  { %v4435_v23 = vpop.f32.mrf.mxu1  ;;  %11424 = vmatpush3.msra.mxu0 %v11382_v62 }
 0xc49   :  { %11425 = vmatprep.subr.mxu0 %v4235_v5 }
 0xc4a   :  { %v11414_v8 = vpop.f32.mrf.mxu1  ;;  %11426 = vmatpush3.msra.mxu0 %v4235_v5 }
 0xc4b   :  { %11428 = vmatmul.mubr.msk.f32.vlgmr.msra.gmra.mxu0 %vm120_vm0, %v13034_v42  ;;  %11436 = vmatprep.subr.mxu1 %v11414_v8 }
 0xc4c   :  { %v4445_v14 = vpop.f32.mrf.mxu1  ;;  %11437 = vmatpush3.msra.mxu1 %v11414_v8  ;;  %11430 = vmatprep.mubr.msk.f32.mxu0 %vm120_vm0, %v13038_v47 }
 0xc4d   :  { %11438 = vmatprep.subr.mxu1 %v4445_v14 }
 0xc4e   :  { %11439 = vmatpush3.msra.mxu1 %v4445_v14 }
 0xc4f   :  { %11431 = vmatmul.mubr.msk.f32.gmra.mxu0 %vm120_vm0, %v13042_v40  ;;  %11440 = vmatprep.subr.mxu1 %v11411_v29 }
 0xc50   :  { %11441 = vmatpush3.msra.mxu1 %v11411_v29  ;;  %11433 = vmatprep.mubr.msk.f32.mxu0 %vm120_vm0, %v13046_v45 }
 0xc51   :  { %11442 = vmatprep.subr.mxu1 %v4435_v23 }
 0xc52   :  { %11443 = vmatpush3.msra.mxu1 %v4435_v23 }
 0xc53   :  { %11434 = vmatmul.mubr.msk.f32.gmra.mxu0 %vm120_vm0, %v13050_v11  ;;  %11444 = vmatprep.subr.mxu1 %v11408_v37 }
 0xc54   :  { %11445 = vmatpush3.msra.mxu1 %v11408_v37  ;;  %11469 = vmatprep.mubr.msk.f32.mxu0 %vm120_vm0, %v4766_v31 }
 0xc55   :  { %11446 = vmatprep.subr.mxu1 %v4425_v12 }
 0xc56   :  { %11447 = vmatpush3.msra.mxu1 %v4425_v12 }
 0xc57   :  { %11449 = vmatmul.mubr.msk.f32.vlgmr.msra.gmra.mxu1 %vm120_vm0, %v13054_v17  ;;  %11478 = vmatprep.subr.mxu1 %v4892_v16 }
 0xc58   :  { %11451 = vmatprep.mubr.msk.f32.mxu1 %vm120_vm0, %v13058_v49  ;;  %11479 = vmatpush3.msra.mxu1 %v4892_v16 }
 0xc59   :  { %11480 = vmatprep.subr.mxu1 %v4891_v18 }
 0xc5a   :  { %11481 = vmatpush3.msra.mxu1 %v4891_v18 }
 0xc5b   :  { %11452 = vmatmul.mubr.msk.f32.gmra.mxu1 %vm120_vm0, %v13062_v54 }
 0xc5c   :  { %11454 = vmatprep.mubr.msk.f32.mxu1 %vm120_vm0, %v13066_v0 }
 0xc5f   :  { %11455 = vmatmul.mubr.msk.f32.gmra.mxu1 %vm120_vm0, %v13070_v50 }
 0xd0b   :  { %v11429_v25 = vpop.f32.mrf.mxu0 }
 0xd0c   :  { %v4526_v13 = vadd.f32 %v11429_v25, %v11395_v53 }
 0xd0d   :  { %v4520_v21 = vpop.f32.mrf.mxu0 }
 0xd0e   :  { %v4521_v35 = vadd.f32 %v4520_v21, %v4330_v57 }
 0xd0f   :  { %v11432_v20 = vpop.f32.mrf.mxu0 }
 0xd10   :  { %v4536_v2 = vadd.f32 %v11432_v20, %v11398_v19 }
 0xd11   :  { %v4530_v41 = vpop.f32.mrf.mxu0 }
 0xd12   :  { %v4531_v60 = vadd.f32 %v4530_v41, %v4340_v6 }
 0xd13   :  { %v11435_v28 = vpop.f32.mrf.mxu0 }
 0xd14   :  { %v4546_v52 = vadd.f32 %v11435_v28, %v11401_v34  ;;  %v13222_v34 = vld [vmem:[%s14010_s7 + $0x120] sm:$0xff] }
 0xd15   :  { %v4540_v3 = vpop.f32.mrf.mxu0 }
 0xd16   :  { %v4541_v62 = vadd.f32 %v4540_v3, %v4350_v61 }
 0xd17   :  { %v11450_v7 = vpop.f32.mrf.mxu1 }
 0xd18   :  { %v4645_v26 = vadd.f32 %v11450_v7, %v4526_v13 }
 0xd19   :  { %v4615_v39 = vpop.f32.mrf.mxu1 }
 0xd1a   :  { %v13197_v59 = vadd.f32 %v9753_v22, %v4645_v26  ;;  %v4644_v56 = vadd.f32 %v4615_v39, %v4521_v35 }
 0xd1b   :  { %v11453_v43 = vpop.f32.mrf.mxu1 }
 0xd1c   :  { %v4662_v33 = vmul.f32 %v13197_v59, %v12865_v55  ;;  %v13201_v9 = vadd.f32 %v9753_v22, %v4644_v56  ;;  %v4647_v58 = vadd.f32 %v11453_v43, %v4536_v2 }
 0xd1d   :  { %v4625_v30 = vpop.f32.mrf.mxu1 }
 0xd1e   :  { %v4661_v36 = vmul.f32 %v13201_v9, %v12870_v51  ;;  %v13205_v44 = vadd.f32 %v9753_v22, %v4647_v58  ;;  %v4646_v1 = vadd.f32 %v4625_v30, %v4531_v60  ;;  %v4686_v5 = vmul.f32 %v4662_v33, %v4662_v33 }
 0xd1f   :  { %v11456_v27 = vpop.f32.mrf.mxu1  ;;  %v4668_v51 = vsel %vm3127_vm3, %v4662_v33, 0.0 }
 0xd20   :  { %v4685_v24 = vmul.f32 %v4661_v36, %v4661_v36  ;;  %v4667_v32 = vsel %vm3127_vm3, %v4661_v36, 0.0  ;;  %v4664_v55 = vmul.f32 %v13205_v44, %v12881_v46  ;;  %v13210_v15 = vadd.f32 %v9753_v22, %v4646_v1 }
 0xd21   :  { %v4649_v4 = vadd.f32 %v11456_v27, %v4546_v52  ;;  %v4635_v37 = vpop.f32.mrf.mxu1  ;;  %v4692_v14 = vsel %vm3127_vm3, %v4686_v5, 0.0  ;;  %v4669_v31 = vadd.f32 %v4668_v51, %v4667_v32 }
 0xd22   :  { %v4648_v12 = vadd.f32 %v4635_v37, %v4541_v62  ;;  %v4691_v29 = vsel %vm3127_vm3, %v4685_v24, 0.0  ;;  %v4663_v23 = vmul.f32 %v13210_v15, %v12897_v63  ;;  %v4688_v18 = vmul.f32 %v4664_v55, %v4664_v55 }
 0xd23   :  { %v4660_v8 = vadd.f32 %v9753_v22, %v4649_v4  ;;  %v4693_v19 = vadd.f32 %v4692_v14, %v4691_v29  ;;  %v4672_v61 = vsel %vm3127_vm3, %v4664_v55, 0.0 }
 0xd24   :  { %v4659_v16 = vadd.f32 %v9753_v22, %v4648_v12  ;;  %v4670_v46 = vsel %vm3127_vm3, %v4663_v23, 0.0  ;;  %v4687_v53 = vmul.f32 %v4663_v23, %v4663_v23 }
 0xd25   :  { %v4666_v57 = vmul.f32 %v4660_v8, %v12902_v10  ;;  %v4671_v6 = vadd.f32 %v4670_v46, %v4669_v31  ;;  %v4696_v10 = vsel %vm3127_vm3, %v4688_v18, 0.0  ;;  %v9754_v46 = vld [vmem:[%s14010_s7 + $0xf7] ss:$0 sm:$0xff] }
 0xd26   :  { %v4665_v63 = vmul.f32 %v13222_v34, %v4659_v16  ;;  %v4694_v25 = vsel %vm3127_vm3, %v4687_v53, 0.0 }
 0xd27   :  { %v4695_v21 = vadd.f32 %v4694_v25, %v4693_v19  ;;  %v4673_v20 = vadd.f32 %v4672_v61, %v4671_v6  ;;  %v4690_v7 = vmul.f32 %v4666_v57, %v4666_v57  ;;  %v4676_v28 = vsel %vm3127_vm3, %v4666_v57, 0.0 }
 0xd28   :  { %v4674_v41 = vsel %vm3127_vm3, %v4665_v63, 0.0  ;;  %v4689_v13 = vmul.f32 %v4665_v63, %v4665_v63 }
 0xd29   :  { %v4675_v22 = vadd.f32 %v4674_v41, %v4673_v20  ;;  %v4697_v35 = vadd.f32 %v4696_v10, %v4695_v21  ;;  %v4700_v56 = vsel %vm3127_vm3, %v4690_v7, 0.0 }
 0xd2a   :  { %v4698_v26 = vsel %vm3127_vm3, %v4689_v13, 0.0 }
 0xd2b   :  { %v4677_v39 = vadd.f32 %v4676_v28, %v4675_v22  ;;  %v4699_v2 = vadd.f32 %v4698_v26, %v4697_v35  ;;  %v12129_v26 = vld [vmem:[%s14010_s7 + $0x128] sm:$0xff] }
 0xd2d   :  { %v4678_v43 = vrot.slane %v4677_v39, 4  ;;  %v4701_v33 = vadd.f32 %v4700_v56, %v4699_v2 }
 0xd2f   :  { %v4679_v58 = vadd.f32 %v4678_v43, %v4677_v39  ;;  %v4702_v60 = vrot.slane %v4701_v33, 4 }
 0xd31   :  { %v4680_v3 = vrot.slane %v4679_v58, 2  ;;  %v4703_v30 = vadd.f32 %v4702_v60, %v4701_v33 }
 0xd33   :  { %v4681_v36 = vadd.f32 %v4680_v3, %v4679_v58  ;;  %v4704_v52 = vrot.slane %v4703_v30, 2  ;;  %v12130_v58 = vld [vmem:[%s14010_s7 + $0x118] sm:$0xff] }
 0xd35   :  { %v4682_v1 = vrot.slane %v4681_v36, 1  ;;  %v4705_v27 = vadd.f32 %v4704_v52, %v4703_v30  ;;  %v12131_v30 = vld [vmem:[%s14010_s7 + $0x110] sm:$0xff] }
 0xd37   :  { %v4683_v62 = vadd.f32 %v4682_v1, %v4681_v36  ;;  %v4706_v5 = vrot.slane %v4705_v27, 1 }
 0xd39   :  { %v4684_v24 = vmul.f32 0.125, %v4683_v62  ;;  %v4707_v32 = vadd.f32 %v4706_v5, %v4705_v27  ;;  %v12133_v27 = vld [vmem:[%s14010_s7 + $0x100] sm:$0xff]  ;;  %v4767_v5 = vld [vmem:[#allocation2 + $0xc8] sm:$0xff] }
 0xd3b   :  { %v4708_v55 = vmul.f32 0.125, %v4707_v32  ;;  %v4709_v4 = vmul.f32 %v4684_v24, %v4684_v24  ;;  %v4716_v29 = vsub.f32 %v4659_v16, %v4684_v24  ;;  %v4717_v23 = vsub.f32 %v4660_v8, %v4684_v24  ;;  %v9755_v8 = vld [vmem:[%s14010_s7 + $0xf8] ss:$0 sm:$0xff] }
 0xd3c   :  { %v4715_v14 = vsub.f32 %v13205_v44, %v4684_v24  ;;  %v4714_v31 = vsub.f32 %v13210_v15, %v4684_v24  ;;  %v4713_v53 = vsub.f32 %v13197_v59, %v4684_v24  ;;  %v4712_v57 = vsub.f32 %v13201_v9, %v4684_v24  ;;  %v4768_v24 = vld [vmem:[#allocation2 + $0xd0] sm:$0xff]  ;;  %v4769_v32 = vld [vmem:[#allocation2 + $0xd8] sm:$0xff] }
 0xd3d   :  { %v4710_v37 = vsub.f32 %v4708_v55, %v4709_v4  ;;  %v4770_v55 = vld [vmem:[#allocation2 + $0xe0] sm:$0xff]  ;;  %v4771_v4 = vld [vmem:[#allocation2 + $0xe8] sm:$0xff] }
 0xd3f   :  { %v4711_v12 = vmax.f32 %v4710_v37, 0.0  ;;  %v4894_v37 = vld [vmem:[#allocation6 + $0x18] sm:$0xff] }
 0xd41   :  { %v4718_v51 = vadd.f32 1e-05, %v4711_v12  ;;  %v4893_v12 = vld [vmem:[#allocation6 + $0x10] sm:$0xff] }
 0xd43   :  { %12060 = vrsqrt.f32 %v4718_v51  ;;  %v4896_v51 = vld [vmem:[#allocation6 + $0x28] sm:$0xff] }
 0xd44   :  { %11504 = vmatprep.subr.mxu1 %v4896_v51 }
 0xd50   :  { %v12061_v18 = vpop.eup %12060 }
 0xd51   :  { %v4724_v19 = vmul.f32 %v12061_v18, %v4716_v29  ;;  %v4725_v6 = vmul.f32 %v12061_v18, %v4717_v23  ;;  %v4723_v63 = vmul.f32 %v12061_v18, %v4715_v14  ;;  %v4722_v61 = vmul.f32 %v12061_v18, %v4714_v31  ;;  %v4895_v14 = vld [vmem:[#allocation6 + $0x20] sm:$0xff] }
 0xd52   :  { %v4721_v44 = vmul.f32 %v12061_v18, %v4713_v53  ;;  %v4720_v16 = vmul.f32 %v12061_v18, %v4712_v57 }
 0xd53   :  { %v4736_v15 = vmul.f32 %v9754_v46, %v4725_v6  ;;  %v4735_v25 = vmul.f32 %v9754_v46, %v4724_v19  ;;  %v4734_v21 = vmul.f32 %v9754_v46, %v4723_v63  ;;  %v4733_v20 = vmul.f32 %v9754_v46, %v4722_v61 }
 0xd54   :  { %v4732_v59 = vmul.f32 %v9754_v46, %v4721_v44  ;;  %v4731_v35 = vmul.f32 %v9754_v46, %v4720_v16 }
 0xd55   :  { %v4747_v41 = vadd.f32 %v9755_v8, %v4736_v15  ;;  %v4746_v13 = vadd.f32 %v9755_v8, %v4735_v25  ;;  %v4745_v10 = vadd.f32 %v9755_v8, %v4734_v21  ;;  %v4744_v22 = vadd.f32 %v9755_v8, %v4733_v20 }
 0xd56   :  { %v4743_v2 = vadd.f32 %v9755_v8, %v4732_v59  ;;  %v4742_v33 = vadd.f32 %v9755_v8, %v4731_v35 }
 0xd57   :  { %v4753_v7 = vmax.f32 %v4747_v41, 0.0  ;;  %v4752_v9 = vmax.f32 %v4746_v13, 0.0  ;;  %v4751_v39 = vmax.f32 %v4745_v10, 0.0  ;;  %v4750_v43 = vmax.f32 %v4744_v22, 0.0 }
 0xd58   :  { %v4749_v3 = vmax.f32 %v4743_v2, 0.0  ;;  %v4748_v52 = vmax.f32 %v4742_v33, 0.0 }
 0xd59   :  { %v4759_v28 = vmul.f32 %v12129_v26, %v4753_v7  ;;  %v4758_v56 = vmul.f32 %v13222_v34, %v4752_v9  ;;  %v4757_v60 = vmul.f32 %v12130_v58, %v4751_v39  ;;  %v4756_v36 = vmul.f32 %v12131_v30, %v4750_v43  ;;  %v12132_v34 = vld [vmem:[%s14010_s7 + $0x108] sm:$0xff]  ;;  %v9792_v7 = vld [vmem:[#allocation6 + $0x78] ss:$0 sm:$0xff]  ;;  %v13311_v26 = vld [vmem:[#allocation6 + $0x90] sm:$0xff] }
 0xd5a   :  { %v4755_v1 = vmul.f32 %v12132_v34, %v4749_v3  ;;  %v4754_v62 = vmul.f32 %v12133_v27, %v4748_v52  ;;  %v13315_v43 = vld [vmem:[#allocation6 + $0x88] sm:$0xff] }
 0xd5b   :  { %11457 = vmatprep.subr.mxu0 %v4759_v28 }
 0xd5c   :  { %11458 = vmatpush3.msra.mxu0 %v4759_v28 }
 0xd5d   :  { %11459 = vmatprep.subr.mxu0 %v4758_v56 }
 0xd5e   :  { %11460 = vmatpush3.msra.mxu0 %v4758_v56 }
 0xd5f   :  { %11461 = vmatprep.subr.mxu0 %v4757_v60 }
 0xd60   :  { %11462 = vmatpush3.msra.mxu0 %v4757_v60 }
 0xd61   :  { %11463 = vmatprep.subr.mxu0 %v4756_v36 }
 0xd62   :  { %11464 = vmatpush3.msra.mxu0 %v4756_v36 }
 0xd63   :  { %11465 = vmatprep.subr.mxu0 %v4755_v1 }
 0xd64   :  { %11466 = vmatpush3.msra.mxu0 %v4755_v1  ;;  %v13323_v1 = vld [vmem:[#allocation6 + $0xa0] sm:$0xff] }
 0xd65   :  { %11467 = vmatprep.subr.mxu0 %v4754_v62 }
 0xd66   :  { %11468 = vmatpush3.msra.mxu0 %v4754_v62 }
 0xd67   :  { %11470 = vmatmul.mubr.msk.f32.vlgmr.msra.gmra.mxu0 %vm120_vm0, %v4767_v5  ;;  %11491 = vmatprep.subr.mxu0 %v4894_v37 }
 0xd68   :  { %11472 = vmatprep.mubr.msk.f32.mxu0 %vm120_vm0, %v4768_v24  ;;  %11492 = vmatpush3.msra.mxu0 %v4894_v37  ;;  %v13327_v37 = vld [vmem:[#allocation6 + $0x98] sm:$0xff] }
 0xd69   :  { %11493 = vmatprep.subr.mxu0 %v4893_v12 }
 0xd6a   :  { %11494 = vmatpush3.msra.mxu0 %v4893_v12 }
 0xd6b   :  { %11473 = vmatmul.mubr.msk.f32.gmra.mxu0 %vm120_vm0, %v4769_v32 }
 0xd6c   :  { %11475 = vmatprep.mubr.msk.f32.mxu0 %vm120_vm0, %v4770_v55 }
 0xd6f   :  { %11476 = vmatmul.mubr.msk.f32.gmra.mxu0 %vm120_vm0, %v4771_v4 }
 0xe27   :  { %v11471_v29 = vpop.f32.mrf.mxu0 }
 0xe29   :  { %v4856_v23 = vpop.f32.mrf.mxu0 }
 0xe2a   :  { %11482 = vmatprep.mubr.msk.f32.mxu1 %vm3127_vm3, %v4856_v23  ;;  %11495 = vmatprep.mubr.msk.f32.mxu0 %vm3127_vm3, %v4856_v23 }
 0xe2b   :  { %v11474_v31 = vpop.f32.mrf.mxu0  ;;  %11483 = vmatmul.mubr.msk.f32.vlgmr.msra.gmra.mxu1 %vm3127_vm3, %v11471_v29  ;;  %11496 = vmatmul.mubr.msk.f32.vlgmr.msra.gmra.mxu0 %vm3127_vm3, %v11471_v29 }
 0xe2c   :  { %11505 = vmatpush3.msra.mxu1 %v4896_v51 }
 0xe2d   :  { %v4866_v18 = vpop.f32.mrf.mxu0  ;;  %11506 = vmatprep.subr.mxu1 %v4895_v14 }
 0xe2e   :  { %11485 = vmatprep.mubr.msk.f32.mxu1 %vm3127_vm3, %v4866_v18  ;;  %11498 = vmatprep.mubr.msk.f32.mxu0 %vm3127_vm3, %v4866_v18 }
 0xe2f   :  { %v11477_v46 = vpop.f32.mrf.mxu0  ;;  %11486 = vmatmul.mubr.msk.f32.gmra.mxu1 %vm3127_vm3, %v11474_v31  ;;  %11499 = vmatmul.mubr.msk.f32.gmra.mxu0 %vm3127_vm3, %v11474_v31 }
 0xe30   :  { %11507 = vmatpush3.msra.mxu1 %v4895_v14 }
 0xe31   :  { %v4876_v53 = vpop.f32.mrf.mxu0 }
 0xe32   :  { %11488 = vmatprep.mubr.msk.f32.mxu1 %vm3127_vm3, %v4876_v53  ;;  %11501 = vmatprep.mubr.msk.f32.mxu0 %vm3127_vm3, %v4876_v53 }
 0xe33   :  { %11489 = vmatmul.mubr.msk.f32.gmra.mxu1 %vm3127_vm3, %v11477_v46  ;;  %11502 = vmatmul.mubr.msk.f32.gmra.mxu0 %vm3127_vm3, %v11477_v46 }
 0xe34   :  { %11508 = vmatprep.mubr.msk.f32.mxu1 %vm3127_vm3, %v4856_v23  ;;  %11529 = vmatprep.mubr.msk.f32.mxu0 %vm120_vm0, %v13014_v38 }
 0xe37   :  { %11509 = vmatmul.mubr.msk.f32.vlgmr.msra.gmra.mxu1 %vm3127_vm3, %v11471_v29 }
 0xe38   :  { %11511 = vmatprep.mubr.msk.f32.mxu1 %vm3127_vm3, %v4866_v18 }
 0xe3b   :  { %11512 = vmatmul.mubr.msk.f32.gmra.mxu1 %vm3127_vm3, %v11474_v31  ;;  %v13334_v31 = vld [vmem:[#allocation6 + $0xb0] sm:$0xff] }
 0xe3c   :  { %11514 = vmatprep.mubr.msk.f32.mxu1 %vm3127_vm3, %v4876_v53 }
 0xe3f   :  { %11515 = vmatmul.mubr.msk.f32.gmra.mxu1 %vm3127_vm3, %v11477_v46 }
 0xe40   :  { %11550 = vmatprep.mubr.msk.f32.mxu1 %vm120_vm0, %v13018_v48 }
 0xeeb   :  { %v11484_v57 = vpop.f32.mrf.mxu1 }
 0xeed   :  { %v4981_v19 = vpop.f32.mrf.mxu1 }
 0xeef   :  { %v11487_v6 = vpop.f32.mrf.mxu1 }
 0xef1   :  { %v4991_v63 = vpop.f32.mrf.mxu1 }
 0xef3   :  { %v11490_v61 = vpop.f32.mrf.mxu1 }
 0xef4   :  { %11517 = vmatprep.subr.mxu0 %v11490_v61 }
 0xef5   :  { %v5001_v38 = vpop.f32.mrf.mxu1  ;;  %11518 = vmatpush3.msra.mxu0 %v11490_v61 }
 0xef6   :  { %11519 = vmatprep.subr.mxu0 %v5001_v38 }
 0xef7   :  { %v11510_v8 = vpop.f32.mrf.mxu1  ;;  %11520 = vmatpush3.msra.mxu0 %v5001_v38 }
 0xef8   :  { %11521 = vmatprep.subr.mxu0 %v11487_v6 }
 0xef9   :  { %v5171_v44 = vpop.f32.mrf.mxu1  ;;  %11522 = vmatpush3.msra.mxu0 %v11487_v6  ;;  %v13340_v6 = vld [vmem:[#allocation6 + $0xa8] sm:$0xff] }
 0xefa   :  { %11523 = vmatprep.subr.mxu0 %v4991_v63 }
 0xefb   :  { %v11513_v16 = vpop.f32.mrf.mxu1  ;;  %11524 = vmatpush3.msra.mxu0 %v4991_v63 }
 0xefc   :  { %11525 = vmatprep.subr.mxu0 %v11484_v57 }
 0xefd   :  { %v5181_v15 = vpop.f32.mrf.mxu1  ;;  %11526 = vmatpush3.msra.mxu0 %v11484_v57 }
 0xefe   :  { %11527 = vmatprep.subr.mxu0 %v4981_v19 }
 0xeff   :  { %v11516_v48 = vpop.f32.mrf.mxu1  ;;  %11528 = vmatpush3.msra.mxu0 %v4981_v19 }
 0xf00   :  { %11530 = vmatmul.mubr.msk.f32.vlgmr.msra.gmra.mxu0 %vm120_vm0, %v13034_v42  ;;  %11538 = vmatprep.subr.mxu1 %v11516_v48  ;;  %v5511_v42 = vld [vmem:[#allocation6 + $0x50] sm:$0xff] }
 0xf01   :  { %v5191_v25 = vpop.f32.mrf.mxu1  ;;  %11539 = vmatpush3.msra.mxu1 %v11516_v48  ;;  %11532 = vmatprep.mubr.msk.f32.mxu0 %vm120_vm0, %v13038_v47  ;;  %v5510_v47 = vld [vmem:[#allocation6 + $0x48] sm:$0xff] }
 0xf02   :  { %11540 = vmatprep.subr.mxu1 %v5191_v25  ;;  %11559 = vmatprep.subr.mxu0 %v5510_v47 }
 0xf03   :  { %11541 = vmatpush3.msra.mxu1 %v5191_v25  ;;  %11560 = vmatpush3.msra.mxu0 %v5510_v47 }
 0xf04   :  { %11533 = vmatmul.mubr.msk.f32.gmra.mxu0 %vm120_vm0, %v13042_v40  ;;  %11542 = vmatprep.subr.mxu1 %v11513_v16  ;;  %v13305_v40 = vld [vmem:[#allocation6 + $0x30] sm:$0xff] }
 0xf05   :  { %11543 = vmatpush3.msra.mxu1 %v11513_v16  ;;  %11535 = vmatprep.mubr.msk.f32.mxu0 %vm120_vm0, %v13046_v45  ;;  %v13308_v45 = vld [vmem:[#allocation6 + $0x58] sm:$0xff] }
 0xf06   :  { %11544 = vmatprep.subr.mxu1 %v5181_v15  ;;  %11581 = vmatprep.subr.mxu0 %v13308_v45 }
 0xf07   :  { %11545 = vmatpush3.msra.mxu1 %v5181_v15 }
 0xf08   :  { %11536 = vmatmul.mubr.msk.f32.gmra.mxu0 %vm120_vm0, %v13050_v11  ;;  %11546 = vmatprep.subr.mxu1 %v11510_v8  ;;  %v11497_v11 = vpop.f32.mrf.mxu0 }
 0xf09   :  { %11547 = vmatpush3.msra.mxu1 %v11510_v8 }
 0xf0a   :  { %11548 = vmatprep.subr.mxu1 %v5171_v44 }
 0xf0b   :  { %11549 = vmatpush3.msra.mxu1 %v5171_v44 }
 0xf0c   :  { %11551 = vmatmul.mubr.msk.f32.vlgmr.msra.gmra.mxu1 %vm120_vm0, %v13054_v17  ;;  %11570 = vmatprep.subr.mxu1 %v5511_v42  ;;  %v5076_v17 = vpop.f32.mrf.mxu0 }
 0xf0d   :  { %11553 = vmatprep.mubr.msk.f32.mxu1 %vm120_vm0, %v13058_v49  ;;  %11571 = vmatpush3.msra.mxu1 %v5511_v42 }
 0xf0e   :  { %11592 = vmatprep.subr.mxu1 %v13305_v40  ;;  %v11500_v49 = vpop.f32.mrf.mxu0 }
 0xf10   :  { %11554 = vmatmul.mubr.msk.f32.gmra.mxu1 %vm120_vm0, %v13062_v54  ;;  %v5086_v54 = vpop.f32.mrf.mxu0 }
 0xf11   :  { %11556 = vmatprep.mubr.msk.f32.mxu1 %vm120_vm0, %v13066_v0 }
 0xf12   :  { %v11503_v0 = vpop.f32.mrf.mxu0 }
 0xf14   :  { %11557 = vmatmul.mubr.msk.f32.gmra.mxu1 %vm120_vm0, %v13070_v50  ;;  %v5096_v50 = vpop.f32.mrf.mxu0 }
 0xfc0   :  { %v11531_v21 = vpop.f32.mrf.mxu0 }
 0xfc1   :  { %v5272_v10 = vadd.f32 %v11531_v21, %v11497_v11 }
 0xfc2   :  { %v5266_v20 = vpop.f32.mrf.mxu0 }
 0xfc3   :  { %v5267_v9 = vadd.f32 %v5266_v20, %v5076_v17 }
 0xfc4   :  { %v11534_v41 = vpop.f32.mrf.mxu0 }
 0xfc5   :  { %v5282_v39 = vadd.f32 %v11534_v41, %v11500_v49 }
 0xfc6   :  { %v5276_v13 = vpop.f32.mrf.mxu0 }
 0xfc7   :  { %v5277_v30 = vadd.f32 %v5276_v13, %v5086_v54 }
 0xfc8   :  { %v11537_v35 = vpop.f32.mrf.mxu0 }
 0xfc9   :  { %v5292_v62 = vadd.f32 %v11537_v35, %v11503_v0 }
 0xfca   :  { %v5286_v36 = vpop.f32.mrf.mxu0 }
 0xfcb   :  { %v5287_v32 = vadd.f32 %v5286_v36, %v5096_v50 }
 0xfcc   :  { %v11552_v59 = vpop.f32.mrf.mxu1 }
 0xfcd   :  { %v5391_v22 = vadd.f32 %v11552_v59, %v5272_v10 }
 0xfce   :  { %v5361_v28 = vpop.f32.mrf.mxu1 }
 0xfcf   :  { %v13313_v2 = vadd.f32 %v9792_v7, %v5391_v22  ;;  %v5390_v56 = vadd.f32 %v5361_v28, %v5267_v9 }
 0xfd0   :  { %v11555_v33 = vpop.f32.mrf.mxu1 }
 0xfd1   :  { %v5408_v58 = vmul.f32 %v13313_v2, %v13311_v26  ;;  %v13319_v60 = vadd.f32 %v9792_v7, %v5390_v56  ;;  %v5393_v3 = vadd.f32 %v11555_v33, %v5282_v39 }
 0xfd2   :  { %v5371_v52 = vpop.f32.mrf.mxu1 }
 0xfd3   :  { %v5407_v34 = vmul.f32 %v13319_v60, %v13315_v43  ;;  %v13325_v27 = vadd.f32 %v9792_v7, %v5393_v3  ;;  %v5392_v5 = vadd.f32 %v5371_v52, %v5277_v30  ;;  %v5433_v55 = vmul.f32 %v5408_v58, %v5408_v58 }
 0xfd4   :  { %v11558_v24 = vpop.f32.mrf.mxu1  ;;  %v5415_v46 = vsel %vm5413_vm4, %v5408_v58, 0.0 }
 0xfd5   :  { %v5432_v4 = vmul.f32 %v5407_v34, %v5407_v34  ;;  %v5414_v12 = vsel %vm5413_vm4, %v5407_v34, 0.0  ;;  %v5410_v51 = vmul.f32 %v13325_v27, %v13323_v1  ;;  %v13332_v29 = vadd.f32 %v9792_v7, %v5392_v5 }
 0xfd6   :  { %v5395_v23 = vadd.f32 %v11558_v24, %v5292_v62  ;;  %v5381_v14 = vpop.f32.mrf.mxu1  ;;  %v5439_v63 = vsel %vm5413_vm4, %v5433_v55, 0.0  ;;  %v5416_v61 = vadd.f32 %v5415_v46, %v5414_v12 }
 0xfd7   :  { %v5394_v18 = vadd.f32 %v5381_v14, %v5287_v32  ;;  %v5438_v53 = vsel %vm5413_vm4, %v5432_v4, 0.0  ;;  %v5409_v57 = vmul.f32 %v13332_v29, %v13327_v37  ;;  %v5435_v8 = vmul.f32 %v5410_v51, %v5410_v51 }
 0xfd8   :  { %v5406_v19 = vadd.f32 %v9792_v7, %v5395_v23  ;;  %v5440_v48 = vadd.f32 %v5439_v63, %v5438_v53  ;;  %v5419_v47 = vsel %vm5413_vm4, %v5410_v51, 0.0  ;;  %v9793_v53 = vld [vmem:[#allocation6 + $0x79] ss:$0 sm:$0xff] }
 0xfd9   :  { %v5405_v38 = vadd.f32 %v9792_v7, %v5394_v18  ;;  %v5417_v44 = vsel %vm5413_vm4, %v5409_v57, 0.0  ;;  %v5434_v16 = vmul.f32 %v5409_v57, %v5409_v57  ;;  %v5443_v50 = vsel %vm5413_vm4, %v5435_v8, 0.0 }
 0xfda   :  { %v5412_v15 = vmul.f32 %v5406_v19, %v13334_v31  ;;  %v5418_v25 = vadd.f32 %v5417_v44, %v5416_v61 }
 0xfdb   :  { %v5411_v42 = vmul.f32 %v5405_v38, %v13340_v6  ;;  %v5441_v11 = vsel %vm5413_vm4, %v5434_v16, 0.0 }
 0xfdc   :  { %v5442_v17 = vadd.f32 %v5441_v11, %v5440_v48  ;;  %v5420_v49 = vadd.f32 %v5419_v47, %v5418_v25  ;;  %v5437_v21 = vmul.f32 %v5412_v15, %v5412_v15  ;;  %v5423_v10 = vsel %vm5413_vm4, %v5412_v15, 0.0  ;;  %v9794_v15 = vld [vmem:[#allocation6 + $0x7a] ss:$0 sm:$0xff] }
 0xfdd   :  { %v5421_v54 = vsel %vm5413_vm4, %v5411_v42, 0.0  ;;  %v5436_v0 = vmul.f32 %v5411_v42, %v5411_v42 }
 0xfde   :  { %v5422_v20 = vadd.f32 %v5421_v54, %v5420_v49  ;;  %v5444_v41 = vadd.f32 %v5443_v50, %v5442_v17  ;;  %v5447_v9 = vsel %vm5413_vm4, %v5437_v21, 0.0 }
 0xfdf   :  { %v5445_v13 = vsel %vm5413_vm4, %v5436_v0, 0.0 }
 0xfe0   :  { %v5424_v59 = vadd.f32 %v5423_v10, %v5422_v20  ;;  %v5446_v7 = vadd.f32 %v5445_v13, %v5444_v41 }
 0xfe2   :  { %v5425_v22 = vrot.slane %v5424_v59, 4  ;;  %v5448_v35 = vadd.f32 %v5447_v9, %v5446_v7  ;;  %v5509_v7 = vld [vmem:[#allocation6 + $0x40] sm:$0xff]  ;;  %v5508_v9 = vld [vmem:[#allocation6 + $0x38] sm:$0xff] }
 0xfe4   :  { %v5426_v28 = vadd.f32 %v5425_v22, %v5424_v59  ;;  %v5449_v39 = vrot.slane %v5448_v35, 4 }
 0xfe6   :  { %v5427_v56 = vrot.slane %v5426_v28, 2  ;;  %v5450_v33 = vadd.f32 %v5449_v39, %v5448_v35 }
 0xfe8   :  { %v5428_v58 = vadd.f32 %v5427_v56, %v5426_v28  ;;  %v5451_v3 = vrot.slane %v5450_v33, 2  ;;  %v4887_v56 = vld [vmem:[%s14006_s3 + $0x10] sm:$0xff] }
 0xfea   :  { %v5429_v30 = vrot.slane %v5428_v58, 1  ;;  %v5452_v36 = vadd.f32 %v5451_v3, %v5450_v33  ;;  %v4888_v33 = vld [vmem:[%s14006_s3 + $0x18] sm:$0xff]  ;;  %v4890_v3 = vld [vmem:[%s14006_s3 + $0x28] sm:$0xff] }
 0xfec   :  { %v5430_v52 = vadd.f32 %v5429_v30, %v5428_v58  ;;  %v5453_v34 = vrot.slane %v5452_v36, 1  ;;  %v4889_v58 = vld [vmem:[%s14006_s3 + $0x20] sm:$0xff] }
 0xfed   :  { %v13419_v30 = vld [vmem:[#allocation2] sm:$0xff] }
 0xfee   :  { %v5431_v62 = vmul.f32 0.0625, %v5430_v52  ;;  %v5454_v5 = vadd.f32 %v5453_v34, %v5452_v36  ;;  %v13423_v36 = vld [vmem:[#allocation2 + $0x30] sm:$0xff] }
 0xff0   :  { %v5455_v24 = vmul.f32 0.0625, %v5454_v5  ;;  %v5456_v32 = vmul.f32 %v5431_v62, %v5431_v62  ;;  %v5460_v51 = vsub.f32 %v13313_v2, %v5431_v62  ;;  %v5463_v23 = vsub.f32 %v5405_v38, %v5431_v62 }
 0xff1   :  { %v5459_v14 = vsub.f32 %v13319_v60, %v5431_v62  ;;  %v5461_v18 = vsub.f32 %v13332_v29, %v5431_v62  ;;  %v5462_v57 = vsub.f32 %v13325_v27, %v5431_v62  ;;  %v5464_v63 = vsub.f32 %v5406_v19, %v5431_v62 }
 0xff2   :  { %v5457_v55 = vsub.f32 %v5455_v24, %v5456_v32 }
 0xff4   :  { %v5458_v4 = vmax.f32 %v5457_v55, 0.0 }
 0xff6   :  { %v5465_v12 = vadd.f32 1e-05, %v5458_v4 }
 0xff8   :  { %12062 = vrsqrt.f32 %v5465_v12 }
0x1005   :  { %v12063_v46 = vpop.eup %12062 }
0x1006   :  { %v5468_v61 = vmul.f32 %v12063_v46, %v5460_v51  ;;  %v5471_v8 = vmul.f32 %v12063_v46, %v5463_v23  ;;  %v5467_v44 = vmul.f32 %v12063_v46, %v5459_v14  ;;  %v5469_v16 = vmul.f32 %v12063_v46, %v5461_v18 }
0x1007   :  { %v5470_v48 = vmul.f32 %v12063_v46, %v5462_v57  ;;  %v5472_v25 = vmul.f32 %v12063_v46, %v5464_v63 }
0x1008   :  { %v5479_v42 = vmul.f32 %v9793_v53, %v5468_v61  ;;  %v5482_v47 = vmul.f32 %v9793_v53, %v5471_v8  ;;  %v5478_v2 = vmul.f32 %v9793_v53, %v5467_v44  ;;  %v5480_v38 = vmul.f32 %v9793_v53, %v5469_v16 }
0x1009   :  { %v5481_v11 = vmul.f32 %v9793_v53, %v5470_v48  ;;  %v5483_v54 = vmul.f32 %v9793_v53, %v5472_v25 }
0x100a   :  { %v5489_v60 = vadd.f32 %v9794_v15, %v5478_v2  ;;  %v5490_v17 = vadd.f32 %v9794_v15, %v5479_v42  ;;  %v5491_v29 = vadd.f32 %v9794_v15, %v5480_v38  ;;  %v5493_v50 = vadd.f32 %v9794_v15, %v5482_v47 }
0x100b   :  { %v5492_v49 = vadd.f32 %v9794_v15, %v5481_v11  ;;  %v5494_v13 = vadd.f32 %v9794_v15, %v5483_v54 }
0x100c   :  { %v5495_v0 = vmax.f32 %v5489_v60, 0.0  ;;  %v5496_v27 = vmax.f32 %v5490_v17, 0.0  ;;  %v5497_v19 = vmax.f32 %v5491_v29, 0.0  ;;  %v5499_v59 = vmax.f32 %v5493_v50, 0.0 }
0x100d   :  { %v5498_v41 = vmax.f32 %v5492_v49, 0.0  ;;  %v5500_v35 = vmax.f32 %v5494_v13, 0.0 }
0x100e   :  { %v5501_v21 = vmul.f32 %v5495_v0, %v13315_v43  ;;  %v5502_v20 = vmul.f32 %v5496_v27, %v13311_v26  ;;  %v5503_v10 = vmul.f32 %v5497_v19, %v13327_v37  ;;  %v5505_v28 = vmul.f32 %v5499_v59, %v13340_v6  ;;  %v13451_v59 = vld [vmem:[#allocation2 + $0x20] sm:$0xff] }
0x100f   :  { %v5504_v22 = vmul.f32 %v5498_v41, %v13323_v1  ;;  %v5506_v39 = vmul.f32 %v5500_v35, %v13334_v31  ;;  %v13459_v35 = vld [vmem:[#allocation2 + $0x38] sm:$0xff] }
0x1010   :  { %11561 = vmatprep.mubr.msk.f32.mxu0 %vm5413_vm4, %v5501_v21  ;;  %11572 = vmatprep.mubr.msk.f32.mxu1 %vm5413_vm4, %v5501_v21 }
0x1011   :  { %11562 = vmatmul.mubr.msk.f32.vlgmr.msra.gmra.mxu0 %vm5413_vm4, %v5502_v20  ;;  %11573 = vmatmul.mubr.msk.f32.vlgmr.msra.gmra.mxu1 %vm5413_vm4, %v5502_v20 }
0x1012   :  { %11564 = vmatprep.mubr.msk.f32.mxu0 %vm5413_vm4, %v5503_v10  ;;  %11575 = vmatprep.mubr.msk.f32.mxu1 %vm5413_vm4, %v5503_v10 }
0x1013   :  { %11593 = vmatpush3.msra.mxu1 %v13305_v40  ;;  %11582 = vmatpush3.msra.mxu0 %v13308_v45  ;;  %v4885_v40 = vld [vmem:[%s14006_s3] sm:$0xff]  ;;  %v4886_v45 = vld [vmem:[%s14006_s3 + $0x8] sm:$0xff] }
0x1014   :  { %11614 = vmatprep.subr.mxu1 %v5509_v7  ;;  %11603 = vmatprep.subr.mxu0 %v5508_v9 }
0x1015   :  { %11565 = vmatmul.mubr.msk.f32.gmra.mxu0 %vm5413_vm4, %v5504_v22  ;;  %11576 = vmatmul.mubr.msk.f32.gmra.mxu1 %vm5413_vm4, %v5504_v22 }
0x1016   :  { %11567 = vmatprep.mubr.msk.f32.mxu0 %vm5413_vm4, %v5505_v28  ;;  %11578 = vmatprep.mubr.msk.f32.mxu1 %vm5413_vm4, %v5505_v28 }
0x1019   :  { %11568 = vmatmul.mubr.msk.f32.gmra.mxu0 %vm5413_vm4, %v5506_v39  ;;  %11579 = vmatmul.mubr.msk.f32.gmra.mxu1 %vm5413_vm4, %v5506_v39 }
0x101a   :  { %11583 = vmatprep.mubr.msk.f32.mxu0 %vm5413_vm4, %v5501_v21  ;;  %11594 = vmatprep.mubr.msk.f32.mxu1 %vm5413_vm4, %v4885_v40  ;;  %v13439_v21 = vld [vmem:[#allocation2 + $0x8] sm:$0xff] }
0x101d   :  { %11584 = vmatmul.mubr.msk.f32.vlgmr.msra.gmra.mxu0 %vm5413_vm4, %v5502_v20  ;;  %11595 = vmatmul.mubr.msk.f32.vlgmr.msra.gmra.mxu1 %vm5413_vm4, %v4886_v45  ;;  %v13443_v20 = vld [vmem:[#allocation2 + $0x10] sm:$0xff] }
0x101e   :  { %11586 = vmatprep.mubr.msk.f32.mxu0 %vm5413_vm4, %v5503_v10  ;;  %11615 = vmatpush3.msra.mxu1 %v5509_v7  ;;  %v13447_v10 = vld [vmem:[#allocation2 + $0x18] sm:$0xff] }
0x101f   :  { %11597 = vmatprep.mubr.msk.f32.mxu1 %vm5413_vm4, %v4887_v56  ;;  %11604 = vmatpush3.msra.mxu0 %v5508_v9 }
0x1021   :  { %11587 = vmatmul.mubr.msk.f32.gmra.mxu0 %vm5413_vm4, %v5504_v22  ;;  %11598 = vmatmul.mubr.msk.f32.gmra.mxu1 %vm5413_vm4, %v4888_v33  ;;  %v13455_v22 = vld [vmem:[#allocation2 + $0x28] sm:$0xff] }
0x1022   :  { %11589 = vmatprep.mubr.msk.f32.mxu0 %vm5413_vm4, %v5505_v28  ;;  %11600 = vmatprep.mubr.msk.f32.mxu1 %vm5413_vm4, %v4889_v58  ;;  %v13463_v28 = vld [vmem:[#allocation2 + $0x40] sm:$0xff] }
0x1025   :  { %11590 = vmatmul.mubr.msk.f32.gmra.mxu0 %vm5413_vm4, %v5506_v39  ;;  %11601 = vmatmul.mubr.msk.f32.gmra.mxu1 %vm5413_vm4, %v4890_v3  ;;  %v13467_v39 = vld [vmem:[#allocation2 + $0x48] sm:$0xff] }
0x1026   :  { %11605 = vmatprep.mubr.msk.f32.mxu0 %vm5413_vm4, %v4885_v40  ;;  %11616 = vmatprep.mubr.msk.f32.mxu1 %vm5413_vm4, %v4885_v40  ;;  %v13471_v40 = vld [vmem:[#allocation2 + $0x50] sm:$0xff] }
0x1029   :  { %11606 = vmatmul.mubr.msk.f32.vlgmr.msra.gmra.mxu0 %vm5413_vm4, %v4886_v45  ;;  %11617 = vmatmul.mubr.msk.f32.vlgmr.msra.gmra.mxu1 %vm5413_vm4, %v4886_v45  ;;  %v13475_v45 = vld [vmem:[#allocation2 + $0x58] sm:$0xff] }
0x102a   :  { %11608 = vmatprep.mubr.msk.f32.mxu0 %vm5413_vm4, %v4887_v56  ;;  %11619 = vmatprep.mubr.msk.f32.mxu1 %vm5413_vm4, %v4887_v56  ;;  %v6425_v56 = vld [vmem:[#allocation6 + $0x60] sm:$0xff] }
0x102d   :  { %11609 = vmatmul.mubr.msk.f32.gmra.mxu0 %vm5413_vm4, %v4888_v33  ;;  %11620 = vmatmul.mubr.msk.f32.gmra.mxu1 %vm5413_vm4, %v4888_v33  ;;  %v6426_v33 = vld [vmem:[#allocation6 + $0x68] sm:$0xff] }
0x102e   :  { %11611 = vmatprep.mubr.msk.f32.mxu0 %vm5413_vm4, %v4889_v58  ;;  %11622 = vmatprep.mubr.msk.f32.mxu1 %vm5413_vm4, %v4889_v58  ;;  %v13479_v58 = vld [vmem:[#allocation6 + $0x70] sm:$0xff] }
0x1031   :  { %11612 = vmatmul.mubr.msk.f32.gmra.mxu0 %vm5413_vm4, %v4890_v3  ;;  %11623 = vmatmul.mubr.msk.f32.gmra.mxu1 %vm5413_vm4, %v4890_v3 }
0x1032   :  { %11637 = vmatprep.mubr.msk.f32.mxu0 %vm120_vm0, %v13419_v30  ;;  %11658 = vmatprep.mubr.msk.f32.mxu1 %vm120_vm0, %v13423_v36 }
0x10d1   :  { %v11563_v52 = vpop.f32.mrf.mxu0  ;;  %v13427_v34 = vpop.f32.mrf.mxu1 }
0x10d3   :  { %v5597_v62 = vpop.f32.mrf.mxu0  ;;  %v13429_v5 = vpop.f32.mrf.mxu1 }
0x10d5   :  { %v11566_v24 = vpop.f32.mrf.mxu0  ;;  %v13431_v32 = vpop.f32.mrf.mxu1 }
0x10d7   :  { %v5607_v55 = vpop.f32.mrf.mxu0  ;;  %v13433_v4 = vpop.f32.mrf.mxu1 }
0x10d9   :  { %v11569_v12 = vpop.f32.mrf.mxu0  ;;  %v13435_v51 = vpop.f32.mrf.mxu1 }
0x10db   :  { %v5617_v23 = vpop.f32.mrf.mxu0  ;;  %v13437_v14 = vpop.f32.mrf.mxu1 }
0x10dd   :  { %v11596_v18 = vpop.f32.mrf.mxu1  ;;  %v11585_v46 = vpop.f32.mrf.mxu0 }
0x10de   :  { %v5906_v60 = vadd.f32 %v11596_v18, %v11563_v52 }
0x10df   :  { %v5900_v53 = vpop.f32.mrf.mxu1  ;;  %v5787_v63 = vpop.f32.mrf.mxu0 }
0x10e0   :  { %v5901_v49 = vadd.f32 %v5900_v53, %v5597_v62 }
0x10e1   :  { %v11599_v57 = vpop.f32.mrf.mxu1  ;;  %v11588_v16 = vpop.f32.mrf.mxu0 }
0x10e2   :  { %v5916_v42 = vadd.f32 %v11599_v57, %v11566_v24 }
0x10e3   :  { %v5910_v61 = vpop.f32.mrf.mxu1  ;;  %v5797_v47 = vpop.f32.mrf.mxu0 }
0x10e4   :  { %v5911_v38 = vadd.f32 %v5910_v61, %v5607_v55 }
0x10e5   :  { %v11602_v8 = vpop.f32.mrf.mxu1  ;;  %v11591_v17 = vpop.f32.mrf.mxu0 }
0x10e6   :  { %v5926_v44 = vadd.f32 %v11602_v8, %v11569_v12 }
0x10e7   :  { %v5920_v15 = vpop.f32.mrf.mxu1  ;;  %v5807_v27 = vpop.f32.mrf.mxu0 }
0x10e8   :  { %v5921_v48 = vadd.f32 %v5920_v15, %v5617_v23  ;;  %11625 = vmatprep.subr.mxu0 %v5926_v44 }
0x10e9   :  { %v11618_v25 = vpop.f32.mrf.mxu1  ;;  %11626 = vmatpush3.msra.mxu0 %v5926_v44  ;;  %v11607_v3 = vpop.f32.mrf.mxu0  ;;  %v9843_v44 = vld [vmem:[#allocation6 + $0x7b] ss:$0 sm:$0xff] }
0x10ea   :  { %11627 = vmatprep.subr.mxu0 %v5921_v48  ;;  %v6096_v7 = vadd.f32 %v11618_v25, %v11585_v46  ;;  %v6001_v53 = vadd.f32 %v11607_v3, %v13427_v34 }
0x10eb   :  { %v6090_v2 = vpop.f32.mrf.mxu1  ;;  %11628 = vmatpush3.msra.mxu0 %v5921_v48  ;;  %v5995_v52 = vpop.f32.mrf.mxu0 }
0x10ec   :  { %11629 = vmatprep.subr.mxu0 %v5916_v42  ;;  %v6091_v9 = vadd.f32 %v6090_v2, %v5787_v63  ;;  %v5996_v63 = vadd.f32 %v5995_v52, %v13429_v5 }
0x10ed   :  { %v11621_v11 = vpop.f32.mrf.mxu1  ;;  %11630 = vmatpush3.msra.mxu0 %v5916_v42  ;;  %v11610_v62 = vpop.f32.mrf.mxu0 }
0x10ee   :  { %11631 = vmatprep.subr.mxu0 %v5911_v38  ;;  %v6106_v41 = vadd.f32 %v11621_v11, %v11588_v16  ;;  %v6011_v16 = vadd.f32 %v11610_v62, %v13431_v32 }
0x10ef   :  { %v6100_v29 = vpop.f32.mrf.mxu1  ;;  %11632 = vmatpush3.msra.mxu0 %v5911_v38  ;;  %v6005_v24 = vpop.f32.mrf.mxu0 }
0x10f0   :  { %11633 = vmatprep.subr.mxu0 %v5906_v60  ;;  %v6101_v13 = vadd.f32 %v6100_v29, %v5797_v47  ;;  %v6006_v11 = vadd.f32 %v6005_v24, %v13433_v4 }
0x10f1   :  { %v11624_v54 = vpop.f32.mrf.mxu1  ;;  %11634 = vmatpush3.msra.mxu0 %v5906_v60  ;;  %v11613_v55 = vpop.f32.mrf.mxu0 }
0x10f2   :  { %v6116_v0 = vadd.f32 %v11624_v54, %v11591_v17  ;;  %11635 = vmatprep.subr.mxu0 %v5901_v49  ;;  %v6021_v29 = vadd.f32 %v11613_v55, %v13435_v51 }
0x10f3   :  { %v6110_v19 = vpop.f32.mrf.mxu1  ;;  %11636 = vmatpush3.msra.mxu0 %v5901_v49  ;;  %v6015_v12 = vpop.f32.mrf.mxu0 }
0x10f4   :  { %v6111_v50 = vadd.f32 %v6110_v19, %v5807_v27  ;;  %11638 = vmatmul.mubr.msk.f32.vlgmr.msra.gmra.mxu0 %vm120_vm0, %v13439_v21  ;;  %11646 = vmatprep.subr.mxu1 %v6116_v0 }
0x10f5   :  { %11647 = vmatpush3.msra.mxu1 %v6116_v0  ;;  %11640 = vmatprep.mubr.msk.f32.mxu0 %vm120_vm0, %v13443_v20  ;;  %v6016_v0 = vadd.f32 %v6015_v12, %v13437_v14 }
0x10f6   :  { %11648 = vmatprep.subr.mxu1 %v6111_v50  ;;  %11667 = vmatprep.subr.mxu0 %v6425_v56 }
0x10f7   :  { %11649 = vmatpush3.msra.mxu1 %v6111_v50  ;;  %11668 = vmatpush3.msra.mxu0 %v6425_v56 }
0x10f8   :  { %11641 = vmatmul.mubr.msk.f32.gmra.mxu0 %vm120_vm0, %v13447_v10  ;;  %11650 = vmatprep.subr.mxu1 %v6106_v41 }
0x10f9   :  { %11651 = vmatpush3.msra.mxu1 %v6106_v41  ;;  %11643 = vmatprep.mubr.msk.f32.mxu0 %vm120_vm0, %v13451_v59 }
0x10fa   :  { %11652 = vmatprep.subr.mxu1 %v6101_v13  ;;  %11689 = vmatprep.subr.mxu0 %v13479_v58 }
0x10fb   :  { %11653 = vmatpush3.msra.mxu1 %v6101_v13 }
0x10fc   :  { %11644 = vmatmul.mubr.msk.f32.gmra.mxu0 %vm120_vm0, %v13455_v22  ;;  %11654 = vmatprep.subr.mxu1 %v6096_v7 }
0x10fd   :  { %11655 = vmatpush3.msra.mxu1 %v6096_v7 }
0x10fe   :  { %11656 = vmatprep.subr.mxu1 %v6091_v9 }
0x10ff   :  { %11657 = vmatpush3.msra.mxu1 %v6091_v9 }
0x1100   :  { %11659 = vmatmul.mubr.msk.f32.vlgmr.msra.gmra.mxu1 %vm120_vm0, %v13459_v35  ;;  %11678 = vmatprep.subr.mxu1 %v6426_v33 }
0x1101   :  { %11661 = vmatprep.mubr.msk.f32.mxu1 %vm120_vm0, %v13463_v28  ;;  %11679 = vmatpush3.msra.mxu1 %v6426_v33 }
0x1104   :  { %11662 = vmatmul.mubr.msk.f32.gmra.mxu1 %vm120_vm0, %v13467_v39 }
0x1105   :  { %11664 = vmatprep.mubr.msk.f32.mxu1 %vm120_vm0, %v13471_v40 }
0x1108   :  { %11665 = vmatmul.mubr.msk.f32.gmra.mxu1 %vm120_vm0, %v13475_v45 }
0x11b4   :  { %v11639_v23 = vpop.f32.mrf.mxu0 }
0x11b5   :  { %v6191_v61 = vadd.f32 %v11639_v23, %v6001_v53 }
0x11b6   :  { %v6185_v18 = vpop.f32.mrf.mxu0 }
0x11b7   :  { %v6186_v15 = vadd.f32 %v6185_v18, %v5996_v63 }
0x11b8   :  { %v11642_v46 = vpop.f32.mrf.mxu0 }
0x11b9   :  { %v6201_v47 = vadd.f32 %v11642_v46, %v6011_v16 }
0x11ba   :  { %v6195_v57 = vpop.f32.mrf.mxu0 }
0x11bb   :  { %v6196_v32 = vadd.f32 %v6195_v57, %v6006_v11 }
0x11bc   :  { %v11645_v25 = vpop.f32.mrf.mxu0 }
0x11bd   :  { %v6211_v4 = vadd.f32 %v11645_v25, %v6021_v29 }
0x11be   :  { %v6205_v49 = vpop.f32.mrf.mxu0 }
0x11bf   :  { %v6206_v7 = vadd.f32 %v6205_v49, %v6016_v0 }
0x11c0   :  { %v11660_v8 = vpop.f32.mrf.mxu1 }
0x11c1   :  { %v6310_v48 = vadd.f32 %v11660_v8, %v6191_v61 }
0x11c2   :  { %v6280_v42 = vpop.f32.mrf.mxu1 }
0x11c3   :  { %v13485_v2 = vadd.f32 %v9843_v44, %v6310_v48  ;;  %v6309_v38 = vadd.f32 %v6280_v42, %v6186_v15 }
0x11c4   :  { %v11663_v60 = vpop.f32.mrf.mxu1 }
0x11c5   :  { %v6327_v34 = vmul.f32 %v13485_v2, %v13311_v26  ;;  %v13490_v5 = vadd.f32 %v9843_v44, %v6309_v38  ;;  %v6312_v17 = vadd.f32 %v11663_v60, %v6201_v47 }
0x11c6   :  { %v6290_v54 = vpop.f32.mrf.mxu1 }
0x11c7   :  { %v6351_v27 = vmul.f32 %v6327_v34, %v6327_v34  ;;  %v6326_v19 = vmul.f32 %v13490_v5, %v13315_v43  ;;  %v13496_v50 = vadd.f32 %v9843_v44, %v6312_v17  ;;  %v6311_v41 = vadd.f32 %v6290_v54, %v6196_v32 }
0x11c8   :  { %v11666_v13 = vpop.f32.mrf.mxu1  ;;  %v6333_v9 = vsel %vm5413_vm4, %v6327_v34, 0.0 }
0x11c9   :  { %v6332_v56 = vsel %vm5413_vm4, %v6326_v19, 0.0  ;;  %v6350_v51 = vmul.f32 %v6326_v19, %v6326_v19  ;;  %v6329_v3 = vmul.f32 %v13496_v50, %v13323_v1  ;;  %v13502_v14 = vadd.f32 %v9843_v44, %v6311_v41 }
0x11ca   :  { %v6334_v33 = vadd.f32 %v6333_v9, %v6332_v56  ;;  %v6314_v52 = vadd.f32 %v11666_v13, %v6211_v4  ;;  %v6300_v62 = vpop.f32.mrf.mxu1  ;;  %v6357_v24 = vsel %vm5413_vm4, %v6351_v27, 0.0 }
0x11cb   :  { %v6356_v55 = vsel %vm5413_vm4, %v6350_v51, 0.0  ;;  %v6313_v12 = vadd.f32 %v6300_v62, %v6206_v7  ;;  %v6328_v18 = vmul.f32 %v13502_v14, %v13327_v37  ;;  %v6353_v57 = vmul.f32 %v6329_v3, %v6329_v3 }
0x11cc   :  { %v6358_v23 = vadd.f32 %v6357_v24, %v6356_v55  ;;  %v6325_v46 = vadd.f32 %v9843_v44, %v6314_v52  ;;  %v6337_v48 = vsel %vm5413_vm4, %v6329_v3, 0.0 }
0x11cd   :  { %v6324_v53 = vadd.f32 %v9843_v44, %v6313_v12  ;;  %v6335_v63 = vsel %vm5413_vm4, %v6328_v18, 0.0  ;;  %v6352_v61 = vmul.f32 %v6328_v18, %v6328_v18  ;;  %v6361_v44 = vsel %vm5413_vm4, %v6353_v57, 0.0 }
0x11ce   :  { %v6331_v8 = vmul.f32 %v6325_v46, %v13334_v31  ;;  %v6336_v16 = vadd.f32 %v6335_v63, %v6334_v33 }
0x11cf   :  { %v6330_v15 = vmul.f32 %v6324_v53, %v13340_v6  ;;  %v6359_v25 = vsel %vm5413_vm4, %v6352_v61, 0.0 }
0x11d0   :  { %v6360_v42 = vadd.f32 %v6359_v25, %v6358_v23  ;;  %v6338_v47 = vadd.f32 %v6337_v48, %v6336_v16  ;;  %v6355_v60 = vmul.f32 %v6331_v8, %v6331_v8  ;;  %v6341_v32 = vsel %vm5413_vm4, %v6331_v8, 0.0 }
0x11d1   :  { %v6339_v38 = vsel %vm5413_vm4, %v6330_v15, 0.0  ;;  %v6354_v11 = vmul.f32 %v6330_v15, %v6330_v15 }
0x11d2   :  { %v6340_v34 = vadd.f32 %v6339_v38, %v6338_v47  ;;  %v6362_v17 = vadd.f32 %v6361_v44, %v6360_v42  ;;  %v6365_v0 = vsel %vm5413_vm4, %v6355_v60, 0.0  ;;  %v9844_v42 = vld [vmem:[#allocation6 + $0x7c] ss:$0 sm:$0xff]  ;;  %v9845_v60 = vld [vmem:[#allocation6 + $0x7d] ss:$0 sm:$0xff] }
0x11d3   :  { %v6363_v29 = vsel %vm5413_vm4, %v6354_v11, 0.0 }
0x11d4   :  { %v6342_v49 = vadd.f32 %v6341_v32, %v6340_v34  ;;  %v6364_v54 = vadd.f32 %v6363_v29, %v6362_v17 }
0x11d6   :  { %v6343_v27 = vrot.slane %v6342_v49, 4  ;;  %v6366_v19 = vadd.f32 %v6365_v0, %v6364_v54 }
0x11d8   :  { %v6344_v4 = vadd.f32 %v6343_v27, %v6342_v49  ;;  %v6367_v41 = vrot.slane %v6366_v19, 4 }
0x11da   :  { %v6345_v13 = vrot.slane %v6344_v4, 2  ;;  %v6368_v7 = vadd.f32 %v6367_v41, %v6366_v19 }
0x11dc   :  { %v6346_v9 = vadd.f32 %v6345_v13, %v6344_v4  ;;  %v6369_v56 = vrot.slane %v6368_v7, 2 }
0x11de   :  { %v6347_v51 = vrot.slane %v6346_v9, 1  ;;  %v6370_v33 = vadd.f32 %v6369_v56, %v6368_v7 }
0x11e0   :  { %v6348_v3 = vadd.f32 %v6347_v51, %v6346_v9  ;;  %v6371_v52 = vrot.slane %v6370_v33, 1 }
0x11e2   :  { %v6349_v62 = vmul.f32 0.0625, %v6348_v3  ;;  %v6372_v24 = vadd.f32 %v6371_v52, %v6370_v33 }
0x11e4   :  { %v6373_v55 = vmul.f32 0.0625, %v6372_v24  ;;  %v6374_v12 = vmul.f32 %v6349_v62, %v6349_v62  ;;  %v6378_v23 = vsub.f32 %v13485_v2, %v6349_v62  ;;  %v6381_v18 = vsub.f32 %v6324_v53, %v6349_v62 }
0x11e5   :  { %v6377_v57 = vsub.f32 %v13490_v5, %v6349_v62  ;;  %v6379_v63 = vsub.f32 %v13502_v14, %v6349_v62  ;;  %v6380_v61 = vsub.f32 %v13496_v50, %v6349_v62  ;;  %v6382_v8 = vsub.f32 %v6325_v46, %v6349_v62 }
0x11e6   :  { %v6375_v16 = vsub.f32 %v6373_v55, %v6374_v12 }
0x11e8   :  { %v6376_v15 = vmax.f32 %v6375_v16, 0.0 }
0x11ea   :  { %v6383_v48 = vadd.f32 1e-05, %v6376_v15 }
0x11ec   :  { %12064 = vrsqrt.f32 %v6383_v48  ;;  %v7043_v48 = vld [vmem:[#allocation2 + $0xf0] sm:$0xff] }
0x11f9   :  { %v12065_v25 = vpop.eup %12064 }
0x11fa   :  { %v6386_v47 = vmul.f32 %v12065_v25, %v6378_v23  ;;  %v6389_v38 = vmul.f32 %v12065_v25, %v6381_v18  ;;  %v6385_v11 = vmul.f32 %v12065_v25, %v6377_v57  ;;  %v6387_v44 = vmul.f32 %v12065_v25, %v6379_v63 }
0x11fb   :  { %v6388_v2 = vmul.f32 %v12065_v25, %v6380_v61  ;;  %v6390_v53 = vmul.f32 %v12065_v25, %v6382_v8  ;;  %v7168_v25 = vld [vmem:[#allocation7] sm:$0xff] }
0x11fc   :  { %v6397_v34 = vmul.f32 %v9844_v42, %v6386_v47  ;;  %v6400_v5 = vmul.f32 %v9844_v42, %v6389_v38  ;;  %v6396_v17 = vmul.f32 %v9844_v42, %v6385_v11  ;;  %v6398_v14 = vmul.f32 %v9844_v42, %v6387_v44 }
0x11fd   :  { %v6399_v29 = vmul.f32 %v9844_v42, %v6388_v2  ;;  %v6401_v54 = vmul.f32 %v9844_v42, %v6390_v53 }
0x11fe   :  { %v6407_v50 = vadd.f32 %v9845_v60, %v6396_v17  ;;  %v6408_v46 = vadd.f32 %v9845_v60, %v6397_v34  ;;  %v6409_v32 = vadd.f32 %v9845_v60, %v6398_v14  ;;  %v6411_v4 = vadd.f32 %v9845_v60, %v6400_v5 }
0x11ff   :  { %v6410_v49 = vadd.f32 %v9845_v60, %v6399_v29  ;;  %v6412_v9 = vadd.f32 %v9845_v60, %v6401_v54  ;;  %v9876_v29 = vld [vmem:[#allocation6 + $0x7e] ss:$0 sm:$0xff] }
0x1200   :  { %v6413_v0 = vmax.f32 %v6407_v50, 0.0  ;;  %v6414_v27 = vmax.f32 %v6408_v46, 0.0  ;;  %v6415_v19 = vmax.f32 %v6409_v32, 0.0  ;;  %v6417_v51 = vmax.f32 %v6411_v4, 0.0 }
0x1201   :  { %v6416_v7 = vmax.f32 %v6410_v49, 0.0  ;;  %v6418_v3 = vmax.f32 %v6412_v9, 0.0 }
0x1202   :  { %v6419_v41 = vmul.f32 %v6413_v0, %v13315_v43  ;;  %v6420_v13 = vmul.f32 %v6414_v27, %v13311_v26  ;;  %v6421_v56 = vmul.f32 %v6415_v19, %v13327_v37  ;;  %v6423_v52 = vmul.f32 %v6417_v51, %v13340_v6 }
0x1203   :  { %v6422_v33 = vmul.f32 %v6416_v7, %v13323_v1  ;;  %v6424_v62 = vmul.f32 %v6418_v3, %v13334_v31 }
0x1204   :  { %11669 = vmatprep.mubr.msk.f32.mxu0 %vm5413_vm4, %v6419_v41  ;;  %11680 = vmatprep.mubr.msk.f32.mxu1 %vm5413_vm4, %v6419_v41 }
0x1205   :  { %11670 = vmatmul.mubr.msk.f32.vlgmr.msra.gmra.mxu0 %vm5413_vm4, %v6420_v13  ;;  %11681 = vmatmul.mubr.msk.f32.vlgmr.msra.gmra.mxu1 %vm5413_vm4, %v6420_v13 }
0x1206   :  { %11672 = vmatprep.mubr.msk.f32.mxu0 %vm5413_vm4, %v6421_v56  ;;  %11683 = vmatprep.mubr.msk.f32.mxu1 %vm5413_vm4, %v6421_v56 }
0x1207   :  { %11690 = vmatpush3.msra.mxu0 %v13479_v58 }
0x1209   :  { %11673 = vmatmul.mubr.msk.f32.gmra.mxu0 %vm5413_vm4, %v6422_v33  ;;  %11684 = vmatmul.mubr.msk.f32.gmra.mxu1 %vm5413_vm4, %v6422_v33 }
0x120a   :  { %11675 = vmatprep.mubr.msk.f32.mxu0 %vm5413_vm4, %v6423_v52  ;;  %11686 = vmatprep.mubr.msk.f32.mxu1 %vm5413_vm4, %v6423_v52 }
0x120d   :  { %11676 = vmatmul.mubr.msk.f32.gmra.mxu0 %vm5413_vm4, %v6424_v62  ;;  %11687 = vmatmul.mubr.msk.f32.gmra.mxu1 %vm5413_vm4, %v6424_v62 }
0x120e   :  { %11691 = vmatprep.mubr.msk.f32.mxu0 %vm5413_vm4, %v6419_v41  ;;  %11712 = vmatprep.mubr.msk.f32.mxu1 %vm120_vm0, %v13419_v30 }
0x1211   :  { %11692 = vmatmul.mubr.msk.f32.vlgmr.msra.gmra.mxu0 %vm5413_vm4, %v6420_v13 }
0x1212   :  { %11694 = vmatprep.mubr.msk.f32.mxu0 %vm5413_vm4, %v6421_v56 }
0x1215   :  { %11695 = vmatmul.mubr.msk.f32.gmra.mxu0 %vm5413_vm4, %v6422_v33 }
0x1216   :  { %11697 = vmatprep.mubr.msk.f32.mxu0 %vm5413_vm4, %v6423_v52 }
0x1219   :  { %11698 = vmatmul.mubr.msk.f32.gmra.mxu0 %vm5413_vm4, %v6424_v62 }
0x121a   :  { %11733 = vmatprep.mubr.msk.f32.mxu0 %vm120_vm0, %v13423_v36 }
0x12c5   :  { %v11671_v58 = vpop.f32.mrf.mxu0  ;;  %v11682_v42 = vpop.f32.mrf.mxu1 }
0x12c7   :  { %v6512_v24 = vpop.f32.mrf.mxu0  ;;  %v6607_v47 = vpop.f32.mrf.mxu1 }
0x12c9   :  { %v11674_v55 = vpop.f32.mrf.mxu0  ;;  %v11685_v38 = vpop.f32.mrf.mxu1 }
0x12cb   :  { %v6522_v12 = vpop.f32.mrf.mxu0  ;;  %v6617_v11 = vpop.f32.mrf.mxu1 }
0x12cd   :  { %v11677_v23 = vpop.f32.mrf.mxu0  ;;  %v11688_v44 = vpop.f32.mrf.mxu1 }
0x12ce   :  { %11700 = vmatprep.subr.mxu1 %v11677_v23 }
0x12cf   :  { %v6532_v18 = vpop.f32.mrf.mxu0  ;;  %11701 = vmatpush3.msra.mxu1 %v11677_v23  ;;  %v6627_v60 = vpop.f32.mrf.mxu1 }
0x12d0   :  { %11702 = vmatprep.subr.mxu1 %v6532_v18 }
0x12d1   :  { %v11693_v57 = vpop.f32.mrf.mxu0  ;;  %11703 = vmatpush3.msra.mxu1 %v6532_v18 }
0x12d2   :  { %11704 = vmatprep.subr.mxu1 %v11674_v55 }
0x12d3   :  { %v6702_v63 = vpop.f32.mrf.mxu0  ;;  %11705 = vmatpush3.msra.mxu1 %v11674_v55 }
0x12d4   :  { %11706 = vmatprep.subr.mxu1 %v6522_v12 }
0x12d5   :  { %v11696_v61 = vpop.f32.mrf.mxu0  ;;  %11707 = vmatpush3.msra.mxu1 %v6522_v12 }
0x12d6   :  { %11708 = vmatprep.subr.mxu1 %v11671_v58 }
0x12d7   :  { %v6712_v8 = vpop.f32.mrf.mxu0  ;;  %11709 = vmatpush3.msra.mxu1 %v11671_v58 }
0x12d8   :  { %11710 = vmatprep.subr.mxu1 %v6512_v24 }
0x12d9   :  { %v11699_v16 = vpop.f32.mrf.mxu0  ;;  %11711 = vmatpush3.msra.mxu1 %v6512_v24 }
0x12da   :  { %11713 = vmatmul.mubr.msk.f32.vlgmr.msra.gmra.mxu1 %vm120_vm0, %v13439_v21  ;;  %11721 = vmatprep.subr.mxu0 %v11699_v16 }
0x12db   :  { %v6722_v15 = vpop.f32.mrf.mxu0  ;;  %11722 = vmatpush3.msra.mxu0 %v11699_v16  ;;  %11715 = vmatprep.mubr.msk.f32.mxu1 %vm120_vm0, %v13443_v20 }
0x12dc   :  { %11723 = vmatprep.subr.mxu0 %v6722_v15 }
0x12dd   :  { %11724 = vmatpush3.msra.mxu0 %v6722_v15 }
0x12de   :  { %11716 = vmatmul.mubr.msk.f32.gmra.mxu1 %vm120_vm0, %v13447_v10  ;;  %11725 = vmatprep.subr.mxu0 %v11696_v61 }
0x12df   :  { %11726 = vmatpush3.msra.mxu0 %v11696_v61  ;;  %11718 = vmatprep.mubr.msk.f32.mxu1 %vm120_vm0, %v13451_v59 }
0x12e0   :  { %11727 = vmatprep.subr.mxu0 %v6712_v8 }
0x12e1   :  { %11728 = vmatpush3.msra.mxu0 %v6712_v8 }
0x12e2   :  { %11719 = vmatmul.mubr.msk.f32.gmra.mxu1 %vm120_vm0, %v13455_v22  ;;  %11729 = vmatprep.subr.mxu0 %v11693_v57 }
0x12e3   :  { %11730 = vmatpush3.msra.mxu0 %v11693_v57  ;;  %11754 = vmatprep.mubr.msk.f32.mxu1 %vm120_vm0, %v7043_v48 }
0x12e4   :  { %11731 = vmatprep.subr.mxu0 %v6702_v63 }
0x12e5   :  { %11732 = vmatpush3.msra.mxu0 %v6702_v63 }
0x12e6   :  { %11734 = vmatmul.mubr.msk.f32.vlgmr.msra.gmra.mxu0 %vm120_vm0, %v13459_v35  ;;  %11763 = vmatprep.subr.mxu0 %v7168_v25 }
0x12e7   :  { %11736 = vmatprep.mubr.msk.f32.mxu0 %vm120_vm0, %v13463_v28  ;;  %11764 = vmatpush3.msra.mxu0 %v7168_v25 }
0x12ea   :  { %11737 = vmatmul.mubr.msk.f32.gmra.mxu0 %vm120_vm0, %v13467_v39 }
0x12eb   :  { %11739 = vmatprep.mubr.msk.f32.mxu0 %vm120_vm0, %v13471_v40 }
0x12ee   :  { %11740 = vmatmul.mubr.msk.f32.gmra.mxu0 %vm120_vm0, %v13475_v45 }
0x139a   :  { %v11714_v2 = vpop.f32.mrf.mxu1 }
0x139b   :  { %v6803_v17 = vadd.f32 %v11714_v2, %v11682_v42 }
0x139c   :  { %v6797_v53 = vpop.f32.mrf.mxu1 }
0x139d   :  { %v6798_v50 = vadd.f32 %v6797_v53, %v6607_v47 }
0x139e   :  { %v11717_v34 = vpop.f32.mrf.mxu1 }
0x139f   :  { %v6813_v54 = vadd.f32 %v11717_v34, %v11685_v38 }
0x13a0   :  { %v6807_v5 = vpop.f32.mrf.mxu1 }
0x13a1   :  { %v6808_v7 = vadd.f32 %v6807_v5, %v6617_v11 }
0x13a2   :  { %v11720_v32 = vpop.f32.mrf.mxu1 }
0x13a3   :  { %v6823_v3 = vadd.f32 %v11720_v32, %v11688_v44 }
0x13a4   :  { %v6817_v9 = vpop.f32.mrf.mxu1 }
0x13a5   :  { %v6818_v58 = vadd.f32 %v6817_v9, %v6627_v60 }
0x13a6   :  { %v11735_v14 = vpop.f32.mrf.mxu0 }
0x13a7   :  { %v6922_v46 = vadd.f32 %v11735_v14, %v6803_v17 }
0x13a8   :  { %v6892_v49 = vpop.f32.mrf.mxu0 }
0x13a9   :  { %v13572_v0 = vadd.f32 %v9876_v29, %v6922_v46  ;;  %v6921_v27 = vadd.f32 %v6892_v49, %v6798_v50 }
0x13aa   :  { %v11738_v19 = vpop.f32.mrf.mxu0 }
0x13ab   :  { %v6939_v4 = vmul.f32 %v13572_v0, %v13311_v26  ;;  %v13576_v41 = vadd.f32 %v9876_v29, %v6921_v27  ;;  %v6924_v13 = vadd.f32 %v11738_v19, %v6813_v54 }
0x13ac   :  { %v6902_v56 = vpop.f32.mrf.mxu0 }
0x13ad   :  { %v6938_v51 = vmul.f32 %v13576_v41, %v13315_v43  ;;  %v13580_v33 = vadd.f32 %v9876_v29, %v6924_v13  ;;  %v6923_v52 = vadd.f32 %v6902_v56, %v6808_v7  ;;  %v6963_v24 = vmul.f32 %v6939_v4, %v6939_v4 }
0x13ae   :  { %v11741_v62 = vpop.f32.mrf.mxu0  ;;  %v6945_v43 = vsel %vm5413_vm4, %v6939_v4, 0.0 }
0x13af   :  { %v6962_v55 = vmul.f32 %v6938_v51, %v6938_v51  ;;  %v6944_v12 = vsel %vm5413_vm4, %v6938_v51, 0.0  ;;  %v6941_v26 = vmul.f32 %v13580_v33, %v13323_v1  ;;  %v13585_v23 = vadd.f32 %v9876_v29, %v6923_v52 }
0x13b0   :  { %v6926_v18 = vadd.f32 %v11741_v62, %v6823_v3  ;;  %v6912_v57 = vpop.f32.mrf.mxu0  ;;  %v6969_v15 = vsel %vm5413_vm4, %v6963_v24, 0.0  ;;  %v6946_v48 = vadd.f32 %v6945_v43, %v6944_v12 }
0x13b1   :  { %v6925_v63 = vadd.f32 %v6912_v57, %v6818_v58  ;;  %v6968_v61 = vsel %vm5413_vm4, %v6962_v55, 0.0  ;;  %v6940_v8 = vmul.f32 %v13585_v23, %v13327_v37  ;;  %v6965_v42 = vmul.f32 %v6941_v26, %v6941_v26 }
0x13b2   :  { %v6937_v16 = vadd.f32 %v9876_v29, %v6926_v18  ;;  %v6970_v11 = vadd.f32 %v6969_v15, %v6968_v61  ;;  %v6949_v2 = vsel %vm5413_vm4, %v6941_v26, 0.0 }
0x13b3   :  { %v6936_v25 = vadd.f32 %v9876_v29, %v6925_v63  ;;  %v6947_v1 = vsel %vm5413_vm4, %v6940_v8, 0.0  ;;  %v6964_v47 = vmul.f32 %v6940_v8, %v6940_v8  ;;  %v6973_v14 = vsel %vm5413_vm4, %v6965_v42, 0.0  ;;  %v9877_v42 = vld [vmem:[#allocation6 + $0x7f] ss:$0 sm:$0xff] }
0x13b4   :  { %v6943_v38 = vmul.f32 %v6937_v16, %v13334_v31  ;;  %v6948_v44 = vadd.f32 %v6947_v1, %v6946_v48 }
0x13b5   :  { %v6942_v60 = vmul.f32 %v6936_v25, %v13340_v6  ;;  %v6971_v53 = vsel %vm5413_vm4, %v6964_v47, 0.0 }
0x13b6   :  { %v6972_v37 = vadd.f32 %v6971_v53, %v6970_v11  ;;  %v6950_v34 = vadd.f32 %v6949_v2, %v6948_v44  ;;  %v6967_v29 = vmul.f32 %v6943_v38, %v6943_v38  ;;  %v6953_v32 = vsel %vm5413_vm4, %v6943_v38, 0.0  ;;  %v9878_v2 = vld [vmem:[#allocation6 + $0x80] ss:$0 sm:$0xff] }
0x13b7   :  { %v6951_v5 = vsel %vm5413_vm4, %v6942_v60, 0.0  ;;  %v6966_v17 = vmul.f32 %v6942_v60, %v6942_v60 }
0x13b8   :  { %v6952_v50 = vadd.f32 %v6951_v5, %v6950_v34  ;;  %v6974_v46 = vadd.f32 %v6973_v14, %v6972_v37  ;;  %v6977_v54 = vsel %vm5413_vm4, %v6967_v29, 0.0 }
0x13b9   :  { %v6975_v31 = vsel %vm5413_vm4, %v6966_v17, 0.0 }
0x13ba   :  { %v6954_v49 = vadd.f32 %v6953_v32, %v6952_v50  ;;  %v6976_v6 = vadd.f32 %v6975_v31, %v6974_v46 }
0x13bc   :  { %v6955_v27 = vrot.slane %v6954_v49, 4  ;;  %v6978_v19 = vadd.f32 %v6977_v54, %v6976_v6  ;;  %v12147_v6 = vld [vmem:[#allocation6 + $0xa8] sm:$0xff] }
0x13be   :  { %v6956_v4 = vadd.f32 %v6955_v27, %v6954_v49  ;;  %v6979_v13 = vrot.slane %v6978_v19, 4 }
0x13c0   :  { %v6957_v7 = vrot.slane %v6956_v4, 2  ;;  %v6980_v9 = vadd.f32 %v6979_v13, %v6978_v19 }
0x13c2   :  { %v6958_v56 = vadd.f32 %v6957_v7, %v6956_v4  ;;  %v6981_v51 = vrot.slane %v6980_v9, 2  ;;  %v12148_v4 = vld [vmem:[#allocation6 + $0xa0] sm:$0xff] }
0x13c4   :  { %v6959_v3 = vrot.slane %v6958_v56, 1  ;;  %v6982_v52 = vadd.f32 %v6981_v51, %v6980_v9  ;;  %v12149_v9 = vld [vmem:[#allocation6 + $0x98] sm:$0xff] }
0x13c6   :  { %v6960_v62 = vadd.f32 %v6959_v3, %v6958_v56  ;;  %v6983_v58 = vrot.slane %v6982_v52, 1  ;;  %v12150_v3 = vld [vmem:[#allocation6 + $0x90] sm:$0xff] }
0x13c8   :  { %v6961_v24 = vmul.f32 0.0625, %v6960_v62  ;;  %v6984_v55 = vadd.f32 %v6983_v58, %v6982_v52  ;;  %v12151_v62 = vld [vmem:[#allocation6 + $0x88] sm:$0xff] }
0x13ca   :  { %v6985_v12 = vmul.f32 0.0625, %v6984_v55  ;;  %v6986_v26 = vmul.f32 %v6961_v24, %v6961_v24  ;;  %v6993_v43 = vsub.f32 %v6936_v25, %v6961_v24  ;;  %v6994_v61 = vsub.f32 %v6937_v16, %v6961_v24  ;;  %v7045_v55 = vld [vmem:[#allocation2 + $0x100] sm:$0xff] }
0x13cb   :  { %v6992_v8 = vsub.f32 %v13580_v33, %v6961_v24  ;;  %v6991_v15 = vsub.f32 %v13585_v23, %v6961_v24  ;;  %v6990_v1 = vsub.f32 %v13572_v0, %v6961_v24  ;;  %v6989_v47 = vsub.f32 %v13576_v41, %v6961_v24  ;;  %v12146_v41 = vld [vmem:[#allocation6 + $0xb0] sm:$0xff]  ;;  %v7044_v24 = vld [vmem:[#allocation2 + $0xf8] sm:$0xff] }
0x13cc   :  { %v6987_v18 = vsub.f32 %v6985_v12, %v6986_v26  ;;  %v7046_v12 = vld [vmem:[#allocation2 + $0x108] sm:$0xff]  ;;  %v7047_v26 = vld [vmem:[#allocation2 + $0x110] sm:$0xff] }
0x13ce   :  { %v6988_v57 = vmax.f32 %v6987_v18, 0.0  ;;  %v7048_v18 = vld [vmem:[#allocation2 + $0x118] sm:$0xff] }
0x13d0   :  { %v6995_v63 = vadd.f32 1e-05, %v6988_v57  ;;  %v7169_v57 = vld [vmem:[#allocation7 + $0x8] sm:$0xff] }
0x13d2   :  { %12066 = vrsqrt.f32 %v6995_v63  ;;  %v7170_v63 = vld [vmem:[#allocation7 + $0x10] sm:$0xff] }
0x13d3   :  { %11785 = vmatprep.subr.mxu0 %v7170_v63 }
0x13df   :  { %v12067_v48 = vpop.eup %12066 }
0x13e0   :  { %v7001_v38 = vmul.f32 %v12067_v48, %v6993_v43  ;;  %v7002_v11 = vmul.f32 %v12067_v48, %v6994_v61  ;;  %v7000_v44 = vmul.f32 %v12067_v48, %v6992_v8  ;;  %v6999_v60 = vmul.f32 %v12067_v48, %v6991_v15 }
0x13e1   :  { %v6998_v53 = vmul.f32 %v12067_v48, %v6990_v1  ;;  %v6997_v37 = vmul.f32 %v12067_v48, %v6989_v47 }
0x13e2   :  { %v7013_v34 = vmul.f32 %v9877_v42, %v7002_v11  ;;  %v7012_v25 = vmul.f32 %v9877_v42, %v7001_v38  ;;  %v7011_v16 = vmul.f32 %v9877_v42, %v7000_v44  ;;  %v7010_v5 = vmul.f32 %v9877_v42, %v6999_v60 }
0x13e3   :  { %v7009_v14 = vmul.f32 %v9877_v42, %v6998_v53  ;;  %v7008_v46 = vmul.f32 %v9877_v42, %v6997_v37 }
0x13e4   :  { %v7024_v33 = vadd.f32 %v9878_v2, %v7013_v34  ;;  %v7023_v17 = vadd.f32 %v9878_v2, %v7012_v25  ;;  %v7022_v23 = vadd.f32 %v9878_v2, %v7011_v16  ;;  %v7021_v0 = vadd.f32 %v9878_v2, %v7010_v5 }
0x13e5   :  { %v7020_v49 = vadd.f32 %v9878_v2, %v7009_v14  ;;  %v7019_v19 = vadd.f32 %v9878_v2, %v7008_v46  ;;  %v9915_v14 = vld [vmem:[#allocation7 + $0x60] ss:$0 sm:$0xff]  ;;  %v13665_v46 = vld [vmem:[#allocation7 + $0x78] sm:$0xff] }
0x13e6   :  { %v7030_v29 = vmax.f32 %v7024_v33, 0.0  ;;  %v7029_v50 = vmax.f32 %v7023_v17, 0.0  ;;  %v7028_v32 = vmax.f32 %v7022_v23, 0.0  ;;  %v7027_v27 = vmax.f32 %v7021_v0, 0.0 }
0x13e7   :  { %v7026_v7 = vmax.f32 %v7020_v49, 0.0  ;;  %v7025_v51 = vmax.f32 %v7019_v19, 0.0 }
0x13e8   :  { %v7036_v31 = vmul.f32 %v12146_v41, %v7030_v29  ;;  %v7035_v54 = vmul.f32 %v12147_v6, %v7029_v50  ;;  %v7034_v13 = vmul.f32 %v12148_v4, %v7028_v32  ;;  %v7033_v56 = vmul.f32 %v12149_v9, %v7027_v27  ;;  %v13669_v6 = vld [vmem:[#allocation7 + $0x70] sm:$0xff] }
0x13e9   :  { %v7032_v52 = vmul.f32 %v12150_v3, %v7026_v7  ;;  %v7031_v58 = vmul.f32 %v12151_v62, %v7025_v51  ;;  %v13677_v51 = vld [vmem:[#allocation7 + $0x88] sm:$0xff] }
0x13ea   :  { %11742 = vmatprep.subr.mxu1 %v7036_v31 }
0x13eb   :  { %11743 = vmatpush3.msra.mxu1 %v7036_v31 }
0x13ec   :  { %11744 = vmatprep.subr.mxu1 %v7035_v54 }
0x13ed   :  { %11745 = vmatpush3.msra.mxu1 %v7035_v54 }
0x13ee   :  { %11746 = vmatprep.subr.mxu1 %v7034_v13 }
0x13ef   :  { %11747 = vmatpush3.msra.mxu1 %v7034_v13 }
0x13f0   :  { %11748 = vmatprep.subr.mxu1 %v7033_v56 }
0x13f1   :  { %11749 = vmatpush3.msra.mxu1 %v7033_v56 }
0x13f2   :  { %11750 = vmatprep.subr.mxu1 %v7032_v52 }
0x13f3   :  { %11751 = vmatpush3.msra.mxu1 %v7032_v52 }
0x13f4   :  { %11752 = vmatprep.subr.mxu1 %v7031_v58 }
0x13f5   :  { %11753 = vmatpush3.msra.mxu1 %v7031_v58 }
0x13f6   :  { %11755 = vmatmul.mubr.msk.f32.vlgmr.msra.gmra.mxu1 %vm120_vm0, %v7044_v24  ;;  %11774 = vmatprep.subr.mxu1 %v7169_v57 }
0x13f7   :  { %11757 = vmatprep.mubr.msk.f32.mxu1 %vm120_vm0, %v7045_v55  ;;  %11775 = vmatpush3.msra.mxu1 %v7169_v57 }
0x13fa   :  { %11758 = vmatmul.mubr.msk.f32.gmra.mxu1 %vm120_vm0, %v7046_v12 }
0x13fb   :  { %11760 = vmatprep.mubr.msk.f32.mxu1 %vm120_vm0, %v7047_v26  ;;  %v13681_v26 = vld [vmem:[#allocation7 + $0x80] sm:$0xff] }
0x13fe   :  { %11761 = vmatmul.mubr.msk.f32.gmra.mxu1 %vm120_vm0, %v7048_v18 }
0x14b6   :  { %v11756_v43 = vpop.f32.mrf.mxu1 }
0x14b8   :  { %v7133_v61 = vpop.f32.mrf.mxu1 }
0x14b9   :  { %11765 = vmatprep.mubr.msk.f32.mxu0 %vm5413_vm4, %v7133_v61  ;;  %11776 = vmatprep.mubr.msk.f32.mxu1 %vm5413_vm4, %v7133_v61 }
0x14ba   :  { %v11759_v8 = vpop.f32.mrf.mxu1  ;;  %11766 = vmatmul.mubr.msk.f32.vlgmr.msra.gmra.mxu0 %vm5413_vm4, %v11756_v43  ;;  %11777 = vmatmul.mubr.msk.f32.vlgmr.msra.gmra.mxu1 %vm5413_vm4, %v11756_v43 }
0x14bb   :  { %11786 = vmatpush3.msra.mxu0 %v7170_v63 }
0x14bc   :  { %v7143_v15 = vpop.f32.mrf.mxu1 }
0x14bd   :  { %11768 = vmatprep.mubr.msk.f32.mxu0 %vm5413_vm4, %v7143_v15  ;;  %11779 = vmatprep.mubr.msk.f32.mxu1 %vm5413_vm4, %v7143_v15 }
0x14be   :  { %v11762_v48 = vpop.f32.mrf.mxu1  ;;  %11769 = vmatmul.mubr.msk.f32.gmra.mxu0 %vm5413_vm4, %v11759_v8  ;;  %11780 = vmatmul.mubr.msk.f32.gmra.mxu1 %vm5413_vm4, %v11759_v8 }
0x14c0   :  { %v7153_v42 = vpop.f32.mrf.mxu1 }
0x14c1   :  { %11771 = vmatprep.mubr.msk.f32.mxu0 %vm5413_vm4, %v7153_v42  ;;  %11782 = vmatprep.mubr.msk.f32.mxu1 %vm5413_vm4, %v7153_v42 }
0x14c2   :  { %11772 = vmatmul.mubr.msk.f32.gmra.mxu0 %vm5413_vm4, %v11762_v48  ;;  %11783 = vmatmul.mubr.msk.f32.gmra.mxu1 %vm5413_vm4, %v11762_v48 }
0x14c3   :  { %11787 = vmatprep.mubr.msk.f32.mxu0 %vm5413_vm4, %v7133_v61  ;;  %11808 = vmatprep.mubr.msk.f32.mxu1 %vm120_vm0, %v13419_v30 }
0x14c6   :  { %11788 = vmatmul.mubr.msk.f32.vlgmr.msra.gmra.mxu0 %vm5413_vm4, %v11756_v43 }
0x14c7   :  { %11790 = vmatprep.mubr.msk.f32.mxu0 %vm5413_vm4, %v7143_v15 }
0x14ca   :  { %11791 = vmatmul.mubr.msk.f32.gmra.mxu0 %vm5413_vm4, %v11759_v8  ;;  %v13688_v8 = vld [vmem:[#allocation7 + $0x98] sm:$0xff] }
0x14cb   :  { %11793 = vmatprep.mubr.msk.f32.mxu0 %vm5413_vm4, %v7153_v42 }
0x14ce   :  { %11794 = vmatmul.mubr.msk.f32.gmra.mxu0 %vm5413_vm4, %v11762_v48 }
0x14cf   :  { %11829 = vmatprep.mubr.msk.f32.mxu0 %vm120_vm0, %v13423_v36 }
0x157a   :  { %v11767_v1 = vpop.f32.mrf.mxu0 }
0x157c   :  { %v7255_v47 = vpop.f32.mrf.mxu0 }
0x157e   :  { %v11770_v38 = vpop.f32.mrf.mxu0 }
0x1580   :  { %v7265_v11 = vpop.f32.mrf.mxu0 }
0x1582   :  { %v11773_v44 = vpop.f32.mrf.mxu0 }
0x1583   :  { %11796 = vmatprep.subr.mxu1 %v11773_v44 }
0x1584   :  { %v7275_v30 = vpop.f32.mrf.mxu0  ;;  %11797 = vmatpush3.msra.mxu1 %v11773_v44 }
0x1585   :  { %11798 = vmatprep.subr.mxu1 %v7275_v30 }
0x1586   :  { %v11789_v60 = vpop.f32.mrf.mxu0  ;;  %11799 = vmatpush3.msra.mxu1 %v7275_v30 }
0x1587   :  { %11800 = vmatprep.subr.mxu1 %v11770_v38 }
0x1588   :  { %v7445_v2 = vpop.f32.mrf.mxu0  ;;  %11801 = vmatpush3.msra.mxu1 %v11770_v38  ;;  %v13694_v38 = vld [vmem:[#allocation7 + $0x90] sm:$0xff] }
0x1589   :  { %11802 = vmatprep.subr.mxu1 %v7265_v11 }
0x158a   :  { %v11792_v53 = vpop.f32.mrf.mxu0  ;;  %11803 = vmatpush3.msra.mxu1 %v7265_v11 }
0x158b   :  { %11804 = vmatprep.subr.mxu1 %v11767_v1 }
0x158c   :  { %v7455_v37 = vpop.f32.mrf.mxu0  ;;  %11805 = vmatpush3.msra.mxu1 %v11767_v1 }
0x158d   :  { %11806 = vmatprep.subr.mxu1 %v7255_v47 }
0x158e   :  { %v11795_v36 = vpop.f32.mrf.mxu0  ;;  %11807 = vmatpush3.msra.mxu1 %v7255_v47 }
0x158f   :  { %11809 = vmatmul.mubr.msk.f32.vlgmr.msra.gmra.mxu1 %vm120_vm0, %v13439_v21  ;;  %11817 = vmatprep.subr.mxu0 %v11795_v36  ;;  %v7785_v21 = vld [vmem:[#allocation7 + $0x38] sm:$0xf] }
0x1590   :  { %v7465_v34 = vpop.f32.mrf.mxu0  ;;  %11818 = vmatpush3.msra.mxu0 %v11795_v36  ;;  %11811 = vmatprep.mubr.msk.f32.mxu1 %vm120_vm0, %v13443_v20  ;;  %v7784_v20 = vld [vmem:[#allocation7 + $0x30] sm:$0xf] }
0x1591   :  { %11819 = vmatprep.subr.mxu0 %v7465_v34  ;;  %11838 = vmatprep.subr.msk.mxu1 %vm7805_vm5, %v7784_v20 }
0x1592   :  { %11820 = vmatpush3.msra.mxu0 %v7465_v34  ;;  %11839 = vmatpush3.msk.msra.mxu1 %vm7805_vm5, %v7784_v20 }
0x1593   :  { %11812 = vmatmul.mubr.msk.f32.gmra.mxu1 %vm120_vm0, %v13447_v10  ;;  %11821 = vmatprep.subr.mxu0 %v11792_v53  ;;  %v13657_v10 = vld [vmem:[#allocation7 + $0x18] sm:$0xf] }
0x1594   :  { %11822 = vmatpush3.msra.mxu0 %v11792_v53  ;;  %11814 = vmatprep.mubr.msk.f32.mxu1 %vm120_vm0, %v13451_v59  ;;  %v13661_v59 = vld [vmem:[#allocation7 + $0x40] sm:$0xf] }
0x1595   :  { %11823 = vmatprep.subr.mxu0 %v7455_v37  ;;  %11860 = vmatprep.subr.msk.mxu1 %vm7805_vm5, %v13661_v59 }
0x1596   :  { %11824 = vmatpush3.msra.mxu0 %v7455_v37 }
0x1597   :  { %11815 = vmatmul.mubr.msk.f32.gmra.mxu1 %vm120_vm0, %v13455_v22  ;;  %11825 = vmatprep.subr.mxu0 %v11789_v60  ;;  %v11778_v22 = vpop.f32.mrf.mxu1 }
0x1598   :  { %11826 = vmatpush3.msra.mxu0 %v11789_v60 }
0x1599   :  { %11827 = vmatprep.subr.mxu0 %v7445_v2 }
0x159a   :  { %11828 = vmatpush3.msra.mxu0 %v7445_v2 }
0x159b   :  { %11830 = vmatmul.mubr.msk.f32.vlgmr.msra.gmra.mxu0 %vm120_vm0, %v13459_v35  ;;  %11849 = vmatprep.subr.msk.mxu0 %vm7805_vm5, %v7785_v21  ;;  %v7350_v35 = vpop.f32.mrf.mxu1 }
0x159c   :  { %11832 = vmatprep.mubr.msk.f32.mxu0 %vm120_vm0, %v13463_v28  ;;  %11850 = vmatpush3.msk.msra.mxu0 %vm7805_vm5, %v7785_v21 }
0x159d   :  { %11871 = vmatprep.subr.msk.mxu0 %vm7805_vm5, %v13657_v10  ;;  %v11781_v28 = vpop.f32.mrf.mxu1 }
0x159f   :  { %11833 = vmatmul.mubr.msk.f32.gmra.mxu0 %vm120_vm0, %v13467_v39  ;;  %v7360_v39 = vpop.f32.mrf.mxu1 }
0x15a0   :  { %11835 = vmatprep.mubr.msk.f32.mxu0 %vm120_vm0, %v13471_v40 }
0x15a1   :  { %v11784_v40 = vpop.f32.mrf.mxu1 }
0x15a3   :  { %11836 = vmatmul.mubr.msk.f32.gmra.mxu0 %vm120_vm0, %v13475_v45  ;;  %v7370_v45 = vpop.f32.mrf.mxu1 }
0x164f   :  { %v11810_v25 = vpop.f32.mrf.mxu1 }
0x1650   :  { %v7546_v17 = vadd.f32 %v11810_v25, %v11778_v22 }
0x1651   :  { %v7540_v16 = vpop.f32.mrf.mxu1 }
0x1652   :  { %v7541_v29 = vadd.f32 %v7540_v16, %v7350_v35 }
0x1653   :  { %v11813_v5 = vpop.f32.mrf.mxu1 }
0x1654   :  { %v7556_v31 = vadd.f32 %v11813_v5, %v11781_v28 }
0x1655   :  { %v7550_v33 = vpop.f32.mrf.mxu1 }
0x1656   :  { %v7551_v13 = vadd.f32 %v7550_v33, %v7360_v39 }
0x1657   :  { %v11816_v0 = vpop.f32.mrf.mxu1 }
0x1658   :  { %v7566_v52 = vadd.f32 %v11816_v0, %v11784_v40 }
0x1659   :  { %v7560_v7 = vpop.f32.mrf.mxu1 }
0x165a   :  { %v7561_v24 = vadd.f32 %v7560_v7, %v7370_v45 }
0x165b   :  { %v11831_v23 = vpop.f32.mrf.mxu0 }
0x165c   :  { %v7665_v50 = vadd.f32 %v11831_v23, %v7546_v17 }
0x165d   :  { %v7635_v41 = vpop.f32.mrf.mxu0 }
0x165e   :  { %v13667_v32 = vadd.f32 %v9915_v14, %v7665_v50  ;;  %v7664_v49 = vadd.f32 %v7635_v41, %v7541_v29 }
0x165f   :  { %v11834_v54 = vpop.f32.mrf.mxu0 }
0x1660   :  { %v7682_v27 = vmul.f32 %v13667_v32, %v13665_v46  ;;  %v13673_v19 = vadd.f32 %v9915_v14, %v7664_v49  ;;  %v7667_v4 = vadd.f32 %v11834_v54, %v7556_v31 }
0x1661   :  { %v7645_v9 = vpop.f32.mrf.mxu0 }
0x1662   :  { %v7681_v56 = vmul.f32 %v13673_v19, %v13669_v6  ;;  %v13679_v3 = vadd.f32 %v9915_v14, %v7667_v4  ;;  %v7666_v62 = vadd.f32 %v7645_v9, %v7551_v13  ;;  %v7707_v55 = vmul.f32 %v7682_v27, %v7682_v27 }
0x1663   :  { %v11837_v58 = vpop.f32.mrf.mxu0  ;;  %v7689_v48 = vsel %vm7687_vm6, %v7682_v27, 0.0 }
0x1664   :  { %v7706_v12 = vmul.f32 %v7681_v56, %v7681_v56  ;;  %v7688_v18 = vsel %vm7687_vm6, %v7681_v56, 0.0  ;;  %v7684_v57 = vmul.f32 %v13679_v3, %v13677_v51  ;;  %v13686_v63 = vadd.f32 %v9915_v14, %v7666_v62 }
0x1665   :  { %v7669_v43 = vadd.f32 %v11837_v58, %v7566_v52  ;;  %v7655_v61 = vpop.f32.mrf.mxu0  ;;  %v7713_v11 = vsel %vm7687_vm6, %v7707_v55, 0.0  ;;  %v7690_v44 = vadd.f32 %v7689_v48, %v7688_v18 }
0x1666   :  { %v7668_v15 = vadd.f32 %v7655_v61, %v7561_v24  ;;  %v7712_v42 = vsel %vm7687_vm6, %v7706_v12, 0.0  ;;  %v7683_v1 = vmul.f32 %v13686_v63, %v13681_v26  ;;  %v7709_v60 = vmul.f32 %v7684_v57, %v7684_v57 }
0x1667   :  { %v7680_v47 = vadd.f32 %v9915_v14, %v7669_v43  ;;  %v7714_v36 = vadd.f32 %v7713_v11, %v7712_v42  ;;  %v7693_v20 = vsel %vm7687_vm6, %v7684_v57, 0.0  ;;  %v9916_v42 = vld [vmem:[#allocation7 + $0x61] ss:$0 sm:$0xff] }
0x1668   :  { %v7679_v30 = vadd.f32 %v9915_v14, %v7668_v15  ;;  %v7691_v2 = vsel %vm7687_vm6, %v7683_v1, 0.0  ;;  %v7708_v53 = vmul.f32 %v7683_v1, %v7683_v1  ;;  %v7717_v45 = vsel %vm7687_vm6, %v7709_v60, 0.0 }
0x1669   :  { %v7686_v37 = vmul.f32 %v7680_v47, %v13688_v8  ;;  %v7692_v34 = vadd.f32 %v7691_v2, %v7690_v44 }
0x166a   :  { %v7685_v21 = vmul.f32 %v7679_v30, %v13694_v38  ;;  %v7715_v22 = vsel %vm7687_vm6, %v7708_v53, 0.0 }
0x166b   :  { %v7716_v35 = vadd.f32 %v7715_v22, %v7714_v36  ;;  %v7694_v28 = vadd.f32 %v7693_v20, %v7692_v34  ;;  %v7711_v25 = vmul.f32 %v7686_v37, %v7686_v37  ;;  %v7697_v17 = vsel %vm7687_vm6, %v7686_v37, 0.0  ;;  %v9917_v37 = vld [vmem:[#allocation7 + $0x62] ss:$0 sm:$0xff] }
0x166c   :  { %v7695_v39 = vsel %vm7687_vm6, %v7685_v21, 0.0  ;;  %v7710_v40 = vmul.f32 %v7685_v21, %v7685_v21 }
0x166d   :  { %v7696_v16 = vadd.f32 %v7695_v39, %v7694_v28  ;;  %v7718_v5 = vadd.f32 %v7717_v45, %v7716_v35  ;;  %v7721_v29 = vsel %vm7687_vm6, %v7711_v25, 0.0 }
0x166e   :  { %v7719_v33 = vsel %vm7687_vm6, %v7710_v40, 0.0 }
0x166f   :  { %v7698_v23 = vadd.f32 %v7697_v17, %v7696_v16  ;;  %v7720_v14 = vadd.f32 %v7719_v33, %v7718_v5 }
0x1671   :  { %v7699_v50 = vrot.slane %v7698_v23, 4  ;;  %v7722_v0 = vadd.f32 %v7721_v29, %v7720_v14  ;;  %v7783_v14 = vld [vmem:[#allocation7 + $0x28] sm:$0xf]  ;;  %v7782_v29 = vld [vmem:[#allocation7 + $0x20] sm:$0xf] }
0x1673   :  { %v7700_v41 = vadd.f32 %v7699_v50, %v7698_v23  ;;  %v7723_v31 = vrot.slane %v7722_v0, 4 }
0x1675   :  { %v7701_v49 = vrot.slane %v7700_v41, 2  ;;  %v7724_v54 = vadd.f32 %v7723_v31, %v7722_v0  ;;  %v7163_v31 = vld [vmem:[%s14007_s4 + $0x8] sm:$0xff] }
0x1677   :  { %v7702_v27 = vadd.f32 %v7701_v49, %v7700_v41  ;;  %v7725_v4 = vrot.slane %v7724_v54, 2  ;;  %v7164_v49 = vld [vmem:[%s14007_s4 + $0x10] sm:$0xff] }
0x1679   :  { %v7703_v13 = vrot.slane %v7702_v27, 1  ;;  %v7726_v7 = vadd.f32 %v7725_v4, %v7724_v54  ;;  %v7165_v54 = vld [vmem:[%s14007_s4 + $0x18] sm:$0xff]  ;;  %v7167_v4 = vld [vmem:[%s14007_s4 + $0x28] sm:$0xff] }
0x167b   :  { %v7704_v9 = vadd.f32 %v7703_v13, %v7702_v27  ;;  %v7727_v56 = vrot.slane %v7726_v7, 1  ;;  %v7166_v27 = vld [vmem:[%s14007_s4 + $0x20] sm:$0xff] }
0x167c   :  { %v13779_v13 = vld [vmem:[#allocation2] sm:$0xff] }
0x167d   :  { %v7705_v52 = vmul.f32 0.03125, %v7704_v9  ;;  %v7728_v62 = vadd.f32 %v7727_v56, %v7726_v7  ;;  %v13783_v7 = vld [vmem:[#allocation2 + $0x30] sm:$0xff] }
0x167f   :  { %v7729_v58 = vmul.f32 0.03125, %v7728_v62  ;;  %v7730_v24 = vmul.f32 %v7705_v52, %v7705_v52  ;;  %v7734_v57 = vsub.f32 %v13667_v32, %v7705_v52  ;;  %v7737_v43 = vsub.f32 %v7679_v30, %v7705_v52 }
0x1680   :  { %v7733_v61 = vsub.f32 %v13673_v19, %v7705_v52  ;;  %v7735_v15 = vsub.f32 %v13686_v63, %v7705_v52  ;;  %v7736_v1 = vsub.f32 %v13679_v3, %v7705_v52  ;;  %v7738_v11 = vsub.f32 %v7680_v47, %v7705_v52 }
0x1681   :  { %v7731_v55 = vsub.f32 %v7729_v58, %v7730_v24 }
0x1683   :  { %v7732_v12 = vmax.f32 %v7731_v55, 0.0 }
0x1685   :  { %v7739_v18 = vadd.f32 1e-05, %v7732_v12 }
0x1687   :  { %12068 = vrsqrt.f32 %v7739_v18 }
0x1694   :  { %v12069_v48 = vpop.eup %12068 }
0x1695   :  { %v7742_v44 = vmul.f32 %v12069_v48, %v7734_v57  ;;  %v7745_v60 = vmul.f32 %v12069_v48, %v7737_v43  ;;  %v7741_v2 = vmul.f32 %v12069_v48, %v7733_v61  ;;  %v7743_v53 = vmul.f32 %v12069_v48, %v7735_v15 }
0x1696   :  { %v7744_v36 = vmul.f32 %v12069_v48, %v7736_v1  ;;  %v7746_v34 = vmul.f32 %v12069_v48, %v7738_v11 }
0x1697   :  { %v7753_v21 = vmul.f32 %v9916_v42, %v7742_v44  ;;  %v7756_v20 = vmul.f32 %v9916_v42, %v7745_v60  ;;  %v7752_v32 = vmul.f32 %v9916_v42, %v7741_v2  ;;  %v7754_v30 = vmul.f32 %v9916_v42, %v7743_v53 }
0x1698   :  { %v7755_v22 = vmul.f32 %v9916_v42, %v7744_v36  ;;  %v7757_v39 = vmul.f32 %v9916_v42, %v7746_v34 }
0x1699   :  { %v7763_v19 = vadd.f32 %v9917_v37, %v7752_v32  ;;  %v7764_v35 = vadd.f32 %v9917_v37, %v7753_v21  ;;  %v7765_v63 = vadd.f32 %v9917_v37, %v7754_v30  ;;  %v7767_v45 = vadd.f32 %v9917_v37, %v7756_v20 }
0x169a   :  { %v7766_v28 = vadd.f32 %v9917_v37, %v7755_v22  ;;  %v7768_v33 = vadd.f32 %v9917_v37, %v7757_v39 }
0x169b   :  { %v7769_v40 = vmax.f32 %v7763_v19, 0.0  ;;  %v7770_v3 = vmax.f32 %v7764_v35, 0.0  ;;  %v7771_v47 = vmax.f32 %v7765_v63, 0.0  ;;  %v7773_v23 = vmax.f32 %v7767_v45, 0.0 }
0x169c   :  { %v7772_v5 = vmax.f32 %v7766_v28, 0.0  ;;  %v7774_v0 = vmax.f32 %v7768_v33, 0.0 }
0x169d   :  { %v7775_v25 = vmul.f32 %v7769_v40, %v13669_v6  ;;  %v7776_v16 = vmul.f32 %v7770_v3, %v13665_v46  ;;  %v7777_v17 = vmul.f32 %v7771_v47, %v13681_v26  ;;  %v7779_v41 = vmul.f32 %v7773_v23, %v13694_v38  ;;  %v13811_v23 = vld [vmem:[#allocation2 + $0x20] sm:$0xff] }
0x169e   :  { %v7778_v50 = vmul.f32 %v7772_v5, %v13677_v51 }
0x169f   :  { %11840 = vmatprep.mubr.msk.f32.mxu1 %vm7687_vm6, %v7775_v25  ;;  %11851 = vmatprep.mubr.msk.f32.mxu0 %vm7687_vm6, %v7775_v25 }
0x16a0   :  { %11841 = vmatmul.mubr.msk.f32.vlgmr.msra.gmra.mxu1 %vm7687_vm6, %v7776_v16  ;;  %11852 = vmatmul.mubr.msk.f32.vlgmr.msra.gmra.mxu0 %vm7687_vm6, %v7776_v16 }
0x16a1   :  { %11843 = vmatprep.mubr.msk.f32.mxu1 %vm7687_vm6, %v7777_v17  ;;  %11854 = vmatprep.mubr.msk.f32.mxu0 %vm7687_vm6, %v7777_v17 }
0x16a2   :  { %11872 = vmatpush3.msk.msra.mxu0 %vm7805_vm5, %v13657_v10  ;;  %11861 = vmatpush3.msk.msra.mxu1 %vm7805_vm5, %v13661_v59  ;;  %v7780_v10 = vmul.f32 %v7774_v0, %v13688_v8  ;;  %v7162_v59 = vld [vmem:[%s14007_s4] sm:$0xff]  ;;  %v13819_v0 = vld [vmem:[#allocation2 + $0x38] sm:$0xff] }
0x16a3   :  { %11893 = vmatprep.subr.msk.mxu0 %vm7805_vm5, %v7783_v14  ;;  %11882 = vmatprep.subr.msk.mxu1 %vm7805_vm5, %v7782_v29 }
0x16a4   :  { %11844 = vmatmul.mubr.msk.f32.gmra.mxu1 %vm7687_vm6, %v7778_v50  ;;  %11855 = vmatmul.mubr.msk.f32.gmra.mxu0 %vm7687_vm6, %v7778_v50 }
0x16a5   :  { %11846 = vmatprep.mubr.msk.f32.mxu1 %vm7687_vm6, %v7779_v41  ;;  %11857 = vmatprep.mubr.msk.f32.mxu0 %vm7687_vm6, %v7779_v41 }
0x16a8   :  { %11847 = vmatmul.mubr.msk.f32.gmra.mxu1 %vm7687_vm6, %v7780_v10  ;;  %11858 = vmatmul.mubr.msk.f32.gmra.mxu0 %vm7687_vm6, %v7780_v10 }
0x16a9   :  { %11862 = vmatprep.mubr.msk.f32.mxu1 %vm7687_vm6, %v7775_v25  ;;  %11873 = vmatprep.mubr.msk.f32.mxu0 %vm7687_vm6, %v7162_v59  ;;  %v13799_v25 = vld [vmem:[#allocation2 + $0x8] sm:$0xff] }
0x16ac   :  { %11863 = vmatmul.mubr.msk.f32.vlgmr.msra.gmra.mxu1 %vm7687_vm6, %v7776_v16  ;;  %11874 = vmatmul.mubr.msk.f32.vlgmr.msra.gmra.mxu0 %vm7687_vm6, %v7163_v31  ;;  %v13803_v16 = vld [vmem:[#allocation2 + $0x10] sm:$0xff] }
0x16ad   :  { %11865 = vmatprep.mubr.msk.f32.mxu1 %vm7687_vm6, %v7777_v17  ;;  %11894 = vmatpush3.msk.msra.mxu0 %vm7805_vm5, %v7783_v14  ;;  %v13807_v17 = vld [vmem:[#allocation2 + $0x18] sm:$0xff] }
0x16ae   :  { %11876 = vmatprep.mubr.msk.f32.mxu0 %vm7687_vm6, %v7164_v49  ;;  %11883 = vmatpush3.msk.msra.mxu1 %vm7805_vm5, %v7782_v29 }
0x16b0   :  { %11866 = vmatmul.mubr.msk.f32.gmra.mxu1 %vm7687_vm6, %v7778_v50  ;;  %11877 = vmatmul.mubr.msk.f32.gmra.mxu0 %vm7687_vm6, %v7165_v54  ;;  %v13815_v50 = vld [vmem:[#allocation2 + $0x28] sm:$0xff] }
0x16b1   :  { %11868 = vmatprep.mubr.msk.f32.mxu1 %vm7687_vm6, %v7779_v41  ;;  %11879 = vmatprep.mubr.msk.f32.mxu0 %vm7687_vm6, %v7166_v27  ;;  %v13823_v41 = vld [vmem:[#allocation2 + $0x40] sm:$0xff] }
0x16b4   :  { %11869 = vmatmul.mubr.msk.f32.gmra.mxu1 %vm7687_vm6, %v7780_v10  ;;  %11880 = vmatmul.mubr.msk.f32.gmra.mxu0 %vm7687_vm6, %v7167_v4  ;;  %v13827_v10 = vld [vmem:[#allocation2 + $0x48] sm:$0xff] }
0x16b5   :  { %11884 = vmatprep.mubr.msk.f32.mxu1 %vm7687_vm6, %v7162_v59  ;;  %11895 = vmatprep.mubr.msk.f32.mxu0 %vm7687_vm6, %v7162_v59  ;;  %v13831_v59 = vld [vmem:[#allocation2 + $0x50] sm:$0xff] }
0x16b8   :  { %11885 = vmatmul.mubr.msk.f32.vlgmr.msra.gmra.mxu1 %vm7687_vm6, %v7163_v31  ;;  %11896 = vmatmul.mubr.msk.f32.vlgmr.msra.gmra.mxu0 %vm7687_vm6, %v7163_v31  ;;  %v13835_v31 = vld [vmem:[#allocation2 + $0x58] sm:$0xff] }
0x16b9   :  { %11887 = vmatprep.mubr.msk.f32.mxu1 %vm7687_vm6, %v7164_v49  ;;  %11898 = vmatprep.mubr.msk.f32.mxu0 %vm7687_vm6, %v7164_v49  ;;  %v8718_v49 = vld [vmem:[#allocation7 + $0x48] sm:$0xf] }
0x16bc   :  { %11888 = vmatmul.mubr.msk.f32.gmra.mxu1 %vm7687_vm6, %v7165_v54  ;;  %11899 = vmatmul.mubr.msk.f32.gmra.mxu0 %vm7687_vm6, %v7165_v54  ;;  %v8719_v54 = vld [vmem:[#allocation7 + $0x50] sm:$0xf] }
0x16bd   :  { %11890 = vmatprep.mubr.msk.f32.mxu1 %vm7687_vm6, %v7166_v27  ;;  %11901 = vmatprep.mubr.msk.f32.mxu0 %vm7687_vm6, %v7166_v27  ;;  %v13843_v27 = vld [vmem:[#allocation7 + $0x58] sm:$0xf] }
0x16c0   :  { %11891 = vmatmul.mubr.msk.f32.gmra.mxu1 %vm7687_vm6, %v7167_v4  ;;  %11902 = vmatmul.mubr.msk.f32.gmra.mxu0 %vm7687_vm6, %v7167_v4 }
0x16c1   :  { %11916 = vmatprep.mubr.msk.f32.mxu1 %vm120_vm0, %v13779_v13  ;;  %11937 = vmatprep.mubr.msk.f32.mxu0 %vm120_vm0, %v13783_v7 }
0x1760   :  { %v11842_v9 = vpop.f32.mrf.mxu1  ;;  %v13787_v56 = vpop.f32.mrf.mxu0 }
0x1762   :  { %v7875_v52 = vpop.f32.mrf.mxu1  ;;  %v13789_v62 = vpop.f32.mrf.mxu0 }
0x1764   :  { %v11845_v58 = vpop.f32.mrf.mxu1  ;;  %v13791_v24 = vpop.f32.mrf.mxu0 }
0x1766   :  { %v7885_v55 = vpop.f32.mrf.mxu1  ;;  %v13793_v12 = vpop.f32.mrf.mxu0 }
0x1768   :  { %v11848_v18 = vpop.f32.mrf.mxu1  ;;  %v13795_v57 = vpop.f32.mrf.mxu0 }
0x176a   :  { %v7895_v43 = vpop.f32.mrf.mxu1  ;;  %v13797_v61 = vpop.f32.mrf.mxu0 }
0x176c   :  { %v11875_v15 = vpop.f32.mrf.mxu0  ;;  %v11864_v48 = vpop.f32.mrf.mxu1 }
0x176d   :  { %v8193_v19 = vadd.f32 %v11875_v15, %v11842_v9 }
0x176e   :  { %v8187_v42 = vpop.f32.mrf.mxu0  ;;  %v8071_v11 = vpop.f32.mrf.mxu1 }
0x176f   :  { %v8188_v28 = vadd.f32 %v8187_v42, %v7875_v52 }
0x1770   :  { %v11878_v1 = vpop.f32.mrf.mxu0  ;;  %v11867_v53 = vpop.f32.mrf.mxu1 }
0x1771   :  { %v8203_v21 = vadd.f32 %v11878_v1, %v11845_v58 }
0x1772   :  { %v8197_v44 = vpop.f32.mrf.mxu0  ;;  %v8081_v20 = vpop.f32.mrf.mxu1 }
0x1773   :  { %v8198_v30 = vadd.f32 %v8197_v44, %v7885_v55 }
0x1774   :  { %v11881_v60 = vpop.f32.mrf.mxu0  ;;  %v11870_v35 = vpop.f32.mrf.mxu1 }
0x1775   :  { %v8213_v2 = vadd.f32 %v11881_v60, %v11848_v18 }
0x1776   :  { %v8207_v37 = vpop.f32.mrf.mxu0  ;;  %v8091_v3 = vpop.f32.mrf.mxu1 }
0x1777   :  { %v8208_v36 = vadd.f32 %v8207_v37, %v7895_v43  ;;  %11904 = vmatprep.subr.mxu1 %v8213_v2 }
0x1778   :  { %v11897_v34 = vpop.f32.mrf.mxu0  ;;  %11905 = vmatpush3.msra.mxu1 %v8213_v2  ;;  %v11886_v4 = vpop.f32.mrf.mxu1  ;;  %v9972_v2 = vld [vmem:[#allocation7 + $0x63] ss:$0 sm:$0xff] }
0x1779   :  { %11906 = vmatprep.subr.mxu1 %v8208_v36  ;;  %v8389_v14 = vadd.f32 %v11897_v34, %v11864_v48  ;;  %v8291_v42 = vadd.f32 %v11886_v4, %v13787_v56 }
0x177a   :  { %v8383_v32 = vpop.f32.mrf.mxu0  ;;  %11907 = vmatpush3.msra.mxu1 %v8208_v36  ;;  %v8285_v9 = vpop.f32.mrf.mxu1 }
0x177b   :  { %11908 = vmatprep.subr.mxu1 %v8203_v21  ;;  %v8384_v29 = vadd.f32 %v8383_v32, %v8071_v11  ;;  %v8286_v11 = vadd.f32 %v8285_v9, %v13789_v62 }
0x177c   :  { %v11900_v22 = vpop.f32.mrf.mxu0  ;;  %11909 = vmatpush3.msra.mxu1 %v8203_v21  ;;  %v11889_v52 = vpop.f32.mrf.mxu1 }
0x177d   :  { %11910 = vmatprep.subr.mxu1 %v8198_v30  ;;  %v8399_v5 = vadd.f32 %v11900_v22, %v11867_v53  ;;  %v8301_v53 = vadd.f32 %v11889_v52, %v13791_v24 }
0x177e   :  { %v8393_v63 = vpop.f32.mrf.mxu0  ;;  %11911 = vmatpush3.msra.mxu1 %v8198_v30  ;;  %v8295_v58 = vpop.f32.mrf.mxu1 }
0x177f   :  { %11912 = vmatprep.subr.mxu1 %v8193_v19  ;;  %v8394_v33 = vadd.f32 %v8393_v63, %v8081_v20  ;;  %v8296_v22 = vadd.f32 %v8295_v58, %v13793_v12 }
0x1780   :  { %v11903_v39 = vpop.f32.mrf.mxu0  ;;  %11913 = vmatpush3.msra.mxu1 %v8193_v19  ;;  %v11892_v55 = vpop.f32.mrf.mxu1 }
0x1781   :  { %v8409_v40 = vadd.f32 %v11903_v39, %v11870_v35  ;;  %11914 = vmatprep.subr.mxu1 %v8188_v28  ;;  %v8311_v63 = vadd.f32 %v11892_v55, %v13795_v57 }
0x1782   :  { %v8403_v47 = vpop.f32.mrf.mxu0  ;;  %11915 = vmatpush3.msra.mxu1 %v8188_v28  ;;  %v8305_v18 = vpop.f32.mrf.mxu1 }
0x1783   :  { %v8404_v45 = vadd.f32 %v8403_v47, %v8091_v3  ;;  %11917 = vmatmul.mubr.msk.f32.vlgmr.msra.gmra.mxu1 %vm120_vm0, %v13799_v25  ;;  %11925 = vmatprep.subr.mxu0 %v8409_v40 }
0x1784   :  { %11926 = vmatpush3.msra.mxu0 %v8409_v40  ;;  %11919 = vmatprep.mubr.msk.f32.mxu1 %vm120_vm0, %v13803_v16  ;;  %v8306_v40 = vadd.f32 %v8305_v18, %v13797_v61 }
0x1785   :  { %11927 = vmatprep.subr.mxu0 %v8404_v45  ;;  %11946 = vmatprep.subr.msk.mxu1 %vm7805_vm5, %v8718_v49 }
0x1786   :  { %11928 = vmatpush3.msra.mxu0 %v8404_v45  ;;  %11947 = vmatpush3.msk.msra.mxu1 %vm7805_vm5, %v8718_v49 }
0x1787   :  { %11920 = vmatmul.mubr.msk.f32.gmra.mxu1 %vm120_vm0, %v13807_v17  ;;  %11929 = vmatprep.subr.mxu0 %v8399_v5 }
0x1788   :  { %11930 = vmatpush3.msra.mxu0 %v8399_v5  ;;  %11922 = vmatprep.mubr.msk.f32.mxu1 %vm120_vm0, %v13811_v23 }
0x1789   :  { %11931 = vmatprep.subr.mxu0 %v8394_v33  ;;  %11968 = vmatprep.subr.msk.mxu1 %vm7805_vm5, %v13843_v27 }
0x178a   :  { %11932 = vmatpush3.msra.mxu0 %v8394_v33 }
0x178b   :  { %11923 = vmatmul.mubr.msk.f32.gmra.mxu1 %vm120_vm0, %v13815_v50  ;;  %11933 = vmatprep.subr.mxu0 %v8389_v14 }
0x178c   :  { %11934 = vmatpush3.msra.mxu0 %v8389_v14 }
0x178d   :  { %11935 = vmatprep.subr.mxu0 %v8384_v29 }
0x178e   :  { %11936 = vmatpush3.msra.mxu0 %v8384_v29 }
0x178f   :  { %11938 = vmatmul.mubr.msk.f32.vlgmr.msra.gmra.mxu0 %vm120_vm0, %v13819_v0  ;;  %11957 = vmatprep.subr.msk.mxu0 %vm7805_vm5, %v8719_v54 }
0x1790   :  { %11940 = vmatprep.mubr.msk.f32.mxu0 %vm120_vm0, %v13823_v41  ;;  %11958 = vmatpush3.msk.msra.mxu0 %vm7805_vm5, %v8719_v54 }
0x1793   :  { %11941 = vmatmul.mubr.msk.f32.gmra.mxu0 %vm120_vm0, %v13827_v10 }
0x1794   :  { %11943 = vmatprep.mubr.msk.f32.mxu0 %vm120_vm0, %v13831_v59 }
0x1797   :  { %11944 = vmatmul.mubr.msk.f32.gmra.mxu0 %vm120_vm0, %v13835_v31 }
0x1843   :  { %v11918_v43 = vpop.f32.mrf.mxu1 }
0x1844   :  { %v8484_v44 = vadd.f32 %v11918_v43, %v8291_v42 }
0x1845   :  { %v8478_v15 = vpop.f32.mrf.mxu1 }
0x1846   :  { %v8479_v37 = vadd.f32 %v8478_v15, %v8286_v11 }
0x1847   :  { %v11921_v48 = vpop.f32.mrf.mxu1 }
0x1848   :  { %v8494_v20 = vadd.f32 %v11921_v48, %v8301_v53 }
0x1849   :  { %v8488_v1 = vpop.f32.mrf.mxu1 }
0x184a   :  { %v8489_v24 = vadd.f32 %v8488_v1, %v8296_v22 }
0x184b   :  { %v11924_v34 = vpop.f32.mrf.mxu1 }
0x184c   :  { %v8504_v12 = vadd.f32 %v11924_v34, %v8311_v63 }
0x184d   :  { %v8498_v28 = vpop.f32.mrf.mxu1 }
0x184e   :  { %v8499_v14 = vadd.f32 %v8498_v28, %v8306_v40 }
0x184f   :  { %v11939_v60 = vpop.f32.mrf.mxu0 }
0x1850   :  { %v8603_v36 = vadd.f32 %v11939_v60, %v8484_v44 }
0x1851   :  { %v8573_v21 = vpop.f32.mrf.mxu0 }
0x1852   :  { %v13850_v32 = vadd.f32 %v9972_v2, %v8603_v36  ;;  %v8602_v30 = vadd.f32 %v8573_v21, %v8479_v37 }
0x1853   :  { %v11942_v19 = vpop.f32.mrf.mxu0 }
0x1854   :  { %v8620_v56 = vmul.f32 %v13850_v32, %v13665_v46  ;;  %v13855_v62 = vadd.f32 %v9972_v2, %v8602_v30  ;;  %v8605_v35 = vadd.f32 %v11942_v19, %v8494_v20 }
0x1855   :  { %v8583_v39 = vpop.f32.mrf.mxu0 }
0x1856   :  { %v8644_v3 = vmul.f32 %v8620_v56, %v8620_v56  ;;  %v8619_v47 = vmul.f32 %v13855_v62, %v13669_v6  ;;  %v13861_v45 = vadd.f32 %v9972_v2, %v8605_v35  ;;  %v8604_v5 = vadd.f32 %v8583_v39, %v8489_v24 }
0x1857   :  { %v11945_v33 = vpop.f32.mrf.mxu0  ;;  %v8626_v29 = vsel %vm7687_vm6, %v8620_v56, 0.0 }
0x1858   :  { %v8625_v49 = vsel %vm7687_vm6, %v8619_v47, 0.0  ;;  %v8643_v57 = vmul.f32 %v8619_v47, %v8619_v47  ;;  %v8622_v4 = vmul.f32 %v13861_v45, %v13677_v51  ;;  %v13867_v61 = vadd.f32 %v9972_v2, %v8604_v5 }
0x1859   :  { %v8627_v54 = vadd.f32 %v8626_v29, %v8625_v49  ;;  %v8607_v9 = vadd.f32 %v11945_v33, %v8504_v12  ;;  %v8593_v52 = vpop.f32.mrf.mxu0  ;;  %v8650_v58 = vsel %vm7687_vm6, %v8644_v3, 0.0 }
0x185a   :  { %v8649_v55 = vsel %vm7687_vm6, %v8643_v57, 0.0  ;;  %v8606_v18 = vadd.f32 %v8593_v52, %v8499_v14  ;;  %v8621_v15 = vmul.f32 %v13867_v61, %v13681_v26  ;;  %v8646_v1 = vmul.f32 %v8622_v4, %v8622_v4 }
0x185b   :  { %v8651_v43 = vadd.f32 %v8650_v58, %v8649_v55  ;;  %v8618_v48 = vadd.f32 %v9972_v2, %v8607_v9  ;;  %v8630_v36 = vsel %vm7687_vm6, %v8622_v4, 0.0 }
0x185c   :  { %v8617_v42 = vadd.f32 %v9972_v2, %v8606_v18  ;;  %v8628_v11 = vsel %vm7687_vm6, %v8621_v15, 0.0  ;;  %v8645_v44 = vmul.f32 %v8621_v15, %v8621_v15  ;;  %v8654_v2 = vsel %vm7687_vm6, %v8646_v1, 0.0 }
0x185d   :  { %v8624_v60 = vmul.f32 %v8618_v48, %v13688_v8  ;;  %v8629_v53 = vadd.f32 %v8628_v11, %v8627_v54 }
0x185e   :  { %v8623_v37 = vmul.f32 %v8617_v42, %v13694_v38  ;;  %v8652_v34 = vsel %vm7687_vm6, %v8645_v44, 0.0 }
0x185f   :  { %v8653_v21 = vadd.f32 %v8652_v34, %v8651_v43  ;;  %v8631_v20 = vadd.f32 %v8630_v36, %v8629_v53  ;;  %v8648_v19 = vmul.f32 %v8624_v60, %v8624_v60  ;;  %v8634_v24 = vsel %vm7687_vm6, %v8624_v60, 0.0 }
0x1860   :  { %v8632_v30 = vsel %vm7687_vm6, %v8623_v37, 0.0  ;;  %v8647_v22 = vmul.f32 %v8623_v37, %v8623_v37 }
0x1861   :  { %v8633_v56 = vadd.f32 %v8632_v30, %v8631_v20  ;;  %v8655_v35 = vadd.f32 %v8654_v2, %v8653_v21  ;;  %v8658_v40 = vsel %vm7687_vm6, %v8648_v19, 0.0  ;;  %v9973_v21 = vld [vmem:[#allocation7 + $0x64] ss:$0 sm:$0xff]  ;;  %v9974_v19 = vld [vmem:[#allocation7 + $0x65] ss:$0 sm:$0xff] }
0x1862   :  { %v8656_v63 = vsel %vm7687_vm6, %v8647_v22, 0.0 }
0x1863   :  { %v8635_v28 = vadd.f32 %v8634_v24, %v8633_v56  ;;  %v8657_v39 = vadd.f32 %v8656_v63, %v8655_v35 }
0x1865   :  { %v8636_v3 = vrot.slane %v8635_v28, 4  ;;  %v8659_v47 = vadd.f32 %v8658_v40, %v8657_v39 }
0x1867   :  { %v8637_v12 = vadd.f32 %v8636_v3, %v8635_v28  ;;  %v8660_v5 = vrot.slane %v8659_v47, 4 }
0x1869   :  { %v8638_v33 = vrot.slane %v8637_v12, 2  ;;  %v8661_v14 = vadd.f32 %v8660_v5, %v8659_v47 }
0x186b   :  { %v8639_v29 = vadd.f32 %v8638_v33, %v8637_v12  ;;  %v8662_v49 = vrot.slane %v8661_v14, 2 }
0x186d   :  { %v8640_v57 = vrot.slane %v8639_v29, 1  ;;  %v8663_v54 = vadd.f32 %v8662_v49, %v8661_v14 }
0x186f   :  { %v8641_v4 = vadd.f32 %v8640_v57, %v8639_v29  ;;  %v8664_v9 = vrot.slane %v8663_v54, 1 }
0x1871   :  { %v8642_v52 = vmul.f32 0.03125, %v8641_v4  ;;  %v8665_v58 = vadd.f32 %v8664_v9, %v8663_v54 }
0x1873   :  { %v8666_v55 = vmul.f32 0.03125, %v8665_v58  ;;  %v8667_v18 = vmul.f32 %v8642_v52, %v8642_v52  ;;  %v8671_v43 = vsub.f32 %v13850_v32, %v8642_v52  ;;  %v8674_v15 = vsub.f32 %v8617_v42, %v8642_v52 }
0x1874   :  { %v8670_v1 = vsub.f32 %v13855_v62, %v8642_v52  ;;  %v8672_v11 = vsub.f32 %v13867_v61, %v8642_v52  ;;  %v8673_v44 = vsub.f32 %v13861_v45, %v8642_v52  ;;  %v8675_v60 = vsub.f32 %v8618_v48, %v8642_v52 }
0x1875   :  { %v8668_v53 = vsub.f32 %v8666_v55, %v8667_v18 }
0x1877   :  { %v8669_v37 = vmax.f32 %v8668_v53, 0.0 }
0x1879   :  { %v8676_v36 = vadd.f32 1e-05, %v8669_v37 }
0x187b   :  { %12070 = vrsqrt.f32 %v8676_v36 }
0x1888   :  { %v12071_v34 = vpop.eup %12070 }
0x1889   :  { %v8679_v20 = vmul.f32 %v12071_v34, %v8671_v43  ;;  %v8682_v30 = vmul.f32 %v12071_v34, %v8674_v15  ;;  %v8678_v22 = vmul.f32 %v12071_v34, %v8670_v1  ;;  %v8680_v2 = vmul.f32 %v12071_v34, %v8672_v11 }
0x188a   :  { %v8681_v32 = vmul.f32 %v12071_v34, %v8673_v44  ;;  %v8683_v42 = vmul.f32 %v12071_v34, %v8675_v60 }
0x188b   :  { %v8690_v56 = vmul.f32 %v9973_v21, %v8679_v20  ;;  %v8693_v62 = vmul.f32 %v9973_v21, %v8682_v30  ;;  %v8689_v35 = vmul.f32 %v9973_v21, %v8678_v22  ;;  %v8691_v61 = vmul.f32 %v9973_v21, %v8680_v2 }
0x188c   :  { %v8692_v63 = vmul.f32 %v9973_v21, %v8681_v32  ;;  %v8694_v39 = vmul.f32 %v9973_v21, %v8683_v42  ;;  %v10008_v21 = vld [vmem:[#allocation7 + $0x66] ss:$0 sm:$0xff] }
0x188d   :  { %v8700_v45 = vadd.f32 %v9974_v19, %v8689_v35  ;;  %v8701_v48 = vadd.f32 %v9974_v19, %v8690_v56  ;;  %v8702_v24 = vadd.f32 %v9974_v19, %v8691_v61  ;;  %v8704_v12 = vadd.f32 %v9974_v19, %v8693_v62 }
0x188e   :  { %v8703_v28 = vadd.f32 %v9974_v19, %v8692_v63  ;;  %v8705_v29 = vadd.f32 %v9974_v19, %v8694_v39 }
0x188f   :  { %v8706_v40 = vmax.f32 %v8700_v45, 0.0  ;;  %v8707_v3 = vmax.f32 %v8701_v48, 0.0  ;;  %v8708_v47 = vmax.f32 %v8702_v24, 0.0  ;;  %v8710_v57 = vmax.f32 %v8704_v12, 0.0 }
0x1890   :  { %v8709_v14 = vmax.f32 %v8703_v28, 0.0  ;;  %v8711_v4 = vmax.f32 %v8705_v29, 0.0 }
0x1891   :  { %v8712_v5 = vmul.f32 %v8706_v40, %v13669_v6  ;;  %v8713_v33 = vmul.f32 %v8707_v3, %v13665_v46  ;;  %v8714_v49 = vmul.f32 %v8708_v47, %v13681_v26  ;;  %v8716_v9 = vmul.f32 %v8710_v57, %v13694_v38 }
0x1892   :  { %v8715_v54 = vmul.f32 %v8709_v14, %v13677_v51  ;;  %v8717_v52 = vmul.f32 %v8711_v4, %v13688_v8 }
0x1893   :  { %11948 = vmatprep.mubr.msk.f32.mxu1 %vm7687_vm6, %v8712_v5  ;;  %11959 = vmatprep.mubr.msk.f32.mxu0 %vm7687_vm6, %v8712_v5 }
0x1894   :  { %11949 = vmatmul.mubr.msk.f32.vlgmr.msra.gmra.mxu1 %vm7687_vm6, %v8713_v33  ;;  %11960 = vmatmul.mubr.msk.f32.vlgmr.msra.gmra.mxu0 %vm7687_vm6, %v8713_v33 }
0x1895   :  { %11951 = vmatprep.mubr.msk.f32.mxu1 %vm7687_vm6, %v8714_v49  ;;  %11962 = vmatprep.mubr.msk.f32.mxu0 %vm7687_vm6, %v8714_v49 }
0x1896   :  { %11969 = vmatpush3.msk.msra.mxu1 %vm7805_vm5, %v13843_v27 }
0x1898   :  { %11952 = vmatmul.mubr.msk.f32.gmra.mxu1 %vm7687_vm6, %v8715_v54  ;;  %11963 = vmatmul.mubr.msk.f32.gmra.mxu0 %vm7687_vm6, %v8715_v54 }
0x1899   :  { %11954 = vmatprep.mubr.msk.f32.mxu1 %vm7687_vm6, %v8716_v9  ;;  %11965 = vmatprep.mubr.msk.f32.mxu0 %vm7687_vm6, %v8716_v9 }
0x189c   :  { %11955 = vmatmul.mubr.msk.f32.gmra.mxu1 %vm7687_vm6, %v8717_v52  ;;  %11966 = vmatmul.mubr.msk.f32.gmra.mxu0 %vm7687_vm6, %v8717_v52 }
0x189d   :  { %11970 = vmatprep.mubr.msk.f32.mxu1 %vm7687_vm6, %v8712_v5  ;;  %11991 = vmatprep.mubr.msk.f32.mxu0 %vm120_vm0, %v13779_v13 }
0x18a0   :  { %11971 = vmatmul.mubr.msk.f32.vlgmr.msra.gmra.mxu1 %vm7687_vm6, %v8713_v33 }
0x18a1   :  { %11973 = vmatprep.mubr.msk.f32.mxu1 %vm7687_vm6, %v8714_v49 }
0x18a4   :  { %11974 = vmatmul.mubr.msk.f32.gmra.mxu1 %vm7687_vm6, %v8715_v54 }
0x18a5   :  { %11976 = vmatprep.mubr.msk.f32.mxu1 %vm7687_vm6, %v8716_v9 }
0x18a8   :  { %11977 = vmatmul.mubr.msk.f32.gmra.mxu1 %vm7687_vm6, %v8717_v52 }
0x18a9   :  { %12012 = vmatprep.mubr.msk.f32.mxu1 %vm120_vm0, %v13783_v7 }
0x1954   :  { %v11950_v27 = vpop.f32.mrf.mxu1 }
0x1956   :  { %v8808_v58 = vpop.f32.mrf.mxu1 }
0x1958   :  { %v11953_v55 = vpop.f32.mrf.mxu1 }
0x195a   :  { %v8818_v18 = vpop.f32.mrf.mxu1 }
0x195c   :  { %v11956_v43 = vpop.f32.mrf.mxu1 }
0x195d   :  { %11979 = vmatprep.subr.mxu0 %v11956_v43 }
0x195e   :  { %v8828_v13 = vpop.f32.mrf.mxu1  ;;  %11980 = vmatpush3.msra.mxu0 %v11956_v43 }
0x195f   :  { %11981 = vmatprep.subr.mxu0 %v8828_v13 }
0x1960   :  { %v11972_v15 = vpop.f32.mrf.mxu1  ;;  %11982 = vmatpush3.msra.mxu0 %v8828_v13 }
0x1961   :  { %11983 = vmatprep.subr.mxu0 %v11953_v55 }
0x1962   :  { %v9004_v1 = vpop.f32.mrf.mxu1  ;;  %11984 = vmatpush3.msra.mxu0 %v11953_v55 }
0x1963   :  { %11985 = vmatprep.subr.mxu0 %v8818_v18 }
0x1964   :  { %v11975_v11 = vpop.f32.mrf.mxu1  ;;  %11986 = vmatpush3.msra.mxu0 %v8818_v18 }
0x1965   :  { %11987 = vmatprep.subr.mxu0 %v11950_v27 }
0x1966   :  { %v9014_v44 = vpop.f32.mrf.mxu1  ;;  %11988 = vmatpush3.msra.mxu0 %v11950_v27 }
0x1967   :  { %11989 = vmatprep.subr.mxu0 %v8808_v58 }
0x1968   :  { %v11978_v7 = vpop.f32.mrf.mxu1  ;;  %11990 = vmatpush3.msra.mxu0 %v8808_v58 }
0x1969   :  { %11992 = vmatmul.mubr.msk.f32.vlgmr.msra.gmra.mxu0 %vm120_vm0, %v13799_v25  ;;  %12000 = vmatprep.subr.mxu1 %v11978_v7  ;;  %v9339_v25 = vld [vmem:[#allocation7 + $0xa0] sm:$0xf] }
0x196a   :  { %v9024_v60 = vpop.f32.mrf.mxu1  ;;  %12001 = vmatpush3.msra.mxu1 %v11978_v7  ;;  %11994 = vmatprep.mubr.msk.f32.mxu0 %vm120_vm0, %v13803_v16  ;;  %v11961_v16 = vpop.f32.mrf.mxu0 }
0x196b   :  { %12002 = vmatprep.subr.mxu1 %v9024_v60  ;;  %12021 = vmatprep.subr.msk.mxu0 %vm7805_vm5, %v9339_v25 }
0x196c   :  { %12003 = vmatpush3.msra.mxu1 %v9024_v60  ;;  %12022 = vmatpush3.msk.msra.mxu0 %vm7805_vm5, %v9339_v25 }
0x196d   :  { %11995 = vmatmul.mubr.msk.f32.gmra.mxu0 %vm120_vm0, %v13807_v17  ;;  %12004 = vmatprep.subr.mxu1 %v11975_v11  ;;  %v8906_v17 = vpop.f32.mrf.mxu0 }
0x196e   :  { %12005 = vmatpush3.msra.mxu1 %v11975_v11  ;;  %11997 = vmatprep.mubr.msk.f32.mxu0 %vm120_vm0, %v13811_v23 }
0x196f   :  { %12006 = vmatprep.subr.mxu1 %v9014_v44  ;;  %v11964_v23 = vpop.f32.mrf.mxu0 }
0x1970   :  { %12007 = vmatpush3.msra.mxu1 %v9014_v44 }
0x1971   :  { %11998 = vmatmul.mubr.msk.f32.gmra.mxu0 %vm120_vm0, %v13815_v50  ;;  %12008 = vmatprep.subr.mxu1 %v11972_v15  ;;  %v8916_v50 = vpop.f32.mrf.mxu0 }
0x1972   :  { %12009 = vmatpush3.msra.mxu1 %v11972_v15 }
0x1973   :  { %12010 = vmatprep.subr.mxu1 %v9004_v1 }
0x1974   :  { %12011 = vmatpush3.msra.mxu1 %v9004_v1 }
0x1975   :  { %12013 = vmatmul.mubr.msk.f32.vlgmr.msra.gmra.mxu1 %vm120_vm0, %v13819_v0  ;;  %v11967_v0 = vpop.f32.mrf.mxu0 }
0x1976   :  { %12015 = vmatprep.mubr.msk.f32.mxu1 %vm120_vm0, %v13823_v41 }
0x1977   :  { %v8926_v41 = vpop.f32.mrf.mxu0 }
0x1979   :  { %12016 = vmatmul.mubr.msk.f32.gmra.mxu1 %vm120_vm0, %v13827_v10 }
0x197a   :  { %12018 = vmatprep.mubr.msk.f32.mxu1 %vm120_vm0, %v13831_v59 }
0x197d   :  { %12019 = vmatmul.mubr.msk.f32.gmra.mxu1 %vm120_vm0, %v13835_v31 }
0x1a29   :  { %v11993_v53 = vpop.f32.mrf.mxu0 }
0x1a2a   :  { %v9105_v34 = vadd.f32 %v11993_v53, %v11961_v16 }
0x1a2b   :  { %v9099_v37 = vpop.f32.mrf.mxu0 }
0x1a2c   :  { %v9100_v20 = vadd.f32 %v9099_v37, %v8906_v17 }
0x1a2d   :  { %v11996_v10 = vpop.f32.mrf.mxu0 }
0x1a2e   :  { %v9115_v2 = vadd.f32 %v11996_v10, %v11964_v23 }
0x1a2f   :  { %v9109_v36 = vpop.f32.mrf.mxu0 }
0x1a30   :  { %v9110_v61 = vadd.f32 %v9109_v36, %v8916_v50 }
0x1a31   :  { %v11999_v30 = vpop.f32.mrf.mxu0 }
0x1a32   :  { %v9125_v28 = vadd.f32 %v11999_v30, %v11967_v0 }
0x1a33   :  { %v9119_v63 = vpop.f32.mrf.mxu0 }
0x1a34   :  { %v9120_v3 = vadd.f32 %v9119_v63, %v8926_v41 }
0x1a35   :  { %v12014_v59 = vpop.f32.mrf.mxu1 }
0x1a36   :  { %v9224_v31 = vadd.f32 %v12014_v59, %v9105_v34 }
0x1a37   :  { %v9194_v22 = vpop.f32.mrf.mxu1 }
0x1a38   :  { %v13939_v19 = vadd.f32 %v10008_v21, %v9224_v31  ;;  %v9223_v32 = vadd.f32 %v9194_v22, %v9100_v20 }
0x1a39   :  { %v12017_v42 = vpop.f32.mrf.mxu1 }
0x1a3a   :  { %v9241_v56 = vmul.f32 %v13939_v19, %v13665_v46  ;;  %v13943_v62 = vadd.f32 %v10008_v21, %v9223_v32  ;;  %v9226_v35 = vadd.f32 %v12017_v42, %v9115_v2 }
0x1a3b   :  { %v9204_v45 = vpop.f32.mrf.mxu1 }
0x1a3c   :  { %v9240_v48 = vmul.f32 %v13943_v62, %v13669_v6  ;;  %v13947_v24 = vadd.f32 %v10008_v21, %v9226_v35  ;;  %v9225_v39 = vadd.f32 %v9204_v45, %v9110_v61  ;;  %v9265_v47 = vmul.f32 %v9241_v56, %v9241_v56 }
0x1a3d   :  { %v12020_v40 = vpop.f32.mrf.mxu1  ;;  %v9247_v6 = vsel %vm7687_vm6, %v9241_v56, 0.0 }
0x1a3e   :  { %v9264_v12 = vmul.f32 %v9240_v48, %v9240_v48  ;;  %v9246_v5 = vsel %vm7687_vm6, %v9240_v48, 0.0  ;;  %v9243_v46 = vmul.f32 %v13947_v24, %v13677_v51  ;;  %v13952_v33 = vadd.f32 %v10008_v21, %v9225_v39 }
0x1a3f   :  { %v9228_v14 = vadd.f32 %v12020_v40, %v9125_v28  ;;  %v9214_v29 = vpop.f32.mrf.mxu1  ;;  %v9271_v9 = vsel %vm7687_vm6, %v9265_v47, 0.0  ;;  %v9248_v52 = vadd.f32 %v9247_v6, %v9246_v5  ;;  %v10009_v47 = vld [vmem:[#allocation7 + $0x67] ss:$0 sm:$0xff]  ;;  %v10010_v6 = vld [vmem:[#allocation7 + $0x68] ss:$0 sm:$0xff] }
0x1a40   :  { %v9227_v49 = vadd.f32 %v9214_v29, %v9120_v3  ;;  %v9270_v57 = vsel %vm7687_vm6, %v9264_v12, 0.0  ;;  %v9242_v54 = vmul.f32 %v13952_v33, %v13681_v26  ;;  %v9267_v58 = vmul.f32 %v9243_v46, %v9243_v46 }
0x1a41   :  { %v9239_v4 = vadd.f32 %v10008_v21, %v9228_v14  ;;  %v9272_v43 = vadd.f32 %v9271_v9, %v9270_v57  ;;  %v9251_v1 = vsel %vm7687_vm6, %v9243_v46, 0.0 }
0x1a42   :  { %v9238_v27 = vadd.f32 %v10008_v21, %v9227_v49  ;;  %v9249_v51 = vsel %vm7687_vm6, %v9242_v54, 0.0  ;;  %v9266_v55 = vmul.f32 %v9242_v54, %v9242_v54  ;;  %v9275_v25 = vsel %vm7687_vm6, %v9267_v58, 0.0 }
0x1a43   :  { %v9245_v18 = vmul.f32 %v9239_v4, %v13688_v8  ;;  %v9250_v13 = vadd.f32 %v9249_v51, %v9248_v52 }
0x1a44   :  { %v9244_v15 = vmul.f32 %v9238_v27, %v13694_v38  ;;  %v9273_v11 = vsel %vm7687_vm6, %v9266_v55, 0.0 }
0x1a45   :  { %v9274_v26 = vadd.f32 %v9273_v11, %v9272_v43  ;;  %v9252_v44 = vadd.f32 %v9251_v1, %v9250_v13  ;;  %v9269_v16 = vmul.f32 %v9245_v18, %v9245_v18  ;;  %v9255_v50 = vsel %vm7687_vm6, %v9245_v18, 0.0  ;;  %v12165_v11 = vld [vmem:[#allocation7 + $0x78] sm:$0xff] }
0x1a46   :  { %v9253_v7 = vsel %vm7687_vm6, %v9244_v15, 0.0  ;;  %v9268_v60 = vmul.f32 %v9244_v15, %v9244_v15  ;;  %v12164_v15 = vld [vmem:[#allocation7 + $0x70] sm:$0xff] }
0x1a47   :  { %v9254_v17 = vadd.f32 %v9253_v7, %v9252_v44  ;;  %v9276_v23 = vadd.f32 %v9275_v25, %v9274_v26  ;;  %v9279_v41 = vsel %vm7687_vm6, %v9269_v16, 0.0 }
0x1a48   :  { %v9277_v8 = vsel %vm7687_vm6, %v9268_v60, 0.0  ;;  %v12166_v60 = vld [vmem:[#allocation7 + $0x80] sm:$0xff] }
0x1a49   :  { %v9256_v0 = vadd.f32 %v9255_v50, %v9254_v17  ;;  %v9278_v38 = vadd.f32 %v9277_v8, %v9276_v23  ;;  %v12167_v17 = vld [vmem:[#allocation7 + $0x88] sm:$0xff]  ;;  %v12168_v50 = vld [vmem:[#allocation7 + $0x90] sm:$0xff] }
0x1a4b   :  { %v9257_v53 = vrot.slane %v9256_v0, 4  ;;  %v9280_v37 = vadd.f32 %v9279_v41, %v9278_v38  ;;  %v12169_v38 = vld [vmem:[#allocation7 + $0x98] sm:$0xff] }
0x1a4d   :  { %v9258_v10 = vadd.f32 %v9257_v53, %v9256_v0  ;;  %v9281_v36 = vrot.slane %v9280_v37, 4  ;;  %v10011_v53 = vld [vmem:[#allocation7 + $0xa8] ss:$0 sm:$0xff] }
0x1a4f   :  { %v9259_v34 = vrot.slane %v9258_v10, 2  ;;  %v9282_v59 = vadd.f32 %v9281_v36, %v9280_v37 }
0x1a51   :  { %v9260_v21 = vadd.f32 %v9259_v34, %v9258_v10  ;;  %v9283_v20 = vrot.slane %v9282_v59, 2 }
0x1a53   :  { %v9261_v31 = vrot.slane %v9260_v21, 1  ;;  %v9284_v30 = vadd.f32 %v9283_v20, %v9282_v59 }
0x1a55   :  { %v9262_v22 = vadd.f32 %v9261_v31, %v9260_v21  ;;  %v9285_v2 = vrot.slane %v9284_v30, 1 }
0x1a57   :  { %v9263_v32 = vmul.f32 0.03125, %v9262_v22  ;;  %v9286_v42 = vadd.f32 %v9285_v2, %v9284_v30 }
0x1a59   :  { %v9287_v56 = vmul.f32 0.03125, %v9286_v42  ;;  %v9288_v35 = vmul.f32 %v9263_v32, %v9263_v32  ;;  %v9292_v48 = vsub.f32 %v13939_v19, %v9263_v32  ;;  %v9295_v28 = vsub.f32 %v9238_v27, %v9263_v32 }
0x1a5a   :  { %v9291_v39 = vsub.f32 %v13943_v62, %v9263_v32  ;;  %v9293_v40 = vsub.f32 %v13952_v33, %v9263_v32  ;;  %v9294_v12 = vsub.f32 %v13947_v24, %v9263_v32  ;;  %v9296_v5 = vsub.f32 %v9239_v4, %v9263_v32 }
0x1a5b   :  { %v9289_v61 = vsub.f32 %v9287_v56, %v9288_v35 }
0x1a5d   :  { %v9290_v63 = vmax.f32 %v9289_v61, 0.0 }
0x1a5f   :  { %v9297_v45 = vadd.f32 1e-05, %v9290_v63 }
0x1a61   :  { %12072 = vrsqrt.f32 %v9297_v45 }
0x1a6e   :  { %v12073_v3 = vpop.eup %12072 }
0x1a6f   :  { %v9300_v46 = vmul.f32 %v12073_v3, %v9292_v48  ;;  %v9303_v14 = vmul.f32 %v12073_v3, %v9295_v28  ;;  %v9299_v29 = vmul.f32 %v12073_v3, %v9291_v39  ;;  %v9301_v49 = vmul.f32 %v12073_v3, %v9293_v40 }
0x1a70   :  { %v9302_v57 = vmul.f32 %v12073_v3, %v9294_v12  ;;  %v9304_v54 = vmul.f32 %v12073_v3, %v9296_v5 }
0x1a71   :  { %v9311_v9 = vmul.f32 %v10009_v47, %v9300_v46  ;;  %v9314_v52 = vmul.f32 %v10009_v47, %v9303_v14  ;;  %v9310_v19 = vmul.f32 %v10009_v47, %v9299_v29  ;;  %v9312_v27 = vmul.f32 %v10009_v47, %v9301_v49 }
0x1a72   :  { %v9313_v58 = vmul.f32 %v10009_v47, %v9302_v57  ;;  %v9315_v18 = vmul.f32 %v10009_v47, %v9304_v54 }
0x1a73   :  { %v9321_v62 = vadd.f32 %v10010_v6, %v9310_v19  ;;  %v9322_v51 = vadd.f32 %v10010_v6, %v9311_v9  ;;  %v9323_v33 = vadd.f32 %v10010_v6, %v9312_v27  ;;  %v9325_v13 = vadd.f32 %v10010_v6, %v9314_v52 }
0x1a74   :  { %v9324_v55 = vadd.f32 %v10010_v6, %v9313_v58  ;;  %v9326_v7 = vadd.f32 %v10010_v6, %v9315_v18 }
0x1a75   :  { %v9327_v43 = vmax.f32 %v9321_v62, 0.0  ;;  %v9328_v24 = vmax.f32 %v9322_v51, 0.0  ;;  %v9329_v4 = vmax.f32 %v9323_v33, 0.0  ;;  %v9331_v16 = vmax.f32 %v9325_v13, 0.0 }
0x1a76   :  { %v9330_v44 = vmax.f32 %v9324_v55, 0.0  ;;  %v9332_v8 = vmax.f32 %v9326_v7, 0.0 }
0x1a77   :  { %v9333_v1 = vmul.f32 %v12164_v15, %v9327_v43  ;;  %v9334_v26 = vmul.f32 %v12165_v11, %v9328_v24  ;;  %v9335_v25 = vmul.f32 %v12166_v60, %v9329_v4  ;;  %v9337_v0 = vmul.f32 %v12168_v50, %v9331_v16 }
0x1a78   :  { %v9336_v23 = vmul.f32 %v12167_v17, %v9330_v44  ;;  %v9338_v41 = vmul.f32 %v12169_v38, %v9332_v8 }
0x1a79   :  { %12023 = vmatprep.mubr.msk.f32.mxu0 %vm7687_vm6, %v9333_v1 }
0x1a7a   :  { %12024 = vmatmul.mubr.msk.f32.vlgmr.msra.gmra.mxu0 %vm7687_vm6, %v9334_v26 }
0x1a7b   :  { %12026 = vmatprep.mubr.msk.f32.mxu0 %vm7687_vm6, %v9335_v25 }
0x1a7e   :  { %12027 = vmatmul.mubr.msk.f32.gmra.mxu0 %vm7687_vm6, %v9336_v23 }
0x1a7f   :  { %12029 = vmatprep.mubr.msk.f32.mxu0 %vm7687_vm6, %v9337_v0 }
0x1a82   :  { %12030 = vmatmul.mubr.msk.f32.gmra.mxu0 %vm7687_vm6, %v9338_v41 }
0x1b3a   :  { %v12025_v37 = vpop.f32.mrf.mxu0 }
0x1b3b   :  { %v9438_v10 = vadd.f32 %v12025_v37, %v10011_v53 }
0x1b3c   :  { %v9432_v36 = vpop.f32.mrf.mxu0 }
0x1b3d   :  { %v9462_v34 = vsub.f32 0.0, %v9438_v10  ;;  %v9433_v59 = vadd.f32 %v10011_v53, %v9432_v36 }
0x1b3e   :  { %v12028_v21 = vpop.f32.mrf.mxu0 }
0x1b3f   :  { %v9469_v20 = vmul.f32 1.442695, %v9462_v34  ;;  %v9461_v31 = vsub.f32 0.0, %v9433_v59  ;;  %v9448_v30 = vadd.f32 %v12028_v21, %v10011_v53 }
0x1b40   :  { %v9442_v22 = vpop.f32.mrf.mxu0 }
0x1b41   :  { %12074 = vpow2.f32 %v9469_v20  ;;  %v9467_v2 = vmul.f32 1.442695, %v9461_v31  ;;  %v9464_v32 = vsub.f32 0.0, %v9448_v30  ;;  %v9443_v42 = vadd.f32 %v10011_v53, %v9442_v22 }
0x1b42   :  { %v12031_v56 = vpop.f32.mrf.mxu0 }
0x1b43   :  { %12076 = vpow2.f32 %v9467_v2  ;;  %v9473_v35 = vmul.f32 1.442695, %v9464_v32  ;;  %v9463_v61 = vsub.f32 0.0, %v9443_v42  ;;  %v9458_v63 = vadd.f32 %v12031_v56, %v10011_v53 }
0x1b44   :  { %v9452_v45 = vpop.f32.mrf.mxu0 }
0x1b45   :  { %12078 = vpow2.f32 %v9473_v35  ;;  %v9471_v48 = vmul.f32 1.442695, %v9463_v61  ;;  %v9466_v28 = vsub.f32 0.0, %v9458_v63  ;;  %v9453_v39 = vadd.f32 %v10011_v53, %v9452_v45 }
0x1b47   :  { %12080 = vpow2.f32 %v9471_v48  ;;  %v9477_v40 = vmul.f32 1.442695, %v9466_v28  ;;  %v9465_v3 = vsub.f32 0.0, %v9453_v39 }
0x1b49   :  { %12082 = vpow2.f32 %v9477_v40  ;;  %v9475_v47 = vmul.f32 1.442695, %v9465_v3 }
0x1b4b   :  { %12084 = vpow2.f32 %v9475_v47 }
0x1b4e   :  { %v12075_v12 = vpop.eup %12074 }
0x1b4f   :  { %v9480_v5 = vadd.f32 1.0, %v12075_v12 }
0x1b50   :  { %v12077_v46 = vpop.eup %12076 }
0x1b51   :  { %12086 = vrcp.f32 %v9480_v5  ;;  %v9479_v14 = vadd.f32 1.0, %v12077_v46 }
0x1b52   :  { %v12079_v29 = vpop.eup %12078 }
0x1b53   :  { %12088 = vrcp.f32 %v9479_v14  ;;  %v9482_v49 = vadd.f32 1.0, %v12079_v29 }
0x1b54   :  { %v12081_v6 = vpop.eup %12080 }
0x1b55   :  { %12090 = vrcp.f32 %v9482_v49  ;;  %v9481_v57 = vadd.f32 1.0, %v12081_v6 }
0x1b56   :  { %v12083_v54 = vpop.eup %12082 }
0x1b57   :  { %12092 = vrcp.f32 %v9481_v57  ;;  %v9484_v9 = vadd.f32 1.0, %v12083_v54 }
0x1b58   :  { %v12085_v52 = vpop.eup %12084 }
0x1b59   :  { %12094 = vrcp.f32 %v9484_v9  ;;  %v9483_v19 = vadd.f32 1.0, %v12085_v52 }
0x1b5b   :  { %12096 = vrcp.f32 %v9483_v19 }
0x1b5e   :  { %v12087_v27 = vpop.eup %12086 }
0x1b5f   :  { %9498 = vst.msk [vmem:[%s14013_s10 + $0x8] sm:$0xff] %vm7687_vm6, %v12087_v27 }
0x1b60   :  { %v12089_v58 = vpop.eup %12088 }
0x1b61   :  { %9497 = vst.msk [vmem:[%s14013_s10] sm:$0xff] %vm7687_vm6, %v12089_v58 }
0x1b62   :  { %v12091_v62 = vpop.eup %12090 }
0x1b63   :  { %9500 = vst.msk [vmem:[%s14013_s10 + $0x18] sm:$0xff] %vm7687_vm6, %v12091_v62 }
0x1b64   :  { %v12093_v51 = vpop.eup %12092 }
0x1b65   :  { %9499 = vst.msk [vmem:[%s14013_s10 + $0x10] sm:$0xff] %vm7687_vm6, %v12093_v51 }
0x1b66   :  { %v12095_v33 = vpop.eup %12094 }
0x1b67   :  { %9502 = vst.msk [vmem:[%s14013_s10 + $0x28] sm:$0xff] %vm7687_vm6, %v12095_v33 }
0x1b68   :  { %v12097_v55 = vpop.eup %12096 }
0x1b69   :  { %9501 = vst.msk [vmem:[%s14013_s10 + $0x20] sm:$0xff] %vm7687_vm6, %v12097_v55 }
0x1b6a   :  { %9507 = vsyncpa [#allocation3], 1 }
0x1b6b   :  { %9508 = vsyncpa [#allocation5], 1 }
0x1b6c   :  { %9509 = vsyncpa [#allocation8], 1 }

</bundles_post_ra>
